<compile_context>
chip_gen: v5e
topology: v5e:2x2
jax: 0.10.0
libtpu: 0.0.40
codegen_flags: <defaults>
</compile_context>

<pallas_src>
import functools

import jax
import jax.numpy as jnp
from jax.experimental import pallas as pl

CPAD = 128          # lane-dense padding for conv channels and fc3 logits
BN_EPS = 1e-5       # PyTorch BatchNorm2d default


# ---------------------------------------------------------------------------
# Pallas kernels
# ---------------------------------------------------------------------------
def _conv_bn_relu_kernel(p_ref, w_ref, b_ref, g_ref, beta_ref, o_ref):
    """o = BatchNorm(ReLU(p @ w + b)), batch stats over all rows.

    p: (M, K) bf16 im2col patches, rows ordered (n, oh, ow) so a per-column
    reduction over M equals the BatchNorm reduction over (N, H, W).
    w: (K, CPAD) bf16; b/g/beta: (1, CPAD) f32; o: (M, CPAD) f32.
    """
    acc = jnp.dot(p_ref[...], w_ref[...], preferred_element_type=jnp.float32)
    acc = jnp.maximum(acc + b_ref[...], 0.0)                  # conv bias + ReLU
    mean = jnp.mean(acc, axis=0, keepdims=True)               # training-mode BN
    var = jnp.mean(jnp.square(acc - mean), axis=0, keepdims=True)
    xhat = (acc - mean) * jax.lax.rsqrt(var + BN_EPS)
    o_ref[...] = xhat * g_ref[...] + beta_ref[...]


def _fc_fused_kernel(num_classes, x_ref, w1_ref, b1_ref, w2_ref, b2_ref,
                     w3_ref, b3_ref, o_ref):
    """log_softmax(relu(relu(x@w1+b1)@w2+b2)@w3+b3) in one VMEM-resident pass."""
    h = jnp.dot(x_ref[...], w1_ref[...], preferred_element_type=jnp.float32)
    h = jnp.maximum(h + b1_ref[...], 0.0)
    h = jnp.dot(h.astype(jnp.bfloat16), w2_ref[...],
                preferred_element_type=jnp.float32)
    h = jnp.maximum(h + b2_ref[...], 0.0)
    z = jnp.dot(h.astype(jnp.bfloat16), w3_ref[...],
                preferred_element_type=jnp.float32)
    z = z + b3_ref[...]
    # Mask the lane-padding columns out of the softmax reduction.
    col = jax.lax.broadcasted_iota(jnp.int32, z.shape, 1)
    z = jnp.where(col < num_classes, z, -jnp.inf)
    m = jnp.max(z, axis=-1, keepdims=True)
    zs = z - m
    lse = jnp.log(jnp.sum(jnp.exp(zs), axis=-1, keepdims=True))
    o_ref[...] = zs - lse


# ---------------------------------------------------------------------------
# pallas_call wrappers
# ---------------------------------------------------------------------------
def conv_bn_relu(p, w, b, g, beta):
    M, K = p.shape
    C = w.shape[1]
    return pl.pallas_call(
        _conv_bn_relu_kernel,
        out_shape=jax.ShapeDtypeStruct((M, C), jnp.float32),
        grid=(1,),
        in_specs=[pl.BlockSpec((M, K), lambda i: (0, 0)),
                  pl.BlockSpec((K, C), lambda i: (0, 0)),
                  pl.BlockSpec((1, C), lambda i: (0, 0)),
                  pl.BlockSpec((1, C), lambda i: (0, 0)),
                  pl.BlockSpec((1, C), lambda i: (0, 0))],
        out_specs=pl.BlockSpec((M, C), lambda i: (0, 0)),
    )(p.astype(jnp.bfloat16), w, b, g, beta)


def fc_fused(x, w1, b1, w2, b2, w3, b3, num_classes):
    M, K1 = x.shape
    N1, N2, N3 = w1.shape[1], w2.shape[1], w3.shape[1]
    kernel = functools.partial(_fc_fused_kernel, num_classes)
    return pl.pallas_call(
        kernel,
        out_shape=jax.ShapeDtypeStruct((M, N3), jnp.float32),
        grid=(1,),
        in_specs=[pl.BlockSpec((M, K1), lambda i: (0, 0)),
                  pl.BlockSpec((K1, N1), lambda i: (0, 0)),
                  pl.BlockSpec((1, N1), lambda i: (0, 0)),
                  pl.BlockSpec((N1, N2), lambda i: (0, 0)),
                  pl.BlockSpec((1, N2), lambda i: (0, 0)),
                  pl.BlockSpec((N2, N3), lambda i: (0, 0)),
                  pl.BlockSpec((1, N3), lambda i: (0, 0))],
        out_specs=pl.BlockSpec((M, N3), lambda i: (0, 0)),
    )(x, w1, b1, w2, b2, w3, b3)


# ---------------------------------------------------------------------------
# Plain-JAX glue (tiny layout plumbing only — no transposes)
# ---------------------------------------------------------------------------
def im2col_nhwc(x, k=3):
    """(N, H, W, C) -> (N*Ho*Wo, k*k*C); patch flattening order (kh, kw, c)."""
    n, h, w, c = x.shape
    ho, wo = h - k + 1, w - k + 1
    cols = jnp.concatenate(
        [x[:, i:i + ho, j:j + wo, :] for i in range(k) for j in range(k)],
        axis=-1)                                   # (N, Ho, Wo, k*k*C)
    return cols.reshape(n * ho * wo, k * k * c)


def maxpool2_nhwc(x):
    """MaxPool2d(2, 2), floor output size, NHWC."""
    n, h, w, c = x.shape
    h2, w2 = h // 2, w // 2
    x = x[:, :h2 * 2, :w2 * 2, :].reshape(n, h2, 2, w2, 2, c)
    return jnp.max(x, axis=(2, 4))


# ---------------------------------------------------------------------------
# Network forward (Pallas path, NHWC end-to-end)
# ---------------------------------------------------------------------------
def pallas_forward(x_nchw, kp, num_classes):
    n, _, h, w = x_nchw.shape
    x = jnp.transpose(x_nchw, (0, 2, 3, 1))                  # NHWC, once

    # conv1 (1->4, k=3) + ReLU + BN1, fused; channels padded to 128 lanes.
    h1, w1 = h - 2, w - 2
    p = im2col_nhwc(x, 3)                                    # (n*26*26, 9)
    y = conv_bn_relu(p, kp["conv1_w"], kp["conv1_b"], kp["bn1_g"], kp["bn1_b"])
    y = maxpool2_nhwc(y.reshape(n, h1, w1, CPAD))            # (n, 13, 13, 128)

    # conv2 (4->16, k=3) + ReLU + BN2, fused.
    h2, w2 = h1 // 2 - 2, w1 // 2 - 2
    p = im2col_nhwc(y, 3)                                    # (n*11*11, 1152)
    y = conv_bn_relu(p, kp["conv2_w"], kp["conv2_b"], kp["bn2_g"], kp["bn2_b"])
    y = maxpool2_nhwc(y.reshape(n, h2, w2, CPAD))            # (n, 5, 5, 128)

    # Flatten in (h, w, c) order with the 16 real channels; fc1 weight was
    # permuted accordingly in prep_params.
    y = y[:, :, :, :16].reshape(n, 16 * 5 * 5)               # (n, 400)
    m_pad = max(8, -(-n // 8) * 8)                           # pad M to sublanes
    y = jnp.pad(y, ((0, m_pad - n), (0, 0))).astype(jnp.bfloat16)

    out = fc_fused(y, kp["fc1_w"], kp["fc1_b"], kp["fc2_w"], kp["fc2_b"],
                   kp["fc3_w"], kp["fc3_b"], num_classes)    # (m_pad, 128)
    return out[:n, :num_classes]


# ---------------------------------------------------------------------------
# Pure-JAX reference (PyTorch layouts / semantics) for the numerical check
# ---------------------------------------------------------------------------
def _bn_ref(x, g, b):
    mean = jnp.mean(x, axis=(0, 2, 3), keepdims=True)
    var = jnp.mean(jnp.square(x - mean), axis=(0, 2, 3), keepdims=True)
    return ((x - mean) * jax.lax.rsqrt(var + BN_EPS)
            * g.reshape(1, -1, 1, 1) + b.reshape(1, -1, 1, 1))


def _pool_ref(x):
    n, c, h, w = x.shape
    h2, w2 = h // 2, w // 2
    x = x[:, :, :h2 * 2, :w2 * 2].reshape(n, c, h2, 2, w2, 2)
    return jnp.max(x, axis=(3, 5))


def ref_forward(x, tp):
    dn = ("NCHW", "OIHW", "NCHW")
    y = jax.lax.conv_general_dilated(x, tp["conv1_w"], (1, 1), "VALID",
                                     dimension_numbers=dn)
    y = jnp.maximum(y + tp["conv1_b"][None, :, None, None], 0.0)
    y = _pool_ref(_bn_ref(y, tp["bn1_g"], tp["bn1_b"]))
    y = jax.lax.conv_general_dilated(y, tp["conv2_w"], (1, 1), "VALID",
                                     dimension_numbers=dn)
    y = jnp.maximum(y + tp["conv2_b"][None, :, None, None], 0.0)
    y = _pool_ref(_bn_ref(y, tp["bn2_g"], tp["bn2_b"]))
    y = y.reshape(y.shape[0], -1)                            # (c, h, w) flatten
    y = jnp.maximum(y @ tp["fc1_w"].T + tp["fc1_b"], 0.0)
    y = jnp.maximum(y @ tp["fc2_w"].T + tp["fc2_b"], 0.0)
    y = y @ tp["fc3_w"].T + tp["fc3_b"]
    return jax.nn.log_softmax(y, axis=-1)


# ---------------------------------------------------------------------------
# Parameters: PyTorch layouts + kernel-ready (transposed / padded / bf16) prep
# ---------------------------------------------------------------------------
def make_torch_params(key, num_classes):
    ks = jax.random.split(key, 10)

    def rnd(k, shape, scale):
        return scale * jax.random.normal(k, shape, dtype=jnp.float32)

    return {
        "conv1_w": rnd(ks[0], (4, 1, 3, 3), 0.1),
        "conv1_b": rnd(ks[1], (4,), 0.1),
        "conv2_w": rnd(ks[2], (16, 4, 3, 3), 0.1),
        "conv2_b": rnd(ks[3], (16,), 0.1),
        "fc1_w": rnd(ks[4], (1024, 400), 0.05),
        "fc1_b": rnd(ks[5], (1024,), 0.05),
        "fc2_w": rnd(ks[6], (512, 1024), 0.05),
        "fc2_b": rnd(ks[7], (512,), 0.05),
        "fc3_w": rnd(ks[8], (num_classes, 512), 0.05),
        "fc3_b": rnd(ks[9], (num_classes,), 0.05),
        # BatchNorm affine params at PyTorch defaults (training-mode stats).
        "bn1_g": jnp.ones((4,), jnp.float32),
        "bn1_b": jnp.zeros((4,), jnp.float32),
        "bn2_g": jnp.ones((16,), jnp.float32),
        "bn2_b": jnp.zeros((16,), jnp.float32),
    }


def _pad_last(a, n, fill=0.0):
    pad = [(0, 0)] * (a.ndim - 1) + [(0, n - a.shape[-1])]
    return jnp.pad(a, pad, constant_values=fill)


def prep_params(tp):
    kp = {}
    # conv1: torch (4,1,3,3) -> (kh,kw,cin,cout) -> (9,4) -> pad cout to 128.
    w = jnp.transpose(tp["conv1_w"], (2, 3, 1, 0)).reshape(9, 4)
    kp["conv1_w"] = _pad_last(w, CPAD).astype(jnp.bfloat16)
    kp["conv1_b"] = _pad_last(tp["conv1_b"][None, :], CPAD)
    kp["bn1_g"] = _pad_last(tp["bn1_g"][None, :], CPAD, fill=1.0)
    kp["bn1_b"] = _pad_last(tp["bn1_b"][None, :], CPAD)
    # conv2: torch (16,4,3,3) -> (kh,kw,cin,cout), pad cin 4->128, cout 16->128.
    w = jnp.transpose(tp["conv2_w"], (2, 3, 1, 0))           # (3,3,4,16)
    w = jnp.pad(w, ((0, 0), (0, 0), (0, CPAD - 4), (0, CPAD - 16)))
    kp["conv2_w"] = w.reshape(9 * CPAD, CPAD).astype(jnp.bfloat16)
    kp["conv2_b"] = _pad_last(tp["conv2_b"][None, :], CPAD)
    kp["bn2_g"] = _pad_last(tp["bn2_g"][None, :], CPAD, fill=1.0)
    kp["bn2_b"] = _pad_last(tp["bn2_b"][None, :], CPAD)
    # fc1: torch (1024, 400) with K ordered (c,h,w) -> reorder K to (h,w,c).
    w = tp["fc1_w"].reshape(1024, 16, 5, 5).transpose(0, 2, 3, 1)
    kp["fc1_w"] = w.reshape(1024, 400).T.astype(jnp.bfloat16)   # (400, 1024)
    kp["fc1_b"] = tp["fc1_b"][None, :]
    kp["fc2_w"] = tp["fc2_w"].T.astype(jnp.bfloat16)            # (1024, 512)
    kp["fc2_b"] = tp["fc2_b"][None, :]
    # fc3: torch (num, 512) -> (512, num) -> pad logits to 128 lanes.
    kp["fc3_w"] = _pad_last(tp["fc3_w"].T, CPAD).astype(jnp.bfloat16)
    kp["fc3_b"] = _pad_last(tp["fc3_b"][None, :], CPAD)
    return kp


# ---------------------------------------------------------------------------
if __name__ == "__main__":
    num_classes = 10
    key = jax.random.PRNGKey(0)
    k_params, k_x = jax.random.split(key)

    torch_params = make_torch_params(k_params, num_classes)
    kernel_params = prep_params(torch_params)
    # fc1 = Linear(16*5*5, ...) implies a 1x28x28 input (MNIST-like); batch=2.
    x = jax.random.normal(k_x, (2, 1, 28, 28), dtype=jnp.float32)

    fwd_pallas = jax.jit(
        functools.partial(pallas_forward, num_classes=num_classes))
    fwd_ref = jax.jit(ref_forward)

    out = jax.block_until_ready(fwd_pallas(x, kernel_params))
    ref = jax.block_until_ready(fwd_ref(x, torch_params))

    assert out.shape == (2, num_classes), out.shape
    assert jnp.allclose(out, ref, rtol=2e-2, atol=2e-2), (
        "Pallas output mismatch vs JAX reference; max abs err = "
        f"{jnp.max(jnp.abs(out - ref))}")
    print("KERNEL_OK")
</pallas_src>

<mosaic_0001>
module attributes {stable_mosaic.version = 11 : i64} {
  func.func @_conv_bn_relu_kernel(%arg0: i32, %arg1: memref<1352x9xbf16, #tpu.memory_space<vmem>>, %arg2: memref<9x128xbf16, #tpu.memory_space<vmem>>, %arg3: memref<1x128xf32, #tpu.memory_space<vmem>>, %arg4: memref<1x128xf32, #tpu.memory_space<vmem>>, %arg5: memref<1x128xf32, #tpu.memory_space<vmem>>, %arg6: memref<1352x128xf32, #tpu.memory_space<vmem>>) attributes {dimension_semantics = [#tpu.dimension_semantics<arbitrary>], iteration_bounds = array<i64: 1>, scalar_prefetch = 0 : i64, scratch_operands = 0 : i64, tpu.core_type = #tpu.core_type<tc>, window_params = [{pipeline_mode = #tpu.pipeline_mode<synchronous>, transform_indices = @transform_0, window_bounds = array<i64: 1352, 9>}, {pipeline_mode = #tpu.pipeline_mode<synchronous>, transform_indices = @transform_1, window_bounds = array<i64: 9, 128>}, {pipeline_mode = #tpu.pipeline_mode<synchronous>, transform_indices = @transform_2, window_bounds = array<i64: 1, 128>}, {pipeline_mode = #tpu.pipeline_mode<synchronous>, transform_indices = @transform_3, window_bounds = array<i64: 1, 128>}, {pipeline_mode = #tpu.pipeline_mode<synchronous>, transform_indices = @transform_4, window_bounds = array<i64: 1, 128>}, {pipeline_mode = #tpu.pipeline_mode<synchronous>, transform_indices = @transform_5, window_bounds = array<i64: 1352, 128>}]} {
    %c0 = arith.constant 0 : index
    %c0_0 = arith.constant 0 : index
    %0 = vector.load %arg1[%c0, %c0_0] : memref<1352x9xbf16, #tpu.memory_space<vmem>>, vector<1352x9xbf16>
    %c0_1 = arith.constant 0 : index
    %c0_2 = arith.constant 0 : index
    %1 = vector.load %arg2[%c0_1, %c0_2] : memref<9x128xbf16, #tpu.memory_space<vmem>>, vector<9x128xbf16>
    %cst = arith.constant dense<0.000000e+00> : vector<1352x128xf32>
    %2 = tpu.matmul %0, %1, %cst {dimension_numbers = #tpu.dot_dimension_numbers<[1], [0], [0], [1], [0, 0, 1, 1], [], []>} : vector<1352x9xbf16>, vector<9x128xbf16>, vector<1352x128xf32> -> vector<1352x128xf32>
    %c0_3 = arith.constant 0 : index
    %c0_4 = arith.constant 0 : index
    %3 = vector.load %arg3[%c0_3, %c0_4] : memref<1x128xf32, #tpu.memory_space<vmem>>, vector<1x128xf32>
    %4 = vector.broadcast %3 : vector<1x128xf32> to vector<1352x128xf32>
    %5 = arith.addf %2, %4 : vector<1352x128xf32>
    %cst_5 = arith.constant 0.000000e+00 : f32
    %6 = vector.broadcast %cst_5 : f32 to vector<1352x128xf32>
    %7 = arith.maximumf %5, %6 : vector<1352x128xf32>
    %cst_6 = arith.constant dense<0.000000e+00> : vector<128xf32>
    %8 = vector.multi_reduction <add>, %7, %cst_6 [0] : vector<1352x128xf32> to vector<128xf32>
    %9 = vector.shape_cast %8 : vector<128xf32> to vector<1x128xf32>
    %cst_7 = arith.constant 1.352000e+03 : f32
    %10 = vector.broadcast %cst_7 : f32 to vector<1x128xf32>
    %11 = arith.divf %9, %10 : vector<1x128xf32>
    %12 = vector.broadcast %11 : vector<1x128xf32> to vector<1352x128xf32>
    %13 = arith.subf %7, %12 : vector<1352x128xf32>
    %14 = arith.mulf %13, %13 : vector<1352x128xf32>
    %cst_8 = arith.constant dense<0.000000e+00> : vector<128xf32>
    %15 = vector.multi_reduction <add>, %14, %cst_8 [0] : vector<1352x128xf32> to vector<128xf32>
    %16 = vector.shape_cast %15 : vector<128xf32> to vector<1x128xf32>
    %cst_9 = arith.constant 1.352000e+03 : f32
    %17 = vector.broadcast %cst_9 : f32 to vector<1x128xf32>
    %18 = arith.divf %16, %17 : vector<1x128xf32>
    %19 = vector.broadcast %11 : vector<1x128xf32> to vector<1352x128xf32>
    %20 = arith.subf %7, %19 : vector<1352x128xf32>
    %cst_10 = arith.constant 9.99999974E-6 : f32
    %21 = vector.broadcast %cst_10 : f32 to vector<1x128xf32>
    %22 = arith.addf %18, %21 : vector<1x128xf32>
    %23 = math.rsqrt %22 : vector<1x128xf32>
    %24 = vector.broadcast %23 : vector<1x128xf32> to vector<1352x128xf32>
    %25 = arith.mulf %20, %24 : vector<1352x128xf32>
    %c0_11 = arith.constant 0 : index
    %c0_12 = arith.constant 0 : index
    %26 = vector.load %arg4[%c0_11, %c0_12] : memref<1x128xf32, #tpu.memory_space<vmem>>, vector<1x128xf32>
    %27 = vector.broadcast %26 : vector<1x128xf32> to vector<1352x128xf32>
    %28 = arith.mulf %25, %27 : vector<1352x128xf32>
    %c0_13 = arith.constant 0 : index
    %c0_14 = arith.constant 0 : index
    %29 = vector.load %arg5[%c0_13, %c0_14] : memref<1x128xf32, #tpu.memory_space<vmem>>, vector<1x128xf32>
    %30 = vector.broadcast %29 : vector<1x128xf32> to vector<1352x128xf32>
    %31 = arith.addf %28, %30 : vector<1352x128xf32>
    %c0_15 = arith.constant 0 : index
    %c0_16 = arith.constant 0 : index
    %32 = vector.load %arg6[%c0_15, %c0_16] : memref<1352x128xf32, #tpu.memory_space<vmem>>, vector<1352x128xf32>
    tpu.vector_store %arg6[%c0_15, %c0_16], %31 {strides = array<i32>} : memref<1352x128xf32, #tpu.memory_space<vmem>>, vector<1352x128xf32>,
    return
  }
  func.func @transform_0(%arg0: i32) -> (i32, i32) {
    %c0_i32 = arith.constant 0 : i32
    %c0_i32_0 = arith.constant 0 : i32
    %c0_i32_1 = arith.constant 0 : i32
    return %c0_i32, %c0_i32_0 : i32, i32
  }
  func.func @transform_1(%arg0: i32) -> (i32, i32) {
    %c0_i32 = arith.constant 0 : i32
    %c0_i32_0 = arith.constant 0 : i32
    %c0_i32_1 = arith.constant 0 : i32
    return %c0_i32, %c0_i32_0 : i32, i32
  }
  func.func @transform_2(%arg0: i32) -> (i32, i32) {
    %c0_i32 = arith.constant 0 : i32
    %c0_i32_0 = arith.constant 0 : i32
    %c0_i32_1 = arith.constant 0 : i32
    return %c0_i32, %c0_i32_0 : i32, i32
  }
  func.func @transform_3(%arg0: i32) -> (i32, i32) {
    %c0_i32 = arith.constant 0 : i32
    %c0_i32_0 = arith.constant 0 : i32
    %c0_i32_1 = arith.constant 0 : i32
    return %c0_i32, %c0_i32_0 : i32, i32
  }
  func.func @transform_4(%arg0: i32) -> (i32, i32) {
    %c0_i32 = arith.constant 0 : i32
    %c0_i32_0 = arith.constant 0 : i32
    %c0_i32_1 = arith.constant 0 : i32
    return %c0_i32, %c0_i32_0 : i32, i32
  }
  func.func @transform_5(%arg0: i32) -> (i32, i32) {
    %c0_i32 = arith.constant 0 : i32
    %c0_i32_0 = arith.constant 0 : i32
    %c0_i32_1 = arith.constant 0 : i32
    return %c0_i32, %c0_i32_0 : i32, i32
  }
}

module attributes {stable_mosaic.version = 11 : i64} {
  func.func @_conv_bn_relu_kernel(%arg0: i32, %arg1: memref<242x1152xbf16, #tpu.memory_space<vmem>>, %arg2: memref<1152x128xbf16, #tpu.memory_space<vmem>>, %arg3: memref<1x128xf32, #tpu.memory_space<vmem>>, %arg4: memref<1x128xf32, #tpu.memory_space<vmem>>, %arg5: memref<1x128xf32, #tpu.memory_space<vmem>>, %arg6: memref<242x128xf32, #tpu.memory_space<vmem>>) attributes {dimension_semantics = [#tpu.dimension_semantics<arbitrary>], iteration_bounds = array<i64: 1>, scalar_prefetch = 0 : i64, scratch_operands = 0 : i64, tpu.core_type = #tpu.core_type<tc>, window_params = [{pipeline_mode = #tpu.pipeline_mode<synchronous>, transform_indices = @transform_0, window_bounds = array<i64: 242, 1152>}, {pipeline_mode = #tpu.pipeline_mode<synchronous>, transform_indices = @transform_1, window_bounds = array<i64: 1152, 128>}, {pipeline_mode = #tpu.pipeline_mode<synchronous>, transform_indices = @transform_2, window_bounds = array<i64: 1, 128>}, {pipeline_mode = #tpu.pipeline_mode<synchronous>, transform_indices = @transform_3, window_bounds = array<i64: 1, 128>}, {pipeline_mode = #tpu.pipeline_mode<synchronous>, transform_indices = @transform_4, window_bounds = array<i64: 1, 128>}, {pipeline_mode = #tpu.pipeline_mode<synchronous>, transform_indices = @transform_5, window_bounds = array<i64: 242, 128>}]} {
    %c0 = arith.constant 0 : index
    %c0_0 = arith.constant 0 : index
    %0 = vector.load %arg1[%c0, %c0_0] : memref<242x1152xbf16, #tpu.memory_space<vmem>>, vector<242x1152xbf16>
    %c0_1 = arith.constant 0 : index
    %c0_2 = arith.constant 0 : index
    %1 = vector.load %arg2[%c0_1, %c0_2] : memref<1152x128xbf16, #tpu.memory_space<vmem>>, vector<1152x128xbf16>
    %cst = arith.constant dense<0.000000e+00> : vector<242x128xf32>
    %2 = tpu.matmul %0, %1, %cst {dimension_numbers = #tpu.dot_dimension_numbers<[1], [0], [0], [1], [0, 0, 1, 1], [], []>} : vector<242x1152xbf16>, vector<1152x128xbf16>, vector<242x128xf32> -> vector<242x128xf32>
    %c0_3 = arith.constant 0 : index
    %c0_4 = arith.constant 0 : index
    %3 = vector.load %arg3[%c0_3, %c0_4] : memref<1x128xf32, #tpu.memory_space<vmem>>, vector<1x128xf32>
    %4 = vector.broadcast %3 : vector<1x128xf32> to vector<242x128xf32>
    %5 = arith.addf %2, %4 : vector<242x128xf32>
    %cst_5 = arith.constant 0.000000e+00 : f32
    %6 = vector.broadcast %cst_5 : f32 to vector<242x128xf32>
    %7 = arith.maximumf %5, %6 : vector<242x128xf32>
    %cst_6 = arith.constant dense<0.000000e+00> : vector<128xf32>
    %8 = vector.multi_reduction <add>, %7, %cst_6 [0] : vector<242x128xf32> to vector<128xf32>
    %9 = vector.shape_cast %8 : vector<128xf32> to vector<1x128xf32>
    %cst_7 = arith.constant 2.420000e+02 : f32
    %10 = vector.broadcast %cst_7 : f32 to vector<1x128xf32>
    %11 = arith.divf %9, %10 : vector<1x128xf32>
    %12 = vector.broadcast %11 : vector<1x128xf32> to vector<242x128xf32>
    %13 = arith.subf %7, %12 : vector<242x128xf32>
    %14 = arith.mulf %13, %13 : vector<242x128xf32>
    %cst_8 = arith.constant dense<0.000000e+00> : vector<128xf32>
    %15 = vector.multi_reduction <add>, %14, %cst_8 [0] : vector<242x128xf32> to vector<128xf32>
    %16 = vector.shape_cast %15 : vector<128xf32> to vector<1x128xf32>
    %cst_9 = arith.constant 2.420000e+02 : f32
    %17 = vector.broadcast %cst_9 : f32 to vector<1x128xf32>
    %18 = arith.divf %16, %17 : vector<1x128xf32>
    %19 = vector.broadcast %11 : vector<1x128xf32> to vector<242x128xf32>
    %20 = arith.subf %7, %19 : vector<242x128xf32>
    %cst_10 = arith.constant 9.99999974E-6 : f32
    %21 = vector.broadcast %cst_10 : f32 to vector<1x128xf32>
    %22 = arith.addf %18, %21 : vector<1x128xf32>
    %23 = math.rsqrt %22 : vector<1x128xf32>
    %24 = vector.broadcast %23 : vector<1x128xf32> to vector<242x128xf32>
    %25 = arith.mulf %20, %24 : vector<242x128xf32>
    %c0_11 = arith.constant 0 : index
    %c0_12 = arith.constant 0 : index
    %26 = vector.load %arg4[%c0_11, %c0_12] : memref<1x128xf32, #tpu.memory_space<vmem>>, vector<1x128xf32>
    %27 = vector.broadcast %26 : vector<1x128xf32> to vector<242x128xf32>
    %28 = arith.mulf %25, %27 : vector<242x128xf32>
    %c0_13 = arith.constant 0 : index
    %c0_14 = arith.constant 0 : index
    %29 = vector.load %arg5[%c0_13, %c0_14] : memref<1x128xf32, #tpu.memory_space<vmem>>, vector<1x128xf32>
    %30 = vector.broadcast %29 : vector<1x128xf32> to vector<242x128xf32>
    %31 = arith.addf %28, %30 : vector<242x128xf32>
    %c0_15 = arith.constant 0 : index
    %c0_16 = arith.constant 0 : index
    %32 = vector.load %arg6[%c0_15, %c0_16] : memref<242x128xf32, #tpu.memory_space<vmem>>, vector<242x128xf32>
    tpu.vector_store %arg6[%c0_15, %c0_16], %31 {strides = array<i32>} : memref<242x128xf32, #tpu.memory_space<vmem>>, vector<242x128xf32>,
    return
  }
  func.func @transform_0(%arg0: i32) -> (i32, i32) {
    %c0_i32 = arith.constant 0 : i32
    %c0_i32_0 = arith.constant 0 : i32
    %c0_i32_1 = arith.constant 0 : i32
    return %c0_i32, %c0_i32_0 : i32, i32
  }
  func.func @transform_1(%arg0: i32) -> (i32, i32) {
    %c0_i32 = arith.constant 0 : i32
    %c0_i32_0 = arith.constant 0 : i32
    %c0_i32_1 = arith.constant 0 : i32
    return %c0_i32, %c0_i32_0 : i32, i32
  }
  func.func @transform_2(%arg0: i32) -> (i32, i32) {
    %c0_i32 = arith.constant 0 : i32
    %c0_i32_0 = arith.constant 0 : i32
    %c0_i32_1 = arith.constant 0 : i32
    return %c0_i32, %c0_i32_0 : i32, i32
  }
  func.func @transform_3(%arg0: i32) -> (i32, i32) {
    %c0_i32 = arith.constant 0 : i32
    %c0_i32_0 = arith.constant 0 : i32
    %c0_i32_1 = arith.constant 0 : i32
    return %c0_i32, %c0_i32_0 : i32, i32
  }
  func.func @transform_4(%arg0: i32) -> (i32, i32) {
    %c0_i32 = arith.constant 0 : i32
    %c0_i32_0 = arith.constant 0 : i32
    %c0_i32_1 = arith.constant 0 : i32
    return %c0_i32, %c0_i32_0 : i32, i32
  }
  func.func @transform_5(%arg0: i32) -> (i32, i32) {
    %c0_i32 = arith.constant 0 : i32
    %c0_i32_0 = arith.constant 0 : i32
    %c0_i32_1 = arith.constant 0 : i32
    return %c0_i32, %c0_i32_0 : i32, i32
  }
}

module attributes {stable_mosaic.version = 11 : i64} {
  func.func @_fc_fused_kernel(%arg0: i32, %arg1: memref<8x400xbf16, #tpu.memory_space<vmem>>, %arg2: memref<400x1024xbf16, #tpu.memory_space<vmem>>, %arg3: memref<1x1024xf32, #tpu.memory_space<vmem>>, %arg4: memref<1024x512xbf16, #tpu.memory_space<vmem>>, %arg5: memref<1x512xf32, #tpu.memory_space<vmem>>, %arg6: memref<512x128xbf16, #tpu.memory_space<vmem>>, %arg7: memref<1x128xf32, #tpu.memory_space<vmem>>, %arg8: memref<8x128xf32, #tpu.memory_space<vmem>>) attributes {dimension_semantics = [#tpu.dimension_semantics<arbitrary>], iteration_bounds = array<i64: 1>, scalar_prefetch = 0 : i64, scratch_operands = 0 : i64, tpu.core_type = #tpu.core_type<tc>, window_params = [{pipeline_mode = #tpu.pipeline_mode<synchronous>, transform_indices = @transform_0, window_bounds = array<i64: 8, 400>}, {pipeline_mode = #tpu.pipeline_mode<synchronous>, transform_indices = @transform_1, window_bounds = array<i64: 400, 1024>}, {pipeline_mode = #tpu.pipeline_mode<synchronous>, transform_indices = @transform_2, window_bounds = array<i64: 1, 1024>}, {pipeline_mode = #tpu.pipeline_mode<synchronous>, transform_indices = @transform_3, window_bounds = array<i64: 1024, 512>}, {pipeline_mode = #tpu.pipeline_mode<synchronous>, transform_indices = @transform_4, window_bounds = array<i64: 1, 512>}, {pipeline_mode = #tpu.pipeline_mode<synchronous>, transform_indices = @transform_5, window_bounds = array<i64: 512, 128>}, {pipeline_mode = #tpu.pipeline_mode<synchronous>, transform_indices = @transform_6, window_bounds = array<i64: 1, 128>}, {pipeline_mode = #tpu.pipeline_mode<synchronous>, transform_indices = @transform_7, window_bounds = array<i64: 8, 128>}]} {
    %c0 = arith.constant 0 : index
    %c0_0 = arith.constant 0 : index
    %0 = vector.load %arg1[%c0, %c0_0] : memref<8x400xbf16, #tpu.memory_space<vmem>>, vector<8x400xbf16>
    %c0_1 = arith.constant 0 : index
    %c0_2 = arith.constant 0 : index
    %1 = vector.load %arg2[%c0_1, %c0_2] : memref<400x1024xbf16, #tpu.memory_space<vmem>>, vector<400x1024xbf16>
    %cst = arith.constant dense<0.000000e+00> : vector<8x1024xf32>
    %2 = tpu.matmul %0, %1, %cst {dimension_numbers = #tpu.dot_dimension_numbers<[1], [0], [0], [1], [0, 0, 1, 1], [], []>} : vector<8x400xbf16>, vector<400x1024xbf16>, vector<8x1024xf32> -> vector<8x1024xf32>
    %c0_3 = arith.constant 0 : index
    %c0_4 = arith.constant 0 : index
    %3 = vector.load %arg3[%c0_3, %c0_4] : memref<1x1024xf32, #tpu.memory_space<vmem>>, vector<1x1024xf32>
    %4 = vector.broadcast %3 : vector<1x1024xf32> to vector<8x1024xf32>
    %5 = arith.addf %2, %4 : vector<8x1024xf32>
    %cst_5 = arith.constant 0.000000e+00 : f32
    %6 = vector.broadcast %cst_5 : f32 to vector<8x1024xf32>
    %7 = arith.maximumf %5, %6 : vector<8x1024xf32>
    %8 = arith.truncf %7 : vector<8x1024xf32> to vector<8x1024xbf16>
    %c0_6 = arith.constant 0 : index
    %c0_7 = arith.constant 0 : index
    %9 = vector.load %arg4[%c0_6, %c0_7] : memref<1024x512xbf16, #tpu.memory_space<vmem>>, vector<1024x512xbf16>
    %cst_8 = arith.constant dense<0.000000e+00> : vector<8x512xf32>
    %10 = tpu.matmul %8, %9, %cst_8 {dimension_numbers = #tpu.dot_dimension_numbers<[1], [0], [0], [1], [0, 0, 1, 1], [], []>} : vector<8x1024xbf16>, vector<1024x512xbf16>, vector<8x512xf32> -> vector<8x512xf32>
    %c0_9 = arith.constant 0 : index
    %c0_10 = arith.constant 0 : index
    %11 = vector.load %arg5[%c0_9, %c0_10] : memref<1x512xf32, #tpu.memory_space<vmem>>, vector<1x512xf32>
    %12 = vector.broadcast %11 : vector<1x512xf32> to vector<8x512xf32>
    %13 = arith.addf %10, %12 : vector<8x512xf32>
    %cst_11 = arith.constant 0.000000e+00 : f32
    %14 = vector.broadcast %cst_11 : f32 to vector<8x512xf32>
    %15 = arith.maximumf %13, %14 : vector<8x512xf32>
    %16 = arith.truncf %15 : vector<8x512xf32> to vector<8x512xbf16>
    %c0_12 = arith.constant 0 : index
    %c0_13 = arith.constant 0 : index
    %17 = vector.load %arg6[%c0_12, %c0_13] : memref<512x128xbf16, #tpu.memory_space<vmem>>, vector<512x128xbf16>
    %cst_14 = arith.constant dense<0.000000e+00> : vector<8x128xf32>
    %18 = tpu.matmul %16, %17, %cst_14 {dimension_numbers = #tpu.dot_dimension_numbers<[1], [0], [0], [1], [0, 0, 1, 1], [], []>} : vector<8x512xbf16>, vector<512x128xbf16>, vector<8x128xf32> -> vector<8x128xf32>
    %c0_15 = arith.constant 0 : index
    %c0_16 = arith.constant 0 : index
    %19 = vector.load %arg7[%c0_15, %c0_16] : memref<1x128xf32, #tpu.memory_space<vmem>>, vector<1x128xf32>
    %20 = vector.broadcast %19 : vector<1x128xf32> to vector<8x128xf32>
    %21 = arith.addf %18, %20 : vector<8x128xf32>
    %22 = tpu.iota {dimensions = array<i32: 1>} : vector<8x128xi32>
    %c10_i32 = arith.constant 10 : i32
    %23 = vector.broadcast %c10_i32 : i32 to vector<8x128xi32>
    %24 = arith.cmpi slt, %22, %23 : vector<8x128xi32>
    %cst_17 = arith.constant 0xFF800000 : f32
    %25 = vector.broadcast %cst_17 : f32 to vector<8x128xf32>
    %26 = arith.select %24, %21, %25 : vector<8x128xi1>, vector<8x128xf32>
    %cst_18 = arith.constant dense<0xFF800000> : vector<8xf32>
    %27 = vector.multi_reduction <maximumf>, %26, %cst_18 [1] : vector<8x128xf32> to vector<8xf32>
    %28 = vector.shape_cast %27 : vector<8xf32> to vector<8x1xf32>
    %29 = vector.broadcast %28 : vector<8x1xf32> to vector<8x128xf32>
    %30 = arith.subf %26, %29 : vector<8x128xf32>
    %31 = math.exp %30 : vector<8x128xf32>
    %cst_19 = arith.constant dense<0.000000e+00> : vector<8xf32>
    %32 = vector.multi_reduction <add>, %31, %cst_19 [1] : vector<8x128xf32> to vector<8xf32>
    %33 = vector.shape_cast %32 : vector<8xf32> to vector<8x1xf32>
    %34 = math.log %33 : vector<8x1xf32>
    %35 = vector.broadcast %34 : vector<8x1xf32> to vector<8x128xf32>
    %36 = arith.subf %30, %35 : vector<8x128xf32>
    %c0_20 = arith.constant 0 : index
    %c0_21 = arith.constant 0 : index
    %37 = vector.load %arg8[%c0_20, %c0_21] : memref<8x128xf32, #tpu.memory_space<vmem>>, vector<8x128xf32>
    tpu.vector_store %arg8[%c0_20, %c0_21], %36 {strides = array<i32>} : memref<8x128xf32, #tpu.memory_space<vmem>>, vector<8x128xf32>,
    return
  }
  func.func @transform_0(%arg0: i32) -> (i32, i32) {
    %c0_i32 = arith.constant 0 : i32
    %c0_i32_0 = arith.constant 0 : i32
    %c0_i32_1 = arith.constant 0 : i32
    return %c0_i32, %c0_i32_0 : i32, i32
  }
  func.func @transform_1(%arg0: i32) -> (i32, i32) {
    %c0_i32 = arith.constant 0 : i32
    %c0_i32_0 = arith.constant 0 : i32
    %c0_i32_1 = arith.constant 0 : i32
    return %c0_i32, %c0_i32_0 : i32, i32
  }
  func.func @transform_2(%arg0: i32) -> (i32, i32) {
    %c0_i32 = arith.constant 0 : i32
    %c0_i32_0 = arith.constant 0 : i32
    %c0_i32_1 = arith.constant 0 : i32
    return %c0_i32, %c0_i32_0 : i32, i32
  }
  func.func @transform_3(%arg0: i32) -> (i32, i32) {
    %c0_i32 = arith.constant 0 : i32
    %c0_i32_0 = arith.constant 0 : i32
    %c0_i32_1 = arith.constant 0 : i32
    return %c0_i32, %c0_i32_0 : i32, i32
  }
  func.func @transform_4(%arg0: i32) -> (i32, i32) {
    %c0_i32 = arith.constant 0 : i32
    %c0_i32_0 = arith.constant 0 : i32
    %c0_i32_1 = arith.constant 0 : i32
    return %c0_i32, %c0_i32_0 : i32, i32
  }
  func.func @transform_5(%arg0: i32) -> (i32, i32) {
    %c0_i32 = arith.constant 0 : i32
    %c0_i32_0 = arith.constant 0 : i32
    %c0_i32_1 = arith.constant 0 : i32
    return %c0_i32, %c0_i32_0 : i32, i32
  }
  func.func @transform_6(%arg0: i32) -> (i32, i32) {
    %c0_i32 = arith.constant 0 : i32
    %c0_i32_0 = arith.constant 0 : i32
    %c0_i32_1 = arith.constant 0 : i32
    return %c0_i32, %c0_i32_0 : i32, i32
  }
  func.func @transform_7(%arg0: i32) -> (i32, i32) {
    %c0_i32 = arith.constant 0 : i32
    %c0_i32_0 = arith.constant 0 : i32
    %c0_i32_1 = arith.constant 0 : i32
    return %c0_i32, %c0_i32_0 : i32, i32
  }
}

</mosaic_0001>

<bundles_post_ra>
// kernel: pallas_forward.3
= control target key start
LH: loop header
LB: loop body
LE: loop exit
PB: predicated region body
PF: predicated region fallthrough
CT: control target
= control target key end

     0   :  { %vm880_vm0 = vcmask 1043456   ;;  %vm881_vm1 = vcmask 1044480   ;;  %v3406_v2 = vmov 65535   ;;  %vm624_vm2 = vcmask 72704   ;;  %s8916_s1 = inlined_call_operand.vmem [shape: bf16[9,128], index: 1, kind: input, shape index: {}]   ;;  %s8917_s2 = inlined_call_operand.vmem [shape: f32[1,128], index: 2, kind: input, shape index: {}]   ;;  %s8918_s0 = inlined_call_operand.vmem [shape: bf16[1352,9], index: 0, kind: input, shape index: {}]   ;;  %s8919_s3 = inlined_call_operand.vmem [shape: f32[1,128], index: 3, kind: input, shape index: {}]   ;;  %s8920_s4 = inlined_call_operand.vmem [shape: f32[1,128], index: 4, kind: input, shape index: {}]   ;;  %s8921_s5 = inlined_call_operand.vmem [shape: f32[1352,128], index: 5, kind: output, shape index: {}]  }
   0x1   :  { %v3221_v0 = vld [vmem:[%s8916_s1] sm:$0xf]  ;;  %v3392_v1 = vld [vmem:[%s8916_s1] sm:$0x10]  ;;  %v882_v3 = vsel %vm880_vm0, 4294967295, %v3406_v2  ;;  %v3309_v8 = vld [vmem:[%s8918_s0 + $0x8] sm:$0xff] }
   0x2   :  { %v3222_v4 = vor.u32 %v3392_v1, %v3221_v0  ;;  %v883_v5 = vsel %vm881_vm1, %v882_v3, 0  ;;  %v3308_v7 = vld [vmem:[%s8918_s0] sm:$0xff]  ;;  %v3310_v9 = vld [vmem:[%s8918_s0 + $0x10] sm:$0xff]  ;;  %v3311_v10 = vld [vmem:[%s8918_s0 + $0x18] sm:$0xff] }
   0x3   :  { %v3330_v11 = vld [vmem:[%s8918_s0 + $0xb0] sm:$0xff]  ;;  %v3312_v12 = vld [vmem:[%s8918_s0 + $0x20] sm:$0xff]  ;;  %v3331_v13 = vld [vmem:[%s8918_s0 + $0xb8] sm:$0xff] }
   0x4   :  { %v885_v6 = vand.u32 %v3222_v4, %v883_v5  ;;  %v3313_v14 = vld [vmem:[%s8918_s0 + $0x28] sm:$0xff]  ;;  %v3332_v15 = vld [vmem:[%s8918_s0 + $0xc0] sm:$0xff]  ;;  %v3314_v16 = vld [vmem:[%s8918_s0 + $0x30] sm:$0xff] }
   0x5   :  { %v3333_v17 = vld [vmem:[%s8918_s0 + $0xc8] sm:$0xff]  ;;  %v3315_v18 = vld [vmem:[%s8918_s0 + $0x38] sm:$0xff]  ;;  %v3334_v19 = vld [vmem:[%s8918_s0 + $0xd0] sm:$0xff] }
   0x6   :  { %894 = vmatpush.bf16.msra.mxu0 %v885_v6  ;;  %3393 = vmatpush.bf16.msra.mxu1 %v885_v6  ;;  %v3316_v20 = vld [vmem:[%s8918_s0 + $0x40] sm:$0xff]  ;;  %v3335_v22 = vld [vmem:[%s8918_s0 + $0xd8] sm:$0xff]  ;;  %v3317_v25 = vld [vmem:[%s8918_s0 + $0x48] sm:$0xff] }
   0x7   :  { %3394 = vmatpush.bf16.msra.mxu2 %v885_v6  ;;  %3395 = vmatpush.bf16.msra.mxu3 %v885_v6  ;;  %v3352_v23 = vld [vmem:[%s8918_s0 + $0x160] sm:$0xff]  ;;  %v3353_v28 = vld [vmem:[%s8918_s0 + $0x168] sm:$0xff]  ;;  %v3318_v30 = vld [vmem:[%s8918_s0 + $0x50] sm:$0xff] }
   0x8   :  { %v3336_v27 = vld [vmem:[%s8918_s0 + $0xe0] sm:$0xff]  ;;  %v3337_v32 = vld [vmem:[%s8918_s0 + $0xe8] sm:$0xff]  ;;  %v3354_v33 = vld [vmem:[%s8918_s0 + $0x170] sm:$0xff] }
   0x9   :  { %3223 = vmatmul.msk.bf16.vlgmr.msra.gmra.mxu0 %vm624_vm2, %v3308_v7  ;;  %3245 = vmatmul.msk.bf16.vlgmr.msra.gmra.mxu1 %vm624_vm2, %v3330_v11  ;;  %v3319_v35 = vld [vmem:[%s8918_s0 + $0x58] sm:$0xff]  ;;  %v3338_v38 = vld [vmem:[%s8918_s0 + $0xf0] sm:$0xff]  ;;  %v3320_v42 = vld [vmem:[%s8918_s0 + $0x60] sm:$0xff] }
   0xa   :  { %3267 = vmatmul.msk.bf16.vlgmr.msra.gmra.mxu2 %vm624_vm2, %v3352_v23  ;;  %v3355_v39 = vld [vmem:[%s8918_s0 + $0x178] sm:$0xff]  ;;  %v3356_v46 = vld [vmem:[%s8918_s0 + $0x180] sm:$0xff]  ;;  %v3321_v49 = vld [vmem:[%s8918_s0 + $0x68] sm:$0xff] }
   0xb   :  { %v3339_v45 = vld [vmem:[%s8918_s0 + $0xf8] sm:$0xff]  ;;  %v3340_v52 = vld [vmem:[%s8918_s0 + $0x100] sm:$0xff]  ;;  %v3357_v53 = vld [vmem:[%s8918_s0 + $0x188] sm:$0xff] }
   0xc   :  { %v3322_v56 = vld [vmem:[%s8918_s0 + $0x70] sm:$0xff]  ;;  %v3341_v59 = vld [vmem:[%s8918_s0 + $0x108] sm:$0xff]  ;;  %v3323_v63 = vld [vmem:[%s8918_s0 + $0x78] sm:$0xff] }
   0xd   :  { %v3358_v60 = vld [vmem:[%s8918_s0 + $0x190] sm:$0xff]  ;;  %v3359_v3 = vld [vmem:[%s8918_s0 + $0x198] sm:$0xff]  ;;  %v3324_v6 = vld [vmem:[%s8918_s0 + $0x80] sm:$0xff] }
   0xe   :  { %v3342_v2 = vld [vmem:[%s8918_s0 + $0x110] sm:$0xff] }
   0xf   :  { %v3374_v11 = vld [vmem:[%s8918_s0 + $0x210] sm:$0xff] }
  0x10   :  { %3289 = vmatmul.msk.bf16.vlgmr.msra.gmra.mxu3 %vm624_vm2, %v3374_v11 }
  0x19   :  { %3224 = vmatmul.msk.bf16.gmra.mxu0 %vm624_vm2, %v3309_v8  ;;  %3246 = vmatmul.msk.bf16.gmra.mxu1 %vm624_vm2, %v3331_v13 }
  0x1a   :  { %3268 = vmatmul.msk.bf16.gmra.mxu2 %vm624_vm2, %v3353_v28  ;;  %v3326_v28 = vld [vmem:[%s8918_s0 + $0x90] sm:$0xff] }
  0x29   :  { %3225 = vmatmul.msk.bf16.gmra.mxu0 %vm624_vm2, %v3310_v9  ;;  %3247 = vmatmul.msk.bf16.gmra.mxu1 %vm624_vm2, %v3332_v15  ;;  %v3343_v9 = vld [vmem:[%s8918_s0 + $0x118] sm:$0xff]  ;;  %v3325_v15 = vld [vmem:[%s8918_s0 + $0x88] sm:$0xff] }
  0x2a   :  { %3269 = vmatmul.msk.bf16.gmra.mxu2 %vm624_vm2, %v3354_v33 }
  0x39   :  { %3226 = vmatmul.msk.bf16.gmra.mxu0 %vm624_vm2, %v3311_v10  ;;  %3248 = vmatmul.msk.bf16.gmra.mxu1 %vm624_vm2, %v3333_v17  ;;  %v3360_v10 = vld [vmem:[%s8918_s0 + $0x1a0] sm:$0xff] }
  0x3a   :  { %3270 = vmatmul.msk.bf16.gmra.mxu2 %vm624_vm2, %v3355_v39  ;;  %v3376_v39 = vld [vmem:[%s8918_s0 + $0x220] sm:$0xff] }
  0x49   :  { %3227 = vmatmul.msk.bf16.gmra.mxu0 %vm624_vm2, %v3312_v12  ;;  %3249 = vmatmul.msk.bf16.gmra.mxu1 %vm624_vm2, %v3334_v19  ;;  %v3344_v19 = vld [vmem:[%s8918_s0 + $0x120] sm:$0xff] }
  0x4a   :  { %3271 = vmatmul.msk.bf16.gmra.mxu2 %vm624_vm2, %v3356_v46 }
  0x59   :  { %3228 = vmatmul.msk.bf16.gmra.mxu0 %vm624_vm2, %v3313_v14  ;;  %3250 = vmatmul.msk.bf16.gmra.mxu1 %vm624_vm2, %v3335_v22  ;;  %v3375_v22 = vld [vmem:[%s8918_s0 + $0x218] sm:$0xff] }
  0x5a   :  { %3272 = vmatmul.msk.bf16.gmra.mxu2 %vm624_vm2, %v3357_v53  ;;  %3290 = vmatmul.msk.bf16.gmra.mxu3 %vm624_vm2, %v3375_v22  ;;  %v3378_v22 = vld [vmem:[%s8918_s0 + $0x230] sm:$0xff] }
  0x69   :  { %3229 = vmatmul.msk.bf16.gmra.mxu0 %vm624_vm2, %v3314_v16  ;;  %3251 = vmatmul.msk.bf16.gmra.mxu1 %vm624_vm2, %v3336_v27 }
  0x6a   :  { %3273 = vmatmul.msk.bf16.gmra.mxu2 %vm624_vm2, %v3358_v60  ;;  %3291 = vmatmul.msk.bf16.gmra.mxu3 %vm624_vm2, %v3376_v39  ;;  %v3363_v60 = vld [vmem:[%s8918_s0 + $0x1b8] sm:$0xff]  ;;  %v3329_v39 = vld [vmem:[%s8918_s0 + $0xa8] sm:$0xff] }
  0x79   :  { %3230 = vmatmul.msk.bf16.gmra.mxu0 %vm624_vm2, %v3315_v18  ;;  %3252 = vmatmul.msk.bf16.gmra.mxu1 %vm624_vm2, %v3337_v32 }
  0x7a   :  { %3274 = vmatmul.msk.bf16.gmra.mxu2 %vm624_vm2, %v3359_v3 }
  0x86   :  { %v3499_v21 = vpop.f32.mrf.mxu0  ;;  %v3549_v37 = vpop.f32.mrf.mxu1 }
  0x89   :  { %3231 = vmatmul.msk.bf16.gmra.mxu0 %vm624_vm2, %v3316_v20  ;;  %3253 = vmatmul.msk.bf16.gmra.mxu1 %vm624_vm2, %v3338_v38  ;;  %v3361_v20 = vld [vmem:[%s8918_s0 + $0x1a8] sm:$0xff]  ;;  %v3362_v38 = vld [vmem:[%s8918_s0 + $0x1b0] sm:$0xff] }
  0x8a   :  { %3275 = vmatmul.msk.bf16.gmra.mxu2 %vm624_vm2, %v3360_v10 }
  0x8d   :  { %v3668_v14 = vpop.f32.mrf.mxu2 }
  0x8e   :  { %v3510_v24 = vpop.f32.mrf.mxu0  ;;  %v3562_v41 = vpop.f32.mrf.mxu1  ;;  %9339 = vst [vmem:[#allocation2_spill] sm:$0xff] %v3668_v14 }
  0x95   :  { %v3677_v18 = vpop.f32.mrf.mxu2 }
  0x96   :  { %v3515_v26 = vpop.f32.mrf.mxu0  ;;  %v3569_v44 = vpop.f32.mrf.mxu1  ;;  %9340 = vst [vmem:[#allocation3_spill] sm:$0xff] %v3677_v18 }
  0x99   :  { %3232 = vmatmul.msk.bf16.gmra.mxu0 %vm624_vm2, %v3317_v25  ;;  %3254 = vmatmul.msk.bf16.gmra.mxu1 %vm624_vm2, %v3339_v45 }
  0x9a   :  { %3276 = vmatmul.msk.bf16.gmra.mxu2 %vm624_vm2, %v3361_v20  ;;  %v3364_v20 = vld [vmem:[%s8918_s0 + $0x1c0] sm:$0xff] }
  0x9d   :  { %v3696_v27 = vpop.f32.mrf.mxu2 }
  0x9e   :  { %v3526_v29 = vpop.f32.mrf.mxu0  ;;  %v3582_v48 = vpop.f32.mrf.mxu1  ;;  %9341 = vst [vmem:[#allocation4_spill] sm:$0xff] %v3696_v27 }
  0xa5   :  { %v3705_v33 = vpop.f32.mrf.mxu2 }
  0xa6   :  { %v3531_v31 = vpop.f32.mrf.mxu0  ;;  %v3589_v51 = vpop.f32.mrf.mxu1  ;;  %9342 = vst [vmem:[#allocation5_spill] sm:$0xff] %v3705_v33 }
  0xa9   :  { %3233 = vmatmul.msk.bf16.gmra.mxu0 %vm624_vm2, %v3318_v30  ;;  %3255 = vmatmul.msk.bf16.gmra.mxu1 %vm624_vm2, %v3340_v52 }
  0xaa   :  { %3277 = vmatmul.msk.bf16.gmra.mxu2 %vm624_vm2, %v3362_v38 }
  0xad   :  { %v3724_v46 = vpop.f32.mrf.mxu2 }
  0xae   :  { %v3542_v34 = vpop.f32.mrf.mxu0  ;;  %v3602_v55 = vpop.f32.mrf.mxu1  ;;  %9343 = vst [vmem:[#allocation6_spill] sm:$0xff] %v3724_v46 }
  0xb6   :  { %v3547_v36 = vpop.f32.mrf.mxu0  ;;  %v3609_v58 = vpop.f32.mrf.mxu1 }
  0xb9   :  { %3234 = vmatmul.msk.bf16.gmra.mxu0 %vm624_vm2, %v3319_v35  ;;  %3256 = vmatmul.msk.bf16.gmra.mxu1 %vm624_vm2, %v3341_v59  ;;  %v3345_v35 = vld [vmem:[%s8918_s0 + $0x128] sm:$0xff]  ;;  %v3346_v59 = vld [vmem:[%s8918_s0 + $0x130] sm:$0xff] }
  0xba   :  { %3278 = vmatmul.msk.bf16.gmra.mxu2 %vm624_vm2, %v3363_v60 }
  0xbe   :  { %v3560_v40 = vpop.f32.mrf.mxu0  ;;  %v3622_v62 = vpop.f32.mrf.mxu1 }
  0xc6   :  { %v3567_v43 = vpop.f32.mrf.mxu0  ;;  %v3629_v1 = vpop.f32.mrf.mxu1 }
  0xc9   :  { %3235 = vmatmul.msk.bf16.gmra.mxu0 %vm624_vm2, %v3320_v42  ;;  %3257 = vmatmul.msk.bf16.gmra.mxu1 %vm624_vm2, %v3342_v2 }
  0xca   :  { %3279 = vmatmul.msk.bf16.gmra.mxu2 %vm624_vm2, %v3364_v20 }
  0xce   :  { %v3580_v47 = vpop.f32.mrf.mxu0  ;;  %v3642_v5 = vpop.f32.mrf.mxu1 }
  0xd6   :  { %v3587_v50 = vpop.f32.mrf.mxu0  ;;  %v3649_v8 = vpop.f32.mrf.mxu1 }
  0xd9   :  { %3236 = vmatmul.msk.bf16.gmra.mxu0 %vm624_vm2, %v3321_v49  ;;  %3258 = vmatmul.msk.bf16.gmra.mxu1 %vm624_vm2, %v3343_v9  ;;  %v3327_v49 = vld [vmem:[%s8918_s0 + $0x98] sm:$0xff]  ;;  %v3328_v9 = vld [vmem:[%s8918_s0 + $0xa0] sm:$0xff] }
  0xde   :  { %v3600_v54 = vpop.f32.mrf.mxu0  ;;  %v3666_v13 = vpop.f32.mrf.mxu1 }
  0xe6   :  { %v3607_v57 = vpop.f32.mrf.mxu0  ;;  %v3675_v17 = vpop.f32.mrf.mxu1 }
  0xe9   :  { %3237 = vmatmul.msk.bf16.gmra.mxu0 %vm624_vm2, %v3322_v56  ;;  %3259 = vmatmul.msk.bf16.gmra.mxu1 %vm624_vm2, %v3344_v19  ;;  %v3733_v56 = vpop.f32.mrf.mxu2  ;;  %v3347_v19 = vld [vmem:[%s8918_s0 + $0x138] sm:$0xff] }
  0xea   :  { %9344 = vst [vmem:[#allocation7_spill] sm:$0xff] %v3733_v56 }
  0xee   :  { %v3620_v61 = vpop.f32.mrf.mxu0  ;;  %v3694_v25 = vpop.f32.mrf.mxu1 }
  0xf6   :  { %v3627_v0 = vpop.f32.mrf.mxu0  ;;  %v3703_v32 = vpop.f32.mrf.mxu1 }
  0xf9   :  { %3238 = vmatmul.msk.bf16.gmra.mxu0 %vm624_vm2, %v3323_v63  ;;  %3260 = vmatmul.msk.bf16.gmra.mxu1 %vm624_vm2, %v3345_v35  ;;  %v3377_v63 = vld [vmem:[%s8918_s0 + $0x228] sm:$0xff] }
  0xfa   :  { %3292 = vmatmul.msk.bf16.gmra.mxu3 %vm624_vm2, %v3377_v63  ;;  %v3348_v63 = vld [vmem:[%s8918_s0 + $0x140] sm:$0xff] }
  0xfe   :  { %v3640_v4 = vpop.f32.mrf.mxu0  ;;  %v3722_v45 = vpop.f32.mrf.mxu1 }
 0x106   :  { %v3647_v7 = vpop.f32.mrf.mxu0  ;;  %v3731_v53 = vpop.f32.mrf.mxu1 }
 0x109   :  { %3239 = vmatmul.msk.bf16.gmra.mxu0 %vm624_vm2, %v3324_v6  ;;  %3261 = vmatmul.msk.bf16.gmra.mxu1 %vm624_vm2, %v3346_v59  ;;  %v3752_v6 = vpop.f32.mrf.mxu2 }
 0x10a   :  { %9345 = vst [vmem:[#allocation8_spill] sm:$0xff] %v3752_v6  ;;  %3293 = vmatmul.msk.bf16.gmra.mxu3 %vm624_vm2, %v3378_v22 }
 0x10e   :  { %v3664_v12 = vpop.f32.mrf.mxu0  ;;  %v3750_v3 = vpop.f32.mrf.mxu1 }
 0x116   :  { %v3673_v16 = vpop.f32.mrf.mxu0  ;;  %v3759_v11 = vpop.f32.mrf.mxu1 }
 0x119   :  { %3240 = vmatmul.msk.bf16.gmra.mxu0 %vm624_vm2, %v3325_v15  ;;  %v3761_v15 = vpop.f32.mrf.mxu2  ;;  %3262 = vmatmul.msk.bf16.gmra.mxu1 %vm624_vm2, %v3347_v19  ;;  %v3379_v19 = vld [vmem:[%s8918_s0 + $0x238] sm:$0xff] }
 0x11a   :  { %9346 = vst [vmem:[#allocation9_spill] sm:$0xff] %v3761_v15  ;;  %3294 = vmatmul.msk.bf16.gmra.mxu3 %vm624_vm2, %v3379_v19  ;;  %v3366_v19 = vld [vmem:[%s8918_s0 + $0x1d0] sm:$0xff] }
 0x11e   :  { %v3692_v23 = vpop.f32.mrf.mxu0  ;;  %v3778_v35 = vpop.f32.mrf.mxu1 }
 0x11f   :  { %9347 = vst [vmem:[#allocation10_spill] sm:$0xff] %v3778_v35 }
 0x121   :  { %v3780_v38 = vpop.f32.mrf.mxu2 }
 0x122   :  { %9348 = vst [vmem:[#allocation11_spill] sm:$0xff] %v3780_v38 }
 0x126   :  { %v3701_v30 = vpop.f32.mrf.mxu0  ;;  %v3787_v59 = vpop.f32.mrf.mxu1 }
 0x127   :  { %9349 = vst [vmem:[#allocation12_spill] sm:$0xff] %v3787_v59  ;;  %v3917_v59 = vpop.f32.mrf.mxu3 }
 0x129   :  { %3241 = vmatmul.msk.bf16.gmra.mxu0 %vm624_vm2, %v3326_v28  ;;  %v3789_v60 = vpop.f32.mrf.mxu2  ;;  %3263 = vmatmul.msk.bf16.gmra.mxu1 %vm624_vm2, %v3348_v63 }
 0x12a   :  { %9350 = vst [vmem:[#allocation13_spill] sm:$0xff] %v3789_v60 }
 0x12e   :  { %v3720_v42 = vpop.f32.mrf.mxu0  ;;  %v3806_v22 = vpop.f32.mrf.mxu1 }
 0x12f   :  { %9351 = vst [vmem:[#allocation14_spill] sm:$0xff] %v3806_v22 }
 0x131   :  { %v3808_v60 = vpop.f32.mrf.mxu2 }
 0x132   :  { %9352 = vst [vmem:[#allocation15_spill] sm:$0xff] %v3808_v60  ;;  %v3380_v60 = vld [vmem:[%s8918_s0 + $0x240] sm:$0xff] }
 0x133   :  { %3295 = vmatmul.msk.bf16.gmra.mxu3 %vm624_vm2, %v3380_v60  ;;  %v3367_v60 = vld [vmem:[%s8918_s0 + $0x1d8] sm:$0xff] }
 0x136   :  { %v3729_v52 = vpop.f32.mrf.mxu0  ;;  %v3812_v63 = vpop.f32.mrf.mxu1 }
 0x137   :  { %9353 = vst [vmem:[#allocation16_spill] sm:$0xff] %v3812_v63 }
 0x139   :  { %3242 = vmatmul.msk.bf16.gmra.mxu0 %vm624_vm2, %v3327_v49  ;;  %v3814_v38 = vpop.f32.mrf.mxu2 }
 0x13a   :  { %9354 = vst [vmem:[#allocation17_spill] sm:$0xff] %v3814_v38 }
 0x13e   :  { %v3748_v2 = vpop.f32.mrf.mxu0  ;;  %v3830_v38 = vpop.f32.mrf.mxu1 }
 0x13f   :  { %9355 = vst [vmem:[#allocation18_spill] sm:$0xff] %v3830_v38 }
 0x141   :  { %v3832_v6 = vpop.f32.mrf.mxu2 }
 0x142   :  { %9356 = vst [vmem:[#allocation19_spill] sm:$0xff] %v3832_v6  ;;  %v3381_v6 = vld [vmem:[%s8918_s0 + $0x248] sm:$0xff] }
 0x143   :  { %3296 = vmatmul.msk.bf16.gmra.mxu3 %vm624_vm2, %v3381_v6  ;;  %v3351_v6 = vld [vmem:[%s8918_s0 + $0x158] sm:$0xff] }
 0x146   :  { %v3757_v10 = vpop.f32.mrf.mxu0 }
 0x149   :  { %3243 = vmatmul.msk.bf16.gmra.mxu0 %vm624_vm2, %v3328_v9  ;;  %v3365_v9 = vld [vmem:[%s8918_s0 + $0x1c8] sm:$0xff]  ;;  %v3838_v46 = vpop.f32.mrf.mxu2 }
 0x14a   :  { %3280 = vmatmul.msk.bf16.gmra.mxu2 %vm624_vm2, %v3365_v9  ;;  %v3349_v9 = vld [vmem:[%s8918_s0 + $0x148] sm:$0xff]  ;;  %9358 = vst [vmem:[#allocation21_spill] sm:$0xff] %v3838_v46 }
 0x14b   :  { %3264 = vmatmul.msk.bf16.gmra.mxu1 %vm624_vm2, %v3349_v9  ;;  %v3836_v9 = vpop.f32.mrf.mxu1 }
 0x14c   :  { %9357 = vst [vmem:[#allocation20_spill] sm:$0xff] %v3836_v9 }
 0x14e   :  { %v3776_v28 = vpop.f32.mrf.mxu0 }
 0x151   :  { %v3856_v27 = vpop.f32.mrf.mxu2 }
 0x152   :  { %9360 = vst [vmem:[#allocation23_spill] sm:$0xff] %v3856_v27 }
 0x153   :  { %v3854_v46 = vpop.f32.mrf.mxu1 }
 0x154   :  { %9359 = vst [vmem:[#allocation22_spill] sm:$0xff] %v3854_v46 }
 0x156   :  { %v3785_v49 = vpop.f32.mrf.mxu0 }
 0x159   :  { %3244 = vmatmul.msk.bf16.gmra.mxu0 %vm624_vm2, %v3329_v39  ;;  %v3869_v14 = vpop.f32.mrf.mxu2 }
 0x15a   :  { %3281 = vmatmul.msk.bf16.gmra.mxu2 %vm624_vm2, %v3366_v19  ;;  %v3350_v19 = vld [vmem:[%s8918_s0 + $0x150] sm:$0xff]  ;;  %9362 = vst [vmem:[#allocation25_spill] sm:$0xff] %v3869_v14 }
 0x15b   :  { %3265 = vmatmul.msk.bf16.gmra.mxu1 %vm624_vm2, %v3350_v19  ;;  %v3861_v19 = vld [vmem:[%s8917_s2] ss:$0 sm:$0xff]  ;;  %v3874_v46 = vpop.f32.mrf.mxu1 }
 0x15c   :  { %9363 = vst [vmem:[#allocation26_spill] sm:$0xff] %v3874_v46  ;;  %v3878_v27 = vadd.f32 %v3861_v19, %v3499_v21  ;;  %v3882_v9 = vadd.f32 %v3861_v19, %v3515_v26  ;;  %v3891_v38 = vadd.f32 %v3861_v19, %v3526_v29  ;;  %v3382_v21 = vld [vmem:[%s8918_s0 + $0x250] sm:$0xff]  ;;  %v3901_v46 = vadd.f32 %v3861_v19, %v3531_v31 }
 0x15d   :  { %3297 = vmatmul.msk.bf16.gmra.mxu3 %vm624_vm2, %v3382_v21  ;;  %v3913_v22 = vadd.f32 %v3861_v19, %v3542_v34 }
 0x15e   :  { %v3804_v20 = vpop.f32.mrf.mxu0  ;;  %9364 = vst [vmem:[#allocation27_spill] sm:$0xff] %v3878_v27  ;;  %v8923_v26 = vmax.f32 %v3878_v27, 0.0  ;;  %v8926_v63 = vmax.f32 %v3891_v38, 0.0  ;;  %v9370_v31 = vmax.f32 %v3882_v9, 0.0  ;;  %v8928_v35 = vmax.f32 %v3901_v46, 0.0 }
 0x15f   :  { %9365 = vst [vmem:[#allocation28_spill] sm:$0xff] %v3882_v9  ;;  %v3924_v27 = vadd.f32 %v3861_v19, %v3547_v36  ;;  %v8930_v34 = vmax.f32 %v3913_v22, 0.0  ;;  %v3940_v36 = vadd.f32 %v3861_v19, %v3567_v43 }
 0x160   :  { %9366 = vst [vmem:[#allocation29_spill] sm:$0xff] %v3891_v38 }
 0x161   :  { %9367 = vst [vmem:[#allocation30_spill] sm:$0xff] %v3901_v46  ;;  %v8936_v43 = vmax.f32 %v3940_v36, 0.0  ;;  %v3960_v46 = vadd.f32 %v3861_v19, %v3587_v50  ;;  %v3383_v50 = vld [vmem:[%s8918_s0 + $0x258] sm:$0xff] }
 0x162   :  { %9369 = vst [vmem:[#allocation31_spill] sm:$0xff] %v3913_v22  ;;  %v3970_v22 = vadd.f32 %v3861_v19, %v3600_v54 }
 0x163   :  { %9371 = vst [vmem:[#allocation32_spill] sm:$0xff] %v3924_v27 }
 0x164   :  { %9373 = vst [vmem:[#allocation34_spill] sm:$0xff] %v3940_v36  ;;  %v4004_v36 = vadd.f32 %v3861_v19, %v3627_v0 }
 0x165   :  { %9375 = vst [vmem:[#allocation36_spill] sm:$0xff] %v3960_v46 }
 0x166   :  { %v3810_v39 = vpop.f32.mrf.mxu0  ;;  %9376 = vst [vmem:[#allocation37_spill] sm:$0xff] %v3970_v22 }
 0x167   :  { %9379 = vst [vmem:[#allocation40_spill] sm:$0xff] %v4004_v36 }
 0x16a   :  { %3282 = vmatmul.msk.bf16.gmra.mxu2 %vm624_vm2, %v3367_v60  ;;  %v3867_v60 = vadd.f32 %v3861_v19, %v3510_v24  ;;  %v3368_v24 = vld [vmem:[%s8918_s0 + $0x1e0] sm:$0xff] }
 0x16b   :  { %3266 = vmatmul.msk.bf16.gmra.mxu1 %vm624_vm2, %v3351_v6  ;;  %v3915_v6 = vpop.f32.mrf.mxu2 }
 0x16c   :  { %9361 = vst [vmem:[#allocation24_spill] sm:$0xff] %v3867_v60  ;;  %v9368_v29 = vmax.f32 %v3867_v60, 0.0  ;;  %v3933_v60 = vadd.f32 %v3861_v19, %v3560_v40  ;;  %v3949_v40 = vadd.f32 %v3861_v19, %v3580_v47 }
 0x16d   :  { %3298 = vmatmul.msk.bf16.gmra.mxu3 %vm624_vm2, %v3383_v50 }
 0x16e   :  { %v3828_v15 = vpop.f32.mrf.mxu0  ;;  %9372 = vst [vmem:[#allocation33_spill] sm:$0xff] %v3933_v60 }
 0x16f   :  { %9374 = vst [vmem:[#allocation35_spill] sm:$0xff] %v3949_v40 }
 0x173   :  { %v3951_v38 = vpop.f32.mrf.mxu2 }
 0x176   :  { %v3834_v56 = vpop.f32.mrf.mxu0 }
 0x17a   :  { %3283 = vmatmul.msk.bf16.gmra.mxu2 %vm624_vm2, %v3368_v24  ;;  %v1489_v24 = vadd.f32 %v9368_v29, %v8923_v26  ;;  %v3926_v29 = vpop.f32.mrf.mxu1 }
 0x17c   :  { %v1490_v21 = vadd.f32 %v1489_v24, %v9370_v31  ;;  %v8932_v31 = vmax.f32 %v3924_v27, 0.0  ;;  %v3993_v27 = vadd.f32 %v3861_v19, %v3620_v61  ;;  %v4011_v61 = vadd.f32 %v3861_v19, %v3640_v4 }
 0x17d   :  { %v4029_v4 = vadd.f32 %v3861_v19, %v3664_v12 }
 0x17e   :  { %v3852_v33 = vpop.f32.mrf.mxu0  ;;  %v1491_v26 = vadd.f32 %v1490_v21, %v8926_v63  ;;  %v8934_v63 = vmax.f32 %v3933_v60, 0.0  ;;  %v8940_v60 = vmax.f32 %v3960_v46, 0.0  ;;  %9378 = vst [vmem:[#allocation39_spill] sm:$0xff] %v3993_v27 }
 0x17f   :  { %9380 = vst [vmem:[#allocation41_spill] sm:$0xff] %v4011_v61 }
 0x180   :  { %v1492_v24 = vadd.f32 %v1491_v26, %v8928_v35  ;;  %v3953_v26 = vpop.f32.mrf.mxu3  ;;  %9382 = vst [vmem:[#allocation43_spill] sm:$0xff] %v4029_v4 }
 0x182   :  { %v1493_v21 = vadd.f32 %v1492_v24, %v8930_v34  ;;  %v3369_v24 = vld [vmem:[%s8918_s0 + $0x1e8] sm:$0xff]  ;;  %v8938_v34 = vmax.f32 %v3949_v40, 0.0 }
 0x184   :  { %v1494_v35 = vadd.f32 %v1493_v21, %v8932_v31  ;;  %v3976_v21 = vpop.f32.mrf.mxu1 }
 0x186   :  { %v3863_v18 = vpop.f32.mrf.mxu0  ;;  %v1495_v47 = vadd.f32 %v1494_v35, %v8934_v63  ;;  %v3983_v35 = vadd.f32 %v3861_v19, %v3607_v57  ;;  %v8942_v63 = vmax.f32 %v3970_v22, 0.0  ;;  %v4040_v22 = vadd.f32 %v3861_v19, %v3673_v16  ;;  %v3384_v16 = vld [vmem:[%s8918_s0 + $0x260] sm:$0xff] }
 0x187   :  { %3299 = vmatmul.msk.bf16.gmra.mxu3 %vm624_vm2, %v3384_v16 }
 0x188   :  { %v1496_v31 = vadd.f32 %v1495_v47, %v8936_v43  ;;  %9377 = vst [vmem:[#allocation38_spill] sm:$0xff] %v3983_v35  ;;  %v3995_v47 = vpop.f32.mrf.mxu2  ;;  %v3997_v43 = vpop.f32.mrf.mxu3  ;;  %v8943_v50 = vmax.f32 %v3983_v35, 0.0 }
 0x189   :  { %9383 = vst [vmem:[#allocation44_spill] sm:$0xff] %v4040_v22 }
 0x18a   :  { %3284 = vmatmul.msk.bf16.gmra.mxu2 %vm624_vm2, %v3369_v24  ;;  %v1497_v24 = vadd.f32 %v1496_v31, %v8938_v34  ;;  %v8946_v34 = vmax.f32 %v3993_v27, 0.0  ;;  %v4050_v27 = vadd.f32 %v3861_v19, %v3692_v23 }
 0x18c   :  { %v1498_v57 = vadd.f32 %v1497_v24, %v8940_v60  ;;  %v8948_v24 = vmax.f32 %v4004_v36, 0.0  ;;  %v4018_v60 = vadd.f32 %v3861_v19, %v3647_v7  ;;  %v4022_v46 = vpop.f32.mrf.mxu1  ;;  %9384 = vst [vmem:[#allocation45_spill] sm:$0xff] %v4050_v27 }
 0x18e   :  { %v3904_v14 = vpop.f32.mrf.mxu0  ;;  %v1499_v31 = vadd.f32 %v1498_v57, %v8942_v63  ;;  %9381 = vst [vmem:[#allocation42_spill] sm:$0xff] %v4018_v60  ;;  %v8949_v63 = vmax.f32 %v4011_v61, 0.0  ;;  %v8951_v35 = vmax.f32 %v4018_v60, 0.0  ;;  %v4071_v61 = vadd.f32 %v3861_v19, %v3720_v42 }
 0x190   :  { %v1500_v40 = vadd.f32 %v1499_v31, %v8943_v50  ;;  %v4031_v31 = vpop.f32.mrf.mxu2  ;;  %v4033_v50 = vpop.f32.mrf.mxu3  ;;  %9386 = vst [vmem:[#allocation47_spill] sm:$0xff] %v4071_v61  ;;  %v8960_v42 = vmax.f32 %v4071_v61, 0.0 }
 0x192   :  { %v1501_v57 = vadd.f32 %v1500_v40, %v8946_v34  ;;  %v3370_v40 = vld [vmem:[%s8918_s0 + $0x1f0] sm:$0xff]  ;;  %v8953_v34 = vmax.f32 %v4029_v4, 0.0  ;;  %v4091_v4 = vadd.f32 %v3861_v19, %v3748_v2  ;;  %v4107_v2 = vadd.f32 %v3861_v19, %v3776_v28 }
 0x194   :  { %v1502_v7 = vadd.f32 %v1501_v57, %v8948_v24  ;;  %9389 = vst [vmem:[#allocation49_spill] sm:$0xff] %v4091_v4  ;;  %v8968_v61 = vmax.f32 %v4107_v2, 0.0 }
 0x195   :  { %9391 = vst [vmem:[#allocation51_spill] sm:$0xff] %v4107_v2 }
 0x196   :  { %v3942_v9 = vpop.f32.mrf.mxu0  ;;  %v1503_v12 = vadd.f32 %v1502_v7, %v8949_v63  ;;  %v4061_v7 = vadd.f32 %v3861_v19, %v3701_v30  ;;  %v9387_v30 = vmax.f32 %v4040_v22, 0.0 }
 0x198   :  { %v1504_v57 = vadd.f32 %v1503_v12, %v8951_v35  ;;  %9385 = vst [vmem:[#allocation46_spill] sm:$0xff] %v4061_v7  ;;  %v4073_v12 = vpop.f32.mrf.mxu2  ;;  %v4075_v35 = vpop.f32.mrf.mxu1  ;;  %v8958_v60 = vmax.f32 %v4061_v7, 0.0  ;;  %v4118_v7 = vadd.f32 %v3861_v19, %v3785_v49  ;;  %v3385_v49 = vld [vmem:[%s8918_s0 + $0x268] sm:$0xff] }
 0x199   :  { %v4077_v24 = vpop.f32.mrf.mxu3  ;;  %3300 = vmatmul.msk.bf16.gmra.mxu3 %vm624_vm2, %v3385_v49  ;;  %v4160_v49 = vadd.f32 %v3861_v19, %v3834_v56  ;;  %v4176_v56 = vadd.f32 %v3861_v19, %v3863_v18 }
 0x19a   :  { %3285 = vmatmul.msk.bf16.gmra.mxu2 %vm624_vm2, %v3370_v40  ;;  %v1505_v23 = vadd.f32 %v1504_v57, %v8953_v34  ;;  %v8956_v40 = vmax.f32 %v4050_v27, 0.0  ;;  %v4084_v57 = vadd.f32 %v3861_v19, %v3729_v52  ;;  %9392 = vst [vmem:[#allocation52_spill] sm:$0xff] %v4118_v7 }
 0x19b   :  { %9396 = vst [vmem:[#allocation56_spill] sm:$0xff] %v4160_v49  ;;  %v8982_v18 = vmax.f32 %v4176_v56, 0.0 }
 0x19c   :  { %v1506_v16 = vadd.f32 %v1505_v23, %v9387_v30  ;;  %9388 = vst [vmem:[#allocation48_spill] sm:$0xff] %v4084_v57  ;;  %v8962_v23 = vmax.f32 %v4084_v57, 0.0  ;;  %v4098_v30 = vadd.f32 %v3861_v19, %v3757_v10  ;;  %v8970_v57 = vmax.f32 %v4118_v7, 0.0 }
 0x19d   :  { %9398 = vst [vmem:[#allocation58_spill] sm:$0xff] %v4176_v56 }
 0x19e   :  { %v3986_v54 = vpop.f32.mrf.mxu0  ;;  %v1507_v34 = vadd.f32 %v1506_v16, %v8956_v40  ;;  %9390 = vst [vmem:[#allocation50_spill] sm:$0xff] %v4098_v30  ;;  %v8964_v40 = vmax.f32 %v4091_v4, 0.0  ;;  %v8967_v10 = vmax.f32 %v4098_v30, 0.0  ;;  %v4149_v4 = vadd.f32 %v3861_v19, %v3828_v15 }
 0x19f   :  { %v4167_v15 = vadd.f32 %v3861_v19, %v3852_v33  ;;  %v4183_v33 = vadd.f32 %v3861_v19, %v3904_v14 }
 0x1a0   :  { %v1508_v36 = vadd.f32 %v1507_v34, %v8958_v60  ;;  %v4109_v27 = vpop.f32.mrf.mxu2  ;;  %9395 = vst [vmem:[#allocation55_spill] sm:$0xff] %v4149_v4 }
 0x1a1   :  { %v4111_v34 = vpop.f32.mrf.mxu3  ;;  %9397 = vst [vmem:[#allocation57_spill] sm:$0xff] %v4167_v15 }
 0x1a2   :  { %v1509_v16 = vadd.f32 %v1508_v36, %v8960_v42  ;;  %v3371_v36 = vld [vmem:[%s8918_s0 + $0x1f8] sm:$0xff]  ;;  %v4123_v42 = vpop.f32.mrf.mxu1  ;;  %9399 = vst [vmem:[#allocation59_spill] sm:$0xff] %v4183_v33 }
 0x1a4   :  { %v1510_v60 = vadd.f32 %v1509_v16, %v8962_v23  ;;  %v4130_v16 = vadd.f32 %v3861_v19, %v3804_v20 }
 0x1a6   :  { %v4020_v0 = vpop.f32.mrf.mxu0  ;;  %v1511_v28 = vadd.f32 %v1510_v60, %v8964_v40  ;;  %9393 = vst [vmem:[#allocation53_spill] sm:$0xff] %v4130_v16  ;;  %v4141_v60 = vadd.f32 %v3861_v19, %v3810_v39 }
 0x1a8   :  { %v1512_v23 = vadd.f32 %v1511_v28, %v8967_v10  ;;  %9394 = vst [vmem:[#allocation54_spill] sm:$0xff] %v4141_v60  ;;  %v4151_v30 = vpop.f32.mrf.mxu2  ;;  %v8975_v10 = vmax.f32 %v4141_v60, 0.0 }
 0x1a9   :  { %v4153_v28 = vpop.f32.mrf.mxu3 }
 0x1aa   :  { %3286 = vmatmul.msk.bf16.gmra.mxu2 %vm624_vm2, %v3371_v36  ;;  %v1513_v20 = vadd.f32 %v1512_v23, %v8968_v61  ;;  %v8972_v36 = vmax.f32 %v4130_v16, 0.0  ;;  %v8976_v61 = vmax.f32 %v4149_v4, 0.0  ;;  %v4169_v2 = vpop.f32.mrf.mxu1  ;;  %v4204_v4 = vadd.f32 %v3861_v19, %v3986_v54 }
 0x1ac   :  { %v1514_v39 = vadd.f32 %v1513_v20, %v8970_v57  ;;  %v8978_v57 = vmax.f32 %v4160_v49, 0.0  ;;  %9401 = vst [vmem:[#allocation61_spill] sm:$0xff] %v4204_v4 }
 0x1ae   :  { %v4064_v63 = vpop.f32.mrf.mxu0  ;;  %v1515_v23 = vadd.f32 %v1514_v39, %v8972_v36  ;;  %v8979_v36 = vmax.f32 %v4167_v15, 0.0  ;;  %v8989_v15 = vmax.f32 %v4204_v4, 0.0 }
 0x1af   :  { %v4225_v56 = vadd.f32 %v3861_v19, %v4064_v63 }
 0x1b0   :  { %v1516_v20 = vadd.f32 %v1515_v23, %v8975_v10  ;;  %v4185_v16 = vpop.f32.mrf.mxu2  ;;  %v4194_v10 = vadd.f32 %v3861_v19, %v3942_v9  ;;  %v3386_v9 = vld [vmem:[%s8918_s0 + $0x270] sm:$0xff] }
 0x1b1   :  { %v4187_v60 = vpop.f32.mrf.mxu3  ;;  %3301 = vmatmul.msk.bf16.gmra.mxu3 %vm624_vm2, %v3386_v9  ;;  %9403 = vst [vmem:[#allocation63_spill] sm:$0xff] %v4225_v56 }
 0x1b2   :  { %v1517_v39 = vadd.f32 %v1516_v20, %v8976_v61  ;;  %9400 = vst [vmem:[#allocation60_spill] sm:$0xff] %v4194_v10  ;;  %v3372_v20 = vld [vmem:[%s8918_s0 + $0x200] sm:$0xff]  ;;  %v8984_v61 = vmax.f32 %v4183_v33, 0.0  ;;  %v4218_v54 = vpop.f32.mrf.mxu1 }
 0x1b4   :  { %v1518_v23 = vadd.f32 %v1517_v39, %v8978_v57  ;;  %v8987_v57 = vmax.f32 %v4194_v10, 0.0 }
 0x1b6   :  { %v4100_v52 = vpop.f32.mrf.mxu0  ;;  %v1519_v14 = vadd.f32 %v1518_v23, %v8979_v36  ;;  %v4215_v23 = vadd.f32 %v3861_v19, %v4020_v0 }
 0x1b7   :  { %v4236_v49 = vadd.f32 %v3861_v19, %v4100_v52 }
 0x1b8   :  { %v1520_v39 = vadd.f32 %v1519_v14, %v8982_v18  ;;  %9402 = vst [vmem:[#allocation62_spill] sm:$0xff] %v4215_v23  ;;  %v4227_v14 = vpop.f32.mrf.mxu2  ;;  %v8991_v9 = vmax.f32 %v4215_v23, 0.0 }
 0x1b9   :  { %v4229_v18 = vpop.f32.mrf.mxu3  ;;  %9404 = vst [vmem:[#allocation64_spill] sm:$0xff] %v4236_v49  ;;  %v8993_v10 = vmax.f32 %v4236_v49, 0.0 }
 0x1ba   :  { %3287 = vmatmul.msk.bf16.gmra.mxu2 %vm624_vm2, %v3372_v20  ;;  %v1521_v20 = vadd.f32 %v1520_v39, %v8984_v61  ;;  %v8992_v61 = vmax.f32 %v4225_v56, 0.0 }
 0x1bc   :  { %v1522_v0 = vadd.f32 %v1521_v20, %v8987_v57 }
 0x1be   :  { %v993_v40 = vpop.f32.mrf.mxu0  ;;  %v1523_v39 = vadd.f32 %v1522_v0, %v8989_v15 }
 0x1bf   :  { %v4242_v63 = vadd.f32 %v3861_v19, %v993_v40  ;;  %v4258_v40 = vpop.f32.mrf.mxu1 }
 0x1c0   :  { %v1524_v33 = vadd.f32 %v1523_v39, %v8991_v9  ;;  %v4256_v15 = vpop.f32.mrf.mxu2 }
 0x1c1   :  { %9405 = vst [vmem:[#allocation65_spill] sm:$0xff] %v4242_v63  ;;  %v8996_v4 = vmax.f32 %v4242_v63, 0.0  ;;  %v4260_v23 = vpop.f32.mrf.mxu3  ;;  %v4284_v63 = vadd.f32 %v3861_v19, %v3549_v37 }
 0x1c2   :  { %v1525_v52 = vadd.f32 %v1524_v33, %v8992_v61  ;;  %v3373_v33 = vld [vmem:[%s8918_s0 + $0x208] sm:$0xff] }
 0x1c3   :  { %9409 = vst [vmem:[#allocation69_spill] sm:$0xff] %v4284_v63 }
 0x1c4   :  { %v1526_v39 = vadd.f32 %v1525_v52, %v8993_v10  ;;  %v3387_v52 = vld [vmem:[%s8918_s0 + $0x278] sm:$0xff] }
 0x1c5   :  { %3302 = vmatmul.msk.bf16.gmra.mxu3 %vm624_vm2, %v3387_v52 }
 0x1c6   :  { %v996_v7 = vpop.f32.mrf.mxu0 }
 0x1c7   :  { %v4248_v20 = vadd.f32 %v3861_v19, %v996_v7 }
 0x1c9   :  { %9406 = vst [vmem:[#allocation66_spill] sm:$0xff] %v4248_v20  ;;  %v8998_v7 = vmax.f32 %v4248_v20, 0.0  ;;  %v4293_v56 = vpop.f32.mrf.mxu3 }
 0x1ca   :  { %3288 = vmatmul.msk.bf16.gmra.mxu2 %vm624_vm2, %v3373_v33 }
 0x1ce   :  { %v998_v36 = vpop.f32.mrf.mxu0 }
 0x1cf   :  { %v4254_v0 = vadd.f32 %v3861_v19, %v998_v36  ;;  %v1527_v36 = vadd.f32 %v1526_v39, %v8996_v4  ;;  %v4291_v4 = vpop.f32.mrf.mxu2 }
 0x1d1   :  { %9407 = vst [vmem:[#allocation67_spill] sm:$0xff] %v4254_v0  ;;  %v8999_v61 = vmax.f32 %v4254_v0, 0.0  ;;  %v1528_v10 = vadd.f32 %v1527_v36, %v8998_v7  ;;  %v4297_v36 = vadd.f32 %v3861_v19, %v3562_v41  ;;  %v4302_v7 = vpop.f32.mrf.mxu1  ;;  %v4314_v41 = vadd.f32 %v3861_v19, %v3582_v48 }
 0x1d2   :  { %v4330_v48 = vadd.f32 %v3861_v19, %v3602_v55 }
 0x1d3   :  { %v1529_v39 = vadd.f32 %v1528_v10, %v8999_v61  ;;  %9411 = vst [vmem:[#allocation71_spill] sm:$0xff] %v4297_v36  ;;  %v9004_v10 = vmax.f32 %v4284_v63, 0.0  ;;  %v9006_v0 = vmax.f32 %v4297_v36, 0.0 }
 0x1d4   :  { %9413 = vst [vmem:[#allocation73_spill] sm:$0xff] %v4314_v41 }
 0x1d5   :  { %9415 = vst [vmem:[#allocation75_spill] sm:$0xff] %v4330_v48 }
 0x1d6   :  { %v1001_v57 = vpop.f32.mrf.mxu0 }
 0x1d7   :  { %v4266_v9 = vadd.f32 %v3861_v19, %v1001_v57 }
 0x1d9   :  { %9408 = vst [vmem:[#allocation68_spill] sm:$0xff] %v4266_v9  ;;  %v9001_v57 = vmax.f32 %v4266_v9, 0.0  ;;  %v4321_v9 = vadd.f32 %v3861_v19, %v3589_v51  ;;  %v4339_v51 = vadd.f32 %v3861_v19, %v3609_v58  ;;  %v4346_v55 = vpop.f32.mrf.mxu1 }
 0x1db   :  { %v1530_v52 = vadd.f32 %v1529_v39, %v9001_v57  ;;  %9414 = vst [vmem:[#allocation74_spill] sm:$0xff] %v4321_v9  ;;  %v9014_v58 = vmax.f32 %v4339_v51, 0.0 }
 0x1dc   :  { %9416 = vst [vmem:[#allocation76_spill] sm:$0xff] %v4339_v51 }
 0x1de   :  { %v1003_v49 = vpop.f32.mrf.mxu0 }
 0x1df   :  { %v4289_v33 = vadd.f32 %v3861_v19, %v1003_v49  ;;  %v4307_v49 = vadd.f32 %v3861_v19, %v3569_v44 }
 0x1e1   :  { %9410 = vst [vmem:[#allocation70_spill] sm:$0xff] %v4289_v33  ;;  %v9005_v37 = vmax.f32 %v4289_v33, 0.0  ;;  %v9008_v57 = vmax.f32 %v4307_v49, 0.0  ;;  %v4325_v33 = vpop.f32.mrf.mxu3 }
 0x1e2   :  { %9412 = vst [vmem:[#allocation72_spill] sm:$0xff] %v4307_v49  ;;  %v9012_v49 = vmax.f32 %v4330_v48, 0.0  ;;  %v9437_v48 = vld [vmem:[#allocation18_spill] sm:$0xff] }
 0x1e3   :  { %v1531_v61 = vadd.f32 %v1530_v52, %v9005_v37  ;;  %v9009_v52 = vmax.f32 %v4314_v41, 0.0  ;;  %v9013_v37 = vmax.f32 %v4321_v9, 0.0 }
 0x1e5   :  { %v1532_v39 = vadd.f32 %v1531_v61, %v9004_v10  ;;  %v4334_v10 = vpop.f32.mrf.mxu2 }
 0x1e7   :  { %v1533_v44 = vadd.f32 %v1532_v39, %v9006_v0  ;;  %v3388_v0 = vld [vmem:[%s8918_s0 + $0x280] sm:$0xff] }
 0x1e8   :  { %3303 = vmatmul.msk.bf16.gmra.mxu3 %vm624_vm2, %v3388_v0 }
 0x1e9   :  { %v1534_v61 = vadd.f32 %v1533_v44, %v9008_v57  ;;  %v4351_v44 = vadd.f32 %v3861_v19, %v3622_v62  ;;  %v4363_v41 = vpop.f32.mrf.mxu3  ;;  %v4368_v62 = vadd.f32 %v3861_v19, %v3642_v5  ;;  %v4384_v5 = vadd.f32 %v3861_v19, %v3666_v13 }
 0x1ea   :  { %v4402_v13 = vadd.f32 %v3861_v19, %v3694_v25  ;;  %v4419_v25 = vadd.f32 %v3861_v19, %v3722_v45 }
 0x1eb   :  { %v1535_v39 = vadd.f32 %v1534_v61, %v9009_v52  ;;  %9417 = vst [vmem:[#allocation77_spill] sm:$0xff] %v4351_v44  ;;  %v4359_v61 = vadd.f32 %v3861_v19, %v3629_v1  ;;  %v9016_v36 = vmax.f32 %v4351_v44, 0.0  ;;  %v4375_v1 = vadd.f32 %v3861_v19, %v3649_v8 }
 0x1ec   :  { %9419 = vst [vmem:[#allocation79_spill] sm:$0xff] %v4368_v62  ;;  %v4393_v8 = vadd.f32 %v3861_v19, %v3675_v17  ;;  %v9022_v44 = vmax.f32 %v4384_v5, 0.0  ;;  %v4409_v17 = vadd.f32 %v3861_v19, %v3703_v32 }
 0x1ed   :  { %v1536_v57 = vadd.f32 %v1535_v39, %v9013_v37  ;;  %9418 = vst [vmem:[#allocation78_spill] sm:$0xff] %v4359_v61  ;;  %v9018_v39 = vmax.f32 %v4359_v61, 0.0  ;;  %v9019_v37 = vmax.f32 %v4368_v62, 0.0  ;;  %v9021_v51 = vmax.f32 %v4375_v1, 0.0 }
 0x1ee   :  { %9420 = vst [vmem:[#allocation80_spill] sm:$0xff] %v4375_v1  ;;  %v9026_v62 = vmax.f32 %v4402_v13, 0.0 }
 0x1ef   :  { %v1537_v52 = vadd.f32 %v1536_v57, %v9012_v49  ;;  %v4379_v49 = vpop.f32.mrf.mxu2  ;;  %9421 = vst [vmem:[#allocation81_spill] sm:$0xff] %v4384_v5 }
 0x1f0   :  { %9422 = vst [vmem:[#allocation82_spill] sm:$0xff] %v4393_v8 }
 0x1f1   :  { %v1538_v0 = vadd.f32 %v1537_v52, %v9014_v58  ;;  %v4388_v58 = vpop.f32.mrf.mxu1  ;;  %9423 = vst [vmem:[#allocation83_spill] sm:$0xff] %v4402_v13  ;;  %v9429_v13 = vld [vmem:[#allocation10_spill] sm:$0xff] }
 0x1f2   :  { %9424 = vst [vmem:[#allocation84_spill] sm:$0xff] %v4409_v17  ;;  %v4454_v1 = vadd.f32 %v3861_v19, %v9429_v13  ;;  %v9433_v13 = vld [vmem:[#allocation14_spill] sm:$0xff] }
 0x1f3   :  { %v1539_v57 = vadd.f32 %v1538_v0, %v9016_v36  ;;  %v4397_v36 = vpop.f32.mrf.mxu3  ;;  %9425 = vst [vmem:[#allocation85_spill] sm:$0xff] %v4419_v25  ;;  %v4472_v61 = vadd.f32 %v3861_v19, %v9433_v13 }
 0x1f4   :  { %9430 = vst [vmem:[#allocation10_spill] sm:$0xff] %v4454_v1 }
 0x1f5   :  { %v1540_v52 = vadd.f32 %v1539_v57, %v9018_v39  ;;  %v9025_v39 = vmax.f32 %v4393_v8, 0.0  ;;  %v9032_v8 = vmax.f32 %v4419_v25, 0.0  ;;  %9434 = vst [vmem:[#allocation14_spill] sm:$0xff] %v4472_v61  ;;  %v9047_v13 = vmax.f32 %v4472_v61, 0.0 }
 0x1f7   :  { %v1541_v0 = vadd.f32 %v1540_v52, %v9019_v37  ;;  %v3389_v37 = vld [vmem:[%s8918_s0 + $0x288] sm:$0xff]  ;;  %v4424_v32 = vpop.f32.mrf.mxu2 }
 0x1f8   :  { %3304 = vmatmul.msk.bf16.gmra.mxu3 %vm624_vm2, %v3389_v37  ;;  %v4440_v37 = vadd.f32 %v3861_v19, %v3750_v3 }
 0x1f9   :  { %v1542_v57 = vadd.f32 %v1541_v0, %v9021_v51  ;;  %v9029_v51 = vmax.f32 %v4409_v17, 0.0  ;;  %v4433_v5 = vpop.f32.mrf.mxu1 }
 0x1fa   :  { %9427 = vst [vmem:[#allocation87_spill] sm:$0xff] %v4440_v37 }
 0x1fb   :  { %v1543_v52 = vadd.f32 %v1542_v57, %v9022_v44  ;;  %v4429_v57 = vadd.f32 %v3861_v19, %v3731_v53  ;;  %v4435_v45 = vpop.f32.mrf.mxu3  ;;  %v4447_v53 = vadd.f32 %v3861_v19, %v3759_v11 }
 0x1fd   :  { %v1544_v0 = vadd.f32 %v1543_v52, %v9025_v39  ;;  %9426 = vst [vmem:[#allocation86_spill] sm:$0xff] %v4429_v57  ;;  %v9034_v39 = vmax.f32 %v4429_v57, 0.0  ;;  %v9435_v57 = vld [vmem:[#allocation16_spill] sm:$0xff] }
 0x1fe   :  { %9428 = vst [vmem:[#allocation88_spill] sm:$0xff] %v4447_v53 }
 0x1ff   :  { %v1545_v44 = vadd.f32 %v1544_v0, %v9026_v62  ;;  %v9036_v62 = vmax.f32 %v4440_v37, 0.0  ;;  %v4465_v25 = vpop.f32.mrf.mxu2  ;;  %v3390_v37 = vld [vmem:[%s8918_s0 + $0x290] sm:$0xff] }
 0x201   :  { %v1546_v52 = vadd.f32 %v1545_v44, %v9029_v51  ;;  %v9039_v44 = vmax.f32 %v4447_v53, 0.0  ;;  %v9431_v51 = vld [vmem:[#allocation12_spill] sm:$0xff] }
 0x202   :  { %v4461_v17 = vadd.f32 %v3861_v19, %v9431_v51  ;;  %v9439_v53 = vld [vmem:[#allocation20_spill] sm:$0xff] }
 0x203   :  { %v1547_v0 = vadd.f32 %v1546_v52, %v9032_v8  ;;  %v4467_v52 = vpop.f32.mrf.mxu3  ;;  %v9041_v8 = vmax.f32 %v4454_v1, 0.0 }
 0x204   :  { %9432 = vst [vmem:[#allocation12_spill] sm:$0xff] %v4461_v17  ;;  %v9045_v51 = vmax.f32 %v4461_v17, 0.0 }
 0x205   :  { %v1548_v3 = vadd.f32 %v1547_v0, %v9034_v39  ;;  %v4476_v39 = vpop.f32.mrf.mxu1 }
 0x207   :  { %v1549_v11 = vadd.f32 %v1548_v3, %v9036_v62  ;;  %v4481_v3 = vadd.f32 %v3861_v19, %v9435_v57 }
 0x208   :  { %3305 = vmatmul.msk.bf16.gmra.mxu3 %vm624_vm2, %v3390_v37  ;;  %v4512_v37 = vpop.f32.mrf.mxu2 }
 0x209   :  { %v1550_v0 = vadd.f32 %v1549_v11, %v9039_v44  ;;  %9436 = vst [vmem:[#allocation16_spill] sm:$0xff] %v4481_v3  ;;  %v4491_v11 = vadd.f32 %v3861_v19, %v9437_v48  ;;  %v9049_v57 = vmax.f32 %v4481_v3, 0.0  ;;  %v9441_v48 = vld [vmem:[#allocation22_spill] sm:$0xff]  ;;  %v4531_v3 = vadd.f32 %v3861_v19, %v3976_v21 }
 0x20a   :  { %v4508_v63 = vadd.f32 %v3861_v19, %v9441_v48  ;;  %v4524_v48 = vadd.f32 %v3861_v19, %v3926_v29  ;;  %v4540_v29 = vadd.f32 %v3861_v19, %v4022_v46  ;;  %v4547_v21 = vadd.f32 %v3861_v19, %v4075_v35 }
 0x20b   :  { %v1551_v62 = vadd.f32 %v1550_v0, %v9041_v8  ;;  %9438 = vst [vmem:[#allocation18_spill] sm:$0xff] %v4491_v11  ;;  %v4499_v0 = vadd.f32 %v3861_v19, %v9439_v53  ;;  %v4503_v1 = vpop.f32.mrf.mxu3  ;;  %v9051_v9 = vmax.f32 %v4491_v11, 0.0  ;;  %v9443_v53 = vld [vmem:[#allocation26_spill] sm:$0xff] }
 0x20c   :  { %9442 = vst [vmem:[#allocation22_spill] sm:$0xff] %v4508_v63  ;;  %v4517_v17 = vadd.f32 %v3861_v19, %v9443_v53  ;;  %v9053_v61 = vmax.f32 %v4508_v63, 0.0  ;;  %v9061_v46 = vmax.f32 %v4540_v29, 0.0 }
 0x20d   :  { %v1552_v44 = vadd.f32 %v1551_v62, %v9045_v51  ;;  %9440 = vst [vmem:[#allocation20_spill] sm:$0xff] %v4499_v0  ;;  %v9052_v51 = vmax.f32 %v4499_v0, 0.0  ;;  %v9480_v0 = vld [vmem:[#allocation13_spill] sm:$0xff] }
 0x20e   :  { %9444 = vst [vmem:[#allocation26_spill] sm:$0xff] %v4517_v17 }
 0x20f   :  { %v1553_v8 = vadd.f32 %v1552_v44, %v9047_v13  ;;  %v1106_v13 = vpop.f32.mrf.mxu1  ;;  %9445 = vst [vmem:[#allocation89_spill] sm:$0xff] %v4524_v48 }
 0x210   :  { %9446 = vst [vmem:[#allocation90_spill] sm:$0xff] %v4531_v3  ;;  %v4554_v63 = vpop.f32.mrf.mxu2 }
 0x211   :  { %v1554_v62 = vadd.f32 %v1553_v8, %v9049_v57  ;;  %v9055_v57 = vmax.f32 %v4517_v17, 0.0  ;;  %9447 = vst [vmem:[#allocation91_spill] sm:$0xff] %v4540_v29  ;;  %v9476_v29 = vld [vmem:[#allocation9_spill] sm:$0xff] }
 0x212   :  { %9448 = vst [vmem:[#allocation92_spill] sm:$0xff] %v4547_v21 }
 0x213   :  { %v1555_v44 = vadd.f32 %v1554_v62, %v9051_v9  ;;  %v4535_v62 = vpop.f32.mrf.mxu3  ;;  %v9056_v9 = vmax.f32 %v4524_v48, 0.0 }
 0x215   :  { %v1556_v8 = vadd.f32 %v1555_v44, %v9052_v51  ;;  %v9060_v51 = vmax.f32 %v4531_v3, 0.0  ;;  %v4576_v3 = vadd.f32 %v3861_v19, %v4218_v54  ;;  %v4592_v54 = vadd.f32 %v3861_v19, %v4302_v7 }
 0x217   :  { %v1557_v53 = vadd.f32 %v1556_v8, %v9053_v61  ;;  %v3391_v61 = vld [vmem:[%s8918_s0 + $0x298] sm:$0xff]  ;;  %v1108_v35 = vpop.f32.mrf.mxu1  ;;  %9451 = vst [vmem:[#allocation95_spill] sm:$0xff] %v4576_v3 }
 0x218   :  { %3306 = vmatmul.msk.bf16.gmra.mxu3 %vm624_vm2, %v3391_v61  ;;  %9453 = vst [vmem:[#allocation97_spill] sm:$0xff] %v4592_v54 }
 0x219   :  { %v1558_v44 = vadd.f32 %v1557_v53, %v9055_v57  ;;  %v4559_v53 = vadd.f32 %v3861_v19, %v4123_v42 }
 0x21b   :  { %v1559_v8 = vadd.f32 %v1558_v44, %v9056_v9  ;;  %9449 = vst [vmem:[#allocation93_spill] sm:$0xff] %v4559_v53  ;;  %v9064_v44 = vmax.f32 %v4547_v21, 0.0  ;;  %v4567_v9 = vadd.f32 %v3861_v19, %v4169_v2  ;;  %v4571_v17 = vpop.f32.mrf.mxu3  ;;  %v9063_v42 = vmax.f32 %v4559_v53, 0.0  ;;  %v4594_v21 = vpop.f32.mrf.mxu2 }
 0x21d   :  { %v1560_v57 = vadd.f32 %v1559_v8, %v9060_v51  ;;  %9450 = vst [vmem:[#allocation94_spill] sm:$0xff] %v4567_v9  ;;  %v9065_v8 = vmax.f32 %v4567_v9, 0.0  ;;  %v4585_v51 = vadd.f32 %v3861_v19, %v4258_v40  ;;  %v4601_v40 = vadd.f32 %v3861_v19, %v4346_v55 }
 0x21e   :  { %v4620_v9 = vadd.f32 %v3861_v19, %v4433_v5  ;;  %v4634_v5 = vadd.f32 %v3861_v19, %v1106_v13 }
 0x21f   :  { %v1561_v48 = vadd.f32 %v1560_v57, %v9061_v46  ;;  %9452 = vst [vmem:[#allocation96_spill] sm:$0xff] %v4585_v51  ;;  %v9066_v57 = vmax.f32 %v4576_v3, 0.0  ;;  %v9072_v3 = vmax.f32 %v4601_v40, 0.0 }
 0x220   :  { %9454 = vst [vmem:[#allocation98_spill] sm:$0xff] %v4601_v40  ;;  %v9466_v40 = vld [vmem:[#allocation4_spill] sm:$0xff] }
 0x221   :  { %v1562_v61 = vadd.f32 %v1561_v48, %v9064_v44  ;;  %9456 = vst [vmem:[#allocation100_spill] sm:$0xff] %v4620_v9 }
 0x222   :  { %9458 = vst [vmem:[#allocation102_spill] sm:$0xff] %v4634_v5 }
 0x223   :  { %v1563_v2 = vadd.f32 %v1562_v61, %v9063_v42  ;;  %v9070_v61 = vmax.f32 %v4585_v51, 0.0  ;;  %v1111_v42 = vpop.f32.mrf.mxu1  ;;  %v4603_v44 = vpop.f32.mrf.mxu3 }
 0x224   :  { %v4650_v13 = vadd.f32 %v3861_v19, %v1111_v42  ;;  %v9464_v42 = vld [vmem:[#allocation3_spill] sm:$0xff] }
 0x225   :  { %v1564_v46 = vadd.f32 %v1563_v2, %v9065_v8  ;;  %v189_v2 = vld [vmem:[%s8918_s0 + $0x2a0] sm:$0xf]  ;;  %v9071_v8 = vmax.f32 %v4592_v54, 0.0 }
 0x226   :  { %9460 = vst [vmem:[#allocation104_spill] sm:$0xff] %v4650_v13 }
 0x227   :  { %v1565_v48 = vadd.f32 %v1564_v46, %v9066_v57  ;;  %v4613_v46 = vadd.f32 %v3861_v19, %v4388_v58  ;;  %v533_v57 = vunpack.c.l.b16 %v189_v2  ;;  %v4627_v58 = vadd.f32 %v3861_v19, %v4476_v39 }
 0x229   :  { %v1566_v7 = vadd.f32 %v1565_v48, %v9070_v61  ;;  %9455 = vst [vmem:[#allocation99_spill] sm:$0xff] %v4613_v46  ;;  %v618_v53 = vpack.c.b16 %v533_v57, %v533_v57  ;;  %v9073_v61 = vmax.f32 %v4613_v46, 0.0  ;;  %v4636_v57 = vpop.f32.mrf.mxu2  ;;  %v9077_v39 = vmax.f32 %v4627_v58, 0.0 }
 0x22a   :  { %9457 = vst [vmem:[#allocation101_spill] sm:$0xff] %v4627_v58 }
 0x22b   :  { %v1567_v55 = vadd.f32 %v1566_v7, %v9071_v8  ;;  %3307 = vmatmul.msk.bf16.gmra.mxu3 %vm624_vm2, %v618_v53  ;;  %v9076_v7 = vmax.f32 %v4620_v9, 0.0  ;;  %v4638_v8 = vpop.f32.mrf.mxu3  ;;  %v1113_v53 = vpop.f32.mrf.mxu1 }
 0x22d   :  { %v1568_v48 = vadd.f32 %v1567_v55, %v9072_v3  ;;  %v4644_v3 = vadd.f32 %v3861_v19, %v1108_v35 }
 0x22f   :  { %v1569_v2 = vadd.f32 %v1568_v48, %v9073_v61  ;;  %9459 = vst [vmem:[#allocation103_spill] sm:$0xff] %v4644_v3  ;;  %v9080_v61 = vmax.f32 %v4634_v5, 0.0  ;;  %v9082_v9 = vmax.f32 %v4644_v3, 0.0  ;;  %v4669_v5 = vadd.f32 %v3861_v19, %v9464_v42  ;;  %v9468_v42 = vld [vmem:[#allocation5_spill] sm:$0xff] }
 0x230   :  { %v4686_v54 = vadd.f32 %v3861_v19, %v9468_v42 }
 0x231   :  { %v1570_v55 = vadd.f32 %v1569_v2, %v9076_v7  ;;  %v4656_v2 = vadd.f32 %v3861_v19, %v1113_v53  ;;  %v9462_v7 = vld [vmem:[#allocation2_spill] sm:$0xff]  ;;  %9465 = vst [vmem:[#allocation3_spill] sm:$0xff] %v4669_v5  ;;  %v9092_v3 = vmax.f32 %v4669_v5, 0.0 }
 0x232   :  { %v4660_v35 = vadd.f32 %v3861_v19, %v9462_v7  ;;  %9469 = vst [vmem:[#allocation5_spill] sm:$0xff] %v4686_v54 }
 0x233   :  { %v1571_v48 = vadd.f32 %v1570_v55, %v9077_v39  ;;  %9461 = vst [vmem:[#allocation105_spill] sm:$0xff] %v4656_v2  ;;  %v9085_v39 = vmax.f32 %v4650_v13, 0.0  ;;  %v4665_v58 = vpop.f32.mrf.mxu3  ;;  %v9089_v53 = vmax.f32 %v4656_v2, 0.0  ;;  %v9470_v13 = vld [vmem:[#allocation6_spill] sm:$0xff] }
 0x234   :  { %9463 = vst [vmem:[#allocation2_spill] sm:$0xff] %v4660_v35  ;;  %v9090_v7 = vmax.f32 %v4660_v35, 0.0  ;;  %v4693_v51 = vadd.f32 %v3861_v19, %v9470_v13  ;;  %v9474_v35 = vld [vmem:[#allocation8_spill] sm:$0xff] }
 0x235   :  { %v1572_v46 = vadd.f32 %v1571_v48, %v9080_v61  ;;  %v4674_v61 = vpop.f32.mrf.mxu2  ;;  %v4709_v13 = vadd.f32 %v3861_v19, %v9474_v35 }
 0x236   :  { %9471 = vst [vmem:[#allocation6_spill] sm:$0xff] %v4693_v51 }
 0x237   :  { %v1573_v55 = vadd.f32 %v1572_v46, %v9082_v9  ;;  %v4679_v46 = vadd.f32 %v3861_v19, %v9466_v40  ;;  %9475 = vst [vmem:[#allocation8_spill] sm:$0xff] %v4709_v13 }
 0x239   :  { %v1574_v48 = vadd.f32 %v1573_v55, %v9085_v39  ;;  %9467 = vst [vmem:[#allocation4_spill] sm:$0xff] %v4679_v46  ;;  %v9095_v39 = vmax.f32 %v4679_v46, 0.0  ;;  %v9478_v46 = vld [vmem:[#allocation11_spill] sm:$0xff] }
 0x23a   :  { %v4725_v35 = vadd.f32 %v3861_v19, %v9478_v46 }
 0x23b   :  { %v1575_v9 = vadd.f32 %v1574_v48, %v9089_v53  ;;  %v4697_v2 = vpop.f32.mrf.mxu3  ;;  %v9097_v48 = vmax.f32 %v4686_v54, 0.0  ;;  %v9472_v53 = vld [vmem:[#allocation7_spill] sm:$0xff] }
 0x23c   :  { %v4702_v42 = vadd.f32 %v3861_v19, %v9472_v53  ;;  %v4718_v53 = vadd.f32 %v3861_v19, %v9476_v29  ;;  %9479 = vst [vmem:[#allocation11_spill] sm:$0xff] %v4725_v35  ;;  %v4734_v29 = vadd.f32 %v3861_v19, %v9480_v0 }
 0x23d   :  { %v1576_v55 = vadd.f32 %v1575_v9, %v9090_v7  ;;  %v9100_v7 = vmax.f32 %v4693_v51, 0.0  ;;  %v9482_v51 = vld [vmem:[#allocation15_spill] sm:$0xff] }
 0x23e   :  { %9473 = vst [vmem:[#allocation7_spill] sm:$0xff] %v4702_v42  ;;  %v9102_v5 = vmax.f32 %v4702_v42, 0.0  ;;  %v9107_v54 = vmax.f32 %v4718_v53, 0.0  ;;  %v4741_v46 = vadd.f32 %v3861_v19, %v9482_v51  ;;  %v9483_v42 = vld [vmem:[#allocation17_spill] sm:$0xff] }
 0x23f   :  { %v1577_v40 = vadd.f32 %v1576_v55, %v9092_v3  ;;  %v4713_v3 = vpop.f32.mrf.mxu2  ;;  %9477 = vst [vmem:[#allocation9_spill] sm:$0xff] %v4718_v53  ;;  %v4748_v11 = vadd.f32 %v3861_v19, %v9483_v42  ;;  %v9486_v42 = vld [vmem:[#allocation21_spill] sm:$0xff] }
 0x240   :  { %9481 = vst [vmem:[#allocation13_spill] sm:$0xff] %v4734_v29  ;;  %v4766_v20 = vadd.f32 %v3861_v19, %v9486_v42 }
 0x241   :  { %v1578_v9 = vadd.f32 %v1577_v40, %v9095_v39  ;;  %v9106_v39 = vmax.f32 %v4709_v13, 0.0  ;;  %9484 = vst [vmem:[#allocation15_spill] sm:$0xff] %v4748_v11  ;;  %v9117_v53 = vmax.f32 %v4748_v11, 0.0 }
 0x242   :  { %9487 = vst [vmem:[#allocation17_spill] sm:$0xff] %v4766_v20 }
 0x243   :  { %v1579_v55 = vadd.f32 %v1578_v9, %v9097_v48  ;;  %v4729_v48 = vpop.f32.mrf.mxu3 }
 0x245   :  { %v1580_v40 = vadd.f32 %v1579_v55, %v9100_v7  ;;  %v9110_v7 = vmax.f32 %v4725_v35, 0.0  ;;  %v9488_v35 = vld [vmem:[#allocation23_spill] sm:$0xff] }
 0x247   :  { %v1581_v9 = vadd.f32 %v1580_v40, %v9102_v5  ;;  %v9112_v5 = vmax.f32 %v4734_v29, 0.0  ;;  %v4752_v13 = vpop.f32.mrf.mxu2  ;;  %v9489_v29 = vld [vmem:[#allocation25_spill] sm:$0xff] }
 0x248   :  { %v4780_v22 = vadd.f32 %v3861_v19, %v9489_v29  ;;  %v4798_v29 = vadd.f32 %v3861_v19, %v3951_v38 }
 0x249   :  { %v1582_v55 = vadd.f32 %v1581_v9, %v9106_v39  ;;  %v9115_v9 = vmax.f32 %v4741_v46, 0.0  ;;  %v9485_v39 = vld [vmem:[#allocation19_spill] sm:$0xff] }
 0x24a   :  { %v4757_v51 = vadd.f32 %v3861_v19, %v9485_v39  ;;  %v4773_v39 = vadd.f32 %v3861_v19, %v9488_v35  ;;  %9490 = vst [vmem:[#allocation19_spill] sm:$0xff] %v4780_v22 }
 0x24b   :  { %v1583_v40 = vadd.f32 %v1582_v55, %v9107_v54  ;;  %v4761_v54 = vpop.f32.mrf.mxu3  ;;  %9491 = vst [vmem:[#allocation21_spill] sm:$0xff] %v4798_v29 }
 0x24d   :  { %v1584_v0 = vadd.f32 %v1583_v40, %v9110_v7  ;;  %v9118_v7 = vmax.f32 %v4757_v51, 0.0 }
 0x24f   :  { %v1585_v55 = vadd.f32 %v1584_v0, %v9112_v5  ;;  %v9119_v5 = vmax.f32 %v4766_v20, 0.0  ;;  %v4791_v11 = vpop.f32.mrf.mxu2  ;;  %v4812_v20 = vadd.f32 %v3861_v19, %v4031_v31  ;;  %v4828_v31 = vadd.f32 %v3861_v19, %v4109_v27 }
 0x251   :  { %v1586_v40 = vadd.f32 %v1585_v55, %v9115_v9  ;;  %v9121_v55 = vmax.f32 %v4773_v39, 0.0  ;;  %v4787_v9 = vadd.f32 %v3861_v19, %v3915_v6  ;;  %v4805_v6 = vadd.f32 %v3861_v19, %v3995_v47  ;;  %9492 = vst [vmem:[#allocation23_spill] sm:$0xff] %v4812_v20 }
 0x252   :  { %9493 = vst [vmem:[#allocation25_spill] sm:$0xff] %v4828_v31 }
 0x253   :  { %v1587_v0 = vadd.f32 %v1586_v40, %v9117_v53  ;;  %v4793_v40 = vpop.f32.mrf.mxu3  ;;  %v9124_v53 = vmax.f32 %v4780_v22, 0.0 }
 0x255   :  { %v1588_v42 = vadd.f32 %v1587_v0, %v9118_v7  ;;  %v9123_v7 = vmax.f32 %v4787_v9, 0.0 }
 0x257   :  { %v1589_v35 = vadd.f32 %v1588_v42, %v9119_v5  ;;  %v9125_v5 = vmax.f32 %v4798_v29, 0.0  ;;  %v4842_v29 = vadd.f32 %v3861_v19, %v4185_v16  ;;  %v4858_v16 = vadd.f32 %v3861_v19, %v4256_v15 }
 0x259   :  { %v1590_v0 = vadd.f32 %v1589_v35, %v9121_v55  ;;  %v9127_v35 = vmax.f32 %v4805_v6, 0.0  ;;  %v4819_v55 = vadd.f32 %v3861_v19, %v4073_v12  ;;  %v4835_v12 = vadd.f32 %v3861_v19, %v4151_v30  ;;  %9494 = vst [vmem:[#allocation106_spill] sm:$0xff] %v4858_v16 }
 0x25b   :  { %v1591_v42 = vadd.f32 %v1590_v0, %v9124_v53  ;;  %v4823_v22 = vpop.f32.mrf.mxu3  ;;  %v9131_v0 = vmax.f32 %v4812_v20, 0.0  ;;  %v9129_v53 = vmax.f32 %v4819_v55, 0.0 }
 0x25d   :  { %v1592_v38 = vadd.f32 %v1591_v42, %v9123_v7  ;;  %v1213_v7 = vpop.f32.mrf.mxu2 }
 0x25f   :  { %v1593_v47 = vadd.f32 %v1592_v38, %v9125_v5  ;;  %v9130_v5 = vmax.f32 %v4828_v31, 0.0  ;;  %v4872_v31 = vadd.f32 %v3861_v19, %v4334_v10  ;;  %v4888_v10 = vadd.f32 %v3861_v19, %v4424_v32 }
 0x261   :  { %v1594_v42 = vadd.f32 %v1593_v47, %v9127_v35  ;;  %v9133_v47 = vmax.f32 %v4835_v12, 0.0  ;;  %v4849_v35 = vadd.f32 %v3861_v19, %v4227_v14  ;;  %v4865_v14 = vadd.f32 %v3861_v19, %v4291_v4  ;;  %9496 = vst [vmem:[#allocation108_spill] sm:$0xff] %v4888_v10 }
 0x263   :  { %v1595_v38 = vadd.f32 %v1594_v42, %v9131_v0  ;;  %v4853_v20 = vpop.f32.mrf.mxu3  ;;  %v9134_v42 = vmax.f32 %v4842_v29, 0.0  ;;  %9495 = vst [vmem:[#allocation107_spill] sm:$0xff] %v4865_v14  ;;  %v9136_v0 = vmax.f32 %v4858_v16, 0.0  ;;  %v4902_v16 = vadd.f32 %v3861_v19, %v4512_v37 }
 0x265   :  { %v1596_v27 = vadd.f32 %v1595_v38, %v9129_v53  ;;  %v9135_v53 = vmax.f32 %v4849_v35, 0.0 }
 0x267   :  { %v1597_v30 = vadd.f32 %v1596_v27, %v9130_v5  ;;  %v1216_v5 = vpop.f32.mrf.mxu2 }
 0x269   :  { %v1598_v38 = vadd.f32 %v1597_v30, %v9133_v47  ;;  %v9139_v30 = vmax.f32 %v4865_v14, 0.0  ;;  %v4879_v47 = vadd.f32 %v3861_v19, %v4379_v49  ;;  %v4895_v49 = vadd.f32 %v3861_v19, %v4465_v25 }
 0x26b   :  { %v1599_v27 = vadd.f32 %v1598_v38, %v9134_v42  ;;  %v4883_v38 = vpop.f32.mrf.mxu3  ;;  %v9140_v42 = vmax.f32 %v4872_v31, 0.0 }
 0x26d   :  { %v1600_v15 = vadd.f32 %v1599_v27, %v9135_v53  ;;  %v9141_v53 = vmax.f32 %v4879_v47, 0.0 }
 0x26f   :  { %v1601_v4 = vadd.f32 %v1600_v15, %v9136_v0  ;;  %v9143_v0 = vmax.f32 %v4888_v10, 0.0  ;;  %v1218_v14 = vpop.f32.mrf.mxu2  ;;  %v4927_v10 = vadd.f32 %v3861_v19, %v4636_v57 }
 0x271   :  { %v1602_v27 = vadd.f32 %v1601_v4, %v9139_v30  ;;  %v9144_v4 = vmax.f32 %v4895_v49, 0.0  ;;  %v4909_v30 = vadd.f32 %v3861_v19, %v4554_v63 }
 0x273   :  { %v1603_v15 = vadd.f32 %v1602_v27, %v9140_v42  ;;  %v4913_v27 = vpop.f32.mrf.mxu3  ;;  %v9145_v42 = vmax.f32 %v4902_v16, 0.0 }
 0x275   :  { %v1604_v32 = vadd.f32 %v1603_v15, %v9141_v53  ;;  %v4920_v15 = vadd.f32 %v3861_v19, %v4594_v21  ;;  %v9146_v53 = vmax.f32 %v4909_v30, 0.0 }
 0x277   :  { %v1605_v25 = vadd.f32 %v1604_v32, %v9143_v0  ;;  %9497 = vst [vmem:[#allocation109_spill] sm:$0xff] %v4920_v15  ;;  %v9147_v0 = vmax.f32 %v4920_v15, 0.0  ;;  %v1221_v57 = vpop.f32.mrf.mxu2 }
 0x279   :  { %v1606_v37 = vadd.f32 %v1605_v25, %v9144_v4  ;;  %v4934_v25 = vadd.f32 %v3861_v19, %v4674_v61  ;;  %v9149_v4 = vmax.f32 %v4927_v10, 0.0  ;;  %v4950_v61 = vadd.f32 %v3861_v19, %v4752_v13 }
 0x27b   :  { %v1607_v63 = vadd.f32 %v1606_v37, %v9145_v42  ;;  %9498 = vst [vmem:[#allocation110_spill] sm:$0xff] %v4934_v25  ;;  %v4941_v37 = vadd.f32 %v3861_v19, %v4713_v3  ;;  %v4943_v42 = vpop.f32.mrf.mxu3  ;;  %v4957_v3 = vadd.f32 %v3861_v19, %v4791_v11 }
 0x27c   :  { %9499 = vst [vmem:[#allocation111_spill] sm:$0xff] %v4950_v61 }
 0x27d   :  { %v1608_v32 = vadd.f32 %v1607_v63, %v9146_v53  ;;  %v9151_v53 = vmax.f32 %v4934_v25, 0.0  ;;  %9500 = vst [vmem:[#allocation112_spill] sm:$0xff] %v4957_v3  ;;  %v9157_v25 = vmax.f32 %v4957_v3, 0.0 }
 0x27f   :  { %v1609_v21 = vadd.f32 %v1608_v32, %v9147_v0  ;;  %v9153_v0 = vmax.f32 %v4941_v37, 0.0 }
 0x281   :  { %v1610_v63 = vadd.f32 %v1609_v21, %v9149_v4  ;;  %v9152_v21 = vmax.f32 %v4950_v61, 0.0  ;;  %v4963_v4 = vadd.f32 %v3861_v19, %v1213_v7 }
 0x283   :  { %v1611_v32 = vadd.f32 %v1610_v63, %v9151_v53  ;;  %v4971_v63 = vld [vmem:[%s8917_s2] ss:$0 sm:$0xff]  ;;  %v4976_v53 = vpop.f32.mrf.mxu3  ;;  %v9156_v19 = vmax.f32 %v4963_v4, 0.0 }
 0x284   :  { %v4974_v11 = vadd.f32 %v4971_v63, %v1216_v5  ;;  %v4982_v7 = vadd.f32 %v4971_v63, %v1218_v14  ;;  %v4988_v61 = vadd.f32 %v4971_v63, %v1221_v57  ;;  %v4998_v14 = vadd.f32 %v4971_v63, %v3917_v59 }
 0x285   :  { %v1612_v15 = vadd.f32 %v1611_v32, %v9153_v0  ;;  %v5007_v57 = vadd.f32 %v4971_v63, %v3953_v26  ;;  %v5015_v59 = vadd.f32 %v4971_v63, %v3997_v43  ;;  %v5022_v26 = vadd.f32 %v4971_v63, %v4033_v50 }
 0x286   :  { %v9158_v0 = vmax.f32 %v4974_v11, 0.0  ;;  %9501 = vst [vmem:[#allocation113_spill] sm:$0xff] %v4988_v61  ;;  %v9159_v3 = vmax.f32 %v4982_v7, 0.0  ;;  %v5038_v50 = vadd.f32 %v4971_v63, %v4111_v34 }
 0x287   :  { %v1613_v13 = vadd.f32 %v1612_v15, %v9152_v21  ;;  %v1223_v15 = vpop.f32.mrf.mxu2  ;;  %9503 = vst [vmem:[#allocation115_spill] sm:$0xff] %v5022_v26 }
 0x289   :  { %v1614_v32 = vadd.f32 %v1613_v13, %v9157_v25  ;;  %v4994_v13 = vadd.f32 %v4971_v63, %v1223_v15 }
 0x28b   :  { %v1615_v21 = vadd.f32 %v1614_v32, %v9156_v19  ;;  %9502 = vst [vmem:[#allocation114_spill] sm:$0xff] %v4994_v13  ;;  %v9160_v19 = vmax.f32 %v4988_v61, 0.0  ;;  %v5003_v25 = vpop.f32.mrf.mxu3  ;;  %v9165_v15 = vmax.f32 %v4994_v13, 0.0  ;;  %v5029_v61 = vadd.f32 %v4971_v63, %v4077_v24 }
 0x28c   :  { %v5045_v24 = vadd.f32 %v4971_v63, %v4153_v28 }
 0x28d   :  { %v1616_v5 = vadd.f32 %v1615_v21, %v9158_v0  ;;  %v9163_v0 = vmax.f32 %v4998_v14, 0.0 }
 0x28f   :  { %v1617_v32 = vadd.f32 %v1616_v5, %v9159_v3  ;;  %v9164_v3 = vmax.f32 %v5007_v57, 0.0 }
 0x291   :  { %v1618_v21 = vadd.f32 %v1617_v32, %v9160_v19  ;;  %v9166_v19 = vmax.f32 %v5015_v59, 0.0 }
 0x293   :  { %v1619_v5 = vadd.f32 %v1618_v21, %v9165_v15  ;;  %v5033_v13 = vpop.f32.mrf.mxu3  ;;  %v9170_v21 = vmax.f32 %v5022_v26, 0.0  ;;  %v5052_v15 = vadd.f32 %v4971_v63, %v4187_v60  ;;  %v5068_v60 = vadd.f32 %v4971_v63, %v4260_v23 }
 0x295   :  { %v1620_v32 = vadd.f32 %v1619_v5, %v9163_v0  ;;  %v9168_v0 = vmax.f32 %v5029_v61, 0.0  ;;  %9504 = vst [vmem:[#allocation116_spill] sm:$0xff] %v5052_v15 }
 0x297   :  { %v1621_v43 = vadd.f32 %v1620_v32, %v9164_v3  ;;  %v9169_v3 = vmax.f32 %v5038_v50, 0.0 }
 0x299   :  { %v1622_v5 = vadd.f32 %v1621_v43, %v9166_v19  ;;  %v9171_v43 = vmax.f32 %v5045_v24, 0.0  ;;  %v5059_v19 = vadd.f32 %v4971_v63, %v4229_v18  ;;  %v5075_v18 = vadd.f32 %v4971_v63, %v4293_v56 }
 0x29b   :  { %v1623_v32 = vadd.f32 %v1622_v5, %v9170_v21  ;;  %v5063_v26 = vpop.f32.mrf.mxu3  ;;  %v9175_v5 = vmax.f32 %v5052_v15, 0.0  ;;  %v5082_v21 = vadd.f32 %v4971_v63, %v4325_v33  ;;  %v5098_v33 = vadd.f32 %v4971_v63, %v4397_v36 }
 0x29d   :  { %v1624_v34 = vadd.f32 %v1623_v32, %v9168_v0  ;;  %v9173_v0 = vmax.f32 %v5059_v19, 0.0 }
 0x29f   :  { %v1625_v28 = vadd.f32 %v1624_v34, %v9169_v3  ;;  %v9174_v3 = vmax.f32 %v5068_v60, 0.0 }
 0x2a1   :  { %v1626_v32 = vadd.f32 %v1625_v28, %v9171_v43  ;;  %v9176_v28 = vmax.f32 %v5075_v18, 0.0  ;;  %v5089_v43 = vadd.f32 %v4971_v63, %v4363_v41  ;;  %v5105_v41 = vadd.f32 %v4971_v63, %v4435_v45 }
 0x2a3   :  { %v1627_v34 = vadd.f32 %v1626_v32, %v9175_v5  ;;  %9505 = vst [vmem:[#allocation117_spill] sm:$0xff] %v5089_v43  ;;  %v5093_v15 = vpop.f32.mrf.mxu3  ;;  %v9177_v32 = vmax.f32 %v5082_v21, 0.0  ;;  %v5112_v5 = vadd.f32 %v4971_v63, %v4467_v52 }
 0x2a5   :  { %v1628_v23 = vadd.f32 %v1627_v34, %v9173_v0  ;;  %v9179_v0 = vmax.f32 %v5089_v43, 0.0 }
 0x2a7   :  { %v1629_v56 = vadd.f32 %v1628_v23, %v9174_v3  ;;  %v9180_v3 = vmax.f32 %v5098_v33, 0.0 }
 0x2a9   :  { %v1630_v34 = vadd.f32 %v1629_v56, %v9176_v28  ;;  %v9181_v56 = vmax.f32 %v5105_v41, 0.0  ;;  %v5119_v28 = vadd.f32 %v4971_v63, %v4503_v1 }
 0x2ab   :  { %v1631_v23 = vadd.f32 %v1630_v34, %v9177_v32  ;;  %9506 = vst [vmem:[#allocation118_spill] sm:$0xff] %v5119_v28  ;;  %v9182_v34 = vmax.f32 %v5112_v5, 0.0  ;;  %v5126_v32 = vadd.f32 %v4971_v63, %v4535_v62 }
 0x2ad   :  { %v1632_v36 = vadd.f32 %v1631_v23, %v9179_v0  ;;  %v9184_v23 = vmax.f32 %v5119_v28, 0.0  ;;  %v5133_v0 = vadd.f32 %v4971_v63, %v4571_v17 }
 0x2ae   :  { %v1316_v43 = vpop.f32.mrf.mxu3 }
 0x2af   :  { %v1633_v45 = vadd.f32 %v1632_v36, %v9180_v3  ;;  %v9185_v36 = vmax.f32 %v5126_v32, 0.0  ;;  %v5140_v3 = vadd.f32 %v4971_v63, %v4603_v44 }
 0x2b1   :  { %v1634_v52 = vadd.f32 %v1633_v45, %v9181_v56  ;;  %v9198_v45 = vmax.f32 %v5133_v0, 0.0  ;;  %v5147_v56 = vadd.f32 %v4971_v63, %v4638_v8 }
 0x2b3   :  { %v1635_v1 = vadd.f32 %v1634_v52, %v9182_v34  ;;  %v9186_v52 = vmax.f32 %v5140_v3, 0.0  ;;  %v5154_v34 = vadd.f32 %v4971_v63, %v4665_v58 }
 0x2b5   :  { %v1636_v62 = vadd.f32 %v1635_v1, %v9184_v23  ;;  %v9187_v1 = vmax.f32 %v5147_v56, 0.0  ;;  %v5161_v23 = vadd.f32 %v4971_v63, %v4697_v2 }
 0x2b6   :  { %v1318_v28 = vpop.f32.mrf.mxu3 }
 0x2b7   :  { %v1637_v17 = vadd.f32 %v1636_v62, %v9185_v36  ;;  %v9188_v62 = vmax.f32 %v5154_v34, 0.0  ;;  %v5168_v36 = vadd.f32 %v4971_v63, %v4729_v48  ;;  %v9189_v28 = vmax.f32 %v5161_v23, 0.0 }
 0x2b9   :  { %v1638_v44 = vadd.f32 %v1637_v17, %v9198_v45  ;;  %v5175_v17 = vadd.f32 %v4971_v63, %v4761_v54 }
 0x2bb   :  { %v1639_v8 = vadd.f32 %v1638_v44, %v9186_v52  ;;  %9507 = vst [vmem:[#allocation119_spill] sm:$0xff] %v5175_v17  ;;  %v9190_v44 = vmax.f32 %v5168_v36, 0.0  ;;  %v5182_v52 = vadd.f32 %v4971_v63, %v4793_v40 }
 0x2bd   :  { %v1640_v58 = vadd.f32 %v1639_v8, %v9187_v1  ;;  %9508 = vst [vmem:[#allocation120_spill] sm:$0xff] %v5182_v52  ;;  %v9191_v8 = vmax.f32 %v5175_v17, 0.0  ;;  %v5189_v1 = vadd.f32 %v4971_v63, %v4823_v22  ;;  %v5205_v22 = vadd.f32 %v4971_v63, %v4883_v38 }
 0x2bf   :  { %v1641_v2 = vadd.f32 %v1640_v58, %v9188_v62  ;;  %9509 = vst [vmem:[#allocation121_spill] sm:$0xff] %v5189_v1  ;;  %v9192_v58 = vmax.f32 %v5182_v52, 0.0  ;;  %v5196_v62 = vadd.f32 %v4971_v63, %v4853_v20  ;;  %v5212_v20 = vadd.f32 %v4971_v63, %v4913_v27 }
 0x2c0   :  { %9511 = vst [vmem:[#allocation123_spill] sm:$0xff] %v5205_v22 }
 0x2c1   :  { %v1642_v48 = vadd.f32 %v1641_v2, %v9189_v28  ;;  %9510 = vst [vmem:[#allocation122_spill] sm:$0xff] %v5196_v62  ;;  %v9195_v2 = vmax.f32 %v5189_v1, 0.0 }
 0x2c2   :  { %9512 = vst [vmem:[#allocation124_spill] sm:$0xff] %v5212_v20 }
 0x2c3   :  { %v1643_v54 = vadd.f32 %v1642_v48, %v9190_v44  ;;  %v9193_v48 = vmax.f32 %v5196_v62, 0.0 }
 0x2c5   :  { %v1644_v40 = vadd.f32 %v1643_v54, %v9191_v8  ;;  %v9194_v8 = vmax.f32 %v5205_v22, 0.0  ;;  %v3407_v22 = vmov 1352.0  }
 0x2c6   :  { %3401 = vrcp.f32 %v3407_v22 }
 0x2c7   :  { %v1645_v28 = vadd.f32 %v1644_v40, %v9192_v58  ;;  %v5219_v40 = vadd.f32 %v4971_v63, %v4943_v42  ;;  %v9196_v58 = vmax.f32 %v5212_v20, 0.0 }
 0x2c9   :  { %v1646_v44 = vadd.f32 %v1645_v28, %v9195_v2  ;;  %9513 = vst [vmem:[#allocation125_spill] sm:$0xff] %v5219_v40  ;;  %v5226_v28 = vadd.f32 %v4971_v63, %v4976_v53 }
 0x2cb   :  { %v1647_v54 = vadd.f32 %v1646_v44, %v9193_v48  ;;  %9514 = vst [vmem:[#allocation126_spill] sm:$0xff] %v5226_v28  ;;  %v9197_v44 = vmax.f32 %v5219_v40, 0.0  ;;  %v5233_v48 = vadd.f32 %v4971_v63, %v5003_v25 }
 0x2cd   :  { %v1648_v38 = vadd.f32 %v1647_v54, %v9194_v8  ;;  %9515 = vst [vmem:[#allocation127_spill] sm:$0xff] %v5233_v48  ;;  %v9202_v54 = vmax.f32 %v5226_v28, 0.0  ;;  %v1309_v8 = vadd.f32 %v4971_v63, %v5033_v13  ;;  %v9207_v2 = vmax.f32 %v5233_v48, 0.0 }
 0x2cf   :  { %v1649_v27 = vadd.f32 %v1648_v38, %v9196_v58  ;;  %v1312_v38 = vadd.f32 %v4971_v63, %v5063_v26  ;;  %v1485_v58 = vmax.f32 %v1309_v8, 0.0  ;;  %v3402_v26 = vpop.eup %3401 }
 0x2d0   :  { %v1664_v48 = vmul.f32 1352.0, %v3402_v26  ;;  %vm1668_vm3 = vweird.f32 %v3402_v26 }
 0x2d1   :  { %v1650_v42 = vadd.f32 %v1649_v27, %v9197_v44  ;;  %v1314_v27 = vadd.f32 %v4971_v63, %v5093_v15  ;;  %v1317_v44 = vadd.f32 %v4971_v63, %v1316_v43  ;;  %v1486_v40 = vmax.f32 %v1312_v38, 0.0 }
 0x2d2   :  { %v1665_v8 = vsub.f32 1.0, %v1664_v48  ;;  %v9521_v48 = vld [vmem:[#allocation24_spill] sm:$0xff] }
 0x2d3   :  { %v1651_v53 = vadd.f32 %v1650_v42, %v9202_v54  ;;  %v1487_v20 = vmax.f32 %v1314_v27, 0.0  ;;  %v1488_v28 = vmax.f32 %v1317_v44, 0.0  ;;  %v9526_v27 = vld [vmem:[#allocation29_spill] sm:$0xff] }
 0x2d4   :  { %v1666_v52 = vmul.f32 %v3402_v26, %v1665_v8 }
 0x2d5   :  { %v1652_v25 = vadd.f32 %v1651_v53, %v9207_v2 }
 0x2d6   :  { %v1667_v17 = vadd.f32 %v3402_v26, %v1666_v52  ;;  %v9519_v52 = vld [vmem:[#allocation27_spill] sm:$0xff] }
 0x2d7   :  { %v1653_v45 = vadd.f32 %v1652_v25, %v1485_v58 }
 0x2d8   :  { %v5250_v43 = vsel %vm1668_vm3, %v3402_v26, %v1667_v17  ;;  %v9529_v26 = vld [vmem:[#allocation30_spill] sm:$0xff] }
 0x2d9   :  { %v1654_v13 = vadd.f32 %v1653_v45, %v1486_v40 }
 0x2db   :  { %v1655_v42 = vadd.f32 %v1654_v13, %v1487_v20  ;;  %v9527_v13 = vmax.f32 %v9526_v27, 0.0 }
 0x2dd   :  { %v1656_v54 = vadd.f32 %v1655_v42, %v1488_v28 }
 0x2df   :  { %v1657_v62 = vrot.slane %v1656_v54, 4 }
 0x2e1   :  { %v1658_v1 = vadd.f32 %v1657_v62, %v1656_v54  ;;  %v9522_v54 = vmax.f32 %v9521_v48, 0.0 }
 0x2e3   :  { %v1659_v53 = vrot.slane %v1658_v1, 2 }
 0x2e5   :  { %v1660_v2 = vadd.f32 %v1659_v53, %v1658_v1  ;;  %v9530_v53 = vmax.f32 %v9529_v26, 0.0 }
 0x2e7   :  { %v1661_v15 = vrot.slane %v1660_v2, 1 }
 0x2e9   :  { %v1662_v63 = vadd.f32 %v1661_v15, %v1660_v2  ;;  %v9520_v2 = vmax.f32 %v9519_v52, 0.0  ;;  %v9532_v52 = vld [vmem:[#allocation31_spill] sm:$0xff] }
 0x2eb   :  { %v5253_v45 = vmul.f32 %v5250_v43, %v1662_v63 }
 0x2ed   :  { %v5256_v44 = vsub.f32 %v1485_v58, %v5253_v45  ;;  %v5259_v22 = vsub.f32 %v1486_v40, %v5253_v45  ;;  %v5262_v62 = vsub.f32 %v1487_v20, %v5253_v45  ;;  %v5265_v1 = vsub.f32 %v1488_v28, %v5253_v45  ;;  %v9523_v58 = vld [vmem:[#allocation28_spill] sm:$0xff] }
 0x2ee   :  { %v5270_v17 = vsub.f32 %v9520_v2, %v5253_v45  ;;  %v5275_v38 = vsub.f32 %v9522_v54, %v5253_v45  ;;  %v9524_v40 = vmax.f32 %v9523_v58, 0.0  ;;  %v5289_v42 = vsub.f32 %v9527_v13, %v5253_v45 }
 0x2ef   :  { %9516 = vst [vmem:[#allocation128_spill] sm:$0xff] %v5256_v44  ;;  %v5294_v8 = vsub.f32 %v9530_v53, %v5253_v45  ;;  %v9533_v2 = vmax.f32 %v9532_v52, 0.0 }
 0x2f0   :  { %9517 = vst [vmem:[#allocation129_spill] sm:$0xff] %v5259_v22  ;;  %v5280_v25 = vsub.f32 %v9524_v40, %v5253_v45  ;;  %v1840_v20 = vmul.f32 %v5270_v17, %v5270_v17  ;;  %v1841_v28 = vmul.f32 %v5275_v38, %v5275_v38  ;;  %v1843_v54 = vmul.f32 %v5289_v42, %v5289_v42  ;;  %v9535_v40 = vld [vmem:[#allocation32_spill] sm:$0xff] }
 0x2f1   :  { %9518 = vst [vmem:[#allocation130_spill] sm:$0xff] %v5262_v62  ;;  %v5301_v48 = vsub.f32 %v9533_v2, %v5253_v45  ;;  %v9536_v27 = vmax.f32 %v9535_v40, 0.0  ;;  %v1844_v26 = vmul.f32 %v5294_v8, %v5294_v8 }
 0x2f2   :  { %9525 = vst [vmem:[#allocation27_spill] sm:$0xff] %v5280_v25  ;;  %v1842_v15 = vmul.f32 %v5280_v25, %v5280_v25  ;;  %v2009_v63 = vadd.f32 %v1841_v28, %v1840_v20  ;;  %v9538_v20 = vld [vmem:[#allocation33_spill] sm:$0xff] }
 0x2f3   :  { %9528 = vst [vmem:[#allocation24_spill] sm:$0xff] %v5289_v42  ;;  %v5308_v13 = vsub.f32 %v9536_v27, %v5253_v45  ;;  %v9539_v28 = vmax.f32 %v9538_v20, 0.0  ;;  %v1845_v52 = vmul.f32 %v5301_v48, %v5301_v48 }
 0x2f4   :  { %9531 = vst [vmem:[#allocation28_spill] sm:$0xff] %v5294_v8  ;;  %v2010_v58 = vadd.f32 %v2009_v63, %v1842_v15  ;;  %v9541_v15 = vld [vmem:[#allocation34_spill] sm:$0xff] }
 0x2f5   :  { %9534 = vst [vmem:[#allocation29_spill] sm:$0xff] %v5301_v48  ;;  %v5315_v25 = vsub.f32 %v9539_v28, %v5253_v45  ;;  %v9542_v63 = vmax.f32 %v9541_v15, 0.0  ;;  %v1846_v40 = vmul.f32 %v5308_v13, %v5308_v13 }
 0x2f6   :  { %9537 = vst [vmem:[#allocation30_spill] sm:$0xff] %v5308_v13  ;;  %v2011_v53 = vadd.f32 %v2010_v58, %v1843_v54  ;;  %v9544_v54 = vld [vmem:[#allocation35_spill] sm:$0xff] }
 0x2f7   :  { %9540 = vst [vmem:[#allocation31_spill] sm:$0xff] %v5315_v25  ;;  %v5322_v42 = vsub.f32 %v9542_v63, %v5253_v45  ;;  %v9545_v58 = vmax.f32 %v9544_v54, 0.0  ;;  %v1847_v20 = vmul.f32 %v5315_v25, %v5315_v25 }
 0x2f8   :  { %v2012_v2 = vadd.f32 %v2011_v53, %v1844_v26  ;;  %v9547_v26 = vld [vmem:[#allocation36_spill] sm:$0xff] }
 0x2f9   :  { %9543 = vst [vmem:[#allocation32_spill] sm:$0xff] %v5322_v42  ;;  %v5329_v8 = vsub.f32 %v9545_v58, %v5253_v45  ;;  %v9548_v53 = vmax.f32 %v9547_v26, 0.0  ;;  %v1848_v15 = vmul.f32 %v5322_v42, %v5322_v42 }
 0x2fa   :  { %v2013_v27 = vadd.f32 %v2012_v2, %v1845_v52  ;;  %v9550_v52 = vld [vmem:[#allocation37_spill] sm:$0xff] }
 0x2fb   :  { %9546 = vst [vmem:[#allocation33_spill] sm:$0xff] %v5329_v8  ;;  %v5336_v48 = vsub.f32 %v9548_v53, %v5253_v45  ;;  %v9551_v2 = vmax.f32 %v9550_v52, 0.0  ;;  %v1849_v54 = vmul.f32 %v5329_v8, %v5329_v8 }
 0x2fc   :  { %v2014_v28 = vadd.f32 %v2013_v27, %v1846_v40  ;;  %v9553_v40 = vld [vmem:[#allocation38_spill] sm:$0xff] }
 0x2fd   :  { %9549 = vst [vmem:[#allocation34_spill] sm:$0xff] %v5336_v48  ;;  %v5343_v13 = vsub.f32 %v9551_v2, %v5253_v45  ;;  %v9554_v27 = vmax.f32 %v9553_v40, 0.0  ;;  %v1850_v26 = vmul.f32 %v5336_v48, %v5336_v48 }
 0x2fe   :  { %v2015_v63 = vadd.f32 %v2014_v28, %v1847_v20  ;;  %v9556_v20 = vld [vmem:[#allocation39_spill] sm:$0xff] }
 0x2ff   :  { %9552 = vst [vmem:[#allocation35_spill] sm:$0xff] %v5343_v13  ;;  %v5350_v25 = vsub.f32 %v9554_v27, %v5253_v45  ;;  %v9557_v28 = vmax.f32 %v9556_v20, 0.0  ;;  %v1851_v52 = vmul.f32 %v5343_v13, %v5343_v13 }
 0x300   :  { %v2016_v58 = vadd.f32 %v2015_v63, %v1848_v15  ;;  %v9559_v15 = vld [vmem:[#allocation40_spill] sm:$0xff] }
 0x301   :  { %9555 = vst [vmem:[#allocation36_spill] sm:$0xff] %v5350_v25  ;;  %v5357_v42 = vsub.f32 %v9557_v28, %v5253_v45  ;;  %v9560_v63 = vmax.f32 %v9559_v15, 0.0  ;;  %v1852_v40 = vmul.f32 %v5350_v25, %v5350_v25 }
 0x302   :  { %v2017_v53 = vadd.f32 %v2016_v58, %v1849_v54  ;;  %v9562_v54 = vld [vmem:[#allocation41_spill] sm:$0xff] }
 0x303   :  { %9558 = vst [vmem:[#allocation37_spill] sm:$0xff] %v5357_v42  ;;  %v5364_v8 = vsub.f32 %v9560_v63, %v5253_v45  ;;  %v9563_v58 = vmax.f32 %v9562_v54, 0.0  ;;  %v1853_v20 = vmul.f32 %v5357_v42, %v5357_v42 }
 0x304   :  { %v2018_v2 = vadd.f32 %v2017_v53, %v1850_v26  ;;  %v9565_v26 = vld [vmem:[#allocation42_spill] sm:$0xff] }
 0x305   :  { %9561 = vst [vmem:[#allocation38_spill] sm:$0xff] %v5364_v8  ;;  %v5371_v48 = vsub.f32 %v9563_v58, %v5253_v45  ;;  %v9566_v53 = vmax.f32 %v9565_v26, 0.0  ;;  %v1854_v15 = vmul.f32 %v5364_v8, %v5364_v8 }
 0x306   :  { %v2019_v27 = vadd.f32 %v2018_v2, %v1851_v52  ;;  %v9568_v52 = vld [vmem:[#allocation43_spill] sm:$0xff] }
 0x307   :  { %9564 = vst [vmem:[#allocation39_spill] sm:$0xff] %v5371_v48  ;;  %v5378_v13 = vsub.f32 %v9566_v53, %v5253_v45  ;;  %v9569_v2 = vmax.f32 %v9568_v52, 0.0  ;;  %v1855_v54 = vmul.f32 %v5371_v48, %v5371_v48 }
 0x308   :  { %v2020_v28 = vadd.f32 %v2019_v27, %v1852_v40  ;;  %v9571_v40 = vld [vmem:[#allocation44_spill] sm:$0xff] }
 0x309   :  { %9567 = vst [vmem:[#allocation40_spill] sm:$0xff] %v5378_v13  ;;  %v5385_v25 = vsub.f32 %v9569_v2, %v5253_v45  ;;  %v9572_v27 = vmax.f32 %v9571_v40, 0.0  ;;  %v1856_v26 = vmul.f32 %v5378_v13, %v5378_v13 }
 0x30a   :  { %v2021_v63 = vadd.f32 %v2020_v28, %v1853_v20  ;;  %v9574_v20 = vld [vmem:[#allocation45_spill] sm:$0xff] }
 0x30b   :  { %9570 = vst [vmem:[#allocation41_spill] sm:$0xff] %v5385_v25  ;;  %v5392_v42 = vsub.f32 %v9572_v27, %v5253_v45  ;;  %v9575_v28 = vmax.f32 %v9574_v20, 0.0  ;;  %v1857_v52 = vmul.f32 %v5385_v25, %v5385_v25 }
 0x30c   :  { %v2022_v58 = vadd.f32 %v2021_v63, %v1854_v15  ;;  %v9577_v15 = vld [vmem:[#allocation46_spill] sm:$0xff] }
 0x30d   :  { %9573 = vst [vmem:[#allocation42_spill] sm:$0xff] %v5392_v42  ;;  %v5399_v8 = vsub.f32 %v9575_v28, %v5253_v45  ;;  %v9578_v63 = vmax.f32 %v9577_v15, 0.0  ;;  %v1858_v40 = vmul.f32 %v5392_v42, %v5392_v42 }
 0x30e   :  { %v2023_v53 = vadd.f32 %v2022_v58, %v1855_v54  ;;  %v9580_v54 = vld [vmem:[#allocation47_spill] sm:$0xff] }
 0x30f   :  { %9576 = vst [vmem:[#allocation43_spill] sm:$0xff] %v5399_v8  ;;  %v5406_v48 = vsub.f32 %v9578_v63, %v5253_v45  ;;  %v9581_v58 = vmax.f32 %v9580_v54, 0.0  ;;  %v1859_v20 = vmul.f32 %v5399_v8, %v5399_v8 }
 0x310   :  { %v2024_v2 = vadd.f32 %v2023_v53, %v1856_v26  ;;  %v9583_v26 = vld [vmem:[#allocation48_spill] sm:$0xff] }
 0x311   :  { %9579 = vst [vmem:[#allocation44_spill] sm:$0xff] %v5406_v48  ;;  %v5413_v13 = vsub.f32 %v9581_v58, %v5253_v45  ;;  %v9584_v53 = vmax.f32 %v9583_v26, 0.0  ;;  %v1860_v15 = vmul.f32 %v5406_v48, %v5406_v48 }
 0x312   :  { %v2025_v27 = vadd.f32 %v2024_v2, %v1857_v52  ;;  %v9586_v52 = vld [vmem:[#allocation49_spill] sm:$0xff] }
 0x313   :  { %9582 = vst [vmem:[#allocation45_spill] sm:$0xff] %v5413_v13  ;;  %v5420_v25 = vsub.f32 %v9584_v53, %v5253_v45  ;;  %v9587_v2 = vmax.f32 %v9586_v52, 0.0  ;;  %v1861_v54 = vmul.f32 %v5413_v13, %v5413_v13 }
 0x314   :  { %v2026_v28 = vadd.f32 %v2025_v27, %v1858_v40  ;;  %v9589_v40 = vld [vmem:[#allocation50_spill] sm:$0xff] }
 0x315   :  { %9585 = vst [vmem:[#allocation46_spill] sm:$0xff] %v5420_v25  ;;  %v5427_v42 = vsub.f32 %v9587_v2, %v5253_v45  ;;  %v9590_v27 = vmax.f32 %v9589_v40, 0.0  ;;  %v1862_v26 = vmul.f32 %v5420_v25, %v5420_v25 }
 0x316   :  { %v2027_v63 = vadd.f32 %v2026_v28, %v1859_v20  ;;  %v9592_v20 = vld [vmem:[#allocation51_spill] sm:$0xff] }
 0x317   :  { %9588 = vst [vmem:[#allocation47_spill] sm:$0xff] %v5427_v42  ;;  %v5434_v8 = vsub.f32 %v9590_v27, %v5253_v45  ;;  %v9593_v28 = vmax.f32 %v9592_v20, 0.0  ;;  %v1863_v52 = vmul.f32 %v5427_v42, %v5427_v42 }
 0x318   :  { %v2028_v58 = vadd.f32 %v2027_v63, %v1860_v15  ;;  %v9595_v15 = vld [vmem:[#allocation52_spill] sm:$0xff] }
 0x319   :  { %9591 = vst [vmem:[#allocation48_spill] sm:$0xff] %v5434_v8  ;;  %v5441_v48 = vsub.f32 %v9593_v28, %v5253_v45  ;;  %v9596_v63 = vmax.f32 %v9595_v15, 0.0  ;;  %v1864_v40 = vmul.f32 %v5434_v8, %v5434_v8 }
 0x31a   :  { %v2029_v53 = vadd.f32 %v2028_v58, %v1861_v54  ;;  %v9598_v54 = vld [vmem:[#allocation53_spill] sm:$0xff] }
 0x31b   :  { %9594 = vst [vmem:[#allocation49_spill] sm:$0xff] %v5441_v48  ;;  %v5448_v13 = vsub.f32 %v9596_v63, %v5253_v45  ;;  %v9599_v58 = vmax.f32 %v9598_v54, 0.0  ;;  %v1865_v20 = vmul.f32 %v5441_v48, %v5441_v48 }
 0x31c   :  { %v2030_v2 = vadd.f32 %v2029_v53, %v1862_v26  ;;  %v9601_v26 = vld [vmem:[#allocation54_spill] sm:$0xff] }
 0x31d   :  { %9597 = vst [vmem:[#allocation50_spill] sm:$0xff] %v5448_v13  ;;  %v5455_v25 = vsub.f32 %v9599_v58, %v5253_v45  ;;  %v9602_v53 = vmax.f32 %v9601_v26, 0.0  ;;  %v1866_v15 = vmul.f32 %v5448_v13, %v5448_v13 }
 0x31e   :  { %v2031_v27 = vadd.f32 %v2030_v2, %v1863_v52  ;;  %v9604_v52 = vld [vmem:[#allocation55_spill] sm:$0xff] }
 0x31f   :  { %9600 = vst [vmem:[#allocation51_spill] sm:$0xff] %v5455_v25  ;;  %v5462_v42 = vsub.f32 %v9602_v53, %v5253_v45  ;;  %v9605_v2 = vmax.f32 %v9604_v52, 0.0  ;;  %v1867_v54 = vmul.f32 %v5455_v25, %v5455_v25 }
 0x320   :  { %v2032_v28 = vadd.f32 %v2031_v27, %v1864_v40  ;;  %v9607_v40 = vld [vmem:[#allocation56_spill] sm:$0xff] }
 0x321   :  { %9603 = vst [vmem:[#allocation52_spill] sm:$0xff] %v5462_v42  ;;  %v5469_v8 = vsub.f32 %v9605_v2, %v5253_v45  ;;  %v9608_v27 = vmax.f32 %v9607_v40, 0.0  ;;  %v1868_v26 = vmul.f32 %v5462_v42, %v5462_v42 }
 0x322   :  { %v2033_v63 = vadd.f32 %v2032_v28, %v1865_v20  ;;  %v9610_v20 = vld [vmem:[#allocation57_spill] sm:$0xff] }
 0x323   :  { %9606 = vst [vmem:[#allocation53_spill] sm:$0xff] %v5469_v8  ;;  %v5476_v48 = vsub.f32 %v9608_v27, %v5253_v45  ;;  %v9611_v28 = vmax.f32 %v9610_v20, 0.0  ;;  %v1869_v52 = vmul.f32 %v5469_v8, %v5469_v8 }
 0x324   :  { %v2034_v58 = vadd.f32 %v2033_v63, %v1866_v15  ;;  %v9613_v15 = vld [vmem:[#allocation58_spill] sm:$0xff] }
 0x325   :  { %9609 = vst [vmem:[#allocation54_spill] sm:$0xff] %v5476_v48  ;;  %v5483_v13 = vsub.f32 %v9611_v28, %v5253_v45  ;;  %v9614_v63 = vmax.f32 %v9613_v15, 0.0  ;;  %v1870_v40 = vmul.f32 %v5476_v48, %v5476_v48 }
 0x326   :  { %v2035_v53 = vadd.f32 %v2034_v58, %v1867_v54  ;;  %v9616_v54 = vld [vmem:[#allocation59_spill] sm:$0xff] }
 0x327   :  { %9612 = vst [vmem:[#allocation55_spill] sm:$0xff] %v5483_v13  ;;  %v5490_v25 = vsub.f32 %v9614_v63, %v5253_v45  ;;  %v9617_v58 = vmax.f32 %v9616_v54, 0.0  ;;  %v1871_v20 = vmul.f32 %v5483_v13, %v5483_v13 }
 0x328   :  { %v2036_v2 = vadd.f32 %v2035_v53, %v1868_v26  ;;  %v9619_v26 = vld [vmem:[#allocation60_spill] sm:$0xff] }
 0x329   :  { %9615 = vst [vmem:[#allocation56_spill] sm:$0xff] %v5490_v25  ;;  %v5497_v42 = vsub.f32 %v9617_v58, %v5253_v45  ;;  %v9620_v53 = vmax.f32 %v9619_v26, 0.0  ;;  %v1872_v15 = vmul.f32 %v5490_v25, %v5490_v25 }
 0x32a   :  { %v2037_v27 = vadd.f32 %v2036_v2, %v1869_v52  ;;  %v9622_v52 = vld [vmem:[#allocation61_spill] sm:$0xff] }
 0x32b   :  { %9618 = vst [vmem:[#allocation57_spill] sm:$0xff] %v5497_v42  ;;  %v5504_v8 = vsub.f32 %v9620_v53, %v5253_v45  ;;  %v9623_v2 = vmax.f32 %v9622_v52, 0.0  ;;  %v1873_v54 = vmul.f32 %v5497_v42, %v5497_v42 }
 0x32c   :  { %v2038_v28 = vadd.f32 %v2037_v27, %v1870_v40  ;;  %v9625_v40 = vld [vmem:[#allocation62_spill] sm:$0xff] }
 0x32d   :  { %9621 = vst [vmem:[#allocation58_spill] sm:$0xff] %v5504_v8  ;;  %v5511_v48 = vsub.f32 %v9623_v2, %v5253_v45  ;;  %v9626_v27 = vmax.f32 %v9625_v40, 0.0  ;;  %v1874_v26 = vmul.f32 %v5504_v8, %v5504_v8 }
 0x32e   :  { %v2039_v63 = vadd.f32 %v2038_v28, %v1871_v20  ;;  %v9628_v20 = vld [vmem:[#allocation63_spill] sm:$0xff] }
 0x32f   :  { %9624 = vst [vmem:[#allocation59_spill] sm:$0xff] %v5511_v48  ;;  %v5518_v13 = vsub.f32 %v9626_v27, %v5253_v45  ;;  %v9629_v28 = vmax.f32 %v9628_v20, 0.0  ;;  %v1875_v52 = vmul.f32 %v5511_v48, %v5511_v48 }
 0x330   :  { %v2040_v58 = vadd.f32 %v2039_v63, %v1872_v15  ;;  %v9631_v15 = vld [vmem:[#allocation64_spill] sm:$0xff] }
 0x331   :  { %9627 = vst [vmem:[#allocation60_spill] sm:$0xff] %v5518_v13  ;;  %v5525_v25 = vsub.f32 %v9629_v28, %v5253_v45  ;;  %v9632_v63 = vmax.f32 %v9631_v15, 0.0  ;;  %v1876_v40 = vmul.f32 %v5518_v13, %v5518_v13 }
 0x332   :  { %v2041_v53 = vadd.f32 %v2040_v58, %v1873_v54  ;;  %v9634_v54 = vld [vmem:[#allocation65_spill] sm:$0xff] }
 0x333   :  { %9630 = vst [vmem:[#allocation61_spill] sm:$0xff] %v5525_v25  ;;  %v5532_v42 = vsub.f32 %v9632_v63, %v5253_v45  ;;  %v9635_v58 = vmax.f32 %v9634_v54, 0.0  ;;  %v1877_v20 = vmul.f32 %v5525_v25, %v5525_v25 }
 0x334   :  { %v2042_v2 = vadd.f32 %v2041_v53, %v1874_v26  ;;  %v9637_v26 = vld [vmem:[#allocation66_spill] sm:$0xff] }
 0x335   :  { %9633 = vst [vmem:[#allocation62_spill] sm:$0xff] %v5532_v42  ;;  %v5539_v8 = vsub.f32 %v9635_v58, %v5253_v45  ;;  %v9638_v53 = vmax.f32 %v9637_v26, 0.0  ;;  %v1878_v15 = vmul.f32 %v5532_v42, %v5532_v42 }
 0x336   :  { %v2043_v27 = vadd.f32 %v2042_v2, %v1875_v52  ;;  %v9640_v52 = vld [vmem:[#allocation67_spill] sm:$0xff] }
 0x337   :  { %9636 = vst [vmem:[#allocation63_spill] sm:$0xff] %v5539_v8  ;;  %v5546_v48 = vsub.f32 %v9638_v53, %v5253_v45  ;;  %v9641_v2 = vmax.f32 %v9640_v52, 0.0  ;;  %v1879_v54 = vmul.f32 %v5539_v8, %v5539_v8 }
 0x338   :  { %v2044_v28 = vadd.f32 %v2043_v27, %v1876_v40  ;;  %v9643_v40 = vld [vmem:[#allocation68_spill] sm:$0xff] }
 0x339   :  { %9639 = vst [vmem:[#allocation64_spill] sm:$0xff] %v5546_v48  ;;  %v5553_v13 = vsub.f32 %v9641_v2, %v5253_v45  ;;  %v9644_v27 = vmax.f32 %v9643_v40, 0.0  ;;  %v1880_v26 = vmul.f32 %v5546_v48, %v5546_v48 }
 0x33a   :  { %v2045_v63 = vadd.f32 %v2044_v28, %v1877_v20  ;;  %v9646_v20 = vld [vmem:[#allocation70_spill] sm:$0xff] }
 0x33b   :  { %9642 = vst [vmem:[#allocation65_spill] sm:$0xff] %v5553_v13  ;;  %v5560_v25 = vsub.f32 %v9644_v27, %v5253_v45  ;;  %v9647_v28 = vmax.f32 %v9646_v20, 0.0  ;;  %v1881_v52 = vmul.f32 %v5553_v13, %v5553_v13 }
 0x33c   :  { %v2046_v58 = vadd.f32 %v2045_v63, %v1878_v15  ;;  %v9649_v15 = vld [vmem:[#allocation69_spill] sm:$0xff] }
 0x33d   :  { %9645 = vst [vmem:[#allocation66_spill] sm:$0xff] %v5560_v25  ;;  %v5567_v42 = vsub.f32 %v9647_v28, %v5253_v45  ;;  %v9650_v63 = vmax.f32 %v9649_v15, 0.0  ;;  %v1882_v40 = vmul.f32 %v5560_v25, %v5560_v25 }
 0x33e   :  { %v2047_v53 = vadd.f32 %v2046_v58, %v1879_v54  ;;  %v9652_v54 = vld [vmem:[#allocation71_spill] sm:$0xff] }
 0x33f   :  { %9648 = vst [vmem:[#allocation67_spill] sm:$0xff] %v5567_v42  ;;  %v5574_v8 = vsub.f32 %v9650_v63, %v5253_v45  ;;  %v9653_v58 = vmax.f32 %v9652_v54, 0.0  ;;  %v1883_v20 = vmul.f32 %v5567_v42, %v5567_v42 }
 0x340   :  { %v2048_v2 = vadd.f32 %v2047_v53, %v1880_v26  ;;  %v9655_v26 = vld [vmem:[#allocation72_spill] sm:$0xff] }
 0x341   :  { %9651 = vst [vmem:[#allocation68_spill] sm:$0xff] %v5574_v8  ;;  %v5581_v48 = vsub.f32 %v9653_v58, %v5253_v45  ;;  %v9656_v53 = vmax.f32 %v9655_v26, 0.0  ;;  %v1884_v15 = vmul.f32 %v5574_v8, %v5574_v8 }
 0x342   :  { %v2049_v27 = vadd.f32 %v2048_v2, %v1881_v52  ;;  %v9658_v52 = vld [vmem:[#allocation73_spill] sm:$0xff] }
 0x343   :  { %9654 = vst [vmem:[#allocation70_spill] sm:$0xff] %v5581_v48  ;;  %v5588_v13 = vsub.f32 %v9656_v53, %v5253_v45  ;;  %v9659_v2 = vmax.f32 %v9658_v52, 0.0  ;;  %v1885_v54 = vmul.f32 %v5581_v48, %v5581_v48 }
 0x344   :  { %v2050_v28 = vadd.f32 %v2049_v27, %v1882_v40  ;;  %v9661_v40 = vld [vmem:[#allocation74_spill] sm:$0xff] }
 0x345   :  { %9657 = vst [vmem:[#allocation69_spill] sm:$0xff] %v5588_v13  ;;  %v5595_v25 = vsub.f32 %v9659_v2, %v5253_v45  ;;  %v9662_v27 = vmax.f32 %v9661_v40, 0.0  ;;  %v1886_v26 = vmul.f32 %v5588_v13, %v5588_v13 }
 0x346   :  { %v2051_v63 = vadd.f32 %v2050_v28, %v1883_v20  ;;  %v9664_v20 = vld [vmem:[#allocation75_spill] sm:$0xff] }
 0x347   :  { %9660 = vst [vmem:[#allocation71_spill] sm:$0xff] %v5595_v25  ;;  %v5602_v42 = vsub.f32 %v9662_v27, %v5253_v45  ;;  %v9665_v28 = vmax.f32 %v9664_v20, 0.0  ;;  %v1887_v52 = vmul.f32 %v5595_v25, %v5595_v25 }
 0x348   :  { %v2052_v58 = vadd.f32 %v2051_v63, %v1884_v15  ;;  %v9667_v15 = vld [vmem:[#allocation76_spill] sm:$0xff] }
 0x349   :  { %9663 = vst [vmem:[#allocation72_spill] sm:$0xff] %v5602_v42  ;;  %v5609_v8 = vsub.f32 %v9665_v28, %v5253_v45  ;;  %v9668_v63 = vmax.f32 %v9667_v15, 0.0  ;;  %v1888_v40 = vmul.f32 %v5602_v42, %v5602_v42 }
 0x34a   :  { %v2053_v53 = vadd.f32 %v2052_v58, %v1885_v54  ;;  %v9670_v54 = vld [vmem:[#allocation77_spill] sm:$0xff] }
 0x34b   :  { %9666 = vst [vmem:[#allocation73_spill] sm:$0xff] %v5609_v8  ;;  %v5616_v48 = vsub.f32 %v9668_v63, %v5253_v45  ;;  %v9671_v58 = vmax.f32 %v9670_v54, 0.0  ;;  %v1889_v20 = vmul.f32 %v5609_v8, %v5609_v8 }
 0x34c   :  { %v2054_v2 = vadd.f32 %v2053_v53, %v1886_v26  ;;  %v9673_v26 = vld [vmem:[#allocation78_spill] sm:$0xff] }
 0x34d   :  { %9669 = vst [vmem:[#allocation74_spill] sm:$0xff] %v5616_v48  ;;  %v5623_v13 = vsub.f32 %v9671_v58, %v5253_v45  ;;  %v9674_v53 = vmax.f32 %v9673_v26, 0.0  ;;  %v1890_v15 = vmul.f32 %v5616_v48, %v5616_v48 }
 0x34e   :  { %v2055_v27 = vadd.f32 %v2054_v2, %v1887_v52  ;;  %v9676_v52 = vld [vmem:[#allocation79_spill] sm:$0xff] }
 0x34f   :  { %9672 = vst [vmem:[#allocation75_spill] sm:$0xff] %v5623_v13  ;;  %v5630_v25 = vsub.f32 %v9674_v53, %v5253_v45  ;;  %v9677_v2 = vmax.f32 %v9676_v52, 0.0  ;;  %v1891_v54 = vmul.f32 %v5623_v13, %v5623_v13 }
 0x350   :  { %v2056_v28 = vadd.f32 %v2055_v27, %v1888_v40  ;;  %v9679_v40 = vld [vmem:[#allocation80_spill] sm:$0xff] }
 0x351   :  { %9675 = vst [vmem:[#allocation76_spill] sm:$0xff] %v5630_v25  ;;  %v5637_v42 = vsub.f32 %v9677_v2, %v5253_v45  ;;  %v9680_v27 = vmax.f32 %v9679_v40, 0.0  ;;  %v1892_v26 = vmul.f32 %v5630_v25, %v5630_v25 }
 0x352   :  { %v2057_v63 = vadd.f32 %v2056_v28, %v1889_v20  ;;  %v9682_v20 = vld [vmem:[#allocation81_spill] sm:$0xff] }
 0x353   :  { %9678 = vst [vmem:[#allocation77_spill] sm:$0xff] %v5637_v42  ;;  %v5644_v8 = vsub.f32 %v9680_v27, %v5253_v45  ;;  %v9683_v28 = vmax.f32 %v9682_v20, 0.0  ;;  %v1893_v52 = vmul.f32 %v5637_v42, %v5637_v42 }
 0x354   :  { %v2058_v58 = vadd.f32 %v2057_v63, %v1890_v15  ;;  %v9685_v15 = vld [vmem:[#allocation82_spill] sm:$0xff] }
 0x355   :  { %9681 = vst [vmem:[#allocation78_spill] sm:$0xff] %v5644_v8  ;;  %v5651_v48 = vsub.f32 %v9683_v28, %v5253_v45  ;;  %v9686_v63 = vmax.f32 %v9685_v15, 0.0  ;;  %v1894_v40 = vmul.f32 %v5644_v8, %v5644_v8 }
 0x356   :  { %v2059_v53 = vadd.f32 %v2058_v58, %v1891_v54  ;;  %v9688_v54 = vld [vmem:[#allocation83_spill] sm:$0xff] }
 0x357   :  { %9684 = vst [vmem:[#allocation79_spill] sm:$0xff] %v5651_v48  ;;  %v5658_v13 = vsub.f32 %v9686_v63, %v5253_v45  ;;  %v9689_v58 = vmax.f32 %v9688_v54, 0.0  ;;  %v1895_v20 = vmul.f32 %v5651_v48, %v5651_v48 }
 0x358   :  { %v2060_v2 = vadd.f32 %v2059_v53, %v1892_v26  ;;  %v9691_v26 = vld [vmem:[#allocation84_spill] sm:$0xff] }
 0x359   :  { %9687 = vst [vmem:[#allocation80_spill] sm:$0xff] %v5658_v13  ;;  %v5665_v25 = vsub.f32 %v9689_v58, %v5253_v45  ;;  %v9692_v53 = vmax.f32 %v9691_v26, 0.0  ;;  %v1896_v15 = vmul.f32 %v5658_v13, %v5658_v13 }
 0x35a   :  { %v2061_v27 = vadd.f32 %v2060_v2, %v1893_v52  ;;  %v9694_v52 = vld [vmem:[#allocation85_spill] sm:$0xff] }
 0x35b   :  { %9690 = vst [vmem:[#allocation81_spill] sm:$0xff] %v5665_v25  ;;  %v5672_v42 = vsub.f32 %v9692_v53, %v5253_v45  ;;  %v9695_v2 = vmax.f32 %v9694_v52, 0.0  ;;  %v1897_v54 = vmul.f32 %v5665_v25, %v5665_v25 }
 0x35c   :  { %v2062_v28 = vadd.f32 %v2061_v27, %v1894_v40  ;;  %v9697_v40 = vld [vmem:[#allocation86_spill] sm:$0xff] }
 0x35d   :  { %9693 = vst [vmem:[#allocation82_spill] sm:$0xff] %v5672_v42  ;;  %v5679_v8 = vsub.f32 %v9695_v2, %v5253_v45  ;;  %v9698_v27 = vmax.f32 %v9697_v40, 0.0  ;;  %v1898_v26 = vmul.f32 %v5672_v42, %v5672_v42 }
 0x35e   :  { %v2063_v63 = vadd.f32 %v2062_v28, %v1895_v20  ;;  %v9700_v20 = vld [vmem:[#allocation87_spill] sm:$0xff] }
 0x35f   :  { %9696 = vst [vmem:[#allocation83_spill] sm:$0xff] %v5679_v8  ;;  %v5686_v48 = vsub.f32 %v9698_v27, %v5253_v45  ;;  %v9701_v28 = vmax.f32 %v9700_v20, 0.0  ;;  %v1899_v52 = vmul.f32 %v5679_v8, %v5679_v8 }
 0x360   :  { %v2064_v58 = vadd.f32 %v2063_v63, %v1896_v15  ;;  %v9703_v15 = vld [vmem:[#allocation88_spill] sm:$0xff] }
 0x361   :  { %9699 = vst [vmem:[#allocation84_spill] sm:$0xff] %v5686_v48  ;;  %v5693_v13 = vsub.f32 %v9701_v28, %v5253_v45  ;;  %v9704_v63 = vmax.f32 %v9703_v15, 0.0  ;;  %v1900_v40 = vmul.f32 %v5686_v48, %v5686_v48 }
 0x362   :  { %v2065_v53 = vadd.f32 %v2064_v58, %v1897_v54  ;;  %v9706_v54 = vld [vmem:[#allocation10_spill] sm:$0xff] }
 0x363   :  { %9702 = vst [vmem:[#allocation85_spill] sm:$0xff] %v5693_v13  ;;  %v5700_v25 = vsub.f32 %v9704_v63, %v5253_v45  ;;  %v9707_v58 = vmax.f32 %v9706_v54, 0.0  ;;  %v1901_v20 = vmul.f32 %v5693_v13, %v5693_v13 }
 0x364   :  { %v2066_v2 = vadd.f32 %v2065_v53, %v1898_v26  ;;  %v9709_v26 = vld [vmem:[#allocation12_spill] sm:$0xff] }
 0x365   :  { %9705 = vst [vmem:[#allocation86_spill] sm:$0xff] %v5700_v25  ;;  %v5707_v42 = vsub.f32 %v9707_v58, %v5253_v45  ;;  %v9710_v53 = vmax.f32 %v9709_v26, 0.0  ;;  %v1902_v15 = vmul.f32 %v5700_v25, %v5700_v25 }
 0x366   :  { %v2067_v27 = vadd.f32 %v2066_v2, %v1899_v52  ;;  %v9712_v52 = vld [vmem:[#allocation14_spill] sm:$0xff] }
 0x367   :  { %9708 = vst [vmem:[#allocation87_spill] sm:$0xff] %v5707_v42  ;;  %v5714_v8 = vsub.f32 %v9710_v53, %v5253_v45  ;;  %v9713_v2 = vmax.f32 %v9712_v52, 0.0  ;;  %v1903_v54 = vmul.f32 %v5707_v42, %v5707_v42 }
 0x368   :  { %v2068_v28 = vadd.f32 %v2067_v27, %v1900_v40  ;;  %v9715_v40 = vld [vmem:[#allocation16_spill] sm:$0xff] }
 0x369   :  { %9711 = vst [vmem:[#allocation88_spill] sm:$0xff] %v5714_v8  ;;  %v5721_v48 = vsub.f32 %v9713_v2, %v5253_v45  ;;  %v9716_v27 = vmax.f32 %v9715_v40, 0.0  ;;  %v1904_v26 = vmul.f32 %v5714_v8, %v5714_v8 }
 0x36a   :  { %v2069_v63 = vadd.f32 %v2068_v28, %v1901_v20  ;;  %v9718_v20 = vld [vmem:[#allocation18_spill] sm:$0xff] }
 0x36b   :  { %9714 = vst [vmem:[#allocation10_spill] sm:$0xff] %v5721_v48  ;;  %v5728_v13 = vsub.f32 %v9716_v27, %v5253_v45  ;;  %v9719_v28 = vmax.f32 %v9718_v20, 0.0  ;;  %v1905_v52 = vmul.f32 %v5721_v48, %v5721_v48 }
 0x36c   :  { %v2070_v58 = vadd.f32 %v2069_v63, %v1902_v15  ;;  %v9721_v15 = vld [vmem:[#allocation20_spill] sm:$0xff] }
 0x36d   :  { %9717 = vst [vmem:[#allocation12_spill] sm:$0xff] %v5728_v13  ;;  %v5735_v25 = vsub.f32 %v9719_v28, %v5253_v45  ;;  %v9722_v63 = vmax.f32 %v9721_v15, 0.0  ;;  %v1906_v40 = vmul.f32 %v5728_v13, %v5728_v13 }
 0x36e   :  { %v2071_v53 = vadd.f32 %v2070_v58, %v1903_v54  ;;  %v9724_v54 = vld [vmem:[#allocation22_spill] sm:$0xff] }
 0x36f   :  { %9720 = vst [vmem:[#allocation14_spill] sm:$0xff] %v5735_v25  ;;  %v5742_v42 = vsub.f32 %v9722_v63, %v5253_v45  ;;  %v9725_v58 = vmax.f32 %v9724_v54, 0.0  ;;  %v1907_v20 = vmul.f32 %v5735_v25, %v5735_v25 }
 0x370   :  { %v2072_v2 = vadd.f32 %v2071_v53, %v1904_v26  ;;  %v9727_v26 = vld [vmem:[#allocation26_spill] sm:$0xff] }
 0x371   :  { %9723 = vst [vmem:[#allocation16_spill] sm:$0xff] %v5742_v42  ;;  %v5749_v8 = vsub.f32 %v9725_v58, %v5253_v45  ;;  %v9728_v53 = vmax.f32 %v9727_v26, 0.0  ;;  %v1908_v15 = vmul.f32 %v5742_v42, %v5742_v42 }
 0x372   :  { %v2073_v27 = vadd.f32 %v2072_v2, %v1905_v52  ;;  %v9730_v52 = vld [vmem:[#allocation89_spill] sm:$0xff] }
 0x373   :  { %9726 = vst [vmem:[#allocation18_spill] sm:$0xff] %v5749_v8  ;;  %v5756_v48 = vsub.f32 %v9728_v53, %v5253_v45  ;;  %v9731_v2 = vmax.f32 %v9730_v52, 0.0  ;;  %v1909_v54 = vmul.f32 %v5749_v8, %v5749_v8 }
 0x374   :  { %v2074_v28 = vadd.f32 %v2073_v27, %v1906_v40  ;;  %v9733_v40 = vld [vmem:[#allocation90_spill] sm:$0xff] }
 0x375   :  { %9729 = vst [vmem:[#allocation20_spill] sm:$0xff] %v5756_v48  ;;  %v5763_v13 = vsub.f32 %v9731_v2, %v5253_v45  ;;  %v9734_v27 = vmax.f32 %v9733_v40, 0.0  ;;  %v1910_v26 = vmul.f32 %v5756_v48, %v5756_v48 }
 0x376   :  { %v2075_v63 = vadd.f32 %v2074_v28, %v1907_v20  ;;  %v9736_v20 = vld [vmem:[#allocation91_spill] sm:$0xff] }
 0x377   :  { %9732 = vst [vmem:[#allocation22_spill] sm:$0xff] %v5763_v13  ;;  %v5770_v25 = vsub.f32 %v9734_v27, %v5253_v45  ;;  %v9737_v28 = vmax.f32 %v9736_v20, 0.0  ;;  %v1911_v52 = vmul.f32 %v5763_v13, %v5763_v13 }
 0x378   :  { %v2076_v58 = vadd.f32 %v2075_v63, %v1908_v15  ;;  %v9739_v15 = vld [vmem:[#allocation92_spill] sm:$0xff] }
 0x379   :  { %9735 = vst [vmem:[#allocation26_spill] sm:$0xff] %v5770_v25  ;;  %v5777_v42 = vsub.f32 %v9737_v28, %v5253_v45  ;;  %v9740_v63 = vmax.f32 %v9739_v15, 0.0  ;;  %v1912_v40 = vmul.f32 %v5770_v25, %v5770_v25 }
 0x37a   :  { %v2077_v53 = vadd.f32 %v2076_v58, %v1909_v54  ;;  %v9742_v54 = vld [vmem:[#allocation93_spill] sm:$0xff] }
 0x37b   :  { %9738 = vst [vmem:[#allocation89_spill] sm:$0xff] %v5777_v42  ;;  %v5784_v8 = vsub.f32 %v9740_v63, %v5253_v45  ;;  %v9743_v58 = vmax.f32 %v9742_v54, 0.0  ;;  %v1913_v20 = vmul.f32 %v5777_v42, %v5777_v42 }
 0x37c   :  { %v2078_v2 = vadd.f32 %v2077_v53, %v1910_v26  ;;  %v9745_v26 = vld [vmem:[#allocation94_spill] sm:$0xff] }
 0x37d   :  { %9741 = vst [vmem:[#allocation90_spill] sm:$0xff] %v5784_v8  ;;  %v5791_v48 = vsub.f32 %v9743_v58, %v5253_v45  ;;  %v9746_v53 = vmax.f32 %v9745_v26, 0.0  ;;  %v1914_v15 = vmul.f32 %v5784_v8, %v5784_v8 }
 0x37e   :  { %v2079_v27 = vadd.f32 %v2078_v2, %v1911_v52  ;;  %v9748_v52 = vld [vmem:[#allocation95_spill] sm:$0xff] }
 0x37f   :  { %9744 = vst [vmem:[#allocation91_spill] sm:$0xff] %v5791_v48  ;;  %v5798_v13 = vsub.f32 %v9746_v53, %v5253_v45  ;;  %v9749_v2 = vmax.f32 %v9748_v52, 0.0  ;;  %v1915_v54 = vmul.f32 %v5791_v48, %v5791_v48 }
 0x380   :  { %v2080_v28 = vadd.f32 %v2079_v27, %v1912_v40  ;;  %v9751_v40 = vld [vmem:[#allocation96_spill] sm:$0xff] }
 0x381   :  { %9747 = vst [vmem:[#allocation92_spill] sm:$0xff] %v5798_v13  ;;  %v5805_v25 = vsub.f32 %v9749_v2, %v5253_v45  ;;  %v9752_v27 = vmax.f32 %v9751_v40, 0.0  ;;  %v1916_v26 = vmul.f32 %v5798_v13, %v5798_v13 }
 0x382   :  { %v2081_v63 = vadd.f32 %v2080_v28, %v1913_v20  ;;  %v9754_v20 = vld [vmem:[#allocation97_spill] sm:$0xff] }
 0x383   :  { %9750 = vst [vmem:[#allocation93_spill] sm:$0xff] %v5805_v25  ;;  %v5812_v42 = vsub.f32 %v9752_v27, %v5253_v45  ;;  %v9755_v28 = vmax.f32 %v9754_v20, 0.0  ;;  %v1917_v52 = vmul.f32 %v5805_v25, %v5805_v25 }
 0x384   :  { %v2082_v58 = vadd.f32 %v2081_v63, %v1914_v15  ;;  %v9757_v15 = vld [vmem:[#allocation98_spill] sm:$0xff] }
 0x385   :  { %9753 = vst [vmem:[#allocation94_spill] sm:$0xff] %v5812_v42  ;;  %v5819_v8 = vsub.f32 %v9755_v28, %v5253_v45  ;;  %v9758_v63 = vmax.f32 %v9757_v15, 0.0  ;;  %v1918_v40 = vmul.f32 %v5812_v42, %v5812_v42 }
 0x386   :  { %v2083_v53 = vadd.f32 %v2082_v58, %v1915_v54  ;;  %v9760_v54 = vld [vmem:[#allocation99_spill] sm:$0xff] }
 0x387   :  { %9756 = vst [vmem:[#allocation95_spill] sm:$0xff] %v5819_v8  ;;  %v5826_v48 = vsub.f32 %v9758_v63, %v5253_v45  ;;  %v9761_v58 = vmax.f32 %v9760_v54, 0.0  ;;  %v1919_v20 = vmul.f32 %v5819_v8, %v5819_v8 }
 0x388   :  { %v2084_v2 = vadd.f32 %v2083_v53, %v1916_v26  ;;  %v9763_v26 = vld [vmem:[#allocation100_spill] sm:$0xff] }
 0x389   :  { %9759 = vst [vmem:[#allocation96_spill] sm:$0xff] %v5826_v48  ;;  %v5833_v13 = vsub.f32 %v9761_v58, %v5253_v45  ;;  %v9764_v53 = vmax.f32 %v9763_v26, 0.0  ;;  %v1920_v15 = vmul.f32 %v5826_v48, %v5826_v48 }
 0x38a   :  { %v2085_v27 = vadd.f32 %v2084_v2, %v1917_v52  ;;  %v9766_v52 = vld [vmem:[#allocation101_spill] sm:$0xff] }
 0x38b   :  { %9762 = vst [vmem:[#allocation97_spill] sm:$0xff] %v5833_v13  ;;  %v5840_v25 = vsub.f32 %v9764_v53, %v5253_v45  ;;  %v9767_v2 = vmax.f32 %v9766_v52, 0.0  ;;  %v1921_v54 = vmul.f32 %v5833_v13, %v5833_v13 }
 0x38c   :  { %v2086_v28 = vadd.f32 %v2085_v27, %v1918_v40  ;;  %v9769_v40 = vld [vmem:[#allocation102_spill] sm:$0xff] }
 0x38d   :  { %9765 = vst [vmem:[#allocation98_spill] sm:$0xff] %v5840_v25  ;;  %v5847_v42 = vsub.f32 %v9767_v2, %v5253_v45  ;;  %v9770_v27 = vmax.f32 %v9769_v40, 0.0  ;;  %v1922_v26 = vmul.f32 %v5840_v25, %v5840_v25 }
 0x38e   :  { %v2087_v63 = vadd.f32 %v2086_v28, %v1919_v20  ;;  %v9772_v20 = vld [vmem:[#allocation103_spill] sm:$0xff] }
 0x38f   :  { %9768 = vst [vmem:[#allocation99_spill] sm:$0xff] %v5847_v42  ;;  %v5854_v8 = vsub.f32 %v9770_v27, %v5253_v45  ;;  %v9773_v28 = vmax.f32 %v9772_v20, 0.0  ;;  %v1923_v52 = vmul.f32 %v5847_v42, %v5847_v42 }
 0x390   :  { %v2088_v58 = vadd.f32 %v2087_v63, %v1920_v15  ;;  %v9775_v15 = vld [vmem:[#allocation104_spill] sm:$0xff] }
 0x391   :  { %9771 = vst [vmem:[#allocation100_spill] sm:$0xff] %v5854_v8  ;;  %v5861_v48 = vsub.f32 %v9773_v28, %v5253_v45  ;;  %v9776_v63 = vmax.f32 %v9775_v15, 0.0  ;;  %v1924_v40 = vmul.f32 %v5854_v8, %v5854_v8 }
 0x392   :  { %v2089_v53 = vadd.f32 %v2088_v58, %v1921_v54  ;;  %v9778_v54 = vld [vmem:[#allocation105_spill] sm:$0xff] }
 0x393   :  { %9774 = vst [vmem:[#allocation101_spill] sm:$0xff] %v5861_v48  ;;  %v5868_v13 = vsub.f32 %v9776_v63, %v5253_v45  ;;  %v9779_v58 = vmax.f32 %v9778_v54, 0.0  ;;  %v1925_v20 = vmul.f32 %v5861_v48, %v5861_v48 }
 0x394   :  { %v2090_v2 = vadd.f32 %v2089_v53, %v1922_v26  ;;  %v9781_v26 = vld [vmem:[#allocation2_spill] sm:$0xff] }
 0x395   :  { %9777 = vst [vmem:[#allocation102_spill] sm:$0xff] %v5868_v13  ;;  %v5875_v25 = vsub.f32 %v9779_v58, %v5253_v45  ;;  %v9782_v53 = vmax.f32 %v9781_v26, 0.0  ;;  %v1926_v15 = vmul.f32 %v5868_v13, %v5868_v13 }
 0x396   :  { %v2091_v27 = vadd.f32 %v2090_v2, %v1923_v52  ;;  %v9784_v52 = vld [vmem:[#allocation3_spill] sm:$0xff] }
 0x397   :  { %9780 = vst [vmem:[#allocation103_spill] sm:$0xff] %v5875_v25  ;;  %v5882_v42 = vsub.f32 %v9782_v53, %v5253_v45  ;;  %v9785_v2 = vmax.f32 %v9784_v52, 0.0  ;;  %v1927_v54 = vmul.f32 %v5875_v25, %v5875_v25 }
 0x398   :  { %v2092_v28 = vadd.f32 %v2091_v27, %v1924_v40  ;;  %v9787_v40 = vld [vmem:[#allocation4_spill] sm:$0xff] }
 0x399   :  { %9783 = vst [vmem:[#allocation104_spill] sm:$0xff] %v5882_v42  ;;  %v5889_v8 = vsub.f32 %v9785_v2, %v5253_v45  ;;  %v9788_v27 = vmax.f32 %v9787_v40, 0.0  ;;  %v1928_v26 = vmul.f32 %v5882_v42, %v5882_v42 }
 0x39a   :  { %v2093_v63 = vadd.f32 %v2092_v28, %v1925_v20  ;;  %v9790_v20 = vld [vmem:[#allocation5_spill] sm:$0xff] }
 0x39b   :  { %9786 = vst [vmem:[#allocation105_spill] sm:$0xff] %v5889_v8  ;;  %v5896_v48 = vsub.f32 %v9788_v27, %v5253_v45  ;;  %v9791_v28 = vmax.f32 %v9790_v20, 0.0  ;;  %v1929_v52 = vmul.f32 %v5889_v8, %v5889_v8 }
 0x39c   :  { %v2094_v58 = vadd.f32 %v2093_v63, %v1926_v15  ;;  %v9793_v15 = vld [vmem:[#allocation6_spill] sm:$0xff] }
 0x39d   :  { %9789 = vst [vmem:[#allocation2_spill] sm:$0xff] %v5896_v48  ;;  %v5903_v13 = vsub.f32 %v9791_v28, %v5253_v45  ;;  %v9794_v63 = vmax.f32 %v9793_v15, 0.0  ;;  %v1930_v40 = vmul.f32 %v5896_v48, %v5896_v48 }
 0x39e   :  { %v2095_v53 = vadd.f32 %v2094_v58, %v1927_v54  ;;  %v9796_v54 = vld [vmem:[#allocation7_spill] sm:$0xff] }
 0x39f   :  { %9792 = vst [vmem:[#allocation3_spill] sm:$0xff] %v5903_v13  ;;  %v5910_v25 = vsub.f32 %v9794_v63, %v5253_v45  ;;  %v9797_v58 = vmax.f32 %v9796_v54, 0.0  ;;  %v1931_v20 = vmul.f32 %v5903_v13, %v5903_v13 }
 0x3a0   :  { %v2096_v2 = vadd.f32 %v2095_v53, %v1928_v26  ;;  %v9798_v26 = vld [vmem:[#allocation8_spill] sm:$0xff] }
 0x3a1   :  { %9795 = vst [vmem:[#allocation4_spill] sm:$0xff] %v5910_v25  ;;  %v5917_v42 = vsub.f32 %v9797_v58, %v5253_v45  ;;  %v9799_v53 = vmax.f32 %v9798_v26, 0.0  ;;  %v1932_v15 = vmul.f32 %v5910_v25, %v5910_v25 }
 0x3a2   :  { %v2097_v27 = vadd.f32 %v2096_v2, %v1929_v52  ;;  %v9801_v52 = vld [vmem:[#allocation9_spill] sm:$0xff] }
 0x3a3   :  { %v5924_v8 = vsub.f32 %v9799_v53, %v5253_v45  ;;  %v9802_v2 = vmax.f32 %v9801_v52, 0.0  ;;  %v1933_v54 = vmul.f32 %v5917_v42, %v5917_v42 }
 0x3a4   :  { %v2098_v28 = vadd.f32 %v2097_v27, %v1930_v40  ;;  %v9803_v40 = vld [vmem:[#allocation11_spill] sm:$0xff] }
 0x3a5   :  { %9800 = vst [vmem:[#allocation5_spill] sm:$0xff] %v5924_v8  ;;  %v5931_v48 = vsub.f32 %v9802_v2, %v5253_v45  ;;  %v9804_v27 = vmax.f32 %v9803_v40, 0.0  ;;  %v1934_v26 = vmul.f32 %v5924_v8, %v5924_v8 }
 0x3a6   :  { %v2099_v63 = vadd.f32 %v2098_v28, %v1931_v20  ;;  %v9806_v20 = vld [vmem:[#allocation13_spill] sm:$0xff] }
 0x3a7   :  { %v5938_v13 = vsub.f32 %v9804_v27, %v5253_v45  ;;  %v9807_v28 = vmax.f32 %v9806_v20, 0.0  ;;  %v1935_v52 = vmul.f32 %v5931_v48, %v5931_v48 }
 0x3a8   :  { %v2100_v58 = vadd.f32 %v2099_v63, %v1932_v15  ;;  %v9808_v15 = vmax.f32 %v4741_v46, 0.0 }
 0x3a9   :  { %9805 = vst [vmem:[#allocation6_spill] sm:$0xff] %v5938_v13  ;;  %v5945_v25 = vsub.f32 %v9807_v28, %v5253_v45  ;;  %v1936_v40 = vmul.f32 %v5938_v13, %v5938_v13 }
 0x3aa   :  { %v2101_v53 = vadd.f32 %v2100_v58, %v1933_v54  ;;  %v5952_v63 = vsub.f32 %v9808_v15, %v5253_v45  ;;  %v9810_v54 = vld [vmem:[#allocation15_spill] sm:$0xff] }
 0x3ab   :  { %v9811_v58 = vmax.f32 %v9810_v54, 0.0  ;;  %v1937_v20 = vmul.f32 %v5945_v25, %v5945_v25 }
 0x3ac   :  { %v2102_v2 = vadd.f32 %v2101_v53, %v1934_v26  ;;  %9809 = vst [vmem:[#allocation7_spill] sm:$0xff] %v5952_v63  ;;  %v9812_v26 = vmax.f32 %v4757_v51, 0.0  ;;  %v1938_v46 = vmul.f32 %v5952_v63, %v5952_v63 }
 0x3ad   :  { %v5959_v8 = vsub.f32 %v9811_v58, %v5253_v45 }
 0x3ae   :  { %v2103_v27 = vadd.f32 %v2102_v2, %v1935_v52  ;;  %v5966_v53 = vsub.f32 %v9812_v26, %v5253_v45  ;;  %v9814_v52 = vld [vmem:[#allocation17_spill] sm:$0xff] }
 0x3af   :  { %v9815_v2 = vmax.f32 %v9814_v52, 0.0  ;;  %v1939_v54 = vmul.f32 %v5959_v8, %v5959_v8 }
 0x3b0   :  { %v2104_v28 = vadd.f32 %v2103_v27, %v1936_v40  ;;  %9813 = vst [vmem:[#allocation8_spill] sm:$0xff] %v5966_v53  ;;  %v9816_v40 = vmax.f32 %v4773_v39, 0.0  ;;  %v1940_v51 = vmul.f32 %v5966_v53, %v5966_v53 }
 0x3b1   :  { %v5973_v13 = vsub.f32 %v9815_v2, %v5253_v45 }
 0x3b2   :  { %v2105_v15 = vadd.f32 %v2104_v28, %v1937_v20  ;;  %v5980_v27 = vsub.f32 %v9816_v40, %v5253_v45  ;;  %v9818_v20 = vld [vmem:[#allocation19_spill] sm:$0xff] }
 0x3b3   :  { %v9819_v28 = vmax.f32 %v9818_v20, 0.0  ;;  %v1941_v52 = vmul.f32 %v5973_v13, %v5973_v13 }
 0x3b4   :  { %v2106_v58 = vadd.f32 %v2105_v15, %v1938_v46  ;;  %9817 = vst [vmem:[#allocation9_spill] sm:$0xff] %v5980_v27  ;;  %v9820_v46 = vmax.f32 %v4787_v9, 0.0  ;;  %v1942_v39 = vmul.f32 %v5980_v27, %v5980_v27 }
 0x3b5   :  { %v5987_v63 = vsub.f32 %v9819_v28, %v5253_v45 }
 0x3b6   :  { %v2107_v26 = vadd.f32 %v2106_v58, %v1939_v54  ;;  %v5994_v15 = vsub.f32 %v9820_v46, %v5253_v45  ;;  %v9822_v54 = vld [vmem:[#allocation21_spill] sm:$0xff] }
 0x3b7   :  { %v9823_v58 = vmax.f32 %v9822_v54, 0.0  ;;  %v1943_v20 = vmul.f32 %v5987_v63, %v5987_v63 }
 0x3b8   :  { %v2108_v2 = vadd.f32 %v2107_v26, %v1940_v51  ;;  %9821 = vst [vmem:[#allocation11_spill] sm:$0xff] %v5994_v15  ;;  %v9824_v51 = vmax.f32 %v4805_v6, 0.0  ;;  %v1944_v9 = vmul.f32 %v5994_v15, %v5994_v15 }
 0x3b9   :  { %v6001_v53 = vsub.f32 %v9823_v58, %v5253_v45 }
 0x3ba   :  { %v2109_v40 = vadd.f32 %v2108_v2, %v1941_v52  ;;  %v6008_v26 = vsub.f32 %v9824_v51, %v5253_v45  ;;  %v9825_v52 = vld [vmem:[#allocation23_spill] sm:$0xff] }
 0x3bb   :  { %v9826_v2 = vmax.f32 %v9825_v52, 0.0  ;;  %v1945_v54 = vmul.f32 %v6001_v53, %v6001_v53 }
 0x3bc   :  { %v2110_v28 = vadd.f32 %v2109_v40, %v1942_v39  ;;  %v9827_v39 = vmax.f32 %v4819_v55, 0.0  ;;  %v1946_v6 = vmul.f32 %v6008_v26, %v6008_v26 }
 0x3bd   :  { %v6015_v27 = vsub.f32 %v9826_v2, %v5253_v45 }
 0x3be   :  { %v2111_v46 = vadd.f32 %v2110_v28, %v1943_v20  ;;  %v6022_v40 = vsub.f32 %v9827_v39, %v5253_v45  ;;  %v9829_v20 = vld [vmem:[#allocation25_spill] sm:$0xff] }
 0x3bf   :  { %v9830_v28 = vmax.f32 %v9829_v20, 0.0  ;;  %v1947_v52 = vmul.f32 %v6015_v27, %v6015_v27 }
 0x3c0   :  { %v2112_v58 = vadd.f32 %v2111_v46, %v1944_v9  ;;  %9828 = vst [vmem:[#allocation13_spill] sm:$0xff] %v6022_v40  ;;  %v9832_v9 = vmax.f32 %v4835_v12, 0.0  ;;  %v1948_v55 = vmul.f32 %v6022_v40, %v6022_v40 }
 0x3c1   :  { %v6029_v15 = vsub.f32 %v9830_v28, %v5253_v45 }
 0x3c2   :  { %v2113_v51 = vadd.f32 %v2112_v58, %v1945_v54  ;;  %v6036_v46 = vsub.f32 %v9832_v9, %v5253_v45  ;;  %v9833_v54 = vmax.f32 %v4842_v29, 0.0 }
 0x3c3   :  { %9831 = vst [vmem:[#allocation15_spill] sm:$0xff] %v6029_v15  ;;  %v1949_v20 = vmul.f32 %v6029_v15, %v6029_v15 }
 0x3c4   :  { %v2114_v2 = vadd.f32 %v2113_v51, %v1946_v6  ;;  %v6043_v58 = vsub.f32 %v9833_v54, %v5253_v45  ;;  %v9834_v6 = vmax.f32 %v4849_v35, 0.0  ;;  %v1950_v12 = vmul.f32 %v6036_v46, %v6036_v46 }
 0x3c6   :  { %v2115_v39 = vadd.f32 %v2114_v2, %v1947_v52  ;;  %v6050_v51 = vsub.f32 %v9834_v6, %v5253_v45  ;;  %v9836_v52 = vld [vmem:[#allocation106_spill] sm:$0xff]  ;;  %v1951_v29 = vmul.f32 %v6043_v58, %v6043_v58 }
 0x3c7   :  { %v9837_v2 = vmax.f32 %v9836_v52, 0.0 }
 0x3c8   :  { %v2116_v28 = vadd.f32 %v2115_v39, %v1948_v55  ;;  %9835 = vst [vmem:[#allocation17_spill] sm:$0xff] %v6050_v51  ;;  %v9838_v55 = vld [vmem:[#allocation107_spill] sm:$0xff]  ;;  %v1952_v35 = vmul.f32 %v6050_v51, %v6050_v51 }
 0x3c9   :  { %v6057_v40 = vsub.f32 %v9837_v2, %v5253_v45  ;;  %v9839_v39 = vmax.f32 %v9838_v55, 0.0 }
 0x3ca   :  { %v2117_v9 = vadd.f32 %v2116_v28, %v1949_v20  ;;  %v9840_v20 = vmax.f32 %v4872_v31, 0.0 }
 0x3cb   :  { %v6064_v15 = vsub.f32 %v9839_v39, %v5253_v45  ;;  %v1953_v52 = vmul.f32 %v6057_v40, %v6057_v40 }
 0x3cc   :  { %v2118_v54 = vadd.f32 %v2117_v9, %v1950_v12  ;;  %v6071_v28 = vsub.f32 %v9840_v20, %v5253_v45  ;;  %v9841_v12 = vmax.f32 %v4879_v47, 0.0 }
 0x3cd   :  { %v1954_v55 = vmul.f32 %v6064_v15, %v6064_v15 }
 0x3ce   :  { %v2119_v6 = vadd.f32 %v2118_v54, %v1951_v29  ;;  %v6078_v9 = vsub.f32 %v9841_v12, %v5253_v45  ;;  %v9843_v29 = vld [vmem:[#allocation108_spill] sm:$0xff]  ;;  %v1955_v31 = vmul.f32 %v6071_v28, %v6071_v28 }
 0x3cf   :  { %v9844_v54 = vmax.f32 %v9843_v29, 0.0 }
 0x3d0   :  { %v2120_v2 = vadd.f32 %v2119_v6, %v1952_v35  ;;  %9842 = vst [vmem:[#allocation19_spill] sm:$0xff] %v6078_v9  ;;  %v9845_v35 = vmax.f32 %v4895_v49, 0.0  ;;  %v1956_v47 = vmul.f32 %v6078_v9, %v6078_v9 }
 0x3d1   :  { %v6085_v51 = vsub.f32 %v9844_v54, %v5253_v45 }
 0x3d2   :  { %v2121_v39 = vadd.f32 %v2120_v2, %v1953_v52  ;;  %v6092_v6 = vsub.f32 %v9845_v35, %v5253_v45  ;;  %v9847_v52 = vmax.f32 %v4902_v16, 0.0 }
 0x3d3   :  { %v1957_v29 = vmul.f32 %v6085_v51, %v6085_v51 }
 0x3d4   :  { %v2122_v20 = vadd.f32 %v2121_v39, %v1954_v55  ;;  %9846 = vst [vmem:[#allocation21_spill] sm:$0xff] %v6092_v6  ;;  %v6099_v2 = vsub.f32 %v9847_v52, %v5253_v45  ;;  %v9848_v55 = vmax.f32 %v4909_v30, 0.0  ;;  %v1958_v49 = vmul.f32 %v6092_v6, %v6092_v6 }
 0x3d6   :  { %v2123_v12 = vadd.f32 %v2122_v20, %v1955_v31  ;;  %v6106_v39 = vsub.f32 %v9848_v55, %v5253_v45  ;;  %v9850_v31 = vld [vmem:[#allocation109_spill] sm:$0xff]  ;;  %v1959_v16 = vmul.f32 %v6099_v2, %v6099_v2 }
 0x3d7   :  { %v9851_v20 = vmax.f32 %v9850_v31, 0.0 }
 0x3d8   :  { %v2124_v54 = vadd.f32 %v2123_v12, %v1956_v47  ;;  %9849 = vst [vmem:[#allocation23_spill] sm:$0xff] %v6106_v39  ;;  %v9853_v47 = vmax.f32 %v4927_v10, 0.0  ;;  %v1960_v30 = vmul.f32 %v6106_v39, %v6106_v39 }
 0x3d9   :  { %v6113_v9 = vsub.f32 %v9851_v20, %v5253_v45 }
 0x3da   :  { %v2125_v35 = vadd.f32 %v2124_v54, %v1957_v29  ;;  %v6120_v12 = vsub.f32 %v9853_v47, %v5253_v45  ;;  %v9854_v29 = vld [vmem:[#allocation110_spill] sm:$0xff] }
 0x3db   :  { %9852 = vst [vmem:[#allocation25_spill] sm:$0xff] %v6113_v9  ;;  %v9855_v54 = vmax.f32 %v9854_v29, 0.0  ;;  %v1961_v31 = vmul.f32 %v6113_v9, %v6113_v9 }
 0x3dc   :  { %v2126_v52 = vadd.f32 %v2125_v35, %v1958_v49  ;;  %v9856_v49 = vmax.f32 %v4941_v37, 0.0  ;;  %v1962_v10 = vmul.f32 %v6120_v12, %v6120_v12 }
 0x3dd   :  { %v6127_v6 = vsub.f32 %v9855_v54, %v5253_v45 }
 0x3de   :  { %v2127_v55 = vadd.f32 %v2126_v52, %v1959_v16  ;;  %v6134_v35 = vsub.f32 %v9856_v49, %v5253_v45  ;;  %v9857_v16 = vld [vmem:[#allocation111_spill] sm:$0xff] }
 0x3df   :  { %v9858_v52 = vmax.f32 %v9857_v16, 0.0  ;;  %v1963_v29 = vmul.f32 %v6127_v6, %v6127_v6 }
 0x3e0   :  { %v2128_v20 = vadd.f32 %v2127_v55, %v1960_v30  ;;  %v9860_v30 = vld [vmem:[#allocation112_spill] sm:$0xff]  ;;  %v1964_v37 = vmul.f32 %v6134_v35, %v6134_v35 }
 0x3e1   :  { %v6141_v39 = vsub.f32 %v9858_v52, %v5253_v45  ;;  %v9861_v55 = vmax.f32 %v9860_v30, 0.0 }
 0x3e2   :  { %v2129_v47 = vadd.f32 %v2128_v20, %v1961_v31  ;;  %v9863_v31 = vmax.f32 %v4963_v4, 0.0 }
 0x3e3   :  { %9859 = vst [vmem:[#allocation106_spill] sm:$0xff] %v6141_v39  ;;  %v6148_v9 = vsub.f32 %v9861_v55, %v5253_v45  ;;  %v1965_v16 = vmul.f32 %v6141_v39, %v6141_v39 }
 0x3e4   :  { %v2130_v54 = vadd.f32 %v2129_v47, %v1962_v10  ;;  %v6155_v20 = vsub.f32 %v9863_v31, %v5253_v45  ;;  %v9864_v10 = vmax.f32 %v4974_v11, 0.0 }
 0x3e5   :  { %9862 = vst [vmem:[#allocation107_spill] sm:$0xff] %v6148_v9  ;;  %v1966_v30 = vmul.f32 %v6148_v9, %v6148_v9 }
 0x3e6   :  { %v2131_v49 = vadd.f32 %v2130_v54, %v1963_v29  ;;  %v6162_v47 = vsub.f32 %v9864_v10, %v5253_v45  ;;  %v9865_v29 = vmax.f32 %v4982_v7, 0.0  ;;  %v1967_v4 = vmul.f32 %v6155_v20, %v6155_v20 }
 0x3e8   :  { %v2132_v52 = vadd.f32 %v2131_v49, %v1964_v37  ;;  %v6169_v54 = vsub.f32 %v9865_v29, %v5253_v45  ;;  %v9866_v37 = vld [vmem:[#allocation113_spill] sm:$0xff]  ;;  %v1968_v11 = vmul.f32 %v6162_v47, %v6162_v47 }
 0x3e9   :  { %v9867_v49 = vmax.f32 %v9866_v37, 0.0 }
 0x3ea   :  { %v2133_v55 = vadd.f32 %v2132_v52, %v1965_v16  ;;  %v9869_v16 = vld [vmem:[#allocation114_spill] sm:$0xff]  ;;  %v1969_v7 = vmul.f32 %v6169_v54, %v6169_v54 }
 0x3eb   :  { %v6176_v39 = vsub.f32 %v9867_v49, %v5253_v45  ;;  %v9870_v52 = vmax.f32 %v9869_v16, 0.0 }
 0x3ec   :  { %v2134_v31 = vadd.f32 %v2133_v55, %v1966_v30  ;;  %v9871_v30 = vmax.f32 %v4998_v14, 0.0 }
 0x3ed   :  { %9868 = vst [vmem:[#allocation108_spill] sm:$0xff] %v6176_v39  ;;  %v6183_v9 = vsub.f32 %v9870_v52, %v5253_v45  ;;  %v1970_v37 = vmul.f32 %v6176_v39, %v6176_v39 }
 0x3ee   :  { %v2135_v10 = vadd.f32 %v2134_v31, %v1967_v4  ;;  %v6190_v55 = vsub.f32 %v9871_v30, %v5253_v45  ;;  %v9872_v4 = vmax.f32 %v5007_v57, 0.0 }
 0x3ef   :  { %v1971_v16 = vmul.f32 %v6183_v9, %v6183_v9 }
 0x3f0   :  { %v2136_v29 = vadd.f32 %v2135_v10, %v1968_v11  ;;  %v6197_v31 = vsub.f32 %v9872_v4, %v5253_v45  ;;  %v9873_v11 = vmax.f32 %v5015_v59, 0.0  ;;  %v1972_v14 = vmul.f32 %v6190_v55, %v6190_v55 }
 0x3f2   :  { %v2137_v49 = vadd.f32 %v2136_v29, %v1969_v7  ;;  %v6204_v10 = vsub.f32 %v9873_v11, %v5253_v45  ;;  %v9875_v7 = vld [vmem:[#allocation115_spill] sm:$0xff]  ;;  %v1973_v57 = vmul.f32 %v6197_v31, %v6197_v31 }
 0x3f3   :  { %v9876_v29 = vmax.f32 %v9875_v7, 0.0 }
 0x3f4   :  { %v2138_v52 = vadd.f32 %v2137_v49, %v1970_v37  ;;  %9874 = vst [vmem:[#allocation109_spill] sm:$0xff] %v6204_v10  ;;  %v9877_v37 = vmax.f32 %v5029_v61, 0.0  ;;  %v1974_v59 = vmul.f32 %v6204_v10, %v6204_v10 }
 0x3f5   :  { %v6211_v39 = vsub.f32 %v9876_v29, %v5253_v45 }
 0x3f6   :  { %v2139_v30 = vadd.f32 %v2138_v52, %v1971_v16  ;;  %v6218_v49 = vsub.f32 %v9877_v37, %v5253_v45  ;;  %v9878_v16 = vmax.f32 %v5038_v50, 0.0 }
 0x3f7   :  { %v1975_v7 = vmul.f32 %v6211_v39, %v6211_v39 }
 0x3f8   :  { %v2140_v4 = vadd.f32 %v2139_v30, %v1972_v14  ;;  %v6225_v52 = vsub.f32 %v9878_v16, %v5253_v45  ;;  %v9879_v14 = vmax.f32 %v5045_v24, 0.0  ;;  %v1976_v61 = vmul.f32 %v6218_v49, %v6218_v49 }
 0x3fa   :  { %v2141_v11 = vadd.f32 %v2140_v4, %v1973_v57  ;;  %v6232_v30 = vsub.f32 %v9879_v14, %v5253_v45  ;;  %v9880_v57 = vld [vmem:[#allocation116_spill] sm:$0xff]  ;;  %v1977_v50 = vmul.f32 %v6225_v52, %v6225_v52 }
 0x3fb   :  { %v9881_v4 = vmax.f32 %v9880_v57, 0.0 }
 0x3fc   :  { %v2142_v29 = vadd.f32 %v2141_v11, %v1974_v59  ;;  %v9883_v59 = vmax.f32 %v5059_v19, 0.0  ;;  %v1978_v24 = vmul.f32 %v6232_v30, %v6232_v30 }
 0x3fd   :  { %v6239_v10 = vsub.f32 %v9881_v4, %v5253_v45 }
 0x3fe   :  { %v2143_v37 = vadd.f32 %v2142_v29, %v1975_v7  ;;  %v6246_v11 = vsub.f32 %v9883_v59, %v5253_v45  ;;  %v9884_v7 = vmax.f32 %v5068_v60, 0.0 }
 0x3ff   :  { %9882 = vst [vmem:[#allocation110_spill] sm:$0xff] %v6239_v10  ;;  %v1979_v57 = vmul.f32 %v6239_v10, %v6239_v10 }
 0x400   :  { %v2144_v16 = vadd.f32 %v2143_v37, %v1976_v61  ;;  %v6253_v29 = vsub.f32 %v9884_v7, %v5253_v45  ;;  %v9885_v61 = vmax.f32 %v5075_v18, 0.0  ;;  %v1980_v19 = vmul.f32 %v6246_v11, %v6246_v11 }
 0x402   :  { %v2145_v14 = vadd.f32 %v2144_v16, %v1977_v50  ;;  %v6260_v37 = vsub.f32 %v9885_v61, %v5253_v45  ;;  %v9886_v50 = vmax.f32 %v5082_v21, 0.0  ;;  %v1981_v60 = vmul.f32 %v6253_v29, %v6253_v29 }
 0x404   :  { %v2146_v4 = vadd.f32 %v2145_v14, %v1978_v24  ;;  %v6267_v16 = vsub.f32 %v9886_v50, %v5253_v45  ;;  %v9888_v24 = vld [vmem:[#allocation117_spill] sm:$0xff]  ;;  %v1982_v18 = vmul.f32 %v6260_v37, %v6260_v37 }
 0x405   :  { %v9889_v14 = vmax.f32 %v9888_v24, 0.0 }
 0x406   :  { %v2147_v59 = vadd.f32 %v2146_v4, %v1979_v57  ;;  %9887 = vst [vmem:[#allocation111_spill] sm:$0xff] %v6267_v16  ;;  %v9890_v57 = vmax.f32 %v5098_v33, 0.0  ;;  %v1983_v21 = vmul.f32 %v6267_v16, %v6267_v16 }
 0x407   :  { %v6274_v10 = vsub.f32 %v9889_v14, %v5253_v45 }
 0x408   :  { %v2148_v7 = vadd.f32 %v2147_v59, %v1980_v19  ;;  %v6281_v4 = vsub.f32 %v9890_v57, %v5253_v45  ;;  %v9891_v19 = vmax.f32 %v5105_v41, 0.0 }
 0x409   :  { %v1984_v24 = vmul.f32 %v6274_v10, %v6274_v10 }
 0x40a   :  { %v2149_v61 = vadd.f32 %v2148_v7, %v1981_v60  ;;  %v6288_v59 = vsub.f32 %v9891_v19, %v5253_v45  ;;  %v9892_v60 = vmax.f32 %v5112_v5, 0.0  ;;  %v1985_v33 = vmul.f32 %v6281_v4, %v6281_v4 }
 0x40c   :  { %v2150_v50 = vadd.f32 %v2149_v61, %v1982_v18  ;;  %v6295_v7 = vsub.f32 %v9892_v60, %v5253_v45  ;;  %v9893_v18 = vld [vmem:[#allocation118_spill] sm:$0xff]  ;;  %v1986_v41 = vmul.f32 %v6288_v59, %v6288_v59 }
 0x40d   :  { %v9894_v61 = vmax.f32 %v9893_v18, 0.0 }
 0x40e   :  { %v2151_v14 = vadd.f32 %v2150_v50, %v1983_v21  ;;  %v9895_v21 = vmax.f32 %v5126_v32, 0.0  ;;  %v1987_v5 = vmul.f32 %v6295_v7, %v6295_v7 }
 0x40f   :  { %v6302_v16 = vsub.f32 %v9894_v61, %v5253_v45 }
 0x410   :  { %v2152_v57 = vadd.f32 %v2151_v14, %v1984_v24  ;;  %v6309_v50 = vsub.f32 %v9895_v21, %v5253_v45  ;;  %v9896_v24 = vmax.f32 %v5133_v0, 0.0 }
 0x411   :  { %v1988_v18 = vmul.f32 %v6302_v16, %v6302_v16 }
 0x412   :  { %v2153_v19 = vadd.f32 %v2152_v57, %v1985_v33  ;;  %v6316_v14 = vsub.f32 %v9896_v24, %v5253_v45  ;;  %v9897_v33 = vmax.f32 %v5140_v3, 0.0  ;;  %v1989_v32 = vmul.f32 %v6309_v50, %v6309_v50 }
 0x414   :  { %v2154_v60 = vadd.f32 %v2153_v19, %v1986_v41  ;;  %v6323_v57 = vsub.f32 %v9897_v33, %v5253_v45  ;;  %v9899_v41 = vmax.f32 %v5147_v56, 0.0  ;;  %v1990_v0 = vmul.f32 %v6316_v14, %v6316_v14 }
 0x416   :  { %v2155_v61 = vadd.f32 %v2154_v60, %v1987_v5  ;;  %9898 = vst [vmem:[#allocation112_spill] sm:$0xff] %v6323_v57  ;;  %v6330_v19 = vsub.f32 %v9899_v41, %v5253_v45  ;;  %v9901_v5 = vmax.f32 %v5154_v34, 0.0  ;;  %v1991_v3 = vmul.f32 %v6323_v57, %v6323_v57 }
 0x418   :  { %v2156_v21 = vadd.f32 %v2155_v61, %v1988_v18  ;;  %9900 = vst [vmem:[#allocation113_spill] sm:$0xff] %v6330_v19  ;;  %v6337_v60 = vsub.f32 %v9901_v5, %v5253_v45  ;;  %v9903_v18 = vmax.f32 %v5161_v23, 0.0  ;;  %v1992_v56 = vmul.f32 %v6330_v19, %v6330_v19 }
 0x41a   :  { %v2157_v24 = vadd.f32 %v2156_v21, %v1989_v32  ;;  %9902 = vst [vmem:[#allocation114_spill] sm:$0xff] %v6337_v60  ;;  %v6344_v61 = vsub.f32 %v9903_v18, %v5253_v45  ;;  %v9905_v32 = vmax.f32 %v5168_v36, 0.0  ;;  %v1993_v34 = vmul.f32 %v6337_v60, %v6337_v60 }
 0x41c   :  { %v2158_v33 = vadd.f32 %v2157_v24, %v1990_v0  ;;  %9904 = vst [vmem:[#allocation115_spill] sm:$0xff] %v6344_v61  ;;  %v6351_v21 = vsub.f32 %v9905_v32, %v5253_v45  ;;  %v9907_v0 = vld [vmem:[#allocation119_spill] sm:$0xff]  ;;  %v1994_v23 = vmul.f32 %v6344_v61, %v6344_v61 }
 0x41d   :  { %v9908_v24 = vmax.f32 %v9907_v0, 0.0 }
 0x41e   :  { %v2159_v41 = vadd.f32 %v2158_v33, %v1991_v3  ;;  %9906 = vst [vmem:[#allocation116_spill] sm:$0xff] %v6351_v21  ;;  %v9910_v3 = vld [vmem:[#allocation120_spill] sm:$0xff]  ;;  %v1995_v36 = vmul.f32 %v6351_v21, %v6351_v21 }
 0x41f   :  { %v6358_v57 = vsub.f32 %v9908_v24, %v5253_v45  ;;  %v9911_v33 = vmax.f32 %v9910_v3, 0.0 }
 0x420   :  { %v2160_v5 = vadd.f32 %v2159_v41, %v1992_v56  ;;  %v9913_v56 = vld [vmem:[#allocation121_spill] sm:$0xff] }
 0x421   :  { %9909 = vst [vmem:[#allocation117_spill] sm:$0xff] %v6358_v57  ;;  %v6365_v19 = vsub.f32 %v9911_v33, %v5253_v45  ;;  %v9914_v41 = vmax.f32 %v9913_v56, 0.0  ;;  %v1996_v0 = vmul.f32 %v6358_v57, %v6358_v57 }
 0x422   :  { %v2161_v18 = vadd.f32 %v2160_v5, %v1993_v34  ;;  %v9916_v34 = vld [vmem:[#allocation122_spill] sm:$0xff] }
 0x423   :  { %9912 = vst [vmem:[#allocation118_spill] sm:$0xff] %v6365_v19  ;;  %v6372_v60 = vsub.f32 %v9914_v41, %v5253_v45  ;;  %v9917_v5 = vmax.f32 %v9916_v34, 0.0  ;;  %v1997_v3 = vmul.f32 %v6365_v19, %v6365_v19 }
 0x424   :  { %v2162_v32 = vadd.f32 %v2161_v18, %v1994_v23  ;;  %v9919_v23 = vld [vmem:[#allocation123_spill] sm:$0xff] }
 0x425   :  { %9915 = vst [vmem:[#allocation119_spill] sm:$0xff] %v6372_v60  ;;  %v6379_v61 = vsub.f32 %v9917_v5, %v5253_v45  ;;  %v9920_v18 = vmax.f32 %v9919_v23, 0.0  ;;  %v1998_v56 = vmul.f32 %v6372_v60, %v6372_v60 }
 0x426   :  { %v2163_v24 = vadd.f32 %v2162_v32, %v1995_v36  ;;  %v9921_v36 = vld [vmem:[#allocation124_spill] sm:$0xff] }
 0x427   :  { %9918 = vst [vmem:[#allocation120_spill] sm:$0xff] %v6379_v61  ;;  %v6386_v21 = vsub.f32 %v9920_v18, %v5253_v45  ;;  %v9922_v32 = vmax.f32 %v9921_v36, 0.0  ;;  %v1999_v34 = vmul.f32 %v6379_v61, %v6379_v61 }
 0x428   :  { %v2164_v33 = vadd.f32 %v2163_v24, %v1996_v0  ;;  %v9923_v0 = vld [vmem:[#allocation125_spill] sm:$0xff] }
 0x429   :  { %v6393_v57 = vsub.f32 %v9922_v32, %v5253_v45  ;;  %v9924_v24 = vmax.f32 %v9923_v0, 0.0  ;;  %v2000_v23 = vmul.f32 %v6386_v21, %v6386_v21 }
 0x42a   :  { %v2165_v41 = vadd.f32 %v2164_v33, %v1997_v3  ;;  %v9926_v3 = vld [vmem:[#allocation126_spill] sm:$0xff] }
 0x42b   :  { %v6400_v19 = vsub.f32 %v9924_v24, %v5253_v45  ;;  %v9927_v33 = vmax.f32 %v9926_v3, 0.0  ;;  %v2001_v36 = vmul.f32 %v6393_v57, %v6393_v57 }
 0x42c   :  { %v2166_v5 = vadd.f32 %v2165_v41, %v1998_v56  ;;  %v9929_v56 = vld [vmem:[#allocation127_spill] sm:$0xff] }
 0x42d   :  { %9925 = vst [vmem:[#allocation121_spill] sm:$0xff] %v6400_v19  ;;  %v6407_v60 = vsub.f32 %v9927_v33, %v5253_v45  ;;  %v9930_v41 = vmax.f32 %v9929_v56, 0.0  ;;  %v2002_v0 = vmul.f32 %v6400_v19, %v6400_v19 }
 0x42e   :  { %v2167_v18 = vadd.f32 %v2166_v5, %v1999_v34 }
 0x42f   :  { %9928 = vst [vmem:[#allocation122_spill] sm:$0xff] %v6407_v60  ;;  %v6414_v61 = vsub.f32 %v9930_v41, %v5253_v45  ;;  %v2003_v34 = vmul.f32 %v6407_v60, %v6407_v60  ;;  %v2006_v45 = vmul.f32 %v5259_v22, %v5259_v22  ;;  %v2007_v41 = vmul.f32 %v5262_v62, %v5262_v62 }
 0x430   :  { %v2168_v32 = vadd.f32 %v2167_v18, %v2000_v23  ;;  %v2005_v23 = vmul.f32 %v5256_v44, %v5256_v44 }
 0x431   :  { %9931 = vst [vmem:[#allocation123_spill] sm:$0xff] %v6414_v61  ;;  %v2004_v3 = vmul.f32 %v6414_v61, %v6414_v61 }
 0x432   :  { %v2169_v24 = vadd.f32 %v2168_v32, %v2001_v36  ;;  %v2008_v32 = vmul.f32 %v5265_v1, %v5265_v1 }
 0x434   :  { %v2170_v5 = vadd.f32 %v2169_v24, %v2002_v0 }
 0x436   :  { %v2171_v33 = vadd.f32 %v2170_v5, %v2003_v34 }
 0x438   :  { %v2172_v18 = vadd.f32 %v2171_v33, %v2004_v3 }
 0x43a   :  { %v2173_v56 = vadd.f32 %v2172_v18, %v2005_v23 }
 0x43c   :  { %v2174_v36 = vadd.f32 %v2173_v56, %v2006_v45 }
 0x43e   :  { %v2175_v0 = vadd.f32 %v2174_v36, %v2007_v41 }
 0x440   :  { %v2176_v24 = vadd.f32 %v2175_v0, %v2008_v32  ;;  %v9936_v32 = vld [vmem:[#allocation29_spill] sm:$0xff]  ;;  %v9937_v0 = vld [vmem:[#allocation30_spill] sm:$0xff] }
 0x442   :  { %v2177_v60 = vrot.slane %v2176_v24, 4 }
 0x444   :  { %v2178_v61 = vadd.f32 %v2177_v60, %v2176_v24  ;;  %v9938_v24 = vld [vmem:[#allocation31_spill] sm:$0xff] }
 0x446   :  { %v2179_v34 = vrot.slane %v2178_v61, 2 }
 0x448   :  { %v2180_v5 = vadd.f32 %v2179_v34, %v2178_v61  ;;  %v9935_v61 = vld [vmem:[#allocation28_spill] sm:$0xff] }
 0x44a   :  { %v2181_v19 = vrot.slane %v2180_v5, 1 }
 0x44c   :  { %v2182_v44 = vadd.f32 %v2181_v19, %v2180_v5  ;;  %v9939_v5 = vld [vmem:[#allocation32_spill] sm:$0xff] }
 0x44e   :  { %v2183_v3 = vmul.f32 %v2182_v44, %v5250_v43  ;;  %v9933_v44 = vld [vmem:[#allocation27_spill] sm:$0xff] }
 0x450   :  { %v2184_v33 = vadd.f32 1e-05, %v2183_v3 }
 0x452   :  { %3403 = vrsqrt.f32 %v2184_v33  ;;  %vm2191_vm5 = vweird.f32 %v2184_v33 }
 0x458   :  { %v3404_v23 = vpop.eup %3403 }
 0x459   :  { %v2186_v18 = vmul.f32 %v3404_v23, %v2184_v33  ;;  %vm2192_vm4 = vweird.f32 %v3404_v23  ;;  %v9940_v33 = vld [vmem:[#allocation33_spill] sm:$0xff] }
 0x45a   :  { %vm2193_vm6 = vmor %vm2191_vm5, %vm2192_vm4 }
 0x45b   :  { %v2187_v22 = vmul.f32 %v3404_v23, %v2186_v18  ;;  %v9941_v18 = vld [vmem:[#allocation34_spill] sm:$0xff] }
 0x45d   :  { %v2188_v62 = vmul.f32 0.5, %v2187_v22  ;;  %v9934_v22 = vld [vmem:[#allocation24_spill] sm:$0xff] }
 0x45f   :  { %v2189_v45 = vsub.f32 1.5, %v2188_v62 }
 0x461   :  { %v2190_v56 = vmul.f32 %v3404_v23, %v2189_v45 }
 0x463   :  { %v6431_v41 = vsel %vm2193_vm6, %v3404_v23, %v2190_v56  ;;  %v9943_v56 = vld [vmem:[#allocation35_spill] sm:$0xff] }
 0x464   :  { %9932 = vst [vmem:[#allocation124_spill] sm:$0xff] %v6431_v41  ;;  %v6435_v60 = vmul.f32 %v6431_v41, %v5270_v17  ;;  %v6439_v43 = vmul.f32 %v6431_v41, %v5275_v38  ;;  %v6443_v19 = vmul.f32 %v6431_v41, %v9933_v44  ;;  %v6447_v62 = vmul.f32 %v6431_v41, %v9934_v22  ;;  %v9945_v22 = vld [vmem:[#allocation36_spill] sm:$0xff] }
 0x465   :  { %v6451_v36 = vmul.f32 %v6431_v41, %v9935_v61  ;;  %v6455_v17 = vmul.f32 %v6431_v41, %v9936_v32  ;;  %v6459_v38 = vmul.f32 %v6431_v41, %v9937_v0  ;;  %v6463_v34 = vmul.f32 %v6431_v41, %v9938_v24  ;;  %v9947_v32 = vld [vmem:[#allocation37_spill] sm:$0xff]  ;;  %v9949_v24 = vld [vmem:[#allocation38_spill] sm:$0xff] }
 0x466   :  { %v6467_v3 = vmul.f32 %v6431_v41, %v9939_v5  ;;  %v6471_v23 = vmul.f32 %v6431_v41, %v9940_v33  ;;  %v6475_v45 = vmul.f32 %v6431_v41, %v9941_v18  ;;  %v6479_v44 = vmul.f32 %v6431_v41, %v9943_v56  ;;  %v9951_v33 = vld [vmem:[#allocation39_spill] sm:$0xff] }
 0x467   :  { %v6483_v61 = vmul.f32 %v6431_v41, %v9945_v22  ;;  %v6487_v0 = vmul.f32 %v6431_v41, %v9947_v32  ;;  %v6491_v5 = vmul.f32 %v6431_v41, %v9949_v24  ;;  %v6495_v18 = vmul.f32 %v6431_v41, %v9951_v33 }
 0x468   :  { %9942 = vst [vmem:[#allocation125_spill] sm:$0xff] %v6475_v45  ;;  %v9953_v45 = vld [vmem:[#allocation40_spill] sm:$0xff] }
 0x469   :  { %9944 = vst [vmem:[#allocation126_spill] sm:$0xff] %v6479_v44  ;;  %v6499_v56 = vmul.f32 %v6431_v41, %v9953_v45  ;;  %v9955_v44 = vld [vmem:[#allocation41_spill] sm:$0xff] }
 0x46a   :  { %9946 = vst [vmem:[#allocation127_spill] sm:$0xff] %v6483_v61  ;;  %v6503_v22 = vmul.f32 %v6431_v41, %v9955_v44  ;;  %v9957_v61 = vld [vmem:[#allocation42_spill] sm:$0xff] }
 0x46b   :  { %9948 = vst [vmem:[#allocation27_spill] sm:$0xff] %v6487_v0  ;;  %v6507_v32 = vmul.f32 %v6431_v41, %v9957_v61  ;;  %v9959_v0 = vld [vmem:[#allocation43_spill] sm:$0xff] }
 0x46c   :  { %9950 = vst [vmem:[#allocation24_spill] sm:$0xff] %v6491_v5  ;;  %v6511_v24 = vmul.f32 %v6431_v41, %v9959_v0  ;;  %v9961_v5 = vld [vmem:[#allocation44_spill] sm:$0xff] }
 0x46d   :  { %9952 = vst [vmem:[#allocation28_spill] sm:$0xff] %v6495_v18  ;;  %v6515_v33 = vmul.f32 %v6431_v41, %v9961_v5  ;;  %v9963_v18 = vld [vmem:[#allocation45_spill] sm:$0xff] }
 0x46e   :  { %9954 = vst [vmem:[#allocation29_spill] sm:$0xff] %v6499_v56  ;;  %v6519_v45 = vmul.f32 %v6431_v41, %v9963_v18  ;;  %v9965_v56 = vld [vmem:[#allocation46_spill] sm:$0xff] }
 0x46f   :  { %9956 = vst [vmem:[#allocation30_spill] sm:$0xff] %v6503_v22  ;;  %v6523_v44 = vmul.f32 %v6431_v41, %v9965_v56  ;;  %v9967_v22 = vld [vmem:[#allocation47_spill] sm:$0xff] }
 0x470   :  { %9958 = vst [vmem:[#allocation31_spill] sm:$0xff] %v6507_v32  ;;  %v6527_v61 = vmul.f32 %v6431_v41, %v9967_v22  ;;  %v9969_v32 = vld [vmem:[#allocation48_spill] sm:$0xff] }
 0x471   :  { %9960 = vst [vmem:[#allocation32_spill] sm:$0xff] %v6511_v24  ;;  %v6531_v0 = vmul.f32 %v6431_v41, %v9969_v32  ;;  %v9971_v24 = vld [vmem:[#allocation49_spill] sm:$0xff] }
 0x472   :  { %9962 = vst [vmem:[#allocation33_spill] sm:$0xff] %v6515_v33  ;;  %v6535_v5 = vmul.f32 %v6431_v41, %v9971_v24  ;;  %v9973_v33 = vld [vmem:[#allocation50_spill] sm:$0xff] }
 0x473   :  { %9964 = vst [vmem:[#allocation34_spill] sm:$0xff] %v6519_v45  ;;  %v6539_v18 = vmul.f32 %v6431_v41, %v9973_v33  ;;  %v9975_v45 = vld [vmem:[#allocation51_spill] sm:$0xff] }
 0x474   :  { %9966 = vst [vmem:[#allocation35_spill] sm:$0xff] %v6523_v44  ;;  %v6543_v56 = vmul.f32 %v6431_v41, %v9975_v45  ;;  %v9977_v44 = vld [vmem:[#allocation52_spill] sm:$0xff] }
 0x475   :  { %9968 = vst [vmem:[#allocation36_spill] sm:$0xff] %v6527_v61  ;;  %v6547_v22 = vmul.f32 %v6431_v41, %v9977_v44  ;;  %v9979_v61 = vld [vmem:[#allocation53_spill] sm:$0xff] }
 0x476   :  { %9970 = vst [vmem:[#allocation37_spill] sm:$0xff] %v6531_v0  ;;  %v6551_v32 = vmul.f32 %v6431_v41, %v9979_v61  ;;  %v9981_v0 = vld [vmem:[#allocation54_spill] sm:$0xff] }
 0x477   :  { %9972 = vst [vmem:[#allocation38_spill] sm:$0xff] %v6535_v5  ;;  %v6555_v24 = vmul.f32 %v6431_v41, %v9981_v0  ;;  %v9983_v5 = vld [vmem:[#allocation55_spill] sm:$0xff] }
 0x478   :  { %9974 = vst [vmem:[#allocation39_spill] sm:$0xff] %v6539_v18  ;;  %v6559_v33 = vmul.f32 %v6431_v41, %v9983_v5  ;;  %v9985_v18 = vld [vmem:[#allocation56_spill] sm:$0xff] }
 0x479   :  { %9976 = vst [vmem:[#allocation40_spill] sm:$0xff] %v6543_v56  ;;  %v6563_v45 = vmul.f32 %v6431_v41, %v9985_v18  ;;  %v9987_v56 = vld [vmem:[#allocation57_spill] sm:$0xff] }
 0x47a   :  { %9978 = vst [vmem:[#allocation41_spill] sm:$0xff] %v6547_v22  ;;  %v6567_v44 = vmul.f32 %v6431_v41, %v9987_v56  ;;  %v9989_v22 = vld [vmem:[#allocation58_spill] sm:$0xff] }
 0x47b   :  { %9980 = vst [vmem:[#allocation42_spill] sm:$0xff] %v6551_v32  ;;  %v6571_v61 = vmul.f32 %v6431_v41, %v9989_v22  ;;  %v9991_v32 = vld [vmem:[#allocation59_spill] sm:$0xff] }
 0x47c   :  { %9982 = vst [vmem:[#allocation43_spill] sm:$0xff] %v6555_v24  ;;  %v6575_v0 = vmul.f32 %v6431_v41, %v9991_v32  ;;  %v9993_v24 = vld [vmem:[#allocation60_spill] sm:$0xff] }
 0x47d   :  { %9984 = vst [vmem:[#allocation44_spill] sm:$0xff] %v6559_v33  ;;  %v6579_v5 = vmul.f32 %v6431_v41, %v9993_v24  ;;  %v9995_v33 = vld [vmem:[#allocation61_spill] sm:$0xff] }
 0x47e   :  { %9986 = vst [vmem:[#allocation45_spill] sm:$0xff] %v6563_v45  ;;  %v6583_v18 = vmul.f32 %v6431_v41, %v9995_v33  ;;  %v9997_v45 = vld [vmem:[#allocation62_spill] sm:$0xff] }
 0x47f   :  { %9988 = vst [vmem:[#allocation46_spill] sm:$0xff] %v6567_v44  ;;  %v6587_v56 = vmul.f32 %v6431_v41, %v9997_v45  ;;  %v9999_v44 = vld [vmem:[#allocation63_spill] sm:$0xff] }
 0x480   :  { %9990 = vst [vmem:[#allocation47_spill] sm:$0xff] %v6571_v61  ;;  %v6591_v22 = vmul.f32 %v6431_v41, %v9999_v44  ;;  %v10001_v61 = vld [vmem:[#allocation64_spill] sm:$0xff] }
 0x481   :  { %9992 = vst [vmem:[#allocation48_spill] sm:$0xff] %v6575_v0  ;;  %v6595_v32 = vmul.f32 %v6431_v41, %v10001_v61  ;;  %v10003_v0 = vld [vmem:[#allocation65_spill] sm:$0xff] }
 0x482   :  { %9994 = vst [vmem:[#allocation49_spill] sm:$0xff] %v6579_v5  ;;  %v6599_v24 = vmul.f32 %v6431_v41, %v10003_v0  ;;  %v10005_v5 = vld [vmem:[#allocation66_spill] sm:$0xff] }
 0x483   :  { %9996 = vst [vmem:[#allocation50_spill] sm:$0xff] %v6583_v18  ;;  %v6603_v33 = vmul.f32 %v6431_v41, %v10005_v5  ;;  %v10007_v18 = vld [vmem:[#allocation67_spill] sm:$0xff] }
 0x484   :  { %9998 = vst [vmem:[#allocation51_spill] sm:$0xff] %v6587_v56  ;;  %v6607_v45 = vmul.f32 %v6431_v41, %v10007_v18  ;;  %v10009_v56 = vld [vmem:[#allocation68_spill] sm:$0xff] }
 0x485   :  { %10000 = vst [vmem:[#allocation52_spill] sm:$0xff] %v6591_v22  ;;  %v6611_v44 = vmul.f32 %v6431_v41, %v10009_v56  ;;  %v10011_v22 = vld [vmem:[#allocation70_spill] sm:$0xff] }
 0x486   :  { %10002 = vst [vmem:[#allocation53_spill] sm:$0xff] %v6595_v32  ;;  %v6615_v61 = vmul.f32 %v6431_v41, %v10011_v22  ;;  %v10013_v32 = vld [vmem:[#allocation69_spill] sm:$0xff] }
 0x487   :  { %10004 = vst [vmem:[#allocation54_spill] sm:$0xff] %v6599_v24  ;;  %v6619_v0 = vmul.f32 %v6431_v41, %v10013_v32  ;;  %v10015_v24 = vld [vmem:[#allocation71_spill] sm:$0xff] }
 0x488   :  { %10006 = vst [vmem:[#allocation55_spill] sm:$0xff] %v6603_v33  ;;  %v6623_v5 = vmul.f32 %v6431_v41, %v10015_v24  ;;  %v10017_v33 = vld [vmem:[#allocation72_spill] sm:$0xff] }
 0x489   :  { %10008 = vst [vmem:[#allocation56_spill] sm:$0xff] %v6607_v45  ;;  %v6627_v18 = vmul.f32 %v6431_v41, %v10017_v33  ;;  %v10019_v45 = vld [vmem:[#allocation73_spill] sm:$0xff] }
 0x48a   :  { %10010 = vst [vmem:[#allocation57_spill] sm:$0xff] %v6611_v44  ;;  %v6631_v56 = vmul.f32 %v6431_v41, %v10019_v45  ;;  %v10021_v44 = vld [vmem:[#allocation74_spill] sm:$0xff] }
 0x48b   :  { %10012 = vst [vmem:[#allocation58_spill] sm:$0xff] %v6615_v61  ;;  %v6635_v22 = vmul.f32 %v6431_v41, %v10021_v44  ;;  %v10023_v61 = vld [vmem:[#allocation75_spill] sm:$0xff] }
 0x48c   :  { %10014 = vst [vmem:[#allocation59_spill] sm:$0xff] %v6619_v0  ;;  %v6639_v32 = vmul.f32 %v6431_v41, %v10023_v61  ;;  %v10025_v0 = vld [vmem:[#allocation76_spill] sm:$0xff] }
 0x48d   :  { %10016 = vst [vmem:[#allocation60_spill] sm:$0xff] %v6623_v5  ;;  %v6643_v24 = vmul.f32 %v6431_v41, %v10025_v0  ;;  %v10027_v5 = vld [vmem:[#allocation87_spill] sm:$0xff] }
 0x48e   :  { %10018 = vst [vmem:[#allocation61_spill] sm:$0xff] %v6627_v18  ;;  %v6647_v33 = vmul.f32 %v6431_v41, %v10027_v5  ;;  %v10029_v18 = vld [vmem:[#allocation88_spill] sm:$0xff] }
 0x48f   :  { %10020 = vst [vmem:[#allocation62_spill] sm:$0xff] %v6631_v56  ;;  %v6651_v45 = vmul.f32 %v6431_v41, %v10029_v18  ;;  %v10031_v56 = vld [vmem:[#allocation10_spill] sm:$0xff] }
 0x490   :  { %10022 = vst [vmem:[#allocation63_spill] sm:$0xff] %v6635_v22  ;;  %v6655_v44 = vmul.f32 %v6431_v41, %v10031_v56  ;;  %v10033_v22 = vld [vmem:[#allocation12_spill] sm:$0xff] }
 0x491   :  { %10024 = vst [vmem:[#allocation64_spill] sm:$0xff] %v6639_v32  ;;  %v6659_v61 = vmul.f32 %v6431_v41, %v10033_v22  ;;  %v10035_v32 = vld [vmem:[#allocation14_spill] sm:$0xff] }
 0x492   :  { %10026 = vst [vmem:[#allocation65_spill] sm:$0xff] %v6643_v24  ;;  %v6663_v0 = vmul.f32 %v6431_v41, %v10035_v32  ;;  %v10037_v24 = vld [vmem:[#allocation16_spill] sm:$0xff] }
 0x493   :  { %10028 = vst [vmem:[#allocation66_spill] sm:$0xff] %v6647_v33  ;;  %v6667_v5 = vmul.f32 %v6431_v41, %v10037_v24  ;;  %v10039_v33 = vld [vmem:[#allocation18_spill] sm:$0xff] }
 0x494   :  { %10030 = vst [vmem:[#allocation67_spill] sm:$0xff] %v6651_v45  ;;  %v6671_v18 = vmul.f32 %v6431_v41, %v10039_v33  ;;  %v10041_v45 = vld [vmem:[#allocation20_spill] sm:$0xff] }
 0x495   :  { %10032 = vst [vmem:[#allocation68_spill] sm:$0xff] %v6655_v44  ;;  %v6675_v56 = vmul.f32 %v6431_v41, %v10041_v45  ;;  %v10043_v44 = vld [vmem:[#allocation22_spill] sm:$0xff] }
 0x496   :  { %10034 = vst [vmem:[#allocation70_spill] sm:$0xff] %v6659_v61  ;;  %v6679_v22 = vmul.f32 %v6431_v41, %v10043_v44  ;;  %v10045_v61 = vld [vmem:[#allocation26_spill] sm:$0xff] }
 0x497   :  { %10036 = vst [vmem:[#allocation69_spill] sm:$0xff] %v6663_v0  ;;  %v6683_v32 = vmul.f32 %v6431_v41, %v10045_v61  ;;  %v10047_v0 = vld [vmem:[#allocation89_spill] sm:$0xff] }
 0x498   :  { %10038 = vst [vmem:[#allocation71_spill] sm:$0xff] %v6667_v5  ;;  %v6687_v24 = vmul.f32 %v6431_v41, %v10047_v0  ;;  %v10049_v5 = vld [vmem:[#allocation90_spill] sm:$0xff] }
 0x499   :  { %10040 = vst [vmem:[#allocation72_spill] sm:$0xff] %v6671_v18  ;;  %v6691_v33 = vmul.f32 %v6431_v41, %v10049_v5  ;;  %v10051_v18 = vld [vmem:[#allocation91_spill] sm:$0xff] }
 0x49a   :  { %10042 = vst [vmem:[#allocation73_spill] sm:$0xff] %v6675_v56  ;;  %v6695_v45 = vmul.f32 %v6431_v41, %v10051_v18  ;;  %v10053_v56 = vld [vmem:[#allocation92_spill] sm:$0xff] }
 0x49b   :  { %10044 = vst [vmem:[#allocation74_spill] sm:$0xff] %v6679_v22  ;;  %v6699_v44 = vmul.f32 %v6431_v41, %v10053_v56  ;;  %v10055_v22 = vld [vmem:[#allocation93_spill] sm:$0xff] }
 0x49c   :  { %10046 = vst [vmem:[#allocation75_spill] sm:$0xff] %v6683_v32  ;;  %v6703_v61 = vmul.f32 %v6431_v41, %v10055_v22  ;;  %v10057_v32 = vld [vmem:[#allocation94_spill] sm:$0xff] }
 0x49d   :  { %10048 = vst [vmem:[#allocation76_spill] sm:$0xff] %v6687_v24  ;;  %v6707_v0 = vmul.f32 %v6431_v41, %v10057_v32  ;;  %v10059_v24 = vld [vmem:[#allocation95_spill] sm:$0xff] }
 0x49e   :  { %10050 = vst [vmem:[#allocation87_spill] sm:$0xff] %v6691_v33  ;;  %v6711_v5 = vmul.f32 %v6431_v41, %v10059_v24  ;;  %v10061_v33 = vld [vmem:[#allocation96_spill] sm:$0xff] }
 0x49f   :  { %10052 = vst [vmem:[#allocation88_spill] sm:$0xff] %v6695_v45  ;;  %v6715_v18 = vmul.f32 %v6431_v41, %v10061_v33  ;;  %v10063_v45 = vld [vmem:[#allocation97_spill] sm:$0xff] }
 0x4a0   :  { %10054 = vst [vmem:[#allocation10_spill] sm:$0xff] %v6699_v44  ;;  %v6719_v56 = vmul.f32 %v6431_v41, %v10063_v45  ;;  %v10065_v44 = vld [vmem:[#allocation98_spill] sm:$0xff] }
 0x4a1   :  { %10056 = vst [vmem:[#allocation12_spill] sm:$0xff] %v6703_v61  ;;  %v6723_v22 = vmul.f32 %v6431_v41, %v10065_v44  ;;  %v10067_v61 = vld [vmem:[#allocation99_spill] sm:$0xff] }
 0x4a2   :  { %10058 = vst [vmem:[#allocation14_spill] sm:$0xff] %v6707_v0  ;;  %v6727_v32 = vmul.f32 %v6431_v41, %v10067_v61  ;;  %v10069_v0 = vld [vmem:[#allocation100_spill] sm:$0xff] }
 0x4a3   :  { %10060 = vst [vmem:[#allocation16_spill] sm:$0xff] %v6711_v5  ;;  %v6731_v24 = vmul.f32 %v6431_v41, %v10069_v0  ;;  %v10071_v5 = vld [vmem:[#allocation101_spill] sm:$0xff] }
 0x4a4   :  { %10062 = vst [vmem:[#allocation18_spill] sm:$0xff] %v6715_v18  ;;  %v6735_v33 = vmul.f32 %v6431_v41, %v10071_v5  ;;  %v10073_v18 = vld [vmem:[#allocation102_spill] sm:$0xff] }
 0x4a5   :  { %10064 = vst [vmem:[#allocation20_spill] sm:$0xff] %v6719_v56  ;;  %v6739_v45 = vmul.f32 %v6431_v41, %v10073_v18  ;;  %v10075_v56 = vld [vmem:[#allocation103_spill] sm:$0xff] }
 0x4a6   :  { %10066 = vst [vmem:[#allocation22_spill] sm:$0xff] %v6723_v22  ;;  %v6743_v44 = vmul.f32 %v6431_v41, %v10075_v56  ;;  %v10076_v22 = vld [vmem:[#allocation104_spill] sm:$0xff] }
 0x4a7   :  { %10068 = vst [vmem:[#allocation26_spill] sm:$0xff] %v6727_v32  ;;  %v6747_v61 = vmul.f32 %v6431_v41, %v10076_v22  ;;  %v10078_v32 = vld [vmem:[#allocation105_spill] sm:$0xff]  ;;  %v6767_v22 = vmul.f32 %v6431_v41, %v5917_v42 }
 0x4a8   :  { %10070 = vst [vmem:[#allocation89_spill] sm:$0xff] %v6731_v24  ;;  %v6751_v0 = vmul.f32 %v6431_v41, %v10078_v32  ;;  %v10079_v24 = vld [vmem:[#allocation2_spill] sm:$0xff] }
 0x4a9   :  { %10072 = vst [vmem:[#allocation90_spill] sm:$0xff] %v6735_v33  ;;  %v6755_v5 = vmul.f32 %v6431_v41, %v10079_v24  ;;  %v10081_v33 = vld [vmem:[#allocation3_spill] sm:$0xff]  ;;  %v6775_v24 = vmul.f32 %v6431_v41, %v5931_v48 }
 0x4aa   :  { %10074 = vst [vmem:[#allocation91_spill] sm:$0xff] %v6739_v45  ;;  %v6759_v18 = vmul.f32 %v6431_v41, %v10081_v33  ;;  %v10082_v45 = vld [vmem:[#allocation4_spill] sm:$0xff] }
 0x4ab   :  { %10077 = vst [vmem:[#allocation92_spill] sm:$0xff] %v6747_v61  ;;  %v6763_v56 = vmul.f32 %v6431_v41, %v10082_v45  ;;  %v10084_v61 = vld [vmem:[#allocation5_spill] sm:$0xff]  ;;  %v6783_v45 = vmul.f32 %v6431_v41, %v5945_v25 }
 0x4ac   :  { %10080 = vst [vmem:[#allocation93_spill] sm:$0xff] %v6755_v5  ;;  %v6771_v32 = vmul.f32 %v6431_v41, %v10084_v61  ;;  %v10086_v5 = vld [vmem:[#allocation6_spill] sm:$0xff]  ;;  %v6791_v61 = vmul.f32 %v6431_v41, %v5959_v8 }
 0x4ad   :  { %10083 = vst [vmem:[#allocation94_spill] sm:$0xff] %v6763_v56  ;;  %v6779_v33 = vmul.f32 %v6431_v41, %v10086_v5  ;;  %v10088_v56 = vld [vmem:[#allocation7_spill] sm:$0xff]  ;;  %v6799_v5 = vmul.f32 %v6431_v41, %v5973_v13  ;;  %v6819_v13 = vmul.f32 %v6431_v41, %v6008_v26  ;;  %v6839_v26 = vmul.f32 %v6431_v41, %v6043_v58 }
 0x4ae   :  { %10085 = vst [vmem:[#allocation95_spill] sm:$0xff] %v6771_v32  ;;  %v6787_v42 = vmul.f32 %v6431_v41, %v10088_v56  ;;  %v10090_v32 = vld [vmem:[#allocation8_spill] sm:$0xff]  ;;  %v6807_v56 = vmul.f32 %v6431_v41, %v5987_v63 }
 0x4af   :  { %10087 = vst [vmem:[#allocation96_spill] sm:$0xff] %v6779_v33  ;;  %v6795_v48 = vmul.f32 %v6431_v41, %v10090_v32  ;;  %v10091_v33 = vld [vmem:[#allocation9_spill] sm:$0xff]  ;;  %v6815_v32 = vmul.f32 %v6431_v41, %v6001_v53  ;;  %v6835_v53 = vmul.f32 %v6431_v41, %v6036_v46  ;;  %v6855_v46 = vmul.f32 %v6431_v41, %v6071_v28 }
 0x4b0   :  { %10089 = vst [vmem:[#allocation97_spill] sm:$0xff] %v6787_v42  ;;  %v6803_v25 = vmul.f32 %v6431_v41, %v10091_v33  ;;  %v10094_v42 = vld [vmem:[#allocation11_spill] sm:$0xff]  ;;  %v6823_v33 = vmul.f32 %v6431_v41, %v6015_v27 }
 0x4b1   :  { %10093 = vst [vmem:[#allocation99_spill] sm:$0xff] %v6807_v56  ;;  %v6811_v8 = vmul.f32 %v6431_v41, %v10094_v42  ;;  %v10097_v56 = vld [vmem:[#allocation15_spill] sm:$0xff] }
 0x4b2   :  { %10092 = vst [vmem:[#allocation98_spill] sm:$0xff] %v6803_v25  ;;  %v10096_v25 = vld [vmem:[#allocation13_spill] sm:$0xff]  ;;  %v6831_v42 = vmul.f32 %v6431_v41, %v10097_v56  ;;  %v6851_v56 = vmul.f32 %v6431_v41, %v6064_v15  ;;  %v6871_v15 = vmul.f32 %v6431_v41, %v6099_v2  ;;  %v6891_v2 = vmul.f32 %v6431_v41, %v6134_v35 }
 0x4b3   :  { %10095 = vst [vmem:[#allocation100_spill] sm:$0xff] %v6819_v13  ;;  %v6827_v63 = vmul.f32 %v6431_v41, %v10096_v25  ;;  %v10099_v13 = vld [vmem:[#allocation17_spill] sm:$0xff]  ;;  %v6847_v25 = vmul.f32 %v6431_v41, %v6057_v40  ;;  %v6911_v35 = vmul.f32 %v6431_v41, %v6169_v54 }
 0x4b4   :  { %10098 = vst [vmem:[#allocation101_spill] sm:$0xff] %v6835_v53  ;;  %v6843_v27 = vmul.f32 %v6431_v41, %v10099_v13  ;;  %v10103_v53 = vld [vmem:[#allocation19_spill] sm:$0xff]  ;;  %v6863_v13 = vmul.f32 %v6431_v41, %v6085_v51  ;;  %v6883_v51 = vmul.f32 %v6431_v41, %v6120_v12  ;;  %v6903_v12 = vmul.f32 %v6431_v41, %v6155_v20 }
 0x4b5   :  { %10101 = vst [vmem:[#allocation103_spill] sm:$0xff] %v6851_v56  ;;  %v6859_v58 = vmul.f32 %v6431_v41, %v10103_v53  ;;  %v10106_v56 = vld [vmem:[#allocation23_spill] sm:$0xff]  ;;  %v6923_v20 = vmul.f32 %v6431_v41, %v6190_v55  ;;  %v6943_v55 = vmul.f32 %v6431_v41, %v6225_v52  ;;  %v6963_v52 = vmul.f32 %v6431_v41, %v6260_v37 }
 0x4b6   :  { %10100 = vst [vmem:[#allocation102_spill] sm:$0xff] %v6843_v27  ;;  %v10104_v27 = vld [vmem:[#allocation21_spill] sm:$0xff]  ;;  %v6875_v28 = vmul.f32 %v6431_v41, %v10106_v56  ;;  %v6983_v37 = vmul.f32 %v6431_v41, %v6295_v7 }
 0x4b7   :  { %10102 = vst [vmem:[#allocation104_spill] sm:$0xff] %v6855_v46  ;;  %v6867_v40 = vmul.f32 %v6431_v41, %v10104_v27  ;;  %v10108_v46 = vld [vmem:[#allocation25_spill] sm:$0xff]  ;;  %v6887_v27 = vmul.f32 %v6431_v41, %v6127_v6  ;;  %v6907_v6 = vmul.f32 %v6431_v41, %v6162_v47  ;;  %v6927_v47 = vmul.f32 %v6431_v41, %v6197_v31 }
 0x4b8   :  { %10105 = vst [vmem:[#allocation105_spill] sm:$0xff] %v6871_v15  ;;  %v6879_v53 = vmul.f32 %v6431_v41, %v10108_v46  ;;  %v10110_v15 = vld [vmem:[#allocation106_spill] sm:$0xff]  ;;  %v6947_v31 = vmul.f32 %v6431_v41, %v6232_v30 }
 0x4b9   :  { %10107 = vst [vmem:[#allocation2_spill] sm:$0xff] %v6875_v28  ;;  %v6895_v56 = vmul.f32 %v6431_v41, %v10110_v15  ;;  %v10111_v28 = vld [vmem:[#allocation107_spill] sm:$0xff] }
 0x4ba   :  { %10109 = vst [vmem:[#allocation3_spill] sm:$0xff] %v6891_v2  ;;  %v6899_v46 = vmul.f32 %v6431_v41, %v10111_v28  ;;  %v10113_v2 = vld [vmem:[#allocation108_spill] sm:$0xff]  ;;  %v6919_v28 = vmul.f32 %v6431_v41, %v6183_v9  ;;  %v6939_v9 = vmul.f32 %v6431_v41, %v6218_v49  ;;  %v6959_v49 = vmul.f32 %v6431_v41, %v6253_v29 }
 0x4bb   :  { %10112 = vst [vmem:[#allocation4_spill] sm:$0xff] %v6907_v6  ;;  %v6915_v15 = vmul.f32 %v6431_v41, %v10113_v2  ;;  %v10115_v6 = vld [vmem:[#allocation109_spill] sm:$0xff]  ;;  %v6935_v2 = vmul.f32 %v6431_v41, %v6211_v39  ;;  %v6955_v39 = vmul.f32 %v6431_v41, %v6246_v11  ;;  %v6975_v11 = vmul.f32 %v6431_v41, %v6281_v4 }
 0x4bc   :  { %10114 = vst [vmem:[#allocation5_spill] sm:$0xff] %v6927_v47  ;;  %v6931_v54 = vmul.f32 %v6431_v41, %v10115_v6  ;;  %v10117_v47 = vld [vmem:[#allocation110_spill] sm:$0xff]  ;;  %v6979_v29 = vmul.f32 %v6431_v41, %v6288_v59  ;;  %v6995_v4 = vmul.f32 %v6431_v41, %v6316_v14 }
 0x4bd   :  { %10116 = vst [vmem:[#allocation6_spill] sm:$0xff] %v6943_v55  ;;  %v6951_v6 = vmul.f32 %v6431_v41, %v10117_v47  ;;  %v10118_v55 = vld [vmem:[#allocation111_spill] sm:$0xff]  ;;  %v6971_v47 = vmul.f32 %v6431_v41, %v6274_v10  ;;  %v6991_v10 = vmul.f32 %v6431_v41, %v6309_v50  ;;  %v7016_v14 = vld [vmem:[%s8919_s3] ss:$0 sm:$0xff] }
 0x4be   :  { %v6967_v30 = vmul.f32 %v6431_v41, %v10118_v55  ;;  %10119 = vst [vmem:[#allocation7_spill] sm:$0xff] %v6975_v11  ;;  %v6987_v55 = vmul.f32 %v6431_v41, %v6302_v16  ;;  %v10125_v11 = vld [vmem:[#allocation112_spill] sm:$0xff] }
 0x4bf   :  { %10120 = vst [vmem:[#allocation8_spill] sm:$0xff] %v6979_v29  ;;  %v6999_v59 = vmul.f32 %v6431_v41, %v10125_v11  ;;  %v10127_v29 = vld [vmem:[#allocation113_spill] sm:$0xff] }
 0x4c0   :  { %10121 = vst [vmem:[#allocation9_spill] sm:$0xff] %v6983_v37  ;;  %v7003_v7 = vmul.f32 %v6431_v41, %v10127_v29  ;;  %v10129_v37 = vld [vmem:[#allocation114_spill] sm:$0xff] }
 0x4c1   :  { %10122 = vst [vmem:[#allocation11_spill] sm:$0xff] %v6987_v55  ;;  %v7007_v16 = vmul.f32 %v6431_v41, %v10129_v37  ;;  %v10131_v55 = vld [vmem:[#allocation115_spill] sm:$0xff] }
 0x4c2   :  { %10123 = vst [vmem:[#allocation13_spill] sm:$0xff] %v6991_v10  ;;  %v7011_v50 = vmul.f32 %v6431_v41, %v10131_v55 }
 0x4c3   :  { %10124 = vst [vmem:[#allocation15_spill] sm:$0xff] %v6995_v4  ;;  %v10134_v4 = vld [vmem:[#allocation116_spill] sm:$0xff] }
 0x4c4   :  { %10126 = vst [vmem:[#allocation17_spill] sm:$0xff] %v6999_v59  ;;  %v7020_v11 = vmul.f32 %v6431_v41, %v10134_v4  ;;  %v10135_v59 = vld [vmem:[#allocation117_spill] sm:$0xff]  ;;  %v7040_v4 = vmul.f32 %v6431_v41, %v6386_v21 }
 0x4c5   :  { %10128 = vst [vmem:[#allocation19_spill] sm:$0xff] %v7003_v7  ;;  %v7024_v29 = vmul.f32 %v6431_v41, %v10135_v59  ;;  %v10137_v7 = vld [vmem:[#allocation118_spill] sm:$0xff]  ;;  %v7044_v59 = vmul.f32 %v6431_v41, %v6393_v57 }
 0x4c6   :  { %10130 = vst [vmem:[#allocation21_spill] sm:$0xff] %v7007_v16  ;;  %v7028_v37 = vmul.f32 %v6431_v41, %v10137_v7  ;;  %v10139_v16 = vld [vmem:[#allocation119_spill] sm:$0xff] }
 0x4c7   :  { %10132 = vst [vmem:[#allocation23_spill] sm:$0xff] %v7011_v50  ;;  %v7032_v55 = vmul.f32 %v6431_v41, %v10139_v16  ;;  %v10141_v50 = vld [vmem:[#allocation120_spill] sm:$0xff] }
 0x4c8   :  { %10133 = vst [vmem:[#allocation25_spill] sm:$0xff] %v7016_v14  ;;  %v7036_v10 = vmul.f32 %v6431_v41, %v10141_v50 }
 0x4c9   :  { %10136 = vst [vmem:[#allocation106_spill] sm:$0xff] %v7024_v29  ;;  %v10145_v29 = vld [vmem:[#allocation121_spill] sm:$0xff] }
 0x4ca   :  { %10138 = vst [vmem:[#allocation107_spill] sm:$0xff] %v7028_v37  ;;  %v7048_v7 = vmul.f32 %v6431_v41, %v10145_v29  ;;  %v10146_v37 = vld [vmem:[#allocation122_spill] sm:$0xff] }
 0x4cb   :  { %10140 = vst [vmem:[#allocation108_spill] sm:$0xff] %v7032_v55  ;;  %v7052_v16 = vmul.f32 %v6431_v41, %v10146_v37  ;;  %v10147_v55 = vld [vmem:[#allocation123_spill] sm:$0xff]  ;;  %v7072_v37 = vmul.f32 %v6431_v41, %v5265_v1  ;;  %v7092_v1 = vmul.f32 %v7016_v14, %v6451_v36  ;;  %v7112_v36 = vmul.f32 %v7016_v14, %v6471_v23 }
 0x4cc   :  { %10142 = vst [vmem:[#allocation109_spill] sm:$0xff] %v7036_v10  ;;  %v7056_v50 = vmul.f32 %v6431_v41, %v10147_v55  ;;  %v10148_v10 = vld [vmem:[#allocation128_spill] sm:$0xff]  ;;  %v7076_v55 = vmul.f32 %v7016_v14, %v6435_v60  ;;  %v7096_v60 = vmul.f32 %v7016_v14, %v6455_v17 }
 0x4cd   :  { %10143 = vst [vmem:[#allocation110_spill] sm:$0xff] %v7040_v4  ;;  %v7060_v21 = vmul.f32 %v6431_v41, %v10148_v10  ;;  %v10149_v4 = vld [vmem:[#allocation129_spill] sm:$0xff]  ;;  %v7080_v10 = vmul.f32 %v7016_v14, %v6439_v43  ;;  %v7100_v43 = vmul.f32 %v7016_v14, %v6459_v38 }
 0x4ce   :  { %10144 = vst [vmem:[#allocation111_spill] sm:$0xff] %v7044_v59  ;;  %v7064_v57 = vmul.f32 %v6431_v41, %v10149_v4  ;;  %v10150_v59 = vld [vmem:[#allocation130_spill] sm:$0xff]  ;;  %v7084_v4 = vmul.f32 %v7016_v14, %v6443_v19  ;;  %v7104_v19 = vmul.f32 %v7016_v14, %v6463_v34 }
 0x4cf   :  { %v7068_v29 = vmul.f32 %v6431_v41, %v10150_v59  ;;  %v7088_v59 = vmul.f32 %v7016_v14, %v6447_v62  ;;  %10151 = vst [vmem:[#allocation112_spill] sm:$0xff] %v7096_v60  ;;  %v7108_v62 = vmul.f32 %v7016_v14, %v6467_v3  ;;  %v10156_v41 = vld [vmem:[#allocation125_spill] sm:$0xff]  ;;  %v10158_v60 = vld [vmem:[#allocation126_spill] sm:$0xff] }
 0x4d0   :  { %10152 = vst [vmem:[#allocation113_spill] sm:$0xff] %v7100_v43  ;;  %v7116_v17 = vmul.f32 %v7016_v14, %v10156_v41  ;;  %v7120_v38 = vmul.f32 %v7016_v14, %v10158_v60  ;;  %v10160_v43 = vld [vmem:[#allocation127_spill] sm:$0xff] }
 0x4d1   :  { %10153 = vst [vmem:[#allocation114_spill] sm:$0xff] %v7104_v19  ;;  %v7124_v34 = vmul.f32 %v7016_v14, %v10160_v43  ;;  %v10162_v19 = vld [vmem:[#allocation27_spill] sm:$0xff] }
 0x4d2   :  { %10154 = vst [vmem:[#allocation115_spill] sm:$0xff] %v7108_v62  ;;  %v7128_v3 = vmul.f32 %v7016_v14, %v10162_v19  ;;  %v10164_v62 = vld [vmem:[#allocation24_spill] sm:$0xff] }
 0x4d3   :  { %10155 = vst [vmem:[#allocation116_spill] sm:$0xff] %v7112_v36  ;;  %v7132_v23 = vmul.f32 %v7016_v14, %v10164_v62  ;;  %v10166_v36 = vld [vmem:[#allocation28_spill] sm:$0xff] }
 0x4d4   :  { %10157 = vst [vmem:[#allocation117_spill] sm:$0xff] %v7116_v17  ;;  %v7136_v41 = vmul.f32 %v7016_v14, %v10166_v36  ;;  %v10168_v17 = vld [vmem:[#allocation29_spill] sm:$0xff] }
 0x4d5   :  { %10159 = vst [vmem:[#allocation118_spill] sm:$0xff] %v7120_v38  ;;  %v7140_v60 = vmul.f32 %v7016_v14, %v10168_v17  ;;  %v10170_v38 = vld [vmem:[#allocation30_spill] sm:$0xff] }
 0x4d6   :  { %10161 = vst [vmem:[#allocation119_spill] sm:$0xff] %v7124_v34  ;;  %v7144_v43 = vmul.f32 %v7016_v14, %v10170_v38  ;;  %v10172_v34 = vld [vmem:[#allocation31_spill] sm:$0xff] }
 0x4d7   :  { %10163 = vst [vmem:[#allocation120_spill] sm:$0xff] %v7128_v3  ;;  %v7148_v19 = vmul.f32 %v7016_v14, %v10172_v34  ;;  %v10174_v3 = vld [vmem:[#allocation32_spill] sm:$0xff] }
 0x4d8   :  { %10165 = vst [vmem:[#allocation121_spill] sm:$0xff] %v7132_v23  ;;  %v7152_v62 = vmul.f32 %v7016_v14, %v10174_v3  ;;  %v10176_v23 = vld [vmem:[#allocation33_spill] sm:$0xff] }
 0x4d9   :  { %10167 = vst [vmem:[#allocation122_spill] sm:$0xff] %v7136_v41  ;;  %v7156_v36 = vmul.f32 %v7016_v14, %v10176_v23  ;;  %v10178_v41 = vld [vmem:[#allocation34_spill] sm:$0xff] }
 0x4da   :  { %10169 = vst [vmem:[#allocation123_spill] sm:$0xff] %v7140_v60  ;;  %v7160_v17 = vmul.f32 %v7016_v14, %v10178_v41  ;;  %v10180_v60 = vld [vmem:[#allocation35_spill] sm:$0xff] }
 0x4db   :  { %10171 = vst [vmem:[#allocation128_spill] sm:$0xff] %v7144_v43  ;;  %v7164_v38 = vmul.f32 %v7016_v14, %v10180_v60  ;;  %v10182_v43 = vld [vmem:[#allocation36_spill] sm:$0xff] }
 0x4dc   :  { %10173 = vst [vmem:[#allocation129_spill] sm:$0xff] %v7148_v19  ;;  %v7168_v34 = vmul.f32 %v7016_v14, %v10182_v43  ;;  %v10184_v19 = vld [vmem:[#allocation37_spill] sm:$0xff] }
 0x4dd   :  { %10175 = vst [vmem:[#allocation130_spill] sm:$0xff] %v7152_v62  ;;  %v7172_v3 = vmul.f32 %v7016_v14, %v10184_v19  ;;  %v10186_v62 = vld [vmem:[#allocation38_spill] sm:$0xff] }
 0x4de   :  { %10177 = vst [vmem:[#allocation125_spill] sm:$0xff] %v7156_v36  ;;  %v7176_v23 = vmul.f32 %v7016_v14, %v10186_v62  ;;  %v10188_v36 = vld [vmem:[#allocation39_spill] sm:$0xff] }
 0x4df   :  { %10179 = vst [vmem:[#allocation126_spill] sm:$0xff] %v7160_v17  ;;  %v7180_v41 = vmul.f32 %v7016_v14, %v10188_v36  ;;  %v10190_v17 = vld [vmem:[#allocation40_spill] sm:$0xff] }
 0x4e0   :  { %10181 = vst [vmem:[#allocation127_spill] sm:$0xff] %v7164_v38  ;;  %v7184_v60 = vmul.f32 %v7016_v14, %v10190_v17  ;;  %v10192_v38 = vld [vmem:[#allocation41_spill] sm:$0xff] }
 0x4e1   :  { %10183 = vst [vmem:[#allocation27_spill] sm:$0xff] %v7168_v34  ;;  %v7188_v43 = vmul.f32 %v7016_v14, %v10192_v38  ;;  %v10194_v34 = vld [vmem:[#allocation42_spill] sm:$0xff] }
 0x4e2   :  { %10185 = vst [vmem:[#allocation24_spill] sm:$0xff] %v7172_v3  ;;  %v7192_v19 = vmul.f32 %v7016_v14, %v10194_v34  ;;  %v10196_v3 = vld [vmem:[#allocation43_spill] sm:$0xff] }
 0x4e3   :  { %10187 = vst [vmem:[#allocation28_spill] sm:$0xff] %v7176_v23  ;;  %v7196_v62 = vmul.f32 %v7016_v14, %v10196_v3  ;;  %v10198_v23 = vld [vmem:[#allocation67_spill] sm:$0xff] }
 0x4e4   :  { %10189 = vst [vmem:[#allocation29_spill] sm:$0xff] %v7180_v41  ;;  %v7200_v36 = vmul.f32 %v7016_v14, %v10198_v23  ;;  %v10200_v41 = vld [vmem:[#allocation68_spill] sm:$0xff] }
 0x4e5   :  { %10191 = vst [vmem:[#allocation30_spill] sm:$0xff] %v7184_v60  ;;  %v7204_v17 = vmul.f32 %v7016_v14, %v10200_v41  ;;  %v10202_v60 = vld [vmem:[#allocation70_spill] sm:$0xff] }
 0x4e6   :  { %10193 = vst [vmem:[#allocation31_spill] sm:$0xff] %v7188_v43  ;;  %v7208_v38 = vmul.f32 %v7016_v14, %v10202_v60  ;;  %v10204_v43 = vld [vmem:[#allocation69_spill] sm:$0xff] }
 0x4e7   :  { %10195 = vst [vmem:[#allocation32_spill] sm:$0xff] %v7192_v19  ;;  %v7212_v34 = vmul.f32 %v7016_v14, %v10204_v43  ;;  %v10206_v19 = vld [vmem:[#allocation71_spill] sm:$0xff] }
 0x4e8   :  { %10197 = vst [vmem:[#allocation33_spill] sm:$0xff] %v7196_v62  ;;  %v7216_v3 = vmul.f32 %v7016_v14, %v10206_v19  ;;  %v10208_v62 = vld [vmem:[#allocation72_spill] sm:$0xff] }
 0x4e9   :  { %10199 = vst [vmem:[#allocation34_spill] sm:$0xff] %v7200_v36  ;;  %v7220_v23 = vmul.f32 %v7016_v14, %v10208_v62  ;;  %v10210_v36 = vld [vmem:[#allocation73_spill] sm:$0xff] }
 0x4ea   :  { %10201 = vst [vmem:[#allocation35_spill] sm:$0xff] %v7204_v17  ;;  %v7224_v41 = vmul.f32 %v7016_v14, %v10210_v36  ;;  %v10212_v17 = vld [vmem:[#allocation74_spill] sm:$0xff] }
 0x4eb   :  { %10203 = vst [vmem:[#allocation36_spill] sm:$0xff] %v7208_v38  ;;  %v7228_v60 = vmul.f32 %v7016_v14, %v10212_v17  ;;  %v10214_v38 = vld [vmem:[#allocation75_spill] sm:$0xff] }
 0x4ec   :  { %10205 = vst [vmem:[#allocation37_spill] sm:$0xff] %v7212_v34  ;;  %v7232_v43 = vmul.f32 %v7016_v14, %v10214_v38  ;;  %v10216_v34 = vld [vmem:[#allocation76_spill] sm:$0xff] }
 0x4ed   :  { %10207 = vst [vmem:[#allocation38_spill] sm:$0xff] %v7216_v3  ;;  %v7236_v19 = vmul.f32 %v7016_v14, %v10216_v34  ;;  %v10218_v3 = vld [vmem:[#allocation87_spill] sm:$0xff] }
 0x4ee   :  { %10209 = vst [vmem:[#allocation39_spill] sm:$0xff] %v7220_v23  ;;  %v7240_v62 = vmul.f32 %v7016_v14, %v10218_v3  ;;  %v10220_v23 = vld [vmem:[#allocation88_spill] sm:$0xff] }
 0x4ef   :  { %10211 = vst [vmem:[#allocation40_spill] sm:$0xff] %v7224_v41  ;;  %v7244_v36 = vmul.f32 %v7016_v14, %v10220_v23  ;;  %v10222_v41 = vld [vmem:[#allocation10_spill] sm:$0xff] }
 0x4f0   :  { %10213 = vst [vmem:[#allocation41_spill] sm:$0xff] %v7228_v60  ;;  %v7248_v17 = vmul.f32 %v7016_v14, %v10222_v41  ;;  %v10224_v60 = vld [vmem:[#allocation12_spill] sm:$0xff] }
 0x4f1   :  { %10215 = vst [vmem:[#allocation42_spill] sm:$0xff] %v7232_v43  ;;  %v7252_v38 = vmul.f32 %v7016_v14, %v10224_v60  ;;  %v10226_v43 = vld [vmem:[#allocation14_spill] sm:$0xff] }
 0x4f2   :  { %10217 = vst [vmem:[#allocation43_spill] sm:$0xff] %v7236_v19  ;;  %v7256_v34 = vmul.f32 %v7016_v14, %v10226_v43  ;;  %v10228_v19 = vld [vmem:[#allocation16_spill] sm:$0xff] }
 0x4f3   :  { %10219 = vst [vmem:[#allocation67_spill] sm:$0xff] %v7240_v62  ;;  %v7260_v3 = vmul.f32 %v7016_v14, %v10228_v19  ;;  %v10230_v62 = vld [vmem:[#allocation18_spill] sm:$0xff] }
 0x4f4   :  { %10221 = vst [vmem:[#allocation68_spill] sm:$0xff] %v7244_v36  ;;  %v7264_v23 = vmul.f32 %v7016_v14, %v10230_v62  ;;  %v10232_v36 = vld [vmem:[#allocation20_spill] sm:$0xff] }
 0x4f5   :  { %10223 = vst [vmem:[#allocation70_spill] sm:$0xff] %v7248_v17  ;;  %v7268_v41 = vmul.f32 %v7016_v14, %v10232_v36  ;;  %v10233_v17 = vld [vmem:[#allocation22_spill] sm:$0xff] }
 0x4f6   :  { %10225 = vst [vmem:[#allocation69_spill] sm:$0xff] %v7252_v38  ;;  %v7272_v60 = vmul.f32 %v7016_v14, %v10233_v17  ;;  %v10235_v38 = vld [vmem:[#allocation26_spill] sm:$0xff]  ;;  %v7292_v17 = vmul.f32 %v7016_v14, %v6743_v44 }
 0x4f7   :  { %10227 = vst [vmem:[#allocation71_spill] sm:$0xff] %v7256_v34  ;;  %v7276_v43 = vmul.f32 %v7016_v14, %v10235_v38  ;;  %v10236_v34 = vld [vmem:[#allocation89_spill] sm:$0xff] }
 0x4f8   :  { %10229 = vst [vmem:[#allocation72_spill] sm:$0xff] %v7260_v3  ;;  %v7280_v19 = vmul.f32 %v7016_v14, %v10236_v34  ;;  %v10238_v3 = vld [vmem:[#allocation90_spill] sm:$0xff]  ;;  %v7300_v34 = vmul.f32 %v7016_v14, %v6751_v0 }
 0x4f9   :  { %10231 = vst [vmem:[#allocation73_spill] sm:$0xff] %v7264_v23  ;;  %v7284_v62 = vmul.f32 %v7016_v14, %v10238_v3  ;;  %v10239_v23 = vld [vmem:[#allocation91_spill] sm:$0xff] }
 0x4fa   :  { %10234 = vst [vmem:[#allocation74_spill] sm:$0xff] %v7272_v60  ;;  %v7288_v36 = vmul.f32 %v7016_v14, %v10239_v23  ;;  %v10241_v60 = vld [vmem:[#allocation92_spill] sm:$0xff]  ;;  %v7308_v23 = vmul.f32 %v7016_v14, %v6759_v18 }
 0x4fb   :  { %10237 = vst [vmem:[#allocation75_spill] sm:$0xff] %v7280_v19  ;;  %v7296_v38 = vmul.f32 %v7016_v14, %v10241_v60  ;;  %v10243_v19 = vld [vmem:[#allocation93_spill] sm:$0xff]  ;;  %v7316_v60 = vmul.f32 %v7016_v14, %v6767_v22 }
 0x4fc   :  { %10240 = vst [vmem:[#allocation76_spill] sm:$0xff] %v7288_v36  ;;  %v7304_v3 = vmul.f32 %v7016_v14, %v10243_v19  ;;  %v10245_v36 = vld [vmem:[#allocation94_spill] sm:$0xff]  ;;  %v7324_v19 = vmul.f32 %v7016_v14, %v6775_v24  ;;  %v7344_v24 = vmul.f32 %v7016_v14, %v6795_v48  ;;  %v7364_v48 = vmul.f32 %v7016_v14, %v6815_v32 }
 0x4fd   :  { %10242 = vst [vmem:[#allocation87_spill] sm:$0xff] %v7296_v38  ;;  %v7312_v44 = vmul.f32 %v7016_v14, %v10245_v36  ;;  %v10247_v38 = vld [vmem:[#allocation95_spill] sm:$0xff]  ;;  %v7332_v36 = vmul.f32 %v7016_v14, %v6783_v45 }
 0x4fe   :  { %10244 = vst [vmem:[#allocation88_spill] sm:$0xff] %v7304_v3  ;;  %v7320_v0 = vmul.f32 %v7016_v14, %v10247_v38  ;;  %v10248_v3 = vld [vmem:[#allocation96_spill] sm:$0xff]  ;;  %v7340_v38 = vmul.f32 %v7016_v14, %v6791_v61  ;;  %v7360_v61 = vmul.f32 %v7016_v14, %v6811_v8  ;;  %v7380_v8 = vmul.f32 %v7016_v14, %v6831_v42 }
 0x4ff   :  { %10246 = vst [vmem:[#allocation10_spill] sm:$0xff] %v7312_v44  ;;  %v7328_v18 = vmul.f32 %v7016_v14, %v10248_v3  ;;  %v10251_v44 = vld [vmem:[#allocation97_spill] sm:$0xff]  ;;  %v7348_v3 = vmul.f32 %v7016_v14, %v6799_v5 }
 0x500   :  { %10250 = vst [vmem:[#allocation14_spill] sm:$0xff] %v7332_v36  ;;  %v7336_v22 = vmul.f32 %v7016_v14, %v10251_v44  ;;  %v10254_v36 = vld [vmem:[#allocation99_spill] sm:$0xff] }
 0x501   :  { %10249 = vst [vmem:[#allocation12_spill] sm:$0xff] %v7328_v18  ;;  %v10253_v18 = vld [vmem:[#allocation98_spill] sm:$0xff]  ;;  %v7356_v44 = vmul.f32 %v7016_v14, %v10254_v36  ;;  %v7376_v36 = vmul.f32 %v7016_v14, %v6827_v63  ;;  %v7396_v63 = vmul.f32 %v7016_v14, %v6847_v25  ;;  %v7416_v25 = vmul.f32 %v7016_v14, %v6867_v40 }
 0x502   :  { %10252 = vst [vmem:[#allocation16_spill] sm:$0xff] %v7344_v24  ;;  %v7352_v45 = vmul.f32 %v7016_v14, %v10253_v18  ;;  %v10256_v24 = vld [vmem:[#allocation100_spill] sm:$0xff]  ;;  %v7372_v18 = vmul.f32 %v7016_v14, %v6823_v33  ;;  %v7436_v40 = vmul.f32 %v7016_v14, %v6887_v27 }
 0x503   :  { %10255 = vst [vmem:[#allocation18_spill] sm:$0xff] %v7360_v61  ;;  %v7368_v5 = vmul.f32 %v7016_v14, %v10256_v24  ;;  %v10260_v61 = vld [vmem:[#allocation101_spill] sm:$0xff]  ;;  %v7388_v24 = vmul.f32 %v7016_v14, %v6839_v26  ;;  %v7408_v26 = vmul.f32 %v7016_v14, %v6859_v58  ;;  %v7428_v58 = vmul.f32 %v7016_v14, %v6879_v53 }
 0x504   :  { %10258 = vst [vmem:[#allocation22_spill] sm:$0xff] %v7376_v36  ;;  %v7384_v32 = vmul.f32 %v7016_v14, %v10260_v61  ;;  %v10263_v36 = vld [vmem:[#allocation103_spill] sm:$0xff]  ;;  %v7448_v53 = vmul.f32 %v7016_v14, %v6899_v46  ;;  %v7468_v46 = vmul.f32 %v7016_v14, %v6919_v28  ;;  %v7488_v28 = vmul.f32 %v7016_v14, %v6939_v9 }
 0x505   :  { %10257 = vst [vmem:[#allocation20_spill] sm:$0xff] %v7368_v5  ;;  %v10261_v5 = vld [vmem:[#allocation102_spill] sm:$0xff]  ;;  %v7400_v42 = vmul.f32 %v7016_v14, %v10263_v36  ;;  %v7508_v9 = vmul.f32 %v7016_v14, %v6959_v49 }
 0x506   :  { %10259 = vst [vmem:[#allocation26_spill] sm:$0xff] %v7380_v8  ;;  %v7392_v33 = vmul.f32 %v7016_v14, %v10261_v5  ;;  %v10265_v8 = vld [vmem:[#allocation104_spill] sm:$0xff]  ;;  %v7412_v5 = vmul.f32 %v7016_v14, %v6863_v13  ;;  %v7432_v13 = vmul.f32 %v7016_v14, %v6883_v51  ;;  %v7452_v51 = vmul.f32 %v7016_v14, %v6903_v12 }
 0x507   :  { %10262 = vst [vmem:[#allocation89_spill] sm:$0xff] %v7396_v63  ;;  %v7404_v61 = vmul.f32 %v7016_v14, %v10265_v8  ;;  %v10267_v63 = vld [vmem:[#allocation105_spill] sm:$0xff]  ;;  %v7472_v12 = vmul.f32 %v7016_v14, %v6923_v20 }
 0x508   :  { %10264 = vst [vmem:[#allocation90_spill] sm:$0xff] %v7400_v42  ;;  %v7420_v36 = vmul.f32 %v7016_v14, %v10267_v63  ;;  %v10268_v42 = vld [vmem:[#allocation2_spill] sm:$0xff] }
 0x509   :  { %10266 = vst [vmem:[#allocation91_spill] sm:$0xff] %v7416_v25  ;;  %v7424_v8 = vmul.f32 %v7016_v14, %v10268_v42  ;;  %v10273_v25 = vld [vmem:[#allocation3_spill] sm:$0xff]  ;;  %v7444_v42 = vmul.f32 %v7016_v14, %v6895_v56  ;;  %v7464_v56 = vmul.f32 %v7016_v14, %v6915_v15  ;;  %v7484_v15 = vmul.f32 %v7016_v14, %v6935_v2 }
 0x50a   :  { %10270 = vst [vmem:[#allocation93_spill] sm:$0xff] %v7428_v58  ;;  %v7440_v63 = vmul.f32 %v7016_v14, %v10273_v25  ;;  %v7460_v25 = vmul.f32 %v7016_v14, %v6911_v35  ;;  %v7480_v35 = vmul.f32 %v7016_v14, %v6931_v54  ;;  %v7500_v54 = vmul.f32 %v7016_v14, %v6951_v6  ;;  %v10386_v58 = vld [vmem:[#allocation32_spill] sm:$0xff] }
 0x50b   :  { %10269 = vst [vmem:[#allocation92_spill] sm:$0xff] %v7424_v8  ;;  %v7504_v2 = vmul.f32 %v7016_v14, %v6955_v39  ;;  %v7520_v6 = vmul.f32 %v7016_v14, %v6971_v47  ;;  %v10387_v8 = vld [vmem:[#allocation33_spill] sm:$0xff] }
 0x50c   :  { %10271 = vst [vmem:[#allocation94_spill] sm:$0xff] %v7432_v13  ;;  %v10278_v13 = vld [vmem:[#allocation4_spill] sm:$0xff] }
 0x50d   :  { %10272 = vst [vmem:[#allocation95_spill] sm:$0xff] %v7436_v40  ;;  %v7456_v27 = vmul.f32 %v7016_v14, %v10278_v13  ;;  %v10385_v40 = vld [vmem:[#allocation31_spill] sm:$0xff] }
 0x50e   :  { %10274 = vst [vmem:[#allocation96_spill] sm:$0xff] %v7440_v63  ;;  %v10383_v63 = vld [vmem:[#allocation29_spill] sm:$0xff] }
 0x50f   :  { %10275 = vst [vmem:[#allocation97_spill] sm:$0xff] %v7444_v42  ;;  %v10382_v42 = vld [vmem:[#allocation28_spill] sm:$0xff] }
 0x510   :  { %10276 = vst [vmem:[#allocation98_spill] sm:$0xff] %v7448_v53  ;;  %v10379_v53 = vld [vmem:[#allocation127_spill] sm:$0xff] }
 0x511   :  { %10277 = vst [vmem:[#allocation99_spill] sm:$0xff] %v7452_v51  ;;  %v10284_v51 = vld [vmem:[#allocation5_spill] sm:$0xff] }
 0x512   :  { %10279 = vst [vmem:[#allocation100_spill] sm:$0xff] %v7456_v27  ;;  %v7476_v13 = vmul.f32 %v7016_v14, %v10284_v51  ;;  %v7496_v51 = vmul.f32 %v7016_v14, %v6947_v31  ;;  %v7516_v31 = vmul.f32 %v7016_v14, %v6967_v30 }
 0x513   :  { %10280 = vst [vmem:[#allocation101_spill] sm:$0xff] %v7460_v25 }
 0x514   :  { %10281 = vst [vmem:[#allocation102_spill] sm:$0xff] %v7464_v56 }
 0x515   :  { %10282 = vst [vmem:[#allocation103_spill] sm:$0xff] %v7468_v46  ;;  %v10289_v46 = vld [vmem:[#allocation6_spill] sm:$0xff] }
 0x516   :  { %10283 = vst [vmem:[#allocation104_spill] sm:$0xff] %v7472_v12  ;;  %v7492_v20 = vmul.f32 %v7016_v14, %v10289_v46  ;;  %v7512_v46 = vmul.f32 %v7016_v14, %v6963_v52 }
 0x517   :  { %10285 = vst [vmem:[#allocation105_spill] sm:$0xff] %v7476_v13 }
 0x518   :  { %10286 = vst [vmem:[#allocation2_spill] sm:$0xff] %v7480_v35  ;;  %v10367_v35 = vld [vmem:[#allocation117_spill] sm:$0xff] }
 0x519   :  { %10287 = vst [vmem:[#allocation3_spill] sm:$0xff] %v7484_v15 }
 0x51a   :  { %10288 = vst [vmem:[#allocation4_spill] sm:$0xff] %v7488_v28  ;;  %v10358_v28 = vld [vmem:[#allocation59_spill] sm:$0xff] }
 0x51b   :  { %10290 = vst [vmem:[#allocation5_spill] sm:$0xff] %v7492_v20 }
 0x51c   :  { %10291 = vst [vmem:[#allocation6_spill] sm:$0xff] %v7496_v51 }
 0x51d   :  { %10292 = vst [vmem:[#allocation131_spill] sm:$0xff] %v7500_v54  ;;  %v10298_v54 = vld [vmem:[#allocation7_spill] sm:$0xff] }
 0x51e   :  { %10293 = vst [vmem:[#allocation132_spill] sm:$0xff] %v7504_v2  ;;  %v7524_v39 = vmul.f32 %v7016_v14, %v10298_v54  ;;  %v10300_v2 = vld [vmem:[#allocation8_spill] sm:$0xff] }
 0x51f   :  { %10294 = vst [vmem:[#allocation133_spill] sm:$0xff] %v7508_v9  ;;  %v7528_v49 = vmul.f32 %v7016_v14, %v10300_v2  ;;  %v10302_v9 = vld [vmem:[#allocation9_spill] sm:$0xff] }
 0x520   :  { %10295 = vst [vmem:[#allocation134_spill] sm:$0xff] %v7512_v46  ;;  %v7532_v52 = vmul.f32 %v7016_v14, %v10302_v9  ;;  %v10304_v46 = vld [vmem:[#allocation11_spill] sm:$0xff] }
 0x521   :  { %10296 = vst [vmem:[#allocation135_spill] sm:$0xff] %v7516_v31  ;;  %v7536_v30 = vmul.f32 %v7016_v14, %v10304_v46  ;;  %v10306_v31 = vld [vmem:[#allocation13_spill] sm:$0xff] }
 0x522   :  { %10297 = vst [vmem:[#allocation136_spill] sm:$0xff] %v7520_v6  ;;  %v7540_v47 = vmul.f32 %v7016_v14, %v10306_v31  ;;  %v10308_v6 = vld [vmem:[#allocation15_spill] sm:$0xff] }
 0x523   :  { %10299 = vst [vmem:[#allocation7_spill] sm:$0xff] %v7524_v39  ;;  %v7544_v54 = vmul.f32 %v7016_v14, %v10308_v6  ;;  %v10310_v39 = vld [vmem:[#allocation17_spill] sm:$0xff]  ;;  %v7565_v6 = vld [vmem:[%s8920_s4] ss:$0 sm:$0xff] }
 0x524   :  { %10301 = vst [vmem:[#allocation8_spill] sm:$0xff] %v7528_v49  ;;  %v7548_v2 = vmul.f32 %v7016_v14, %v10310_v39  ;;  %v10312_v49 = vld [vmem:[#allocation19_spill] sm:$0xff]  ;;  %v7569_v39 = vmul.f32 %v7016_v14, %v7020_v11 }
 0x525   :  { %10303 = vst [vmem:[#allocation9_spill] sm:$0xff] %v7532_v52  ;;  %v7552_v9 = vmul.f32 %v7016_v14, %v10312_v49  ;;  %v10314_v52 = vld [vmem:[#allocation21_spill] sm:$0xff] }
 0x526   :  { %10305 = vst [vmem:[#allocation11_spill] sm:$0xff] %v7536_v30  ;;  %v7556_v46 = vmul.f32 %v7016_v14, %v10314_v52  ;;  %v10316_v30 = vld [vmem:[#allocation23_spill] sm:$0xff] }
 0x527   :  { %10307 = vst [vmem:[#allocation13_spill] sm:$0xff] %v7540_v47  ;;  %v7560_v31 = vmul.f32 %v7016_v14, %v10316_v30  ;;  %v10327_v47 = vld [vmem:[#allocation110_spill] sm:$0xff] }
 0x528   :  { %10309 = vst [vmem:[#allocation15_spill] sm:$0xff] %v7544_v54  ;;  %v7589_v11 = vmul.f32 %v7016_v14, %v10327_v47  ;;  %v7609_v47 = vmul.f32 %v7016_v14, %v7060_v21  ;;  %v10338_v21 = vld [vmem:[#allocation44_spill] sm:$0xff] }
 0x529   :  { %10311 = vst [vmem:[#allocation17_spill] sm:$0xff] %v7548_v2  ;;  %v10319_v2 = vld [vmem:[#allocation106_spill] sm:$0xff] }
 0x52a   :  { %10313 = vst [vmem:[#allocation19_spill] sm:$0xff] %v7552_v9  ;;  %v7573_v49 = vmul.f32 %v7016_v14, %v10319_v2  ;;  %v10321_v9 = vld [vmem:[#allocation107_spill] sm:$0xff] }
 0x52b   :  { %10315 = vst [vmem:[#allocation21_spill] sm:$0xff] %v7556_v46  ;;  %v7577_v52 = vmul.f32 %v7016_v14, %v10321_v9  ;;  %v10323_v46 = vld [vmem:[#allocation108_spill] sm:$0xff]  ;;  %v7597_v9 = vmul.f32 %v7016_v14, %v7048_v7  ;;  %v7617_v7 = vmul.f32 %v7016_v14, %v7068_v29  ;;  %v2543_v29 = vadd.f32 %v7565_v6, %v7084_v4  ;;  %v10343_v4 = vld [vmem:[#allocation49_spill] sm:$0xff] }
 0x52c   :  { %10317 = vst [vmem:[#allocation23_spill] sm:$0xff] %v7560_v31  ;;  %v7581_v30 = vmul.f32 %v7016_v14, %v10323_v46  ;;  %v10325_v31 = vld [vmem:[#allocation109_spill] sm:$0xff]  ;;  %v7601_v46 = vmul.f32 %v7016_v14, %v7052_v16  ;;  %v7621_v16 = vmul.f32 %v7016_v14, %v7072_v37  ;;  %v10340_v37 = vld [vmem:[#allocation46_spill] sm:$0xff] }
 0x52d   :  { %10318 = vst [vmem:[#allocation137_spill] sm:$0xff] %v7569_v39  ;;  %v7585_v54 = vmul.f32 %v7016_v14, %v10325_v31  ;;  %v10329_v39 = vld [vmem:[#allocation111_spill] sm:$0xff]  ;;  %v7605_v31 = vmul.f32 %v7016_v14, %v7056_v50  ;;  %v2541_v50 = vadd.f32 %v7565_v6, %v7076_v55 }
 0x52e   :  { %10320 = vst [vmem:[#allocation106_spill] sm:$0xff] %v7573_v49  ;;  %v7593_v2 = vmul.f32 %v7016_v14, %v10329_v39  ;;  %v7613_v39 = vmul.f32 %v7016_v14, %v7064_v57 }
 0x52f   :  { %10322 = vst [vmem:[#allocation107_spill] sm:$0xff] %v7577_v52 }
 0x530   :  { %10324 = vst [vmem:[#allocation108_spill] sm:$0xff] %v7581_v30 }
 0x531   :  { %10326 = vst [vmem:[#allocation109_spill] sm:$0xff] %v7585_v54 }
 0x532   :  { %10328 = vst [vmem:[#allocation110_spill] sm:$0xff] %v7589_v11 }
 0x533   :  { %10330 = vst [vmem:[#allocation111_spill] sm:$0xff] %v7593_v2 }
 0x534   :  { %10331 = vst [vmem:[#allocation138_spill] sm:$0xff] %v7597_v9  ;;  %v10342_v9 = vld [vmem:[#allocation48_spill] sm:$0xff] }
 0x535   :  { %10332 = vst [vmem:[#allocation139_spill] sm:$0xff] %v7601_v46  ;;  %v10339_v46 = vld [vmem:[#allocation45_spill] sm:$0xff] }
 0x536   :  { %10333 = vst [vmem:[#allocation140_spill] sm:$0xff] %v7605_v31  ;;  %v2542_v31 = vadd.f32 %v7565_v6, %v7080_v10  ;;  %v2400_v57 = vmul.f32 %v7016_v14, %v10339_v46  ;;  %v2403_v10 = vmul.f32 %v7016_v14, %v10342_v9  ;;  %v2404_v46 = vmul.f32 %v7016_v14, %v10343_v4  ;;  %v10349_v4 = vld [vmem:[#allocation54_spill] sm:$0xff] }
 0x537   :  { %10334 = vst [vmem:[#allocation141_spill] sm:$0xff] %v7609_v47  ;;  %v2399_v47 = vmul.f32 %v7016_v14, %v10338_v21  ;;  %v2545_v21 = vadd.f32 %v7565_v6, %v7092_v1  ;;  %v10347_v1 = vld [vmem:[#allocation52_spill] sm:$0xff]  ;;  %v2409_v52 = vmul.f32 %v7016_v14, %v10349_v4 }
 0x538   :  { %10335 = vst [vmem:[#allocation142_spill] sm:$0xff] %v7613_v39  ;;  %v10341_v39 = vld [vmem:[#allocation47_spill] sm:$0xff]  ;;  %v2407_v9 = vmul.f32 %v7016_v14, %v10347_v1  ;;  %v10353_v1 = vld [vmem:[#allocation57_spill] sm:$0xff] }
 0x539   :  { %10336 = vst [vmem:[#allocation143_spill] sm:$0xff] %v7617_v7  ;;  %v2544_v7 = vadd.f32 %v7565_v6, %v7088_v59  ;;  %v2402_v55 = vmul.f32 %v7016_v14, %v10341_v39  ;;  %v10344_v59 = vld [vmem:[#allocation50_spill] sm:$0xff]  ;;  %v10346_v39 = vld [vmem:[#allocation112_spill] sm:$0xff]  ;;  %v7674_v20 = vmul.f32 %v7016_v14, %v10353_v1  ;;  %v10362_v1 = vld [vmem:[#allocation115_spill] sm:$0xff] }
 0x53a   :  { %10337 = vst [vmem:[#allocation144_spill] sm:$0xff] %v7621_v16  ;;  %v2401_v16 = vmul.f32 %v7016_v14, %v10340_v37  ;;  %v2405_v2 = vmul.f32 %v7016_v14, %v10344_v59  ;;  %v10345_v37 = vld [vmem:[#allocation51_spill] sm:$0xff]  ;;  %v2546_v54 = vadd.f32 %v7565_v6, %v10346_v39  ;;  %v10350_v59 = vld [vmem:[#allocation113_spill] sm:$0xff] }
 0x53b   :  { %2710 = vst [vmem:[%s8921_s5] sm:$0xff] %v2541_v50  ;;  %v2406_v11 = vmul.f32 %v7016_v14, %v10345_v37  ;;  %v10348_v50 = vld [vmem:[#allocation53_spill] sm:$0xff]  ;;  %v2547_v49 = vadd.f32 %v7565_v6, %v10350_v59  ;;  %v10351_v37 = vld [vmem:[#allocation55_spill] sm:$0xff]  ;;  %v10356_v59 = vld [vmem:[#allocation58_spill] sm:$0xff] }
 0x53c   :  { %2711 = vst [vmem:[%s8921_s5 + $0x8] sm:$0xff] %v2542_v31  ;;  %v2408_v30 = vmul.f32 %v7016_v14, %v10348_v50  ;;  %v2410_v39 = vmul.f32 %v7016_v14, %v10351_v37  ;;  %v10352_v31 = vld [vmem:[#allocation56_spill] sm:$0xff]  ;;  %v10355_v50 = vld [vmem:[#allocation114_spill] sm:$0xff]  ;;  %v7687_v37 = vmul.f32 %v7016_v14, %v10358_v28 }
 0x53d   :  { %2712 = vst [vmem:[%s8921_s5 + $0x10] sm:$0xff] %v2543_v29  ;;  %v2411_v51 = vmul.f32 %v7016_v14, %v10352_v31  ;;  %v2548_v4 = vadd.f32 %v7565_v6, %v10355_v50  ;;  %v7683_v29 = vmul.f32 %v7016_v14, %v10356_v59  ;;  %v10360_v31 = vld [vmem:[#allocation60_spill] sm:$0xff]  ;;  %v10365_v59 = vld [vmem:[#allocation66_spill] sm:$0xff] }
 0x53e   :  { %10354 = vst [vmem:[#allocation44_spill] sm:$0xff] %v7674_v20  ;;  %v7691_v15 = vmul.f32 %v7016_v14, %v10360_v31  ;;  %v2549_v20 = vadd.f32 %v7565_v6, %v10362_v1  ;;  %v10366_v28 = vld [vmem:[#allocation116_spill] sm:$0xff]  ;;  %v2551_v31 = vadd.f32 %v7565_v6, %v10367_v35  ;;  %v10368_v1 = vld [vmem:[#allocation118_spill] sm:$0xff] }
 0x53f   :  { %2713 = vst [vmem:[%s8921_s5 + $0x18] sm:$0xff] %v2544_v7  ;;  %v10363_v7 = vld [vmem:[#allocation61_spill] sm:$0xff]  ;;  %v10372_v35 = vld [vmem:[#allocation122_spill] sm:$0xff] }
 0x540   :  { %10357 = vst [vmem:[#allocation45_spill] sm:$0xff] %v7683_v29  ;;  %v7700_v50 = vmul.f32 %v7016_v14, %v10363_v7  ;;  %v2431_v29 = vmul.f32 %v7016_v14, %v10365_v59  ;;  %v10371_v59 = vld [vmem:[#allocation121_spill] sm:$0xff] }
 0x541   :  { %10359 = vst [vmem:[#allocation46_spill] sm:$0xff] %v7687_v37  ;;  %v2550_v37 = vadd.f32 %v7565_v6, %v10366_v28  ;;  %v2555_v14 = vadd.f32 %v7565_v6, %v10371_v59  ;;  %v2556_v28 = vadd.f32 %v7565_v6, %v10372_v35  ;;  %v10378_v35 = vld [vmem:[#allocation126_spill] sm:$0xff] }
 0x542   :  { %10361 = vst [vmem:[#allocation47_spill] sm:$0xff] %v7691_v15  ;;  %v10369_v15 = vld [vmem:[#allocation119_spill] sm:$0xff] }
 0x543   :  { %2714 = vst [vmem:[%s8921_s5 + $0x20] sm:$0xff] %v2545_v21  ;;  %v2552_v21 = vadd.f32 %v7565_v6, %v10368_v1  ;;  %v2553_v7 = vadd.f32 %v7565_v6, %v10369_v15  ;;  %v10374_v1 = vld [vmem:[#allocation128_spill] sm:$0xff]  ;;  %v10375_v15 = vld [vmem:[#allocation129_spill] sm:$0xff] }
 0x544   :  { %10364 = vst [vmem:[#allocation48_spill] sm:$0xff] %v7700_v50  ;;  %v10370_v50 = vld [vmem:[#allocation120_spill] sm:$0xff]  ;;  %v2558_v56 = vadd.f32 %v7565_v6, %v10374_v1  ;;  %v2559_v25 = vadd.f32 %v7565_v6, %v10375_v15  ;;  %v7745_v1 = vadd.f32 %v7565_v6, %v10379_v53  ;;  %v7764_v53 = vadd.f32 %v7565_v6, %v10383_v63 }
 0x545   :  { %2715 = vst [vmem:[%s8921_s5 + $0x28] sm:$0xff] %v2546_v54  ;;  %v2554_v13 = vadd.f32 %v7565_v6, %v10370_v50  ;;  %v10373_v54 = vld [vmem:[#allocation123_spill] sm:$0xff]  ;;  %v10376_v50 = vld [vmem:[#allocation130_spill] sm:$0xff]  ;;  %v7783_v63 = vadd.f32 %v7565_v6, %v10387_v8  ;;  %v7804_v8 = vadd.f32 %v7565_v6, %v2403_v10  ;;  %v7825_v10 = vadd.f32 %v7565_v6, %v2409_v52 }
 0x546   :  { %2716 = vst [vmem:[%s8921_s5 + $0x30] sm:$0xff] %v2547_v49  ;;  %v2557_v12 = vadd.f32 %v7565_v6, %v10373_v54  ;;  %v2560_v59 = vadd.f32 %v7565_v6, %v10376_v50  ;;  %v10377_v49 = vld [vmem:[#allocation125_spill] sm:$0xff]  ;;  %v7741_v54 = vadd.f32 %v7565_v6, %v10378_v35  ;;  %v10381_v50 = vld [vmem:[#allocation24_spill] sm:$0xff]  ;;  %v7760_v35 = vadd.f32 %v7565_v6, %v10382_v42 }
 0x547   :  { %2717 = vst [vmem:[%s8921_s5 + $0x38] sm:$0xff] %v2548_v4  ;;  %v7737_v27 = vadd.f32 %v7565_v6, %v10377_v49  ;;  %v10380_v4 = vld [vmem:[#allocation27_spill] sm:$0xff]  ;;  %v7756_v49 = vadd.f32 %v7565_v6, %v10381_v50  ;;  %v7775_v50 = vadd.f32 %v7565_v6, %v10385_v40  ;;  %v7779_v42 = vadd.f32 %v7565_v6, %v10386_v58 }
 0x548   :  { %2718 = vst [vmem:[%s8921_s5 + $0x40] sm:$0xff] %v2549_v20  ;;  %v7752_v15 = vadd.f32 %v7565_v6, %v10380_v4  ;;  %v10384_v20 = vld [vmem:[#allocation30_spill] sm:$0xff]  ;;  %v7795_v40 = vadd.f32 %v7565_v6, %v2401_v16  ;;  %v7798_v58 = vadd.f32 %v7565_v6, %v2402_v55  ;;  %v7819_v16 = vadd.f32 %v7565_v6, %v2407_v9 }
 0x549   :  { %2719 = vst [vmem:[%s8921_s5 + $0x48] sm:$0xff] %v2550_v37  ;;  %v7771_v4 = vadd.f32 %v7565_v6, %v10384_v20  ;;  %v7789_v37 = vadd.f32 %v7565_v6, %v2399_v47  ;;  %v7792_v20 = vadd.f32 %v7565_v6, %v2400_v57  ;;  %v7810_v47 = vadd.f32 %v7565_v6, %v2405_v2  ;;  %v10388_v9 = vld [vmem:[#allocation34_spill] sm:$0xff] }
 0x54a   :  { %2720 = vst [vmem:[%s8921_s5 + $0x50] sm:$0xff] %v2551_v31  ;;  %v7807_v31 = vadd.f32 %v7565_v6, %v2404_v46  ;;  %v7813_v57 = vadd.f32 %v7565_v6, %v2406_v11  ;;  %v7822_v55 = vadd.f32 %v7565_v6, %v2408_v30  ;;  %v7828_v46 = vadd.f32 %v7565_v6, %v2410_v39  ;;  %v10391_v39 = vld [vmem:[#allocation36_spill] sm:$0xff] }
 0x54b   :  { %2721 = vst [vmem:[%s8921_s5 + $0x58] sm:$0xff] %v2552_v21  ;;  %v7834_v11 = vadd.f32 %v7565_v6, %v2411_v51  ;;  %v7837_v2 = vadd.f32 %v7565_v6, %v2431_v29  ;;  %v7841_v30 = vadd.f32 %v7565_v6, %v10388_v9  ;;  %v10390_v21 = vld [vmem:[#allocation35_spill] sm:$0xff]  ;;  %v10393_v51 = vld [vmem:[#allocation37_spill] sm:$0xff] }
 0x54c   :  { %2722 = vst [vmem:[%s8921_s5 + $0x60] sm:$0xff] %v2553_v7  ;;  %v7845_v52 = vadd.f32 %v7565_v6, %v10390_v21  ;;  %v7856_v29 = vadd.f32 %v7565_v6, %v10393_v51  ;;  %v10395_v7 = vld [vmem:[#allocation38_spill] sm:$0xff] }
 0x54d   :  { %2723 = vst [vmem:[%s8921_s5 + $0x68] sm:$0xff] %v2554_v13  ;;  %v7852_v13 = vadd.f32 %v7565_v6, %v10391_v39  ;;  %v7860_v9 = vadd.f32 %v7565_v6, %v10395_v7 }
 0x54e   :  { %10389 = vst [vmem:[#allocation49_spill] sm:$0xff] %v7841_v30  ;;  %v10397_v30 = vld [vmem:[#allocation39_spill] sm:$0xff] }
 0x54f   :  { %2724 = vst [vmem:[%s8921_s5 + $0x70] sm:$0xff] %v2555_v14  ;;  %v7864_v21 = vadd.f32 %v7565_v6, %v10397_v30  ;;  %v10398_v14 = vld [vmem:[#allocation40_spill] sm:$0xff] }
 0x550   :  { %10392 = vst [vmem:[#allocation50_spill] sm:$0xff] %v7852_v13  ;;  %v7871_v39 = vadd.f32 %v7565_v6, %v10398_v14  ;;  %v10400_v13 = vld [vmem:[#allocation41_spill] sm:$0xff] }
 0x551   :  { %10394 = vst [vmem:[#allocation51_spill] sm:$0xff] %v7856_v29  ;;  %v7875_v51 = vadd.f32 %v7565_v6, %v10400_v13  ;;  %v10402_v29 = vld [vmem:[#allocation42_spill] sm:$0xff] }
 0x552   :  { %10396 = vst [vmem:[#allocation112_spill] sm:$0xff] %v7860_v9  ;;  %v7879_v7 = vadd.f32 %v7565_v6, %v10402_v29  ;;  %v10404_v9 = vld [vmem:[#allocation43_spill] sm:$0xff] }
 0x553   :  { %2725 = vst [vmem:[%s8921_s5 + $0x78] sm:$0xff] %v2556_v28  ;;  %v7883_v30 = vadd.f32 %v7565_v6, %v10404_v9  ;;  %v10405_v28 = vld [vmem:[#allocation67_spill] sm:$0xff] }
 0x554   :  { %10399 = vst [vmem:[#allocation52_spill] sm:$0xff] %v7871_v39  ;;  %v7890_v14 = vadd.f32 %v7565_v6, %v10405_v28  ;;  %v10407_v39 = vld [vmem:[#allocation68_spill] sm:$0xff] }
 0x555   :  { %10401 = vst [vmem:[#allocation53_spill] sm:$0xff] %v7875_v51  ;;  %v7894_v13 = vadd.f32 %v7565_v6, %v10407_v39  ;;  %v10409_v51 = vld [vmem:[#allocation70_spill] sm:$0xff] }
 0x556   :  { %10403 = vst [vmem:[#allocation54_spill] sm:$0xff] %v7879_v7  ;;  %v7898_v29 = vadd.f32 %v7565_v6, %v10409_v51  ;;  %v10410_v7 = vld [vmem:[#allocation69_spill] sm:$0xff] }
 0x557   :  { %2726 = vst [vmem:[%s8921_s5 + $0x80] sm:$0xff] %v2557_v12  ;;  %v7902_v9 = vadd.f32 %v7565_v6, %v10410_v7  ;;  %v10411_v12 = vld [vmem:[#allocation71_spill] sm:$0xff]  ;;  %v7921_v7 = vadd.f32 %v7565_v6, %v7268_v41  ;;  %v7940_v41 = vadd.f32 %v7565_v6, %v7284_v62  ;;  %v7959_v62 = vadd.f32 %v7565_v6, %v7300_v34 }
 0x558   :  { %10406 = vst [vmem:[#allocation113_spill] sm:$0xff] %v7890_v14  ;;  %v7909_v28 = vadd.f32 %v7565_v6, %v10411_v12  ;;  %v10412_v14 = vld [vmem:[#allocation72_spill] sm:$0xff]  ;;  %v7979_v34 = vadd.f32 %v7565_v6, %v7316_v60 }
 0x559   :  { %10408 = vst [vmem:[#allocation55_spill] sm:$0xff] %v7894_v13  ;;  %v7913_v39 = vadd.f32 %v7565_v6, %v10412_v14  ;;  %v10414_v13 = vld [vmem:[#allocation73_spill] sm:$0xff]  ;;  %v7932_v14 = vadd.f32 %v7565_v6, %v7276_v43  ;;  %v7951_v43 = vadd.f32 %v7565_v6, %v7292_v17  ;;  %v7971_v17 = vadd.f32 %v7565_v6, %v7308_v23 }
 0x55a   :  { %2727 = vst [vmem:[%s8921_s5 + $0x88] sm:$0xff] %v2558_v56  ;;  %v7917_v51 = vadd.f32 %v7565_v6, %v10414_v13  ;;  %v10415_v56 = vld [vmem:[#allocation74_spill] sm:$0xff]  ;;  %v7991_v23 = vadd.f32 %v7565_v6, %v7324_v19  ;;  %v8011_v19 = vadd.f32 %v7565_v6, %v7340_v38  ;;  %v8031_v38 = vadd.f32 %v7565_v6, %v7356_v44 }
 0x55b   :  { %10413 = vst [vmem:[#allocation56_spill] sm:$0xff] %v7913_v39  ;;  %v7928_v12 = vadd.f32 %v7565_v6, %v10415_v56  ;;  %v10417_v39 = vld [vmem:[#allocation75_spill] sm:$0xff]  ;;  %v8051_v44 = vadd.f32 %v7565_v6, %v7372_v18  ;;  %v8071_v18 = vadd.f32 %v7565_v6, %v7388_v24  ;;  %v8091_v24 = vadd.f32 %v7565_v6, %v7404_v61 }
 0x55c   :  { %2728 = vst [vmem:[%s8921_s5 + $0x90] sm:$0xff] %v2559_v25  ;;  %v7936_v13 = vadd.f32 %v7565_v6, %v10417_v39  ;;  %v10418_v25 = vld [vmem:[#allocation76_spill] sm:$0xff]  ;;  %v8111_v61 = vadd.f32 %v7565_v6, %v7420_v36 }
 0x55d   :  { %10416 = vst [vmem:[#allocation57_spill] sm:$0xff] %v7932_v14  ;;  %v7947_v56 = vadd.f32 %v7565_v6, %v10418_v25  ;;  %v10420_v14 = vld [vmem:[#allocation87_spill] sm:$0xff] }
 0x55e   :  { %2729 = vst [vmem:[%s8921_s5 + $0x98] sm:$0xff] %v2560_v59  ;;  %v7955_v39 = vadd.f32 %v7565_v6, %v10420_v14  ;;  %v10421_v59 = vld [vmem:[#allocation88_spill] sm:$0xff] }
 0x55f   :  { %10419 = vst [vmem:[#allocation114_spill] sm:$0xff] %v7951_v43  ;;  %v7967_v25 = vadd.f32 %v7565_v6, %v10421_v59  ;;  %v10422_v43 = vld [vmem:[#allocation10_spill] sm:$0xff]  ;;  %v10424_v59 = vld [vmem:[#allocation12_spill] sm:$0xff] }
 0x560   :  { %2730 = vst [vmem:[%s8921_s5 + $0xa0] sm:$0xff] %v7737_v27  ;;  %v7975_v14 = vadd.f32 %v7565_v6, %v10422_v43  ;;  %v7987_v27 = vadd.f32 %v7565_v6, %v7320_v0  ;;  %v7995_v43 = vadd.f32 %v7565_v6, %v10424_v59  ;;  %v8007_v0 = vadd.f32 %v7565_v6, %v7336_v22 }
 0x561   :  { %2731 = vst [vmem:[%s8921_s5 + $0xa8] sm:$0xff] %v7741_v54  ;;  %v10426_v54 = vld [vmem:[#allocation16_spill] sm:$0xff]  ;;  %v8027_v22 = vadd.f32 %v7565_v6, %v7352_v45 }
 0x562   :  { %10423 = vst [vmem:[#allocation58_spill] sm:$0xff] %v7975_v14  ;;  %v10425_v14 = vld [vmem:[#allocation14_spill] sm:$0xff]  ;;  %v8015_v59 = vadd.f32 %v7565_v6, %v10426_v54 }
 0x563   :  { %v7999_v60 = vadd.f32 %v7565_v6, %v10425_v14  ;;  %2732 = vst [vmem:[%s8921_s5 + $0xb0] sm:$0xff] %v7745_v1  ;;  %v8019_v14 = vadd.f32 %v7565_v6, %v7348_v3  ;;  %v10428_v1 = vld [vmem:[#allocation18_spill] sm:$0xff]  ;;  %v8039_v3 = vadd.f32 %v7565_v6, %v7364_v48 }
 0x564   :  { %2733 = vst [vmem:[%s8921_s5 + $0xb8] sm:$0xff] %v7752_v15  ;;  %v8035_v54 = vadd.f32 %v7565_v6, %v10428_v1  ;;  %v10430_v15 = vld [vmem:[#allocation20_spill] sm:$0xff] }
 0x565   :  { %10427 = vst [vmem:[#allocation59_spill] sm:$0xff] %v8031_v38  ;;  %v8047_v45 = vadd.f32 %v7565_v6, %v10430_v15  ;;  %v10431_v38 = vld [vmem:[#allocation22_spill] sm:$0xff]  ;;  %v10433_v15 = vld [vmem:[#allocation89_spill] sm:$0xff] }
 0x566   :  { %10429 = vst [vmem:[#allocation60_spill] sm:$0xff] %v8035_v54  ;;  %v8055_v1 = vadd.f32 %v7565_v6, %v10431_v38  ;;  %v10432_v54 = vld [vmem:[#allocation26_spill] sm:$0xff]  ;;  %v8075_v38 = vadd.f32 %v7565_v6, %v7392_v33  ;;  %v8095_v33 = vadd.f32 %v7565_v6, %v7408_v26 }
 0x567   :  { %2734 = vst [vmem:[%s8921_s5 + $0xc0] sm:$0xff] %v7756_v49  ;;  %v8059_v48 = vadd.f32 %v7565_v6, %v10432_v54  ;;  %v8067_v49 = vadd.f32 %v7565_v6, %v7384_v32  ;;  %v8079_v54 = vadd.f32 %v7565_v6, %v10433_v15  ;;  %v8099_v15 = vadd.f32 %v7565_v6, %v7412_v5 }
 0x568   :  { %2735 = vst [vmem:[%s8921_s5 + $0xc8] sm:$0xff] %v7760_v35  ;;  %v10434_v35 = vld [vmem:[#allocation90_spill] sm:$0xff] }
 0x569   :  { %2736 = vst [vmem:[%s8921_s5 + $0xd0] sm:$0xff] %v7764_v53  ;;  %v8087_v32 = vadd.f32 %v7565_v6, %v10434_v35  ;;  %v10437_v53 = vld [vmem:[#allocation91_spill] sm:$0xff] }
 0x56a   :  { %10435 = vst [vmem:[#allocation115_spill] sm:$0xff] %v8091_v24  ;;  %v8107_v35 = vadd.f32 %v7565_v6, %v10437_v53  ;;  %v10440_v24 = vld [vmem:[#allocation92_spill] sm:$0xff] }
 0x56b   :  { %10436 = vst [vmem:[#allocation61_spill] sm:$0xff] %v8095_v33  ;;  %v8115_v26 = vadd.f32 %v7565_v6, %v10440_v24  ;;  %v10442_v33 = vld [vmem:[#allocation93_spill] sm:$0xff] }
 0x56c   :  { %2737 = vst [vmem:[%s8921_s5 + $0xd8] sm:$0xff] %v7771_v4  ;;  %v8119_v5 = vadd.f32 %v7565_v6, %v10442_v33  ;;  %v10443_v4 = vld [vmem:[#allocation94_spill] sm:$0xff] }
 0x56d   :  { %10438 = vst [vmem:[#allocation66_spill] sm:$0xff] %v8107_v35  ;;  %v8127_v53 = vadd.f32 %v7565_v6, %v10443_v4  ;;  %v10445_v35 = vld [vmem:[#allocation95_spill] sm:$0xff] }
 0x56e   :  { %10439 = vst [vmem:[#allocation116_spill] sm:$0xff] %v8111_v61  ;;  %v8131_v36 = vadd.f32 %v7565_v6, %v10445_v35  ;;  %v10447_v61 = vld [vmem:[#allocation96_spill] sm:$0xff] }
 0x56f   :  { %10441 = vst [vmem:[#allocation117_spill] sm:$0xff] %v8115_v26  ;;  %v8135_v24 = vadd.f32 %v7565_v6, %v10447_v61  ;;  %v10449_v26 = vld [vmem:[#allocation97_spill] sm:$0xff] }
 0x570   :  { %2738 = vst [vmem:[%s8921_s5 + $0xe0] sm:$0xff] %v7775_v50  ;;  %v8139_v33 = vadd.f32 %v7565_v6, %v10449_v26  ;;  %v10450_v50 = vld [vmem:[#allocation98_spill] sm:$0xff] }
 0x571   :  { %10444 = vst [vmem:[#allocation118_spill] sm:$0xff] %v8127_v53  ;;  %v8147_v4 = vadd.f32 %v7565_v6, %v10450_v50  ;;  %v10452_v53 = vld [vmem:[#allocation99_spill] sm:$0xff] }
 0x572   :  { %10446 = vst [vmem:[#allocation119_spill] sm:$0xff] %v8131_v36  ;;  %v8151_v35 = vadd.f32 %v7565_v6, %v10452_v53  ;;  %v10454_v36 = vld [vmem:[#allocation100_spill] sm:$0xff] }
 0x573   :  { %10448 = vst [vmem:[#allocation120_spill] sm:$0xff] %v8135_v24  ;;  %v8155_v61 = vadd.f32 %v7565_v6, %v10454_v36  ;;  %v10456_v24 = vld [vmem:[#allocation101_spill] sm:$0xff] }
 0x574   :  { %2739 = vst [vmem:[%s8921_s5 + $0xe8] sm:$0xff] %v7779_v42  ;;  %v8159_v26 = vadd.f32 %v7565_v6, %v10456_v24  ;;  %v10458_v42 = vld [vmem:[#allocation102_spill] sm:$0xff] }
 0x575   :  { %10451 = vst [vmem:[#allocation121_spill] sm:$0xff] %v8147_v4  ;;  %v8167_v50 = vadd.f32 %v7565_v6, %v10458_v42  ;;  %v10460_v4 = vld [vmem:[#allocation103_spill] sm:$0xff] }
 0x576   :  { %10453 = vst [vmem:[#allocation122_spill] sm:$0xff] %v8151_v35  ;;  %v8171_v53 = vadd.f32 %v7565_v6, %v10460_v4  ;;  %v10462_v35 = vld [vmem:[#allocation104_spill] sm:$0xff] }
 0x577   :  { %10455 = vst [vmem:[#allocation123_spill] sm:$0xff] %v8155_v61  ;;  %v8175_v36 = vadd.f32 %v7565_v6, %v10462_v35  ;;  %v10464_v61 = vld [vmem:[#allocation105_spill] sm:$0xff] }
 0x578   :  { %10457 = vst [vmem:[#allocation128_spill] sm:$0xff] %v8159_v26  ;;  %v8179_v24 = vadd.f32 %v7565_v6, %v10464_v61 }
 0x579   :  { %2740 = vst [vmem:[%s8921_s5 + $0xf0] sm:$0xff] %v7783_v63  ;;  %v10466_v63 = vld [vmem:[#allocation2_spill] sm:$0xff] }
 0x57a   :  { %10459 = vst [vmem:[#allocation129_spill] sm:$0xff] %v8167_v50  ;;  %v8187_v42 = vadd.f32 %v7565_v6, %v10466_v63  ;;  %v10468_v50 = vld [vmem:[#allocation3_spill] sm:$0xff] }
 0x57b   :  { %10461 = vst [vmem:[#allocation130_spill] sm:$0xff] %v8171_v53  ;;  %v8191_v4 = vadd.f32 %v7565_v6, %v10468_v50  ;;  %v10470_v53 = vld [vmem:[#allocation4_spill] sm:$0xff] }
 0x57c   :  { %10463 = vst [vmem:[#allocation125_spill] sm:$0xff] %v8175_v36  ;;  %v8195_v35 = vadd.f32 %v7565_v6, %v10470_v53  ;;  %v10472_v36 = vld [vmem:[#allocation5_spill] sm:$0xff] }
 0x57d   :  { %10465 = vst [vmem:[#allocation126_spill] sm:$0xff] %v8179_v24  ;;  %v8199_v61 = vadd.f32 %v7565_v6, %v10472_v36 }
 0x57e   :  { %2741 = vst [vmem:[%s8921_s5 + $0xf8] sm:$0xff] %v7789_v37  ;;  %v10474_v37 = vld [vmem:[#allocation6_spill] sm:$0xff] }
 0x57f   :  { %10467 = vst [vmem:[#allocation127_spill] sm:$0xff] %v8187_v42  ;;  %v8207_v63 = vadd.f32 %v7565_v6, %v10474_v37  ;;  %v10476_v42 = vld [vmem:[#allocation131_spill] sm:$0xff] }
 0x580   :  { %10469 = vst [vmem:[#allocation27_spill] sm:$0xff] %v8191_v4  ;;  %v8211_v50 = vadd.f32 %v7565_v6, %v10476_v42  ;;  %v10478_v4 = vld [vmem:[#allocation132_spill] sm:$0xff] }
 0x581   :  { %10471 = vst [vmem:[#allocation24_spill] sm:$0xff] %v8195_v35  ;;  %v8215_v53 = vadd.f32 %v7565_v6, %v10478_v4  ;;  %v10480_v35 = vld [vmem:[#allocation133_spill] sm:$0xff] }
 0x582   :  { %10473 = vst [vmem:[#allocation28_spill] sm:$0xff] %v8199_v61  ;;  %v8219_v36 = vadd.f32 %v7565_v6, %v10480_v35  ;;  %v10550_v61 = vld [vmem:[#allocation48_spill] sm:$0xff] }
 0x583   :  { %2742 = vst [vmem:[%s8921_s5 + $0x100] sm:$0xff] %v7792_v20  ;;  %v10482_v20 = vld [vmem:[#allocation134_spill] sm:$0xff] }
 0x584   :  { %10475 = vst [vmem:[#allocation29_spill] sm:$0xff] %v8207_v63  ;;  %v8227_v37 = vadd.f32 %v7565_v6, %v10482_v20  ;;  %v10484_v63 = vld [vmem:[#allocation135_spill] sm:$0xff] }
 0x585   :  { %10477 = vst [vmem:[#allocation30_spill] sm:$0xff] %v8211_v50  ;;  %v8231_v42 = vadd.f32 %v7565_v6, %v10484_v63  ;;  %v10486_v50 = vld [vmem:[#allocation136_spill] sm:$0xff] }
 0x586   :  { %10479 = vst [vmem:[#allocation31_spill] sm:$0xff] %v8215_v53  ;;  %v8235_v4 = vadd.f32 %v7565_v6, %v10486_v50  ;;  %v10488_v53 = vld [vmem:[#allocation7_spill] sm:$0xff] }
 0x587   :  { %10481 = vst [vmem:[#allocation32_spill] sm:$0xff] %v8219_v36  ;;  %v8239_v35 = vadd.f32 %v7565_v6, %v10488_v53  ;;  %v10549_v36 = vld [vmem:[#allocation65_spill] sm:$0xff] }
 0x588   :  { %2743 = vst [vmem:[%s8921_s5 + $0x108] sm:$0xff] %v7795_v40  ;;  %v10490_v40 = vld [vmem:[#allocation8_spill] sm:$0xff] }
 0x589   :  { %10483 = vst [vmem:[#allocation33_spill] sm:$0xff] %v8227_v37  ;;  %v8247_v20 = vadd.f32 %v7565_v6, %v10490_v40  ;;  %v10492_v37 = vld [vmem:[#allocation9_spill] sm:$0xff] }
 0x58a   :  { %10485 = vst [vmem:[#allocation34_spill] sm:$0xff] %v8231_v42  ;;  %v8251_v63 = vadd.f32 %v7565_v6, %v10492_v37  ;;  %v10494_v42 = vld [vmem:[#allocation11_spill] sm:$0xff] }
 0x58b   :  { %10487 = vst [vmem:[#allocation35_spill] sm:$0xff] %v8235_v4  ;;  %v8255_v50 = vadd.f32 %v7565_v6, %v10494_v42  ;;  %v10496_v4 = vld [vmem:[#allocation13_spill] sm:$0xff] }
 0x58c   :  { %10489 = vst [vmem:[#allocation36_spill] sm:$0xff] %v8239_v35  ;;  %v8259_v53 = vadd.f32 %v7565_v6, %v10496_v4  ;;  %v10547_v35 = vld [vmem:[#allocation47_spill] sm:$0xff] }
 0x58d   :  { %2744 = vst [vmem:[%s8921_s5 + $0x110] sm:$0xff] %v7798_v58  ;;  %v10498_v58 = vld [vmem:[#allocation15_spill] sm:$0xff] }
 0x58e   :  { %10491 = vst [vmem:[#allocation37_spill] sm:$0xff] %v8247_v20  ;;  %v8267_v40 = vadd.f32 %v7565_v6, %v10498_v58  ;;  %v10500_v20 = vld [vmem:[#allocation17_spill] sm:$0xff] }
 0x58f   :  { %10493 = vst [vmem:[#allocation38_spill] sm:$0xff] %v8251_v63  ;;  %v8271_v37 = vadd.f32 %v7565_v6, %v10500_v20  ;;  %v10502_v63 = vld [vmem:[#allocation19_spill] sm:$0xff] }
 0x590   :  { %10495 = vst [vmem:[#allocation39_spill] sm:$0xff] %v8255_v50  ;;  %v8275_v42 = vadd.f32 %v7565_v6, %v10502_v63  ;;  %v10504_v50 = vld [vmem:[#allocation21_spill] sm:$0xff] }
 0x591   :  { %10497 = vst [vmem:[#allocation40_spill] sm:$0xff] %v8259_v53  ;;  %v8279_v4 = vadd.f32 %v7565_v6, %v10504_v50  ;;  %v10546_v53 = vld [vmem:[#allocation64_spill] sm:$0xff] }
 0x592   :  { %2745 = vst [vmem:[%s8921_s5 + $0x118] sm:$0xff] %v7804_v8  ;;  %v10506_v8 = vld [vmem:[#allocation23_spill] sm:$0xff] }
 0x593   :  { %10499 = vst [vmem:[#allocation41_spill] sm:$0xff] %v8267_v40  ;;  %v8287_v58 = vadd.f32 %v7565_v6, %v10506_v8  ;;  %v10508_v40 = vld [vmem:[#allocation137_spill] sm:$0xff] }
 0x594   :  { %10501 = vst [vmem:[#allocation42_spill] sm:$0xff] %v8271_v37  ;;  %v8291_v20 = vadd.f32 %v7565_v6, %v10508_v40  ;;  %v10510_v37 = vld [vmem:[#allocation106_spill] sm:$0xff] }
 0x595   :  { %10503 = vst [vmem:[#allocation43_spill] sm:$0xff] %v8275_v42  ;;  %v8295_v63 = vadd.f32 %v7565_v6, %v10510_v37  ;;  %v10512_v42 = vld [vmem:[#allocation107_spill] sm:$0xff] }
 0x596   :  { %10505 = vst [vmem:[#allocation67_spill] sm:$0xff] %v8279_v4  ;;  %v8299_v50 = vadd.f32 %v7565_v6, %v10512_v42 }
 0x597   :  { %2746 = vst [vmem:[%s8921_s5 + $0x120] sm:$0xff] %v7807_v31  ;;  %v10514_v31 = vld [vmem:[#allocation108_spill] sm:$0xff] }
 0x598   :  { %10507 = vst [vmem:[#allocation68_spill] sm:$0xff] %v8287_v58  ;;  %v8307_v8 = vadd.f32 %v7565_v6, %v10514_v31  ;;  %v10516_v58 = vld [vmem:[#allocation109_spill] sm:$0xff] }
 0x599   :  { %10509 = vst [vmem:[#allocation70_spill] sm:$0xff] %v8291_v20  ;;  %v8311_v40 = vadd.f32 %v7565_v6, %v10516_v58  ;;  %v10518_v20 = vld [vmem:[#allocation110_spill] sm:$0xff] }
 0x59a   :  { %10511 = vst [vmem:[#allocation69_spill] sm:$0xff] %v8295_v63  ;;  %v8315_v37 = vadd.f32 %v7565_v6, %v10518_v20  ;;  %v10520_v63 = vld [vmem:[#allocation111_spill] sm:$0xff] }
 0x59b   :  { %10513 = vst [vmem:[#allocation71_spill] sm:$0xff] %v8299_v50  ;;  %v8319_v42 = vadd.f32 %v7565_v6, %v10520_v63  ;;  %v10540_v50 = vld [vmem:[#allocation25_spill] sm:$0xff] }
 0x59c   :  { %2747 = vst [vmem:[%s8921_s5 + $0x128] sm:$0xff] %v7810_v47  ;;  %v10522_v47 = vld [vmem:[#allocation138_spill] sm:$0xff] }
 0x59d   :  { %10515 = vst [vmem:[#allocation72_spill] sm:$0xff] %v8307_v8  ;;  %v8327_v31 = vadd.f32 %v7565_v6, %v10522_v47  ;;  %v10524_v8 = vld [vmem:[#allocation139_spill] sm:$0xff] }
 0x59e   :  { %10517 = vst [vmem:[#allocation73_spill] sm:$0xff] %v8311_v40  ;;  %v8331_v58 = vadd.f32 %v7565_v6, %v10524_v8  ;;  %v10526_v40 = vld [vmem:[#allocation140_spill] sm:$0xff] }
 0x59f   :  { %10519 = vst [vmem:[#allocation74_spill] sm:$0xff] %v8315_v37  ;;  %v8335_v20 = vadd.f32 %v7565_v6, %v10526_v40  ;;  %v10528_v37 = vld [vmem:[#allocation141_spill] sm:$0xff] }
 0x5a0   :  { %10521 = vst [vmem:[#allocation75_spill] sm:$0xff] %v8319_v42  ;;  %v8339_v63 = vadd.f32 %v7565_v6, %v10528_v37  ;;  %v10539_v42 = vld [vmem:[#allocation62_spill] sm:$0xff] }
 0x5a1   :  { %2748 = vst [vmem:[%s8921_s5 + $0x130] sm:$0xff] %v7813_v57  ;;  %v10530_v57 = vld [vmem:[#allocation44_spill] sm:$0xff] }
 0x5a2   :  { %10523 = vst [vmem:[#allocation76_spill] sm:$0xff] %v8327_v31  ;;  %v2585_v47 = vadd.f32 %v7565_v6, %v10530_v57  ;;  %v10531_v31 = vld [vmem:[#allocation142_spill] sm:$0xff] }
 0x5a3   :  { %10525 = vst [vmem:[#allocation87_spill] sm:$0xff] %v8331_v58  ;;  %v8349_v8 = vadd.f32 %v7565_v6, %v10531_v31  ;;  %v10533_v58 = vld [vmem:[#allocation143_spill] sm:$0xff]  ;;  %v2417_v31 = vmul.f32 %v10540_v50, %v10539_v42 }
 0x5a4   :  { %10527 = vst [vmem:[#allocation88_spill] sm:$0xff] %v8335_v20  ;;  %v8353_v40 = vadd.f32 %v7565_v6, %v10533_v58  ;;  %v10535_v20 = vld [vmem:[#allocation144_spill] sm:$0xff]  ;;  %v10542_v58 = vld [vmem:[#allocation78_spill] sm:$0xff]  ;;  %v10545_v42 = vld [vmem:[#allocation79_spill] sm:$0xff] }
 0x5a5   :  { %10529 = vst [vmem:[#allocation10_spill] sm:$0xff] %v8339_v63  ;;  %v8357_v37 = vadd.f32 %v7565_v6, %v10535_v20  ;;  %v10538_v63 = vld [vmem:[#allocation124_spill] sm:$0xff] }
 0x5a6   :  { %2749 = vst [vmem:[%s8921_s5 + $0x138] sm:$0xff] %v7819_v16  ;;  %v10537_v16 = vld [vmem:[#allocation77_spill] sm:$0xff]  ;;  %v2249_v20 = vmul.f32 %v10538_v63, %v10542_v58  ;;  %v2588_v58 = vadd.f32 %v7565_v6, %v10547_v35 }
 0x5a7   :  { %10532 = vst [vmem:[#allocation12_spill] sm:$0xff] %v8349_v8  ;;  %v2248_v57 = vmul.f32 %v10538_v63, %v10537_v16  ;;  %v10541_v8 = vld [vmem:[#allocation45_spill] sm:$0xff] }
 0x5a8   :  { %10534 = vst [vmem:[#allocation14_spill] sm:$0xff] %v8353_v40  ;;  %v2586_v4 = vadd.f32 %v7565_v6, %v10541_v8  ;;  %v10544_v40 = vld [vmem:[#allocation46_spill] sm:$0xff]  ;;  %v2250_v8 = vmul.f32 %v10538_v63, %v10545_v42  ;;  %v2589_v42 = vadd.f32 %v7565_v6, %v10550_v61  ;;  %v2422_v61 = vmul.f32 %v10540_v50, %v2249_v20 }
 0x5a9   :  { %10536 = vst [vmem:[#allocation16_spill] sm:$0xff] %v8357_v37  ;;  %v10543_v37 = vld [vmem:[#allocation63_spill] sm:$0xff]  ;;  %v2587_v16 = vadd.f32 %v7565_v6, %v10544_v40  ;;  %v10548_v40 = vld [vmem:[#allocation80_spill] sm:$0xff]  ;;  %v2421_v24 = vmul.f32 %v10540_v50, %v2248_v57 }
 0x5aa   :  { %2750 = vst [vmem:[%s8921_s5 + $0x140] sm:$0xff] %v7822_v55  ;;  %v2418_v55 = vmul.f32 %v10540_v50, %v10543_v37  ;;  %v2251_v37 = vmul.f32 %v10538_v63, %v10548_v40  ;;  %v10552_v40 = vld [vmem:[#allocation82_spill] sm:$0xff] }
 0x5ab   :  { %2751 = vst [vmem:[%s8921_s5 + $0x148] sm:$0xff] %v7825_v10  ;;  %v2419_v10 = vmul.f32 %v10540_v50, %v10546_v53  ;;  %v10551_v53 = vld [vmem:[#allocation81_spill] sm:$0xff] }
 0x5ac   :  { %2752 = vst [vmem:[%s8921_s5 + $0x150] sm:$0xff] %v7828_v46  ;;  %v2420_v46 = vmul.f32 %v10540_v50, %v10549_v36  ;;  %v2252_v35 = vmul.f32 %v10538_v63, %v10551_v53  ;;  %v2253_v36 = vmul.f32 %v10538_v63, %v10552_v40  ;;  %v2591_v26 = vadd.f32 %v7565_v6, %v2418_v55 }
 0x5ad   :  { %2753 = vst [vmem:[%s8921_s5 + $0x158] sm:$0xff] %v7834_v11  ;;  %v2590_v11 = vadd.f32 %v7565_v6, %v2417_v31  ;;  %v2423_v31 = vmul.f32 %v10540_v50, %v2250_v8  ;;  %v2592_v53 = vadd.f32 %v7565_v6, %v2419_v10  ;;  %v2424_v55 = vmul.f32 %v10540_v50, %v2251_v37 }
 0x5ae   :  { %2754 = vst [vmem:[%s8921_s5 + $0x160] sm:$0xff] %v2585_v47  ;;  %v10553_v47 = vld [vmem:[#allocation83_spill] sm:$0xff]  ;;  %v2593_v40 = vadd.f32 %v7565_v6, %v2420_v46  ;;  %v2425_v10 = vmul.f32 %v10540_v50, %v2252_v35  ;;  %v2426_v46 = vmul.f32 %v10540_v50, %v2253_v36 }
 0x5af   :  { %2755 = vst [vmem:[%s8921_s5 + $0x168] sm:$0xff] %v2586_v4  ;;  %v2254_v57 = vmul.f32 %v10538_v63, %v10553_v47  ;;  %v10554_v4 = vld [vmem:[#allocation84_spill] sm:$0xff]  ;;  %v2594_v47 = vadd.f32 %v7565_v6, %v2421_v24  ;;  %v2596_v35 = vadd.f32 %v7565_v6, %v2423_v31 }
 0x5b0   :  { %2756 = vst [vmem:[%s8921_s5 + $0x170] sm:$0xff] %v2587_v16  ;;  %v2255_v20 = vmul.f32 %v10538_v63, %v10554_v4  ;;  %v10555_v16 = vld [vmem:[#allocation85_spill] sm:$0xff]  ;;  %v2595_v4 = vadd.f32 %v7565_v6, %v2422_v61  ;;  %v2599_v61 = vadd.f32 %v7565_v6, %v2426_v46  ;;  %v10607_v46 = vld [vmem:[#allocation67_spill] sm:$0xff] }
 0x5b1   :  { %2757 = vst [vmem:[%s8921_s5 + $0x178] sm:$0xff] %v2588_v58  ;;  %v2256_v8 = vmul.f32 %v10538_v63, %v10555_v16  ;;  %v10556_v58 = vld [vmem:[#allocation86_spill] sm:$0xff] }
 0x5b2   :  { %2758 = vst [vmem:[%s8921_s5 + $0x180] sm:$0xff] %v2589_v42  ;;  %v2257_v37 = vmul.f32 %v10538_v63, %v10556_v58  ;;  %v2427_v42 = vmul.f32 %v10540_v50, %v2254_v57  ;;  %v2428_v24 = vmul.f32 %v10540_v50, %v2255_v20  ;;  %v2597_v63 = vadd.f32 %v7565_v6, %v2424_v55  ;;  %v10558_v20 = vld [vmem:[#allocation50_spill] sm:$0xff]  ;;  %v10559_v55 = vld [vmem:[#allocation51_spill] sm:$0xff] }
 0x5b3   :  { %2759 = vst [vmem:[%s8921_s5 + $0x188] sm:$0xff] %v2590_v11  ;;  %v2429_v11 = vmul.f32 %v10540_v50, %v2256_v8  ;;  %v10563_v16 = vld [vmem:[#allocation54_spill] sm:$0xff]  ;;  %v10565_v8 = vld [vmem:[#allocation55_spill] sm:$0xff] }
 0x5b4   :  { %2760 = vst [vmem:[%s8921_s5 + $0x190] sm:$0xff] %v2591_v26  ;;  %v2598_v26 = vadd.f32 %v7565_v6, %v2425_v10  ;;  %v2430_v36 = vmul.f32 %v10540_v50, %v2257_v37  ;;  %v2600_v57 = vadd.f32 %v7565_v6, %v2427_v42  ;;  %v2601_v31 = vadd.f32 %v7565_v6, %v2428_v24  ;;  %v10603_v10 = vld [vmem:[#allocation40_spill] sm:$0xff]  ;;  %v10605_v58 = vld [vmem:[#allocation42_spill] sm:$0xff]  ;;  %v10606_v37 = vld [vmem:[#allocation43_spill] sm:$0xff] }
 0x5b5   :  { %2761 = vst [vmem:[%s8921_s5 + $0x198] sm:$0xff] %v2592_v53  ;;  %v2602_v50 = vadd.f32 %v7565_v6, %v2429_v11  ;;  %v10609_v42 = vld [vmem:[#allocation70_spill] sm:$0xff]  ;;  %v10611_v24 = vld [vmem:[#allocation71_spill] sm:$0xff]  ;;  %v10613_v11 = vld [vmem:[#allocation73_spill] sm:$0xff] }
 0x5b6   :  { %2762 = vst [vmem:[%s8921_s5 + $0x1a0] sm:$0xff] %v2593_v40  ;;  %v2603_v53 = vadd.f32 %v7565_v6, %v2430_v36  ;;  %v10557_v6 = vld [vmem:[#allocation49_spill] sm:$0xff]  ;;  %v10615_v36 = vld [vmem:[#allocation75_spill] sm:$0xff] }
 0x5b7   :  { %2763 = vst [vmem:[%s8921_s5 + $0x1a8] sm:$0xff] %v2594_v47  ;;  %v10562_v40 = vld [vmem:[#allocation53_spill] sm:$0xff] }
 0x5b8   :  { %2764 = vst [vmem:[%s8921_s5 + $0x1b0] sm:$0xff] %v2595_v4  ;;  %v10604_v47 = vld [vmem:[#allocation41_spill] sm:$0xff]  ;;  %v10608_v4 = vld [vmem:[#allocation68_spill] sm:$0xff] }
 0x5b9   :  { %2765 = vst [vmem:[%s8921_s5 + $0x1b8] sm:$0xff] %v2596_v35  ;;  %v10610_v35 = vld [vmem:[#allocation69_spill] sm:$0xff] }
 0x5ba   :  { %2766 = vst [vmem:[%s8921_s5 + $0x1c0] sm:$0xff] %v2597_v63  ;;  %v10612_v63 = vld [vmem:[#allocation72_spill] sm:$0xff] }
 0x5bb   :  { %2767 = vst [vmem:[%s8921_s5 + $0x1c8] sm:$0xff] %v2598_v26  ;;  %v10614_v26 = vld [vmem:[#allocation74_spill] sm:$0xff] }
 0x5bc   :  { %2768 = vst [vmem:[%s8921_s5 + $0x1d0] sm:$0xff] %v2599_v61  ;;  %v10616_v61 = vld [vmem:[#allocation76_spill] sm:$0xff] }
 0x5bd   :  { %2769 = vst [vmem:[%s8921_s5 + $0x1d8] sm:$0xff] %v2600_v57  ;;  %v10617_v57 = vld [vmem:[#allocation87_spill] sm:$0xff] }
 0x5be   :  { %2770 = vst [vmem:[%s8921_s5 + $0x1e0] sm:$0xff] %v2601_v31  ;;  %v10618_v31 = vld [vmem:[#allocation88_spill] sm:$0xff] }
 0x5bf   :  { %2771 = vst [vmem:[%s8921_s5 + $0x1e8] sm:$0xff] %v2602_v50  ;;  %v10619_v50 = vld [vmem:[#allocation10_spill] sm:$0xff] }
 0x5c0   :  { %2772 = vst [vmem:[%s8921_s5 + $0x1f0] sm:$0xff] %v2603_v53  ;;  %v10620_v53 = vld [vmem:[#allocation12_spill] sm:$0xff] }
 0x5c1   :  { %2773 = vst [vmem:[%s8921_s5 + $0x1f8] sm:$0xff] %v7837_v2  ;;  %v10560_v2 = vld [vmem:[#allocation112_spill] sm:$0xff] }
 0x5c2   :  { %2774 = vst [vmem:[%s8921_s5 + $0x200] sm:$0xff] %v10557_v6  ;;  %v10621_v6 = vld [vmem:[#allocation14_spill] sm:$0xff] }
 0x5c3   :  { %2775 = vst [vmem:[%s8921_s5 + $0x208] sm:$0xff] %v7845_v52  ;;  %v10561_v52 = vld [vmem:[#allocation52_spill] sm:$0xff] }
 0x5c4   :  { %2776 = vst [vmem:[%s8921_s5 + $0x210] sm:$0xff] %v10558_v20  ;;  %v10622_v20 = vld [vmem:[#allocation16_spill] sm:$0xff] }
 0x5c5   :  { %2777 = vst [vmem:[%s8921_s5 + $0x218] sm:$0xff] %v10559_v55 }
 0x5c6   :  { %2778 = vst [vmem:[%s8921_s5 + $0x220] sm:$0xff] %v10560_v2 }
 0x5c7   :  { %2779 = vst [vmem:[%s8921_s5 + $0x228] sm:$0xff] %v7864_v21  ;;  %v10564_v21 = vld [vmem:[#allocation113_spill] sm:$0xff] }
 0x5c8   :  { %2780 = vst [vmem:[%s8921_s5 + $0x230] sm:$0xff] %v10561_v52 }
 0x5c9   :  { %2781 = vst [vmem:[%s8921_s5 + $0x238] sm:$0xff] %v10562_v40 }
 0x5ca   :  { %2782 = vst [vmem:[%s8921_s5 + $0x240] sm:$0xff] %v10563_v16 }
 0x5cb   :  { %2783 = vst [vmem:[%s8921_s5 + $0x248] sm:$0xff] %v7883_v30  ;;  %v10566_v30 = vld [vmem:[#allocation56_spill] sm:$0xff] }
 0x5cc   :  { %2784 = vst [vmem:[%s8921_s5 + $0x250] sm:$0xff] %v10564_v21 }
 0x5cd   :  { %2785 = vst [vmem:[%s8921_s5 + $0x258] sm:$0xff] %v10565_v8 }
 0x5ce   :  { %2786 = vst [vmem:[%s8921_s5 + $0x260] sm:$0xff] %v7898_v29  ;;  %v10567_v29 = vld [vmem:[#allocation57_spill] sm:$0xff] }
 0x5cf   :  { %2787 = vst [vmem:[%s8921_s5 + $0x268] sm:$0xff] %v7902_v9  ;;  %v10568_v9 = vld [vmem:[#allocation114_spill] sm:$0xff] }
 0x5d0   :  { %2788 = vst [vmem:[%s8921_s5 + $0x270] sm:$0xff] %v7909_v28  ;;  %v10569_v28 = vld [vmem:[#allocation58_spill] sm:$0xff] }
 0x5d1   :  { %2789 = vst [vmem:[%s8921_s5 + $0x278] sm:$0xff] %v10566_v30 }
 0x5d2   :  { %2790 = vst [vmem:[%s8921_s5 + $0x280] sm:$0xff] %v7917_v51  ;;  %v10570_v51 = vld [vmem:[#allocation59_spill] sm:$0xff] }
 0x5d3   :  { %2791 = vst [vmem:[%s8921_s5 + $0x288] sm:$0xff] %v7921_v7  ;;  %v10571_v7 = vld [vmem:[#allocation60_spill] sm:$0xff] }
 0x5d4   :  { %2792 = vst [vmem:[%s8921_s5 + $0x290] sm:$0xff] %v7928_v12  ;;  %v10572_v12 = vld [vmem:[#allocation115_spill] sm:$0xff] }
 0x5d5   :  { %2793 = vst [vmem:[%s8921_s5 + $0x298] sm:$0xff] %v10567_v29 }
 0x5d6   :  { %2794 = vst [vmem:[%s8921_s5 + $0x2a0] sm:$0xff] %v7936_v13  ;;  %v10573_v13 = vld [vmem:[#allocation61_spill] sm:$0xff] }
 0x5d7   :  { %2795 = vst [vmem:[%s8921_s5 + $0x2a8] sm:$0xff] %v7940_v41  ;;  %v10574_v41 = vld [vmem:[#allocation66_spill] sm:$0xff] }
 0x5d8   :  { %2796 = vst [vmem:[%s8921_s5 + $0x2b0] sm:$0xff] %v7947_v56  ;;  %v10575_v56 = vld [vmem:[#allocation116_spill] sm:$0xff] }
 0x5d9   :  { %2797 = vst [vmem:[%s8921_s5 + $0x2b8] sm:$0xff] %v10568_v9 }
 0x5da   :  { %2798 = vst [vmem:[%s8921_s5 + $0x2c0] sm:$0xff] %v7955_v39  ;;  %v10576_v39 = vld [vmem:[#allocation117_spill] sm:$0xff] }
 0x5db   :  { %2799 = vst [vmem:[%s8921_s5 + $0x2c8] sm:$0xff] %v7959_v62  ;;  %v10577_v62 = vld [vmem:[#allocation118_spill] sm:$0xff] }
 0x5dc   :  { %2800 = vst [vmem:[%s8921_s5 + $0x2d0] sm:$0xff] %v7967_v25  ;;  %v10578_v25 = vld [vmem:[#allocation119_spill] sm:$0xff] }
 0x5dd   :  { %2801 = vst [vmem:[%s8921_s5 + $0x2d8] sm:$0xff] %v7971_v17  ;;  %v10579_v17 = vld [vmem:[#allocation120_spill] sm:$0xff] }
 0x5de   :  { %2802 = vst [vmem:[%s8921_s5 + $0x2e0] sm:$0xff] %v10569_v28 }
 0x5df   :  { %2803 = vst [vmem:[%s8921_s5 + $0x2e8] sm:$0xff] %v7979_v34  ;;  %v10580_v34 = vld [vmem:[#allocation121_spill] sm:$0xff] }
 0x5e0   :  { %2804 = vst [vmem:[%s8921_s5 + $0x2f0] sm:$0xff] %v7987_v27  ;;  %v10581_v27 = vld [vmem:[#allocation122_spill] sm:$0xff] }
 0x5e1   :  { %2805 = vst [vmem:[%s8921_s5 + $0x2f8] sm:$0xff] %v7991_v23  ;;  %v10582_v23 = vld [vmem:[#allocation123_spill] sm:$0xff] }
 0x5e2   :  { %2806 = vst [vmem:[%s8921_s5 + $0x300] sm:$0xff] %v7995_v43  ;;  %v10583_v43 = vld [vmem:[#allocation128_spill] sm:$0xff] }
 0x5e3   :  { %2807 = vst [vmem:[%s8921_s5 + $0x308] sm:$0xff] %v7999_v60  ;;  %v10584_v60 = vld [vmem:[#allocation129_spill] sm:$0xff] }
 0x5e4   :  { %2808 = vst [vmem:[%s8921_s5 + $0x310] sm:$0xff] %v8007_v0  ;;  %v10585_v0 = vld [vmem:[#allocation130_spill] sm:$0xff] }
 0x5e5   :  { %2809 = vst [vmem:[%s8921_s5 + $0x318] sm:$0xff] %v8011_v19  ;;  %v10586_v19 = vld [vmem:[#allocation125_spill] sm:$0xff] }
 0x5e6   :  { %2810 = vst [vmem:[%s8921_s5 + $0x320] sm:$0xff] %v8015_v59  ;;  %v10587_v59 = vld [vmem:[#allocation126_spill] sm:$0xff] }
 0x5e7   :  { %2811 = vst [vmem:[%s8921_s5 + $0x328] sm:$0xff] %v8019_v14  ;;  %v10588_v14 = vld [vmem:[#allocation127_spill] sm:$0xff] }
 0x5e8   :  { %2812 = vst [vmem:[%s8921_s5 + $0x330] sm:$0xff] %v8027_v22  ;;  %v10589_v22 = vld [vmem:[#allocation27_spill] sm:$0xff] }
 0x5e9   :  { %2813 = vst [vmem:[%s8921_s5 + $0x338] sm:$0xff] %v10570_v51 }
 0x5ea   :  { %2814 = vst [vmem:[%s8921_s5 + $0x340] sm:$0xff] %v10571_v7 }
 0x5eb   :  { %2815 = vst [vmem:[%s8921_s5 + $0x348] sm:$0xff] %v8039_v3  ;;  %v10590_v3 = vld [vmem:[#allocation24_spill] sm:$0xff] }
 0x5ec   :  { %2816 = vst [vmem:[%s8921_s5 + $0x350] sm:$0xff] %v8047_v45  ;;  %v10591_v45 = vld [vmem:[#allocation28_spill] sm:$0xff] }
 0x5ed   :  { %2817 = vst [vmem:[%s8921_s5 + $0x358] sm:$0xff] %v8051_v44  ;;  %v10592_v44 = vld [vmem:[#allocation29_spill] sm:$0xff] }
 0x5ee   :  { %2818 = vst [vmem:[%s8921_s5 + $0x360] sm:$0xff] %v8055_v1  ;;  %v10593_v1 = vld [vmem:[#allocation30_spill] sm:$0xff] }
 0x5ef   :  { %2819 = vst [vmem:[%s8921_s5 + $0x368] sm:$0xff] %v8059_v48  ;;  %v10594_v48 = vld [vmem:[#allocation31_spill] sm:$0xff] }
 0x5f0   :  { %2820 = vst [vmem:[%s8921_s5 + $0x370] sm:$0xff] %v8067_v49  ;;  %v10595_v49 = vld [vmem:[#allocation32_spill] sm:$0xff] }
 0x5f1   :  { %2821 = vst [vmem:[%s8921_s5 + $0x378] sm:$0xff] %v8071_v18  ;;  %v10596_v18 = vld [vmem:[#allocation33_spill] sm:$0xff] }
 0x5f2   :  { %2822 = vst [vmem:[%s8921_s5 + $0x380] sm:$0xff] %v8075_v38  ;;  %v10597_v38 = vld [vmem:[#allocation34_spill] sm:$0xff] }
 0x5f3   :  { %2823 = vst [vmem:[%s8921_s5 + $0x388] sm:$0xff] %v8079_v54  ;;  %v10598_v54 = vld [vmem:[#allocation35_spill] sm:$0xff] }
 0x5f4   :  { %2824 = vst [vmem:[%s8921_s5 + $0x390] sm:$0xff] %v8087_v32  ;;  %v10599_v32 = vld [vmem:[#allocation36_spill] sm:$0xff] }
 0x5f5   :  { %2825 = vst [vmem:[%s8921_s5 + $0x398] sm:$0xff] %v10572_v12 }
 0x5f6   :  { %2826 = vst [vmem:[%s8921_s5 + $0x3a0] sm:$0xff] %v10573_v13 }
 0x5f7   :  { %2827 = vst [vmem:[%s8921_s5 + $0x3a8] sm:$0xff] %v8099_v15  ;;  %v10600_v15 = vld [vmem:[#allocation37_spill] sm:$0xff] }
 0x5f8   :  { %2828 = vst [vmem:[%s8921_s5 + $0x3b0] sm:$0xff] %v10574_v41 }
 0x5f9   :  { %2829 = vst [vmem:[%s8921_s5 + $0x3b8] sm:$0xff] %v10575_v56 }
 0x5fa   :  { %2830 = vst [vmem:[%s8921_s5 + $0x3c0] sm:$0xff] %v10576_v39 }
 0x5fb   :  { %2831 = vst [vmem:[%s8921_s5 + $0x3c8] sm:$0xff] %v8119_v5  ;;  %v10601_v5 = vld [vmem:[#allocation38_spill] sm:$0xff] }
 0x5fc   :  { %2832 = vst [vmem:[%s8921_s5 + $0x3d0] sm:$0xff] %v10577_v62 }
 0x5fd   :  { %2833 = vst [vmem:[%s8921_s5 + $0x3d8] sm:$0xff] %v10578_v25 }
 0x5fe   :  { %2834 = vst [vmem:[%s8921_s5 + $0x3e0] sm:$0xff] %v10579_v17 }
 0x5ff   :  { %2835 = vst [vmem:[%s8921_s5 + $0x3e8] sm:$0xff] %v8139_v33  ;;  %v10602_v33 = vld [vmem:[#allocation39_spill] sm:$0xff] }
 0x600   :  { %2836 = vst [vmem:[%s8921_s5 + $0x3f0] sm:$0xff] %v10580_v34 }
 0x601   :  { %2837 = vst [vmem:[%s8921_s5 + $0x3f8] sm:$0xff] %v10581_v27 }
 0x602   :  { %2838 = vst [vmem:[%s8921_s5 + $0x400] sm:$0xff] %v10582_v23 }
 0x603   :  { %2839 = vst [vmem:[%s8921_s5 + $0x408] sm:$0xff] %v10583_v43 }
 0x604   :  { %2840 = vst [vmem:[%s8921_s5 + $0x410] sm:$0xff] %v10584_v60 }
 0x605   :  { %2841 = vst [vmem:[%s8921_s5 + $0x418] sm:$0xff] %v10585_v0 }
 0x606   :  { %2842 = vst [vmem:[%s8921_s5 + $0x420] sm:$0xff] %v10586_v19 }
 0x607   :  { %2843 = vst [vmem:[%s8921_s5 + $0x428] sm:$0xff] %v10587_v59 }
 0x608   :  { %2844 = vst [vmem:[%s8921_s5 + $0x430] sm:$0xff] %v10588_v14 }
 0x609   :  { %2845 = vst [vmem:[%s8921_s5 + $0x438] sm:$0xff] %v10589_v22 }
 0x60a   :  { %2846 = vst [vmem:[%s8921_s5 + $0x440] sm:$0xff] %v10590_v3 }
 0x60b   :  { %2847 = vst [vmem:[%s8921_s5 + $0x448] sm:$0xff] %v10591_v45 }
 0x60c   :  { %2848 = vst [vmem:[%s8921_s5 + $0x450] sm:$0xff] %v10592_v44 }
 0x60d   :  { %2849 = vst [vmem:[%s8921_s5 + $0x458] sm:$0xff] %v10593_v1 }
 0x60e   :  { %2850 = vst [vmem:[%s8921_s5 + $0x460] sm:$0xff] %v10594_v48 }
 0x60f   :  { %2851 = vst [vmem:[%s8921_s5 + $0x468] sm:$0xff] %v10595_v49 }
 0x610   :  { %2852 = vst [vmem:[%s8921_s5 + $0x470] sm:$0xff] %v10596_v18 }
 0x611   :  { %2853 = vst [vmem:[%s8921_s5 + $0x478] sm:$0xff] %v10597_v38 }
 0x612   :  { %2854 = vst [vmem:[%s8921_s5 + $0x480] sm:$0xff] %v10598_v54 }
 0x613   :  { %2855 = vst [vmem:[%s8921_s5 + $0x488] sm:$0xff] %v10599_v32 }
 0x614   :  { %2856 = vst [vmem:[%s8921_s5 + $0x490] sm:$0xff] %v10600_v15 }
 0x615   :  { %2857 = vst [vmem:[%s8921_s5 + $0x498] sm:$0xff] %v10601_v5 }
 0x616   :  { %2858 = vst [vmem:[%s8921_s5 + $0x4a0] sm:$0xff] %v10602_v33 }
 0x617   :  { %2859 = vst [vmem:[%s8921_s5 + $0x4a8] sm:$0xff] %v10603_v10 }
 0x618   :  { %2860 = vst [vmem:[%s8921_s5 + $0x4b0] sm:$0xff] %v10604_v47 }
 0x619   :  { %2861 = vst [vmem:[%s8921_s5 + $0x4b8] sm:$0xff] %v10605_v58 }
 0x61a   :  { %2862 = vst [vmem:[%s8921_s5 + $0x4c0] sm:$0xff] %v10606_v37 }
 0x61b   :  { %2863 = vst [vmem:[%s8921_s5 + $0x4c8] sm:$0xff] %v10607_v46 }
 0x61c   :  { %2864 = vst [vmem:[%s8921_s5 + $0x4d0] sm:$0xff] %v10608_v4 }
 0x61d   :  { %2865 = vst [vmem:[%s8921_s5 + $0x4d8] sm:$0xff] %v10609_v42 }
 0x61e   :  { %2866 = vst [vmem:[%s8921_s5 + $0x4e0] sm:$0xff] %v10610_v35 }
 0x61f   :  { %2867 = vst [vmem:[%s8921_s5 + $0x4e8] sm:$0xff] %v10611_v24 }
 0x620   :  { %2868 = vst [vmem:[%s8921_s5 + $0x4f0] sm:$0xff] %v10612_v63 }
 0x621   :  { %2869 = vst [vmem:[%s8921_s5 + $0x4f8] sm:$0xff] %v10613_v11 }
 0x622   :  { %2870 = vst [vmem:[%s8921_s5 + $0x500] sm:$0xff] %v10614_v26 }
 0x623   :  { %2871 = vst [vmem:[%s8921_s5 + $0x508] sm:$0xff] %v10615_v36 }
 0x624   :  { %2872 = vst [vmem:[%s8921_s5 + $0x510] sm:$0xff] %v10616_v61 }
 0x625   :  { %2873 = vst [vmem:[%s8921_s5 + $0x518] sm:$0xff] %v10617_v57 }
 0x626   :  { %2874 = vst [vmem:[%s8921_s5 + $0x520] sm:$0xff] %v10618_v31 }
 0x627   :  { %2875 = vst [vmem:[%s8921_s5 + $0x528] sm:$0xff] %v10619_v50 }
 0x628   :  { %2876 = vst [vmem:[%s8921_s5 + $0x530] sm:$0xff] %v10620_v53 }
 0x629   :  { %2877 = vst [vmem:[%s8921_s5 + $0x538] sm:$0xff] %v10621_v6 }
 0x62a   :  { %2878 = vst [vmem:[%s8921_s5 + $0x540] sm:$0xff] %v10622_v20 }

// kernel: pallas_forward.4
= control target key start
LH: loop header
LB: loop body
LE: loop exit
PB: predicated region body
PF: predicated region fallthrough
CT: control target
= control target key end

     0   :  { %vm2329_vm0 = vcmask 1041408   ;;  %s5545_s1 = inlined_call_operand.vmem [shape: bf16[1152,128], index: 1, kind: input, shape index: {}]   ;;  %s5546_s2 = inlined_call_operand.vmem [shape: f32[1,128], index: 2, kind: input, shape index: {}]   ;;  %s5547_s0 = inlined_call_operand.vmem [shape: bf16[242,1152], index: 0, kind: input, shape index: {}]   ;;  %s5548_s3 = inlined_call_operand.vmem [shape: f32[1,128], index: 3, kind: input, shape index: {}]   ;;  %s5549_s4 = inlined_call_operand.vmem [shape: f32[1,128], index: 4, kind: input, shape index: {}]   ;;  %s5550_s5 = inlined_call_operand.vmem [shape: f32[242,128], index: 5, kind: output, shape index: {}]  }
   0x1   :  { %v3563_v0 = vld [vmem:[%s5545_s1 + $0x38] sm:$0xff]  ;;  %v3562_v1 = vld [vmem:[%s5545_s1 + $0x30] sm:$0xff]  ;;  %v3561_v2 = vld [vmem:[%s5545_s1 + $0x28] sm:$0xff] }
   0x2   :  { %3628 = vmatpush.bf16.msra.mxu1 %v3563_v0  ;;  %3629 = vmatpush.bf16.msra.mxu2 %v3563_v0  ;;  %v3560_v3 = vld [vmem:[%s5545_s1 + $0x20] sm:$0xff]  ;;  %v3559_v4 = vld [vmem:[%s5545_s1 + $0x18] sm:$0xff]  ;;  %v3558_v5 = vld [vmem:[%s5545_s1 + $0x10] sm:$0xff] }
   0x3   :  { %3630 = vmatpush.bf16.msra.mxu3 %v3563_v0  ;;  %1477 = vmatpush.bf16.msra.mxu0 %v3563_v0  ;;  %v3557_v6 = vld [vmem:[%s5545_s1 + $0x8] sm:$0xff]  ;;  %v3556_v7 = vld [vmem:[%s5545_s1] sm:$0xff]  ;;  %v3579_v16 = vld [vmem:[%s5545_s1 + $0xb8] sm:$0xff] }
   0x4   :  { %v2739_v8 = vld [vmem:[%s5547_s0 + $0x120] sm:$0xf]  ;;  %v3461_v9 = vld [vmem:[%s5547_s0 + $0x140] sm:$0xf0]  ;;  %v3587_v17 = vld [vmem:[%s5545_s1 + $0xf8] sm:$0xff] }
   0x5   :  { %v2883_v10 = vld [vmem:[%s5547_s0 + $0x240] sm:$0xf]  ;;  %v3497_v11 = vld [vmem:[%s5547_s0 + $0x260] sm:$0xf0]  ;;  %v2740_v18 = vor.u32 %v3461_v9, %v2739_v8  ;;  %v3571_v22 = vld [vmem:[%s5545_s1 + $0x78] sm:$0xff] }
   0x6   :  { %3631 = vmatpush.bf16.msra.mxu1 %v3562_v1  ;;  %3632 = vmatpush.bf16.msra.mxu2 %v3562_v1  ;;  %v3027_v12 = vld [vmem:[%s5547_s0 + $0x360] sm:$0xf]  ;;  %v3533_v13 = vld [vmem:[%s5547_s0 + $0x380] sm:$0xf0]  ;;  %v2884_v19 = vor.u32 %v3497_v11, %v2883_v10  ;;  %v3595_v23 = vld [vmem:[%s5545_s1 + $0x138] sm:$0xff] }
   0x7   :  { %3633 = vmatpush.bf16.msra.mxu3 %v3562_v1  ;;  %1478 = vmatpush.bf16.msra.mxu0 %v3562_v1  ;;  %v2595_v14 = vld [vmem:[%s5547_s0] sm:$0xf]  ;;  %v3425_v15 = vld [vmem:[%s5547_s0 + $0x20] sm:$0xf0]  ;;  %v3028_v20 = vor.u32 %v3533_v13, %v3027_v12  ;;  %v3578_v24 = vld [vmem:[%s5545_s1 + $0xb0] sm:$0xff] }
   0x8   :  { %v2596_v21 = vor.u32 %v3425_v15, %v2595_v14  ;;  %v3586_v25 = vld [vmem:[%s5545_s1 + $0xf0] sm:$0xff]  ;;  %v3577_v28 = vld [vmem:[%s5545_s1 + $0xa8] sm:$0xff]  ;;  %v3576_v33 = vld [vmem:[%s5545_s1 + $0xa0] sm:$0xff] }
   0x9   :  { %v3570_v26 = vld [vmem:[%s5545_s1 + $0x70] sm:$0xff]  ;;  %v3585_v29 = vld [vmem:[%s5545_s1 + $0xe8] sm:$0xff]  ;;  %v3584_v34 = vld [vmem:[%s5545_s1 + $0xe0] sm:$0xff] }
   0xa   :  { %3634 = vmatpush.bf16.msra.mxu1 %v3561_v2  ;;  %3635 = vmatpush.bf16.msra.mxu2 %v3561_v2  ;;  %v3594_v27 = vld [vmem:[%s5545_s1 + $0x130] sm:$0xff]  ;;  %v3569_v30 = vld [vmem:[%s5545_s1 + $0x68] sm:$0xff]  ;;  %v3568_v42 = vld [vmem:[%s5545_s1 + $0x60] sm:$0xff] }
   0xb   :  { %3636 = vmatpush.bf16.msra.mxu3 %v3561_v2  ;;  %1479 = vmatpush.bf16.msra.mxu0 %v3561_v2  ;;  %v3593_v31 = vld [vmem:[%s5545_s1 + $0x128] sm:$0xff]  ;;  %v3592_v43 = vld [vmem:[%s5545_s1 + $0x120] sm:$0xff]  ;;  %v3575_v44 = vld [vmem:[%s5545_s1 + $0x98] sm:$0xff] }
   0xc   :  { %v2775_v32 = vld [vmem:[%s5547_s0 + $0x168] sm:$0xf]  ;;  %v3470_v35 = vld [vmem:[%s5547_s0 + $0x188] sm:$0xf0]  ;;  %v3583_v45 = vld [vmem:[%s5545_s1 + $0xd8] sm:$0xff] }
   0xd   :  { %v2919_v36 = vld [vmem:[%s5547_s0 + $0x288] sm:$0xf]  ;;  %v3506_v37 = vld [vmem:[%s5547_s0 + $0x2a8] sm:$0xf0]  ;;  %v2776_v46 = vor.u32 %v3470_v35, %v2775_v32  ;;  %v3567_v50 = vld [vmem:[%s5545_s1 + $0x58] sm:$0xff] }
   0xe   :  { %3637 = vmatpush.bf16.msra.mxu1 %v3560_v3  ;;  %3638 = vmatpush.bf16.msra.mxu2 %v3560_v3  ;;  %v3063_v38 = vld [vmem:[%s5547_s0 + $0x3a8] sm:$0xf]  ;;  %v3542_v39 = vld [vmem:[%s5547_s0 + $0x3c8] sm:$0xf0]  ;;  %v2920_v47 = vor.u32 %v3506_v37, %v2919_v36  ;;  %v3591_v51 = vld [vmem:[%s5545_s1 + $0x118] sm:$0xff] }
   0xf   :  { %3639 = vmatpush.bf16.msra.mxu3 %v3560_v3  ;;  %1480 = vmatpush.bf16.msra.mxu0 %v3560_v3  ;;  %v2631_v40 = vld [vmem:[%s5547_s0 + $0x48] sm:$0xf]  ;;  %v3434_v41 = vld [vmem:[%s5547_s0 + $0x68] sm:$0xf0]  ;;  %v3064_v48 = vor.u32 %v3542_v39, %v3063_v38  ;;  %v3574_v52 = vld [vmem:[%s5545_s1 + $0x90] sm:$0xff] }
  0x10   :  { %v2632_v49 = vor.u32 %v3434_v41, %v2631_v40  ;;  %v3582_v53 = vld [vmem:[%s5545_s1 + $0xd0] sm:$0xff]  ;;  %v3573_v56 = vld [vmem:[%s5545_s1 + $0x88] sm:$0xff]  ;;  %v3572_v61 = vld [vmem:[%s5545_s1 + $0x80] sm:$0xff] }
  0x11   :  { %v3566_v54 = vld [vmem:[%s5545_s1 + $0x50] sm:$0xff]  ;;  %v3581_v57 = vld [vmem:[%s5545_s1 + $0xc8] sm:$0xff]  ;;  %v3580_v62 = vld [vmem:[%s5545_s1 + $0xc0] sm:$0xff] }
  0x12   :  { %3640 = vmatpush.bf16.msra.mxu1 %v3559_v4  ;;  %3641 = vmatpush.bf16.msra.mxu2 %v3559_v4  ;;  %v3590_v55 = vld [vmem:[%s5545_s1 + $0x110] sm:$0xff]  ;;  %v3565_v58 = vld [vmem:[%s5545_s1 + $0x48] sm:$0xff]  ;;  %v3611_v12 = vld [vmem:[%s5545_s1 + $0x1b8] sm:$0xff] }
  0x13   :  { %3642 = vmatpush.bf16.msra.mxu3 %v3559_v4  ;;  %1481 = vmatpush.bf16.msra.mxu0 %v3559_v4  ;;  %v3589_v59 = vld [vmem:[%s5545_s1 + $0x108] sm:$0xff]  ;;  %v2811_v60 = vld [vmem:[%s5547_s0 + $0x1b0] sm:$0xf]  ;;  %v3479_v63 = vld [vmem:[%s5547_s0 + $0x1d0] sm:$0xf0] }
  0x14   :  { %v2955_v0 = vld [vmem:[%s5547_s0 + $0x2d0] sm:$0xf]  ;;  %v3515_v1 = vld [vmem:[%s5547_s0 + $0x2f0] sm:$0xf0]  ;;  %v2812_v8 = vor.u32 %v3479_v63, %v2811_v60  ;;  %v3619_v13 = vld [vmem:[%s5545_s1 + $0x1f8] sm:$0xff] }
  0x15   :  { %v3099_v2 = vld [vmem:[%s5547_s0 + $0x3f0] sm:$0xf]  ;;  %v3551_v3 = vld [vmem:[%s5547_s0 + $0x410] sm:$0xf0]  ;;  %v2956_v9 = vor.u32 %v3515_v1, %v2955_v0  ;;  %v3603_v14 = vld [vmem:[%s5545_s1 + $0x178] sm:$0xff] }
  0x16   :  { %3643 = vmatpush.bf16.msra.mxu1 %v3558_v5  ;;  %3644 = vmatpush.bf16.msra.mxu2 %v3558_v5  ;;  %v2667_v4 = vld [vmem:[%s5547_s0 + $0x90] sm:$0xf]  ;;  %v3100_v10 = vor.u32 %v3551_v3, %v3099_v2  ;;  %v3627_v15 = vld [vmem:[%s5545_s1 + $0x238] sm:$0xff]  ;;  %v3422_v32 = vld [vmem:[%s5547_s0 + $0xc] sm:$0xf] }
  0x17   :  { %3645 = vmatpush.bf16.msra.mxu3 %v3558_v5  ;;  %1482 = vmatpush.bf16.msra.mxu0 %v3558_v5  ;;  %v3443_v5 = vld [vmem:[%s5547_s0 + $0xb0] sm:$0xf0]  ;;  %v3440_v60 = vld [vmem:[%s5547_s0 + $0x9c] sm:$0xf]  ;;  %v3445_v63 = vld [vmem:[%s5547_s0 + $0xc0] sm:$0xf0] }
  0x18   :  { %v2668_v11 = vor.u32 %v3443_v5, %v2667_v4  ;;  %v3427_v35 = vld [vmem:[%s5547_s0 + $0x30] sm:$0xf0]  ;;  %v3609_v4 = vld [vmem:[%s5545_s1 + $0x1a8] sm:$0xff] }
  0x19   :  { %v3610_v40 = vld [vmem:[%s5545_s1 + $0x1b0] sm:$0xff]  ;;  %v3617_v5 = vld [vmem:[%s5545_s1 + $0x1e8] sm:$0xff] }
  0x1a   :  { %3646 = vmatpush.bf16.msra.mxu1 %v3557_v6  ;;  %3647 = vmatpush.bf16.msra.mxu2 %v3557_v6  ;;  %v3618_v41 = vld [vmem:[%s5545_s1 + $0x1f0] sm:$0xff] }
  0x1b   :  { %3648 = vmatpush.bf16.msra.mxu3 %v3557_v6  ;;  %1483 = vmatpush.bf16.msra.mxu0 %v3557_v6  ;;  %v3564_v6 = vld [vmem:[%s5545_s1 + $0x40] sm:$0xff] }
  0x1e   :  { %3649 = vmatpush.bf16.msra.mxu1 %v3556_v7  ;;  %3650 = vmatpush.bf16.msra.mxu2 %v3556_v7 }
  0x1f   :  { %3651 = vmatpush.bf16.msra.mxu3 %v3556_v7  ;;  %1484 = vmatpush.bf16.msra.mxu0 %v3556_v7  ;;  %v3588_v7 = vld [vmem:[%s5545_s1 + $0x100] sm:$0xff] }
  0x21   :  { %1505 = vmatmul.bf16.vlgmr.msra.gmra.mxu1 %v2740_v18  ;;  %1525 = vmatmul.bf16.vlgmr.msra.gmra.mxu2 %v2884_v19  ;;  %v3488_v18 = vld [vmem:[%s5547_s0 + $0x218] sm:$0xf0]  ;;  %v2991_v19 = vld [vmem:[%s5547_s0 + $0x318] sm:$0xf] }
  0x22   :  { %1653 = vmatpush.bf16.msrb.mxu2 %v3579_v16  ;;  %1545 = vmatmul.bf16.vlgmr.msra.gmra.mxu3 %v3028_v20  ;;  %v3900_v16 = vld [vmem:[%s5547_s0 + $0x438] sm:$0x11] }
  0x23   :  { %1741 = vmatpush.bf16.msrb.mxu3 %v3587_v17  ;;  %1485 = vmatmul.bf16.vlgmr.msra.gmra.mxu0 %v2596_v21  ;;  %v2847_v17 = vld [vmem:[%s5547_s0 + $0x1f8] sm:$0xf]  ;;  %v3524_v20 = vld [vmem:[%s5547_s0 + $0x338] sm:$0xf0]  ;;  %v748_v21 = vunpack.c.l.b16 %v3900_v16 }
  0x24   :  { %1565 = vmatpush.bf16.msrb.mxu1 %v3571_v22  ;;  %1829 = vmatpush.bf16.msrb.mxu0 %v3595_v23  ;;  %v2703_v22 = vld [vmem:[%s5547_s0 + $0xd8] sm:$0xf]  ;;  %v3452_v23 = vld [vmem:[%s5547_s0 + $0xf8] sm:$0xf0] }
  0x26   :  { %1654 = vmatpush.bf16.msrb.mxu2 %v3578_v24  ;;  %v2848_v24 = vor.u32 %v3488_v18, %v2847_v17 }
  0x27   :  { %1742 = vmatpush.bf16.msrb.mxu3 %v3586_v25  ;;  %v2992_v25 = vor.u32 %v3524_v20, %v2991_v19 }
  0x28   :  { %1566 = vmatpush.bf16.msrb.mxu1 %v3570_v26  ;;  %1830 = vmatpush.bf16.msrb.mxu0 %v3594_v27  ;;  %v892_v26 = vpack.c.b16 %v748_v21, %v748_v21  ;;  %v2704_v27 = vor.u32 %v3452_v23, %v2703_v22  ;;  %v3457_v21 = vld [vmem:[%s5547_s0 + $0x124] sm:$0xf]  ;;  %v2741_v22 = vld [vmem:[%s5547_s0 + $0x144] sm:$0xf0] }
  0x29   :  { %v2747_v23 = vld [vmem:[%s5547_s0 + $0x128] sm:$0xf] }
  0x2a   :  { %1655 = vmatpush.bf16.msrb.mxu2 %v3577_v28  ;;  %v3421_v28 = vld [vmem:[%s5547_s0 + $0x4] sm:$0xf] }
  0x2b   :  { %1743 = vmatpush.bf16.msrb.mxu3 %v3585_v29  ;;  %v2597_v29 = vld [vmem:[%s5547_s0 + $0x24] sm:$0xf0] }
  0x2c   :  { %1567 = vmatpush.bf16.msrb.mxu1 %v3569_v30  ;;  %1831 = vmatpush.bf16.msrb.mxu0 %v3593_v31  ;;  %v2603_v30 = vld [vmem:[%s5547_s0 + $0x8] sm:$0xf]  ;;  %v3426_v31 = vld [vmem:[%s5547_s0 + $0x28] sm:$0xf0]  ;;  %v2600_v36 = vor.u32 %v3421_v28, %v2597_v29  ;;  %v3463_v28 = vld [vmem:[%s5547_s0 + $0x150] sm:$0xf0]  ;;  %v2744_v29 = vor.u32 %v3457_v21, %v2741_v22 }
  0x2d   :  { %v2604_v37 = vor.u32 %v3426_v31, %v2603_v30  ;;  %v3599_v22 = vld [vmem:[%s5545_s1 + $0x158] sm:$0xff] }
  0x2e   :  { %1656 = vmatpush.bf16.msrb.mxu2 %v3576_v33  ;;  %v2605_v33 = vld [vmem:[%s5547_s0 + $0x2c] sm:$0xf0] }
  0x2f   :  { %1744 = vmatpush.bf16.msrb.mxu3 %v3584_v34  ;;  %v2611_v34 = vld [vmem:[%s5547_s0 + $0x10] sm:$0xf]  ;;  %v2608_v38 = vor.u32 %v3422_v32, %v2605_v33 }
  0x30   :  { %1568 = vmatpush.bf16.msrb.mxu1 %v3568_v42  ;;  %1832 = vmatpush.bf16.msrb.mxu0 %v3592_v43  ;;  %v2612_v39 = vor.u32 %v3427_v35, %v2611_v34  ;;  %v3602_v42 = vld [vmem:[%s5545_s1 + $0x170] sm:$0xff]  ;;  %v3608_v35 = vld [vmem:[%s5545_s1 + $0x1a0] sm:$0xff] }
  0x31   :  { %1510 = vmatmul.bf16.gmra.mxu1 %v2776_v46  ;;  %1530 = vmatmul.bf16.gmra.mxu2 %v2920_v47  ;;  %v3626_v43 = vld [vmem:[%s5545_s1 + $0x230] sm:$0xff] }
  0x32   :  { %1657 = vmatpush.bf16.msrb.mxu2 %v3575_v44  ;;  %1550 = vmatmul.bf16.gmra.mxu3 %v3064_v48  ;;  %v3430_v44 = vld [vmem:[%s5547_s0 + $0x4c] sm:$0xf]  ;;  %v2639_v46 = vld [vmem:[%s5547_s0 + $0x50] sm:$0xf]  ;;  %v3435_v47 = vld [vmem:[%s5547_s0 + $0x70] sm:$0xf0] }
  0x33   :  { %1745 = vmatpush.bf16.msrb.mxu3 %v3583_v45  ;;  %1490 = vmatmul.bf16.gmra.mxu0 %v2632_v49  ;;  %v2633_v45 = vld [vmem:[%s5547_s0 + $0x6c] sm:$0xf0]  ;;  %v3431_v48 = vld [vmem:[%s5547_s0 + $0x54] sm:$0xf]  ;;  %v2641_v49 = vld [vmem:[%s5547_s0 + $0x74] sm:$0xf0] }
  0x34   :  { %1569 = vmatpush.bf16.msrb.mxu1 %v3567_v50  ;;  %1833 = vmatpush.bf16.msrb.mxu0 %v3591_v51  ;;  %v2647_v50 = vld [vmem:[%s5547_s0 + $0x58] sm:$0xf]  ;;  %v3436_v51 = vld [vmem:[%s5547_s0 + $0x78] sm:$0xf0] }
  0x36   :  { %1658 = vmatpush.bf16.msrb.mxu2 %v3574_v52  ;;  %v2636_v52 = vor.u32 %v3430_v44, %v2633_v45  ;;  %v2777_v44 = vld [vmem:[%s5547_s0 + $0x18c] sm:$0xf0] }
  0x37   :  { %1746 = vmatpush.bf16.msrb.mxu3 %v3582_v53  ;;  %v2640_v53 = vor.u32 %v3435_v47, %v2639_v46  ;;  %v2783_v45 = vld [vmem:[%s5547_s0 + $0x170] sm:$0xf]  ;;  %v3471_v46 = vld [vmem:[%s5547_s0 + $0x190] sm:$0xf0] }
  0x38   :  { %1570 = vmatpush.bf16.msrb.mxu1 %v3566_v54  ;;  %1834 = vmatpush.bf16.msrb.mxu0 %v3590_v55  ;;  %v2644_v54 = vor.u32 %v3431_v48, %v2641_v49  ;;  %v2648_v55 = vor.u32 %v3436_v51, %v2647_v50  ;;  %v3467_v47 = vld [vmem:[%s5547_s0 + $0x174] sm:$0xf]  ;;  %v2785_v48 = vld [vmem:[%s5547_s0 + $0x194] sm:$0xf0]  ;;  %v3472_v50 = vld [vmem:[%s5547_s0 + $0x198] sm:$0xf0] }
  0x39   :  { %v2791_v49 = vld [vmem:[%s5547_s0 + $0x178] sm:$0xf] }
  0x3a   :  { %1659 = vmatpush.bf16.msrb.mxu2 %v3573_v56  ;;  %v3439_v56 = vld [vmem:[%s5547_s0 + $0x94] sm:$0xf] }
  0x3b   :  { %1747 = vmatpush.bf16.msrb.mxu3 %v3581_v57  ;;  %v2669_v57 = vld [vmem:[%s5547_s0 + $0xb4] sm:$0xf0] }
  0x3c   :  { %1571 = vmatpush.bf16.msrb.mxu1 %v3565_v58  ;;  %1835 = vmatpush.bf16.msrb.mxu0 %v3589_v59  ;;  %v2675_v58 = vld [vmem:[%s5547_s0 + $0x98] sm:$0xf]  ;;  %v3444_v59 = vld [vmem:[%s5547_s0 + $0xb8] sm:$0xf0]  ;;  %v2672_v0 = vor.u32 %v3439_v56, %v2669_v57  ;;  %v2788_v56 = vor.u32 %v3467_v47, %v2785_v48  ;;  %v2792_v57 = vor.u32 %v3472_v50, %v2791_v49  ;;  %v4224_v50 = vld [vmem:[%s5546_s2] ss:$0 sm:$0xff] }
  0x3d   :  { %v2676_v1 = vor.u32 %v3444_v59, %v2675_v58 }
  0x3e   :  { %1660 = vmatpush.bf16.msrb.mxu2 %v3572_v61  ;;  %v2677_v61 = vld [vmem:[%s5547_s0 + $0xbc] sm:$0xf0] }
  0x3f   :  { %1748 = vmatpush.bf16.msrb.mxu3 %v3580_v62  ;;  %v2683_v62 = vld [vmem:[%s5547_s0 + $0xa0] sm:$0xf]  ;;  %v2680_v2 = vor.u32 %v3440_v60, %v2677_v61 }
  0x40   :  { %1572 = vmatpush.bf16.msrb.mxu1 %v3564_v6  ;;  %1836 = vmatpush.bf16.msrb.mxu0 %v3588_v7  ;;  %v2684_v3 = vor.u32 %v3445_v63, %v2683_v62  ;;  %v3601_v6 = vld [vmem:[%s5545_s1 + $0x168] sm:$0xff]  ;;  %v3475_v63 = vld [vmem:[%s5547_s0 + $0x1b4] sm:$0xf] }
  0x41   :  { %1515 = vmatmul.bf16.gmra.mxu1 %v2812_v8  ;;  %1535 = vmatmul.bf16.gmra.mxu2 %v2956_v9  ;;  %v3625_v7 = vld [vmem:[%s5545_s1 + $0x228] sm:$0xff]  ;;  %v3448_v8 = vld [vmem:[%s5547_s0 + $0xdc] sm:$0xf]  ;;  %v2705_v9 = vld [vmem:[%s5547_s0 + $0xfc] sm:$0xf0] }
  0x42   :  { %1555 = vmatmul.bf16.gmra.mxu3 %v3100_v10  ;;  %2005 = vmatpush.bf16.msra.mxu2 %v3611_v12  ;;  %v2711_v10 = vld [vmem:[%s5547_s0 + $0xe0] sm:$0xf]  ;;  %v3449_v12 = vld [vmem:[%s5547_s0 + $0xe4] sm:$0xf]  ;;  %v2708_v17 = vor.u32 %v3448_v8, %v2705_v9 }
  0x43   :  { %1495 = vmatmul.bf16.gmra.mxu0 %v2668_v11  ;;  %2093 = vmatpush.bf16.msra.mxu3 %v3619_v13  ;;  %v3453_v11 = vld [vmem:[%s5547_s0 + $0x100] sm:$0xf0]  ;;  %v2713_v13 = vld [vmem:[%s5547_s0 + $0x104] sm:$0xf0] }
  0x44   :  { %1917 = vmatpush.bf16.msra.mxu1 %v3603_v14  ;;  %2181 = vmatpush.bf16.msra.mxu0 %v3627_v15  ;;  %v2719_v14 = vld [vmem:[%s5547_s0 + $0xe8] sm:$0xf]  ;;  %v3454_v15 = vld [vmem:[%s5547_s0 + $0x108] sm:$0xf0]  ;;  %v2712_v18 = vor.u32 %v3453_v11, %v2711_v10  ;;  %v2716_v19 = vor.u32 %v3449_v12, %v2713_v13 }
  0x45   :  { %v2720_v20 = vor.u32 %v3454_v15, %v2719_v14  ;;  %v3607_v15 = vld [vmem:[%s5545_s1 + $0x198] sm:$0xff] }
  0x46   :  { %2006 = vmatpush.bf16.msra.mxu2 %v3610_v40  ;;  %v3600_v40 = vld [vmem:[%s5545_s1 + $0x160] sm:$0xff] }
  0x47   :  { %2094 = vmatpush.bf16.msra.mxu3 %v3618_v41 }
  0x48   :  { %1918 = vmatpush.bf16.msra.mxu1 %v3602_v42  ;;  %2182 = vmatpush.bf16.msra.mxu0 %v3626_v43  ;;  %v3624_v42 = vld [vmem:[%s5545_s1 + $0x220] sm:$0xff]  ;;  %v3466_v43 = vld [vmem:[%s5547_s0 + $0x16c] sm:$0xf] }
  0x4a   :  { %2007 = vmatpush.bf16.msra.mxu2 %v3609_v4  ;;  %v2821_v4 = vld [vmem:[%s5547_s0 + $0x1dc] sm:$0xf0] }
  0x4b   :  { %2095 = vmatpush.bf16.msra.mxu3 %v3617_v5  ;;  %v2827_v5 = vld [vmem:[%s5547_s0 + $0x1c0] sm:$0xf] }
  0x4c   :  { %1919 = vmatpush.bf16.msra.mxu1 %v3601_v6  ;;  %2183 = vmatpush.bf16.msra.mxu0 %v3625_v7  ;;  %v3481_v6 = vld [vmem:[%s5547_s0 + $0x1e0] sm:$0xf0] }
  0x4d   :  { %v2828_v13 = vor.u32 %v3481_v6, %v2827_v5 }
  0x4e   :  { %2008 = vmatpush.bf16.msra.mxu2 %v3608_v35 }
  0x50   :  { %1920 = vmatpush.bf16.msra.mxu1 %v3600_v40  ;;  %2184 = vmatpush.bf16.msra.mxu0 %v3624_v42 }
  0x51   :  { %1520 = vmatmul.bf16.gmra.mxu1 %v2848_v24  ;;  %1540 = vmatmul.bf16.gmra.mxu2 %v2992_v25  ;;  %v3462_v24 = vld [vmem:[%s5547_s0 + $0x148] sm:$0xf0] }
  0x52   :  { %1560 = vmatmul.bf16.gmra.mxu3 %v892_v26  ;;  %v3458_v25 = vld [vmem:[%s5547_s0 + $0x12c] sm:$0xf]  ;;  %v2749_v26 = vld [vmem:[%s5547_s0 + $0x14c] sm:$0xf0]  ;;  %v2748_v30 = vor.u32 %v3462_v24, %v2747_v23  ;;  %2009 = vmatpush.bf16.msra.mxu2 %v3607_v15  ;;  %v3623_v23 = vld [vmem:[%s5545_s1 + $0x218] sm:$0xff] }
  0x53   :  { %1500 = vmatmul.bf16.gmra.mxu0 %v2704_v27  ;;  %v2755_v27 = vld [vmem:[%s5547_s0 + $0x130] sm:$0xf]  ;;  %v2752_v32 = vor.u32 %v3458_v25, %v2749_v26  ;;  %v3484_v24 = vld [vmem:[%s5547_s0 + $0x1fc] sm:$0xf]  ;;  %v2849_v25 = vld [vmem:[%s5547_s0 + $0x21c] sm:$0xf0] }
  0x54   :  { %v2756_v33 = vor.u32 %v3463_v28, %v2755_v27  ;;  %1921 = vmatpush.bf16.msra.mxu1 %v3599_v22  ;;  %2185 = vmatpush.bf16.msra.mxu0 %v3623_v23  ;;  %v2855_v26 = vld [vmem:[%s5547_s0 + $0x200] sm:$0xf]  ;;  %v3489_v27 = vld [vmem:[%s5547_s0 + $0x220] sm:$0xf0]  ;;  %v3606_v22 = vld [vmem:[%s5545_s1 + $0x190] sm:$0xff] }
  0x55   :  { %v3485_v28 = vld [vmem:[%s5547_s0 + $0x204] sm:$0xf]  ;;  %v2856_v40 = vor.u32 %v3489_v27, %v2855_v26 }
  0x56   :  { %2010 = vmatpush.bf16.msra.mxu2 %v3606_v22 }
  0x61   :  { %1573 = vmatmul.bf16.vlgmr.msrb.gmra.mxu1 %v2600_v36  ;;  %1661 = vmatmul.bf16.vlgmr.msrb.gmra.mxu2 %v2604_v37  ;;  %v3616_v36 = vld [vmem:[%s5545_s1 + $0x1e0] sm:$0xff] }
  0x62   :  { %1749 = vmatmul.bf16.vlgmr.msrb.gmra.mxu3 %v2608_v38 }
  0x63   :  { %1837 = vmatmul.bf16.vlgmr.msrb.gmra.mxu0 %v2612_v39  ;;  %2096 = vmatpush.bf16.msra.mxu3 %v3616_v36  ;;  %v2852_v36 = vor.u32 %v3484_v24, %v2849_v25 }
  0x71   :  { %1578 = vmatmul.bf16.gmra.mxu1 %v2636_v52  ;;  %1666 = vmatmul.bf16.gmra.mxu2 %v2640_v53  ;;  %v2780_v53 = vor.u32 %v3466_v43, %v2777_v44 }
  0x72   :  { %1754 = vmatmul.bf16.gmra.mxu3 %v2644_v54  ;;  %v2784_v54 = vor.u32 %v3471_v46, %v2783_v45 }
  0x73   :  { %1842 = vmatmul.bf16.gmra.mxu0 %v2648_v55 }
  0x81   :  { %1583 = vmatmul.bf16.gmra.mxu1 %v2672_v0  ;;  %1671 = vmatmul.bf16.gmra.mxu2 %v2676_v1  ;;  %v2813_v0 = vld [vmem:[%s5547_s0 + $0x1d4] sm:$0xf0] }
  0x82   :  { %1759 = vmatmul.bf16.gmra.mxu3 %v2680_v2  ;;  %v2819_v1 = vld [vmem:[%s5547_s0 + $0x1b8] sm:$0xf]  ;;  %v3480_v2 = vld [vmem:[%s5547_s0 + $0x1d8] sm:$0xf0]  ;;  %v2816_v9 = vor.u32 %v3475_v63, %v2813_v0  ;;  %v3494_v63 = vld [vmem:[%s5547_s0 + $0x24c] sm:$0xf] }
  0x83   :  { %1847 = vmatmul.bf16.gmra.mxu0 %v2684_v3  ;;  %v3476_v3 = vld [vmem:[%s5547_s0 + $0x1bc] sm:$0xf]  ;;  %v2820_v10 = vor.u32 %v3480_v2, %v2819_v1  ;;  %v2893_v0 = vld [vmem:[%s5547_s0 + $0x26c] sm:$0xf0]  ;;  %v3499_v2 = vld [vmem:[%s5547_s0 + $0x270] sm:$0xf0] }
  0x84   :  { %v2824_v12 = vor.u32 %v3476_v3, %v2821_v4  ;;  %v2899_v1 = vld [vmem:[%s5547_s0 + $0x250] sm:$0xf] }
  0x91   :  { %1588 = vmatmul.bf16.gmra.mxu1 %v2708_v17  ;;  %1676 = vmatmul.bf16.gmra.mxu2 %v2712_v18  ;;  %v3615_v17 = vld [vmem:[%s5545_s1 + $0x1d8] sm:$0xff] }
  0x92   :  { %1764 = vmatmul.bf16.gmra.mxu3 %v2716_v19 }
  0x93   :  { %1852 = vmatmul.bf16.gmra.mxu0 %v2720_v20  ;;  %2097 = vmatpush.bf16.msra.mxu3 %v3615_v17 }
  0x9e   :  { %v4065_v31 = vpop.f32.mrf.mxu1 }
  0xa0   :  { %v4067_v34 = vpop.f32.mrf.mxu0 }
  0xa1   :  { %1593 = vmatmul.bf16.gmra.mxu1 %v2744_v29  ;;  %1681 = vmatmul.bf16.gmra.mxu2 %v2748_v30  ;;  %v2857_v29 = vld [vmem:[%s5547_s0 + $0x224] sm:$0xf0]  ;;  %v1487_v4 = vadd.f32 %v4224_v50, %v4067_v34  ;;  %v3614_v34 = vld [vmem:[%s5545_s1 + $0x1d0] sm:$0xff] }
  0xa2   :  { %1769 = vmatmul.bf16.gmra.mxu3 %v2752_v32  ;;  %v2863_v30 = vld [vmem:[%s5547_s0 + $0x208] sm:$0xf]  ;;  %v3490_v32 = vld [vmem:[%s5547_s0 + $0x228] sm:$0xf0]  ;;  %v2860_v43 = vor.u32 %v3485_v28, %v2857_v29 }
  0xa3   :  { %1857 = vmatmul.bf16.gmra.mxu0 %v2756_v33  ;;  %v2864_v44 = vor.u32 %v3490_v32, %v2863_v30  ;;  %2098 = vmatpush.bf16.msra.mxu3 %v3614_v34  ;;  %v3598_v32 = vld [vmem:[%s5545_s1 + $0x150] sm:$0xff] }
  0xa4   :  { %v4075_v37 = vpop.f32.mrf.mxu2  ;;  %1922 = vmatpush.bf16.msra.mxu1 %v3598_v32 }
  0xa5   :  { %v4077_v38 = vpop.f32.mrf.mxu3 }
  0xa6   :  { %v4079_v39 = vpop.f32.mrf.mxu1 }
  0xa8   :  { %v4084_v41 = vpop.f32.mrf.mxu0 }
  0xa9   :  { %v1489_v24 = vadd.f32 %v4224_v50, %v4084_v41  ;;  %v2921_v41 = vld [vmem:[%s5547_s0 + $0x2ac] sm:$0xf0] }
  0xac   :  { %v4113_v51 = vpop.f32.mrf.mxu2 }
  0xad   :  { %v4115_v52 = vpop.f32.mrf.mxu3 }
  0xae   :  { %v4117_v55 = vpop.f32.mrf.mxu1 }
  0xb0   :  { %v4119_v58 = vpop.f32.mrf.mxu0 }
  0xb1   :  { %1598 = vmatmul.bf16.gmra.mxu1 %v2780_v53  ;;  %1686 = vmatmul.bf16.gmra.mxu2 %v2784_v54  ;;  %v3493_v53 = vld [vmem:[%s5547_s0 + $0x244] sm:$0xf]  ;;  %v2885_v54 = vld [vmem:[%s5547_s0 + $0x264] sm:$0xf0] }
  0xb2   :  { %1774 = vmatmul.bf16.gmra.mxu3 %v2788_v56  ;;  %v2891_v56 = vld [vmem:[%s5547_s0 + $0x248] sm:$0xf]  ;;  %v2888_v6 = vor.u32 %v3493_v53, %v2885_v54  ;;  %v3507_v53 = vld [vmem:[%s5547_s0 + $0x2b0] sm:$0xf0] }
  0xb3   :  { %1862 = vmatmul.bf16.gmra.mxu0 %v2792_v57  ;;  %v3498_v57 = vld [vmem:[%s5547_s0 + $0x268] sm:$0xf0]  ;;  %v3503_v54 = vld [vmem:[%s5547_s0 + $0x294] sm:$0xf] }
  0xb4   :  { %v4121_v59 = vpop.f32.mrf.mxu2 }
  0xb5   :  { %v4123_v60 = vpop.f32.mrf.mxu3 }
  0xb6   :  { %v4125_v61 = vpop.f32.mrf.mxu1 }
  0xb8   :  { %v4127_v62 = vpop.f32.mrf.mxu0 }
  0xbc   :  { %v4153_v7 = vpop.f32.mrf.mxu2 }
  0xbd   :  { %v4155_v8 = vpop.f32.mrf.mxu3 }
  0xbe   :  { %v4157_v11 = vpop.f32.mrf.mxu1 }
  0xc0   :  { %v4159_v14 = vpop.f32.mrf.mxu0 }
  0xc1   :  { %1603 = vmatmul.bf16.gmra.mxu1 %v2816_v9  ;;  %1691 = vmatmul.bf16.gmra.mxu2 %v2820_v10  ;;  %v2892_v9 = vor.u32 %v3498_v57, %v2891_v56  ;;  %v2929_v56 = vld [vmem:[%s5547_s0 + $0x2b4] sm:$0xf0] }
  0xc2   :  { %1779 = vmatmul.bf16.gmra.mxu3 %v2824_v12  ;;  %v2896_v12 = vor.u32 %v3494_v63, %v2893_v0  ;;  %v2935_v57 = vld [vmem:[%s5547_s0 + $0x298] sm:$0xf]  ;;  %v3508_v63 = vld [vmem:[%s5547_s0 + $0x2b8] sm:$0xf0] }
  0xc3   :  { %1867 = vmatmul.bf16.gmra.mxu0 %v2828_v13  ;;  %v2900_v13 = vor.u32 %v3499_v2, %v2899_v1  ;;  %v1492_v1 = vadd.f32 %v4224_v50, %v4119_v58  ;;  %v1494_v58 = vadd.f32 %v4224_v50, %v4127_v62  ;;  %v2963_v62 = vld [vmem:[%s5547_s0 + $0x2d8] sm:$0xf] }
  0xc4   :  { %v4167_v18 = vpop.f32.mrf.mxu2 }
  0xc5   :  { %v4169_v19 = vpop.f32.mrf.mxu3 }
  0xc6   :  { %v4171_v20 = vpop.f32.mrf.mxu1 }
  0xc8   :  { %v4173_v21 = vpop.f32.mrf.mxu0 }
  0xcc   :  { %v4205_v33 = vpop.f32.mrf.mxu2 }
  0xcd   :  { %v4207_v35 = vpop.f32.mrf.mxu3 }
  0xce   :  { %v4209_v42 = vpop.f32.mrf.mxu1 }
  0xd0   :  { %v4211_v45 = vpop.f32.mrf.mxu0 }
  0xd1   :  { %1608 = vmatmul.bf16.gmra.mxu1 %v2852_v36  ;;  %1696 = vmatmul.bf16.gmra.mxu2 %v2856_v40  ;;  %v3622_v36 = vld [vmem:[%s5545_s1 + $0x210] sm:$0xff]  ;;  %v3502_v40 = vld [vmem:[%s5547_s0 + $0x28c] sm:$0xf] }
  0xd2   :  { %1784 = vmatmul.bf16.gmra.mxu3 %v2860_v43  ;;  %2186 = vmatpush.bf16.msra.mxu0 %v3622_v36  ;;  %v3516_v36 = vld [vmem:[%s5547_s0 + $0x2f8] sm:$0xf0] }
  0xd3   :  { %1872 = vmatmul.bf16.gmra.mxu0 %v2864_v44  ;;  %v2927_v44 = vld [vmem:[%s5547_s0 + $0x290] sm:$0xf] }
  0xd4   :  { %v4213_v46 = vpop.f32.mrf.mxu2 }
  0xd5   :  { %v4215_v47 = vpop.f32.mrf.mxu3 }
  0xd6   :  { %v4217_v48 = vpop.f32.mrf.mxu1 }
  0xd8   :  { %v4219_v49 = vpop.f32.mrf.mxu0 }
  0xdc   :  { %v4250_v3 = vpop.f32.mrf.mxu2 }
  0xdd   :  { %v1563_v5 = vpop.f32.mrf.mxu3 }
  0xde   :  { %v1574_v10 = vpop.f32.mrf.mxu1  ;;  %v2924_v5 = vor.u32 %v3502_v40, %v2921_v41  ;;  %v3512_v40 = vld [vmem:[%s5547_s0 + $0x2dc] sm:$0xf]  ;;  %v2965_v41 = vld [vmem:[%s5547_s0 + $0x2fc] sm:$0xf0] }
  0xdf   :  { %v1575_v15 = vadd.f32 %v1574_v10, %v1487_v4  ;;  %v2932_v10 = vor.u32 %v3503_v54, %v2929_v56  ;;  %v1497_v56 = vadd.f32 %v4224_v50, %v4159_v14  ;;  %v3605_v14 = vld [vmem:[%s5545_s1 + $0x188] sm:$0xff] }
  0xe0   :  { %v1838_v17 = vpop.f32.mrf.mxu0  ;;  %2011 = vmatpush.bf16.msra.mxu2 %v3605_v14 }
  0xe1   :  { %1613 = vmatmul.bf16.gmra.mxu1 %v2888_v6  ;;  %1701 = vmatmul.bf16.gmra.mxu2 %v2892_v9  ;;  %v2928_v6 = vor.u32 %v3507_v53, %v2927_v44  ;;  %v2971_v44 = vld [vmem:[%s5547_s0 + $0x2e0] sm:$0xf]  ;;  %v3517_v53 = vld [vmem:[%s5547_s0 + $0x300] sm:$0xf0] }
  0xe2   :  { %1789 = vmatmul.bf16.gmra.mxu3 %v2896_v12  ;;  %v2936_v12 = vor.u32 %v3508_v63, %v2935_v57 }
  0xe3   :  { %1877 = vmatmul.bf16.gmra.mxu0 %v2900_v13 }
  0xe4   :  { %v1662_v23 = vpop.f32.mrf.mxu2 }
  0xe5   :  { %v1663_v25 = vadd.f32 %v1662_v23, %v1575_v15  ;;  %v1750_v26 = vpop.f32.mrf.mxu3 }
  0xe6   :  { %v1576_v27 = vpop.f32.mrf.mxu1 }
  0xe7   :  { %v1751_v28 = vadd.f32 %v1750_v26, %v1663_v25  ;;  %v1577_v29 = vadd.f32 %v1576_v27, %v1489_v24 }
  0xe8   :  { %v1840_v30 = vpop.f32.mrf.mxu0 }
  0xe9   :  { %v4274_v43 = vadd.f32 %v1838_v17, %v1751_v28 }
  0xec   :  { %v1664_v0 = vpop.f32.mrf.mxu2 }
  0xed   :  { %v1665_v2 = vadd.f32 %v1664_v0, %v1577_v29  ;;  %v1752_v4 = vpop.f32.mrf.mxu3  ;;  %v3511_v29 = vld [vmem:[%s5547_s0 + $0x2d4] sm:$0xf] }
  0xee   :  { %v1579_v9 = vpop.f32.mrf.mxu1 }
  0xef   :  { %v1753_v13 = vadd.f32 %v1752_v4, %v1665_v2  ;;  %v1580_v15 = vadd.f32 %v1579_v9, %v1492_v1  ;;  %v2964_v1 = vor.u32 %v3516_v36, %v2963_v62  ;;  %v2968_v4 = vor.u32 %v3512_v40, %v2965_v41  ;;  %v2999_v62 = vld [vmem:[%s5547_s0 + $0x320] sm:$0xf]  ;;  %v3525_v36 = vld [vmem:[%s5547_s0 + $0x340] sm:$0xf0]  ;;  %v3001_v41 = vld [vmem:[%s5547_s0 + $0x344] sm:$0xf0] }
  0xf0   :  { %v1843_v17 = vpop.f32.mrf.mxu0  ;;  %v3521_v40 = vld [vmem:[%s5547_s0 + $0x324] sm:$0xf] }
  0xf1   :  { %1618 = vmatmul.bf16.gmra.mxu1 %v2924_v5  ;;  %1706 = vmatmul.bf16.gmra.mxu2 %v2928_v6  ;;  %v4296_v22 = vadd.f32 %v1840_v30, %v1753_v13  ;;  %v2957_v30 = vld [vmem:[%s5547_s0 + $0x2f4] sm:$0xf0]  ;;  %v2972_v5 = vor.u32 %v3517_v53, %v2971_v44  ;;  %v3613_v13 = vld [vmem:[%s5545_s1 + $0x1c8] sm:$0xff] }
  0xf2   :  { %1794 = vmatmul.bf16.gmra.mxu3 %v2932_v10  ;;  %v2960_v0 = vor.u32 %v3511_v29, %v2957_v30  ;;  %v3520_v29 = vld [vmem:[%s5547_s0 + $0x31c] sm:$0xf]  ;;  %v3007_v44 = vld [vmem:[%s5547_s0 + $0x328] sm:$0xf]  ;;  %v3526_v53 = vld [vmem:[%s5547_s0 + $0x348] sm:$0xf0] }
  0xf3   :  { %1882 = vmatmul.bf16.gmra.mxu0 %v2936_v12  ;;  %2099 = vmatpush.bf16.msra.mxu3 %v3613_v13 }
  0xf4   :  { %v1667_v34 = vpop.f32.mrf.mxu2 }
  0xf5   :  { %v1668_v23 = vadd.f32 %v1667_v34, %v1580_v15  ;;  %v1755_v24 = vpop.f32.mrf.mxu3 }
  0xf6   :  { %v1581_v25 = vpop.f32.mrf.mxu1 }
  0xf7   :  { %v1756_v26 = vadd.f32 %v1755_v24, %v1668_v23  ;;  %v1582_v27 = vadd.f32 %v1581_v25, %v1494_v58 }
  0xf8   :  { %v1845_v28 = vpop.f32.mrf.mxu0 }
  0xf9   :  { %v4306_v32 = vadd.f32 %v1843_v17, %v1756_v26  ;;  %v1499_v17 = vadd.f32 %v4224_v50, %v4173_v21  ;;  %v2993_v21 = vld [vmem:[%s5547_s0 + $0x33c] sm:$0xf0] }
  0xfc   :  { %v1669_v54 = vpop.f32.mrf.mxu2 }
  0xfd   :  { %v1670_v57 = vadd.f32 %v1669_v54, %v1582_v27  ;;  %v1757_v63 = vpop.f32.mrf.mxu3  ;;  %v3597_v27 = vld [vmem:[%s5545_s1 + $0x148] sm:$0xff] }
  0xfe   :  { %v1584_v2 = vpop.f32.mrf.mxu1  ;;  %1923 = vmatpush.bf16.msra.mxu1 %v3597_v27 }
  0xff   :  { %v1758_v6 = vadd.f32 %v1757_v63, %v1670_v57  ;;  %v1585_v9 = vadd.f32 %v1584_v2, %v1497_v56  ;;  %v1502_v56 = vadd.f32 %v4224_v50, %v4211_v45  ;;  %v1504_v45 = vadd.f32 %v4224_v50, %v4219_v49  ;;  %v3035_v49 = vld [vmem:[%s5547_s0 + $0x368] sm:$0xf] }
 0x100   :  { %v1848_v10 = vpop.f32.mrf.mxu0 }
 0x101   :  { %1623 = vmatmul.bf16.gmra.mxu1 %v2960_v0  ;;  %1711 = vmatmul.bf16.gmra.mxu2 %v2964_v1  ;;  %v4328_v12 = vadd.f32 %v1845_v28, %v1758_v6  ;;  %v3621_v28 = vld [vmem:[%s5545_s1 + $0x208] sm:$0xff]  ;;  %v2996_v0 = vor.u32 %v3520_v29, %v2993_v21  ;;  %v3000_v1 = vor.u32 %v3525_v36, %v2999_v62  ;;  %v3037_v21 = vld [vmem:[%s5547_s0 + $0x38c] sm:$0xf0]  ;;  %v3535_v36 = vld [vmem:[%s5547_s0 + $0x390] sm:$0xf0] }
 0x102   :  { %1799 = vmatmul.bf16.gmra.mxu3 %v2968_v4  ;;  %2187 = vmatpush.bf16.msra.mxu0 %v3621_v28  ;;  %v3004_v4 = vor.u32 %v3521_v40, %v3001_v41  ;;  %v3534_v28 = vld [vmem:[%s5547_s0 + $0x388] sm:$0xf0]  ;;  %v3043_v62 = vld [vmem:[%s5547_s0 + $0x370] sm:$0xf]  ;;  %v1507_v41 = vadd.f32 %v4224_v50, %v4065_v31  ;;  %v3604_v31 = vld [vmem:[%s5545_s1 + $0x180] sm:$0xff] }
 0x103   :  { %1887 = vmatmul.bf16.gmra.mxu0 %v2972_v5  ;;  %v3008_v5 = vor.u32 %v3526_v53, %v3007_v44  ;;  %v3530_v29 = vld [vmem:[%s5547_s0 + $0x36c] sm:$0xf]  ;;  %2012 = vmatpush.bf16.msra.mxu2 %v3604_v31 }
 0x104   :  { %v1672_v15 = vpop.f32.mrf.mxu2 }
 0x105   :  { %v1673_v34 = vadd.f32 %v1672_v15, %v1585_v9  ;;  %v1760_v58 = vpop.f32.mrf.mxu3 }
 0x106   :  { %v1586_v23 = vpop.f32.mrf.mxu1 }
 0x107   :  { %v1761_v24 = vadd.f32 %v1760_v58, %v1673_v34  ;;  %v1587_v25 = vadd.f32 %v1586_v23, %v1499_v17 }
 0x108   :  { %v1850_v26 = vpop.f32.mrf.mxu0 }
 0x109   :  { %v4350_v30 = vadd.f32 %v1848_v10, %v1761_v24 }
 0x10c   :  { %v1674_v54 = vpop.f32.mrf.mxu2 }
 0x10d   :  { %v1675_v57 = vadd.f32 %v1674_v54, %v1587_v25  ;;  %v1762_v63 = vpop.f32.mrf.mxu3  ;;  %v3529_v25 = vld [vmem:[%s5547_s0 + $0x364] sm:$0xf] }
 0x10e   :  { %v1589_v2 = vpop.f32.mrf.mxu1 }
 0x10f   :  { %v1763_v6 = vadd.f32 %v1762_v63, %v1675_v57  ;;  %v1590_v9 = vadd.f32 %v1589_v2, %v1502_v56  ;;  %v3036_v56 = vor.u32 %v3534_v28, %v3035_v49  ;;  %v3040_v63 = vor.u32 %v3530_v29, %v3037_v21  ;;  %v3071_v49 = vld [vmem:[%s5547_s0 + $0x3b0] sm:$0xf]  ;;  %v3543_v28 = vld [vmem:[%s5547_s0 + $0x3d0] sm:$0xf0]  ;;  %v3073_v21 = vld [vmem:[%s5547_s0 + $0x3d4] sm:$0xf0] }
 0x110   :  { %v1853_v10 = vpop.f32.mrf.mxu0  ;;  %v3539_v29 = vld [vmem:[%s5547_s0 + $0x3b4] sm:$0xf] }
 0x111   :  { %1628 = vmatmul.bf16.gmra.mxu1 %v2996_v0  ;;  %1716 = vmatmul.bf16.gmra.mxu2 %v3000_v1  ;;  %v4372_v14 = vadd.f32 %v1850_v26, %v1763_v6  ;;  %v3029_v26 = vld [vmem:[%s5547_s0 + $0x384] sm:$0xf0]  ;;  %v3044_v0 = vor.u32 %v3535_v36, %v3043_v62  ;;  %v3612_v6 = vld [vmem:[%s5545_s1 + $0x1c0] sm:$0xff]  ;;  %v3079_v62 = vld [vmem:[%s5547_s0 + $0x3b8] sm:$0xf] }
 0x112   :  { %1804 = vmatmul.bf16.gmra.mxu3 %v3004_v4  ;;  %v3032_v54 = vor.u32 %v3529_v25, %v3029_v26  ;;  %v3538_v25 = vld [vmem:[%s5547_s0 + $0x3ac] sm:$0xf]  ;;  %v3544_v36 = vld [vmem:[%s5547_s0 + $0x3d8] sm:$0xf0] }
 0x113   :  { %1892 = vmatmul.bf16.gmra.mxu0 %v3008_v5  ;;  %2100 = vmatpush.bf16.msra.mxu3 %v3612_v6 }
 0x114   :  { %v1677_v13 = vpop.f32.mrf.mxu2 }
 0x115   :  { %v1678_v15 = vadd.f32 %v1677_v13, %v1590_v9  ;;  %v1765_v17 = vpop.f32.mrf.mxu3 }
 0x116   :  { %v1591_v34 = vpop.f32.mrf.mxu1 }
 0x117   :  { %v1766_v58 = vadd.f32 %v1765_v17, %v1678_v15  ;;  %v1592_v23 = vadd.f32 %v1591_v34, %v1504_v45 }
 0x118   :  { %v1855_v24 = vpop.f32.mrf.mxu0 }
 0x119   :  { %v4382_v27 = vadd.f32 %v1853_v10, %v1766_v58  ;;  %v1509_v10 = vadd.f32 %v4224_v50, %v4079_v39  ;;  %v3065_v39 = vld [vmem:[%s5547_s0 + $0x3cc] sm:$0xf0] }
 0x11c   :  { %v1679_v40 = vpop.f32.mrf.mxu2 }
 0x11d   :  { %v1680_v44 = vadd.f32 %v1679_v40, %v1592_v23  ;;  %v1767_v53 = vpop.f32.mrf.mxu3  ;;  %v3596_v23 = vld [vmem:[%s5545_s1 + $0x140] sm:$0xff] }
 0x11e   :  { %v1594_v57 = vpop.f32.mrf.mxu1  ;;  %1924 = vmatpush.bf16.msra.mxu1 %v3596_v23 }
 0x11f   :  { %v1768_v1 = vadd.f32 %v1767_v53, %v1680_v44  ;;  %v1595_v2 = vadd.f32 %v1594_v57, %v1507_v41  ;;  %v1512_v41 = vadd.f32 %v4224_v50, %v4117_v55  ;;  %v1514_v55 = vadd.f32 %v4224_v50, %v4125_v61  ;;  %v3107_v61 = vld [vmem:[%s5547_s0 + $0x3f8] sm:$0xf] }
 0x120   :  { %v1858_v4 = vpop.f32.mrf.mxu0 }
 0x121   :  { %1633 = vmatmul.bf16.gmra.mxu1 %v3032_v54  ;;  %1721 = vmatmul.bf16.gmra.mxu2 %v3036_v56  ;;  %v4404_v5 = vadd.f32 %v1855_v24, %v1768_v1  ;;  %v3620_v24 = vld [vmem:[%s5545_s1 + $0x200] sm:$0xff]  ;;  %v3068_v54 = vor.u32 %v3538_v25, %v3065_v39  ;;  %v3072_v56 = vor.u32 %v3543_v28, %v3071_v49  ;;  %v3548_v25 = vld [vmem:[%s5547_s0 + $0x3fc] sm:$0xf] }
 0x122   :  { %1809 = vmatmul.bf16.gmra.mxu3 %v3040_v63  ;;  %2188 = vmatpush.bf16.msra.mxu0 %v3620_v24  ;;  %v3076_v63 = vor.u32 %v3539_v29, %v3073_v21  ;;  %v3552_v24 = vld [vmem:[%s5547_s0 + $0x418] sm:$0xf0]  ;;  %v3109_v39 = vld [vmem:[%s5547_s0 + $0x41c] sm:$0xf0]  ;;  %v3553_v28 = vld [vmem:[%s5547_s0 + $0x420] sm:$0xf0]  ;;  %v1517_v21 = vadd.f32 %v4224_v50, %v4157_v11  ;;  %v1519_v11 = vadd.f32 %v4224_v50, %v4171_v20 }
 0x123   :  { %1897 = vmatmul.bf16.gmra.mxu0 %v3044_v0  ;;  %v3080_v0 = vor.u32 %v3544_v36, %v3079_v62  ;;  %v3115_v49 = vld [vmem:[%s5547_s0 + $0x400] sm:$0xf] }
 0x124   :  { %v1682_v9 = vpop.f32.mrf.mxu2 }
 0x125   :  { %v1683_v13 = vadd.f32 %v1682_v9, %v1595_v2  ;;  %v1770_v45 = vpop.f32.mrf.mxu3 }
 0x126   :  { %v1596_v15 = vpop.f32.mrf.mxu1 }
 0x127   :  { %v1771_v17 = vadd.f32 %v1770_v45, %v1683_v13  ;;  %v1597_v34 = vadd.f32 %v1596_v15, %v1509_v10 }
 0x128   :  { %v1860_v58 = vpop.f32.mrf.mxu0 }
 0x129   :  { %v4426_v26 = vadd.f32 %v1858_v4, %v1771_v17 }
 0x12c   :  { %v1684_v40 = vpop.f32.mrf.mxu2 }
 0x12d   :  { %v1685_v44 = vadd.f32 %v1684_v40, %v1597_v34  ;;  %v1772_v53 = vpop.f32.mrf.mxu3  ;;  %v3547_v34 = vld [vmem:[%s5547_s0 + $0x3f4] sm:$0xf] }
 0x12e   :  { %v1599_v57 = vpop.f32.mrf.mxu1 }
 0x12f   :  { %v1773_v1 = vadd.f32 %v1772_v53, %v1685_v44  ;;  %v1600_v2 = vadd.f32 %v1599_v57, %v1512_v41  ;;  %v3108_v41 = vor.u32 %v3552_v24, %v3107_v61  ;;  %v3112_v53 = vor.u32 %v3548_v25, %v3109_v39 }
 0x130   :  { %v1863_v4 = vpop.f32.mrf.mxu0  ;;  %v1522_v24 = vadd.f32 %v4224_v50, %v4209_v42  ;;  %v1524_v42 = vadd.f32 %v4224_v50, %v4217_v48  ;;  %v2619_v48 = vld [vmem:[%s5547_s0 + $0x18] sm:$0xf] }
 0x131   :  { %1638 = vmatmul.bf16.gmra.mxu1 %v3068_v54  ;;  %1726 = vmatmul.bf16.gmra.mxu2 %v3072_v56  ;;  %v4448_v31 = vadd.f32 %v1860_v58, %v1773_v1  ;;  %v3101_v58 = vld [vmem:[%s5547_s0 + $0x414] sm:$0xf0]  ;;  %v3116_v54 = vor.u32 %v3553_v28, %v3115_v49 }
 0x132   :  { %1814 = vmatmul.bf16.gmra.mxu3 %v3076_v63  ;;  %v3104_v40 = vor.u32 %v3547_v34, %v3101_v58 }
 0x133   :  { %1902 = vmatmul.bf16.gmra.mxu0 %v3080_v0 }
 0x134   :  { %v1687_v6 = vpop.f32.mrf.mxu2 }
 0x135   :  { %v1688_v9 = vadd.f32 %v1687_v6, %v1600_v2  ;;  %v1775_v10 = vpop.f32.mrf.mxu3 }
 0x136   :  { %v1601_v13 = vpop.f32.mrf.mxu1 }
 0x137   :  { %v1776_v45 = vadd.f32 %v1775_v10, %v1688_v9  ;;  %v1602_v15 = vadd.f32 %v1601_v13, %v1514_v55  ;;  %v171_v55 = vld [vmem:[%s5547_s0 + $0x440] sm:$0x11] }
 0x138   :  { %v1865_v17 = vpop.f32.mrf.mxu0  ;;  %v751_v20 = vunpack.c.h.b16 %v171_v55 }
 0x139   :  { %v4458_v23 = vadd.f32 %v1863_v4, %v1776_v45  ;;  %v172_v45 = vld [vmem:[%s5547_s0 + $0x448] sm:$0x11] }
 0x13a   :  { %v752_v58 = vunpack.c.l.b16 %v172_v45 }
 0x13c   :  { %v1689_v29 = vpop.f32.mrf.mxu2 }
 0x13d   :  { %v1690_v62 = vadd.f32 %v1689_v29, %v1602_v15  ;;  %v1777_v36 = vpop.f32.mrf.mxu3  ;;  %v749_v15 = vunpack.c.h.b16 %v3900_v16 }
 0x13e   :  { %v1604_v44 = vpop.f32.mrf.mxu1 }
 0x13f   :  { %v1778_v56 = vadd.f32 %v1777_v36, %v1690_v62  ;;  %v1605_v57 = vadd.f32 %v1604_v44, %v1517_v21  ;;  %v893_v49 = vpack.c.b16 %v749_v15, %v749_v15  ;;  %v895_v21 = vpack.c.b16 %v751_v20, %v751_v20 }
 0x140   :  { %v1868_v63 = vpop.f32.mrf.mxu0  ;;  %v896_v62 = vpack.c.b16 %v752_v58, %v752_v58  ;;  %v1527_v15 = vadd.f32 %v4224_v50, %v4075_v37  ;;  %v1529_v37 = vadd.f32 %v4224_v50, %v4113_v51  ;;  %v2655_v51 = vld [vmem:[%s5547_s0 + $0x60] sm:$0xf] }
 0x141   :  { %1643 = vmatmul.bf16.gmra.mxu1 %v3104_v40  ;;  %1731 = vmatmul.bf16.gmra.mxu2 %v3108_v41  ;;  %v4480_v0 = vadd.f32 %v1865_v17, %v1778_v56  ;;  %v750_v17 = vunpack.c.l.b16 %v171_v55  ;;  %v3424_v55 = vld [vmem:[%s5547_s0 + $0x1c] sm:$0xf] }
 0x142   :  { %1819 = vmatmul.bf16.gmra.mxu3 %v3112_v53 }
 0x143   :  { %1907 = vmatmul.bf16.gmra.mxu0 %v3116_v54  ;;  %v894_v28 = vpack.c.b16 %v750_v17, %v750_v17 }
 0x144   :  { %v1692_v1 = vpop.f32.mrf.mxu2 }
 0x145   :  { %v1693_v2 = vadd.f32 %v1692_v1, %v1605_v57  ;;  %v1780_v4 = vpop.f32.mrf.mxu3 }
 0x146   :  { %v1606_v6 = vpop.f32.mrf.mxu1 }
 0x147   :  { %v1781_v9 = vadd.f32 %v1780_v4, %v1693_v2  ;;  %v1607_v10 = vadd.f32 %v1606_v6, %v1519_v11  ;;  %v3423_v11 = vld [vmem:[%s5547_s0 + $0x14] sm:$0xf]  ;;  %v2613_v2 = vld [vmem:[%s5547_s0 + $0x34] sm:$0xf0]  ;;  %v3428_v6 = vld [vmem:[%s5547_s0 + $0x38] sm:$0xf0] }
 0x148   :  { %v1870_v13 = vpop.f32.mrf.mxu0  ;;  %v2616_v58 = vor.u32 %v3423_v11, %v2613_v2  ;;  %v2657_v11 = vld [vmem:[%s5547_s0 + $0x84] sm:$0xf0] }
 0x149   :  { %v4491_v34 = vadd.f32 %v1868_v63, %v1781_v9  ;;  %v2621_v9 = vld [vmem:[%s5547_s0 + $0x3c] sm:$0xf0]  ;;  %v2663_v2 = vld [vmem:[%s5547_s0 + $0x68] sm:$0xf] }
 0x14c   :  { %v1694_v61 = vpop.f32.mrf.mxu2 }
 0x14d   :  { %v1695_v25 = vadd.f32 %v1694_v61, %v1607_v10  ;;  %v1782_v39 = vpop.f32.mrf.mxu3  ;;  %v2627_v10 = vld [vmem:[%s5547_s0 + $0x20] sm:$0xf]  ;;  %v2620_v61 = vor.u32 %v3428_v6, %v2619_v48  ;;  %v3438_v48 = vld [vmem:[%s5547_s0 + $0x88] sm:$0xf0] }
 0x14e   :  { %v1609_v29 = vpop.f32.mrf.mxu1 }
 0x14f   :  { %v1783_v36 = vadd.f32 %v1782_v39, %v1695_v25  ;;  %v1610_v40 = vadd.f32 %v1609_v29, %v1522_v24  ;;  %v2624_v25 = vor.u32 %v3424_v55, %v2621_v9  ;;  %v1532_v55 = vadd.f32 %v4224_v50, %v4121_v59 }
 0x150   :  { %v1873_v41 = vpop.f32.mrf.mxu0  ;;  %v1534_v59 = vadd.f32 %v4224_v50, %v4153_v7  ;;  %v2691_v7 = vld [vmem:[%s5547_s0 + $0xa8] sm:$0xf] }
 0x151   :  { %1648 = vmatmul.bf16.gmra.mxu1 %v893_v49  ;;  %1736 = vmatmul.bf16.gmra.mxu2 %v894_v28  ;;  %v4495_v16 = vadd.f32 %v1870_v13, %v1783_v36  ;;  %v3429_v13 = vld [vmem:[%s5547_s0 + $0x40] sm:$0xf0] }
 0x152   :  { %1824 = vmatmul.bf16.gmra.mxu3 %v895_v21  ;;  %v2628_v39 = vor.u32 %v3429_v13, %v2627_v10 }
 0x153   :  { %1912 = vmatmul.bf16.gmra.mxu0 %v896_v62 }
 0x154   :  { %v1697_v44 = vpop.f32.mrf.mxu2 }
 0x155   :  { %v1698_v53 = vadd.f32 %v1697_v44, %v1610_v40  ;;  %v1785_v54 = vpop.f32.mrf.mxu3 }
 0x156   :  { %v1611_v56 = vpop.f32.mrf.mxu1 }
 0x157   :  { %v1786_v57 = vadd.f32 %v1785_v54, %v1698_v53  ;;  %v1612_v63 = vadd.f32 %v1611_v56, %v1524_v42  ;;  %v3432_v54 = vld [vmem:[%s5547_s0 + $0x5c] sm:$0xf]  ;;  %v2649_v56 = vld [vmem:[%s5547_s0 + $0x7c] sm:$0xf0] }
 0x158   :  { %v1875_v1 = vpop.f32.mrf.mxu0  ;;  %v2652_v13 = vor.u32 %v3432_v54, %v2649_v56  ;;  %v2693_v54 = vld [vmem:[%s5547_s0 + $0xcc] sm:$0xf0] }
 0x159   :  { %v4505_v4 = vadd.f32 %v1873_v41, %v1786_v57  ;;  %v2699_v56 = vld [vmem:[%s5547_s0 + $0xb0] sm:$0xf] }
 0x15c   :  { %v1699_v45 = vpop.f32.mrf.mxu2 }
 0x15d   :  { %v1700_v17 = vadd.f32 %v1699_v45, %v1612_v63  ;;  %v1787_v20 = vpop.f32.mrf.mxu3  ;;  %v3437_v63 = vld [vmem:[%s5547_s0 + $0x80] sm:$0xf0] }
 0x15e   :  { %v1614_v24 = vpop.f32.mrf.mxu1  ;;  %v2656_v45 = vor.u32 %v3437_v63, %v2655_v51  ;;  %v3447_v51 = vld [vmem:[%s5547_s0 + $0xd0] sm:$0xf0] }
 0x15f   :  { %v1788_v49 = vadd.f32 %v1787_v20, %v1700_v17  ;;  %v1615_v28 = vadd.f32 %v1614_v24, %v1527_v15  ;;  %v2664_v20 = vor.u32 %v3438_v48, %v2663_v2 }
 0x160   :  { %v1878_v29 = vpop.f32.mrf.mxu0 }
 0x161   :  { %1925 = vmatmul.bf16.vlgmr.msra.gmra.mxu1 %v2616_v58  ;;  %2013 = vmatmul.bf16.vlgmr.msra.gmra.mxu2 %v2620_v61  ;;  %v4527_v21 = vadd.f32 %v1875_v1, %v1788_v49  ;;  %v3433_v1 = vld [vmem:[%s5547_s0 + $0x64] sm:$0xf] }
 0x162   :  { %2101 = vmatmul.bf16.vlgmr.msra.gmra.mxu3 %v2624_v25  ;;  %v2660_v17 = vor.u32 %v3433_v1, %v2657_v11  ;;  %v1537_v1 = vadd.f32 %v4224_v50, %v4167_v18  ;;  %v1539_v18 = vadd.f32 %v4224_v50, %v4205_v33  ;;  %v2727_v33 = vld [vmem:[%s5547_s0 + $0xf0] sm:$0xf] }
 0x163   :  { %2189 = vmatmul.bf16.vlgmr.msra.gmra.mxu0 %v2628_v39 }
 0x164   :  { %v1702_v62 = vpop.f32.mrf.mxu2 }
 0x165   :  { %v1703_v36 = vadd.f32 %v1702_v62, %v1615_v28  ;;  %v1790_v40 = vpop.f32.mrf.mxu3 }
 0x166   :  { %v1616_v41 = vpop.f32.mrf.mxu1 }
 0x167   :  { %v1791_v44 = vadd.f32 %v1790_v40, %v1703_v36  ;;  %v1617_v42 = vadd.f32 %v1616_v41, %v1529_v37  ;;  %v3441_v40 = vld [vmem:[%s5547_s0 + $0xa4] sm:$0xf]  ;;  %v2685_v41 = vld [vmem:[%s5547_s0 + $0xc4] sm:$0xf0] }
 0x168   :  { %v1880_v53 = vpop.f32.mrf.mxu0  ;;  %v2688_v48 = vor.u32 %v3441_v40, %v2685_v41  ;;  %v2729_v40 = vld [vmem:[%s5547_s0 + $0x114] sm:$0xf0] }
 0x169   :  { %v4537_v57 = vadd.f32 %v1878_v29, %v1791_v44  ;;  %v2735_v41 = vld [vmem:[%s5547_s0 + $0xf8] sm:$0xf] }
 0x16c   :  { %v1704_v6 = vpop.f32.mrf.mxu2 }
 0x16d   :  { %v1705_v9 = vadd.f32 %v1704_v6, %v1617_v42  ;;  %v1792_v10 = vpop.f32.mrf.mxu3  ;;  %v3446_v42 = vld [vmem:[%s5547_s0 + $0xc8] sm:$0xf0] }
 0x16e   :  { %v1619_v15 = vpop.f32.mrf.mxu1  ;;  %v2692_v6 = vor.u32 %v3446_v42, %v2691_v7  ;;  %v3456_v7 = vld [vmem:[%s5547_s0 + $0x118] sm:$0xf0] }
 0x16f   :  { %v1793_v58 = vadd.f32 %v1792_v10, %v1705_v9  ;;  %v1620_v61 = vadd.f32 %v1619_v15, %v1532_v55  ;;  %v2700_v10 = vor.u32 %v3447_v51, %v2699_v56 }
 0x170   :  { %v1883_v24 = vpop.f32.mrf.mxu0 }
 0x171   :  { %1930 = vmatmul.bf16.gmra.mxu1 %v2652_v13  ;;  %2018 = vmatmul.bf16.gmra.mxu2 %v2656_v45  ;;  %v4559_v25 = vadd.f32 %v1880_v53, %v1793_v58  ;;  %v3442_v53 = vld [vmem:[%s5547_s0 + $0xac] sm:$0xf] }
 0x172   :  { %2106 = vmatmul.bf16.gmra.mxu3 %v2660_v17  ;;  %v2696_v9 = vor.u32 %v3442_v53, %v2693_v54  ;;  %v1542_v53 = vadd.f32 %v4224_v50, %v4213_v46  ;;  %v1544_v46 = vadd.f32 %v4224_v50, %v4250_v3  ;;  %v2763_v3 = vld [vmem:[%s5547_s0 + $0x138] sm:$0xf] }
 0x173   :  { %2194 = vmatmul.bf16.gmra.mxu0 %v2664_v20 }
 0x174   :  { %v1707_v39 = vpop.f32.mrf.mxu2 }
 0x175   :  { %v1708_v49 = vadd.f32 %v1707_v39, %v1620_v61  ;;  %v1795_v28 = vpop.f32.mrf.mxu3 }
 0x176   :  { %v1621_v29 = vpop.f32.mrf.mxu1 }
 0x177   :  { %v1796_v62 = vadd.f32 %v1795_v28, %v1708_v49  ;;  %v1622_v37 = vadd.f32 %v1621_v29, %v1534_v59  ;;  %v3450_v28 = vld [vmem:[%s5547_s0 + $0xec] sm:$0xf]  ;;  %v2721_v29 = vld [vmem:[%s5547_s0 + $0x10c] sm:$0xf0] }
 0x178   :  { %v1885_v36 = vpop.f32.mrf.mxu0  ;;  %v2724_v51 = vor.u32 %v3450_v28, %v2721_v29  ;;  %v2765_v28 = vld [vmem:[%s5547_s0 + $0x15c] sm:$0xf0] }
 0x179   :  { %v4569_v44 = vadd.f32 %v1883_v24, %v1796_v62  ;;  %v2771_v29 = vld [vmem:[%s5547_s0 + $0x140] sm:$0xf] }
 0x17c   :  { %v1709_v63 = vpop.f32.mrf.mxu2 }
 0x17d   :  { %v1710_v11 = vadd.f32 %v1709_v63, %v1622_v37  ;;  %v1797_v2 = vpop.f32.mrf.mxu3  ;;  %v3455_v37 = vld [vmem:[%s5547_s0 + $0x110] sm:$0xf0] }
 0x17e   :  { %v1624_v55 = vpop.f32.mrf.mxu1  ;;  %v2728_v63 = vor.u32 %v3455_v37, %v2727_v33  ;;  %v3465_v33 = vld [vmem:[%s5547_s0 + $0x160] sm:$0xf0] }
 0x17f   :  { %v1798_v13 = vadd.f32 %v1797_v2, %v1710_v11  ;;  %v1625_v45 = vadd.f32 %v1624_v55, %v1537_v1  ;;  %v2736_v2 = vor.u32 %v3456_v7, %v2735_v41 }
 0x180   :  { %v1888_v15 = vpop.f32.mrf.mxu0 }
 0x181   :  { %1935 = vmatmul.bf16.gmra.mxu1 %v2688_v48  ;;  %2023 = vmatmul.bf16.gmra.mxu2 %v2692_v6  ;;  %v4591_v17 = vadd.f32 %v1885_v36, %v1798_v13  ;;  %v3451_v36 = vld [vmem:[%s5547_s0 + $0xf4] sm:$0xf] }
 0x182   :  { %2111 = vmatmul.bf16.gmra.mxu3 %v2696_v9  ;;  %v2732_v11 = vor.u32 %v3451_v36, %v2729_v40  ;;  %v1547_v36 = vadd.f32 %v4224_v50, %v4077_v38  ;;  %v1549_v38 = vadd.f32 %v4224_v50, %v4115_v52  ;;  %v2799_v52 = vld [vmem:[%s5547_s0 + $0x180] sm:$0xf] }
 0x183   :  { %2199 = vmatmul.bf16.gmra.mxu0 %v2700_v10 }
 0x184   :  { %v1712_v20 = vpop.f32.mrf.mxu2 }
 0x185   :  { %v1713_v58 = vadd.f32 %v1712_v20, %v1625_v45  ;;  %v1800_v61 = vpop.f32.mrf.mxu3 }
 0x186   :  { %v1626_v24 = vpop.f32.mrf.mxu1 }
 0x187   :  { %v1801_v39 = vadd.f32 %v1800_v61, %v1713_v58  ;;  %v1627_v59 = vadd.f32 %v1626_v24, %v1539_v18  ;;  %v3459_v61 = vld [vmem:[%s5547_s0 + $0x134] sm:$0xf]  ;;  %v2757_v24 = vld [vmem:[%s5547_s0 + $0x154] sm:$0xf0] }
 0x188   :  { %v1890_v49 = vpop.f32.mrf.mxu0  ;;  %v2760_v7 = vor.u32 %v3459_v61, %v2757_v24  ;;  %v2801_v61 = vld [vmem:[%s5547_s0 + $0x1a4] sm:$0xf0] }
 0x189   :  { %v4601_v62 = vadd.f32 %v1888_v15, %v1801_v39  ;;  %v2807_v24 = vld [vmem:[%s5547_s0 + $0x188] sm:$0xf] }
 0x18c   :  { %v1714_v42 = vpop.f32.mrf.mxu2 }
 0x18d   :  { %v1715_v54 = vadd.f32 %v1714_v42, %v1627_v59  ;;  %v1802_v56 = vpop.f32.mrf.mxu3  ;;  %v3464_v59 = vld [vmem:[%s5547_s0 + $0x158] sm:$0xf0] }
 0x18e   :  { %v1629_v1 = vpop.f32.mrf.mxu1  ;;  %v2764_v42 = vor.u32 %v3464_v59, %v2763_v3  ;;  %v3474_v3 = vld [vmem:[%s5547_s0 + $0x1a8] sm:$0xf0] }
 0x18f   :  { %v1803_v48 = vadd.f32 %v1802_v56, %v1715_v54  ;;  %v1630_v6 = vadd.f32 %v1629_v1, %v1542_v53  ;;  %v2772_v56 = vor.u32 %v3465_v33, %v2771_v29 }
 0x190   :  { %v1893_v55 = vpop.f32.mrf.mxu0 }
 0x191   :  { %1940 = vmatmul.bf16.gmra.mxu1 %v2724_v51  ;;  %2028 = vmatmul.bf16.gmra.mxu2 %v2728_v63  ;;  %v4623_v9 = vadd.f32 %v1890_v49, %v1803_v48  ;;  %v3460_v49 = vld [vmem:[%s5547_s0 + $0x13c] sm:$0xf] }
 0x192   :  { %2116 = vmatmul.bf16.gmra.mxu3 %v2732_v11  ;;  %v2768_v54 = vor.u32 %v3460_v49, %v2765_v28  ;;  %v1552_v49 = vadd.f32 %v4224_v50, %v4123_v60  ;;  %v1554_v60 = vadd.f32 %v4224_v50, %v4155_v8  ;;  %v2835_v8 = vld [vmem:[%s5547_s0 + $0x1c8] sm:$0xf] }
 0x193   :  { %2204 = vmatmul.bf16.gmra.mxu0 %v2736_v2 }
 0x194   :  { %v1717_v10 = vpop.f32.mrf.mxu2 }
 0x195   :  { %v1718_v13 = vadd.f32 %v1717_v10, %v1630_v6  ;;  %v1805_v45 = vpop.f32.mrf.mxu3 }
 0x196   :  { %v1631_v15 = vpop.f32.mrf.mxu1 }
 0x197   :  { %v1806_v20 = vadd.f32 %v1805_v45, %v1718_v13  ;;  %v1632_v18 = vadd.f32 %v1631_v15, %v1544_v46  ;;  %v3468_v45 = vld [vmem:[%s5547_s0 + $0x17c] sm:$0xf]  ;;  %v2793_v15 = vld [vmem:[%s5547_s0 + $0x19c] sm:$0xf0] }
 0x198   :  { %v1895_v58 = vpop.f32.mrf.mxu0  ;;  %v2796_v33 = vor.u32 %v3468_v45, %v2793_v15  ;;  %v2837_v45 = vld [vmem:[%s5547_s0 + $0x1ec] sm:$0xf0] }
 0x199   :  { %v4633_v39 = vadd.f32 %v1893_v55, %v1806_v20  ;;  %v2843_v15 = vld [vmem:[%s5547_s0 + $0x1d0] sm:$0xf] }
 0x19c   :  { %v1719_v37 = vpop.f32.mrf.mxu2 }
 0x19d   :  { %v1720_v40 = vadd.f32 %v1719_v37, %v1632_v18  ;;  %v1807_v41 = vpop.f32.mrf.mxu3  ;;  %v3473_v18 = vld [vmem:[%s5547_s0 + $0x1a0] sm:$0xf0] }
 0x19e   :  { %v1634_v53 = vpop.f32.mrf.mxu1  ;;  %v2800_v37 = vor.u32 %v3473_v18, %v2799_v52  ;;  %v3483_v52 = vld [vmem:[%s5547_s0 + $0x1f0] sm:$0xf0] }
 0x19f   :  { %v1808_v51 = vadd.f32 %v1807_v41, %v1720_v40  ;;  %v1635_v63 = vadd.f32 %v1634_v53, %v1547_v36  ;;  %v2808_v41 = vor.u32 %v3474_v3, %v2807_v24 }
 0x1a0   :  { %v1898_v1 = vpop.f32.mrf.mxu0 }
 0x1a1   :  { %1945 = vmatmul.bf16.gmra.mxu1 %v2760_v7  ;;  %2033 = vmatmul.bf16.gmra.mxu2 %v2764_v42  ;;  %v4655_v11 = vadd.f32 %v1895_v58, %v1808_v51  ;;  %v3469_v58 = vld [vmem:[%s5547_s0 + $0x184] sm:$0xf] }
 0x1a2   :  { %2121 = vmatmul.bf16.gmra.mxu3 %v2768_v54  ;;  %v2804_v40 = vor.u32 %v3469_v58, %v2801_v61  ;;  %v1557_v58 = vadd.f32 %v4224_v50, %v4169_v19  ;;  %v3660_v19 = vld [vmem:[%s5546_s2] ss:$0 sm:$0xff] }
 0x1a3   :  { %2209 = vmatmul.bf16.gmra.mxu0 %v2772_v56  ;;  %v1559_v50 = vadd.f32 %v3660_v19, %v4207_v35  ;;  %v2871_v35 = vld [vmem:[%s5547_s0 + $0x210] sm:$0xf] }
 0x1a4   :  { %v1722_v2 = vpop.f32.mrf.mxu2 }
 0x1a5   :  { %v1723_v48 = vadd.f32 %v1722_v2, %v1635_v63  ;;  %v1810_v6 = vpop.f32.mrf.mxu3 }
 0x1a6   :  { %v1636_v55 = vpop.f32.mrf.mxu1 }
 0x1a7   :  { %v1811_v10 = vadd.f32 %v1810_v6, %v1723_v48  ;;  %v1637_v46 = vadd.f32 %v1636_v55, %v1549_v38  ;;  %v3477_v6 = vld [vmem:[%s5547_s0 + $0x1c4] sm:$0xf]  ;;  %v2829_v55 = vld [vmem:[%s5547_s0 + $0x1e4] sm:$0xf0] }
 0x1a8   :  { %v1900_v13 = vpop.f32.mrf.mxu0  ;;  %v2832_v3 = vor.u32 %v3477_v6, %v2829_v55  ;;  %v2873_v6 = vld [vmem:[%s5547_s0 + $0x234] sm:$0xf0] }
 0x1a9   :  { %v4665_v20 = vadd.f32 %v1898_v1, %v1811_v10  ;;  %v2879_v55 = vld [vmem:[%s5547_s0 + $0x218] sm:$0xf] }
 0x1ac   :  { %v1724_v59 = vpop.f32.mrf.mxu2 }
 0x1ad   :  { %v1725_v28 = vadd.f32 %v1724_v59, %v1637_v46  ;;  %v1812_v29 = vpop.f32.mrf.mxu3  ;;  %v3482_v46 = vld [vmem:[%s5547_s0 + $0x1e8] sm:$0xf0] }
 0x1ae   :  { %v1639_v36 = vpop.f32.mrf.mxu1  ;;  %v2836_v59 = vor.u32 %v3482_v46, %v2835_v8  ;;  %v3492_v8 = vld [vmem:[%s5547_s0 + $0x238] sm:$0xf0] }
 0x1af   :  { %v1813_v7 = vadd.f32 %v1812_v29, %v1725_v28  ;;  %v1640_v42 = vadd.f32 %v1639_v36, %v1552_v49  ;;  %v2844_v29 = vor.u32 %v3483_v52, %v2843_v15 }
 0x1b0   :  { %v1903_v53 = vpop.f32.mrf.mxu0 }
 0x1b1   :  { %1950 = vmatmul.bf16.gmra.mxu1 %v2796_v33  ;;  %2038 = vmatmul.bf16.gmra.mxu2 %v2800_v37  ;;  %v4687_v54 = vadd.f32 %v1900_v13, %v1813_v7  ;;  %v3478_v13 = vld [vmem:[%s5547_s0 + $0x1cc] sm:$0xf] }
 0x1b2   :  { %2126 = vmatmul.bf16.gmra.mxu3 %v2804_v40  ;;  %v2840_v28 = vor.u32 %v3478_v13, %v2837_v45  ;;  %v1562_v13 = vadd.f32 %v3660_v19, %v4215_v47  ;;  %v3495_v19 = vld [vmem:[%s5547_s0 + $0x254] sm:$0xf] }
 0x1b3   :  { %2214 = vmatmul.bf16.gmra.mxu0 %v2808_v41 }
 0x1b4   :  { %v1727_v56 = vpop.f32.mrf.mxu2 }
 0x1b5   :  { %v1728_v51 = vadd.f32 %v1727_v56, %v1640_v42  ;;  %v1815_v63 = vpop.f32.mrf.mxu3 }
 0x1b6   :  { %v1641_v1 = vpop.f32.mrf.mxu1 }
 0x1b7   :  { %v1816_v2 = vadd.f32 %v1815_v63, %v1728_v51  ;;  %v1642_v38 = vadd.f32 %v1641_v1, %v1554_v60  ;;  %v3486_v63 = vld [vmem:[%s5547_s0 + $0x20c] sm:$0xf]  ;;  %v2865_v1 = vld [vmem:[%s5547_s0 + $0x22c] sm:$0xf0] }
 0x1b8   :  { %v1905_v48 = vpop.f32.mrf.mxu0  ;;  %v2868_v52 = vor.u32 %v3486_v63, %v2865_v1  ;;  %v3501_v63 = vld [vmem:[%s5547_s0 + $0x280] sm:$0xf0] }
 0x1b9   :  { %v4697_v10 = vadd.f32 %v1903_v53, %v1816_v2 }
 0x1bc   :  { %v1729_v18 = vpop.f32.mrf.mxu2 }
 0x1bd   :  { %v1730_v61 = vadd.f32 %v1729_v18, %v1642_v38  ;;  %v1817_v24 = vpop.f32.mrf.mxu3  ;;  %v3491_v38 = vld [vmem:[%s5547_s0 + $0x230] sm:$0xf0] }
 0x1be   :  { %v1644_v49 = vpop.f32.mrf.mxu1  ;;  %v2872_v18 = vor.u32 %v3491_v38, %v2871_v35 }
 0x1bf   :  { %v1818_v33 = vadd.f32 %v1817_v24, %v1730_v61  ;;  %v1645_v37 = vadd.f32 %v1644_v49, %v1557_v58  ;;  %v2880_v24 = vor.u32 %v3492_v8, %v2879_v55 }
 0x1c0   :  { %v1908_v36 = vpop.f32.mrf.mxu0 }
 0x1c1   :  { %1955 = vmatmul.bf16.gmra.mxu1 %v2832_v3  ;;  %2043 = vmatmul.bf16.gmra.mxu2 %v2836_v59  ;;  %v4719_v40 = vadd.f32 %v1905_v48, %v1818_v33  ;;  %v3487_v48 = vld [vmem:[%s5547_s0 + $0x214] sm:$0xf] }
 0x1c2   :  { %2131 = vmatmul.bf16.gmra.mxu3 %v2840_v28  ;;  %v2876_v61 = vor.u32 %v3487_v48, %v2873_v6 }
 0x1c3   :  { %2219 = vmatmul.bf16.gmra.mxu0 %v2844_v29 }
 0x1c4   :  { %v1732_v41 = vpop.f32.mrf.mxu2 }
 0x1c5   :  { %v1733_v7 = vadd.f32 %v1732_v41, %v1645_v37  ;;  %v1820_v42 = vpop.f32.mrf.mxu3 }
 0x1c6   :  { %v1646_v53 = vpop.f32.mrf.mxu1 }
 0x1c7   :  { %v1821_v56 = vadd.f32 %v1820_v42, %v1733_v7  ;;  %v1647_v60 = vadd.f32 %v1646_v53, %v1559_v50  ;;  %v2901_v50 = vld [vmem:[%s5547_s0 + $0x274] sm:$0xf0]  ;;  %v3500_v53 = vld [vmem:[%s5547_s0 + $0x278] sm:$0xf0] }
 0x1c8   :  { %v1910_v51 = vpop.f32.mrf.mxu0  ;;  %v2907_v42 = vld [vmem:[%s5547_s0 + $0x258] sm:$0xf]  ;;  %v2904_v38 = vor.u32 %v3495_v19, %v2901_v50 }
 0x1c9   :  { %v4731_v2 = vadd.f32 %v1908_v36, %v1821_v56  ;;  %v3496_v56 = vld [vmem:[%s5547_s0 + $0x25c] sm:$0xf]  ;;  %v2908_v48 = vor.u32 %v3500_v53, %v2907_v42 }
 0x1cc   :  { %v1734_v46 = vpop.f32.mrf.mxu2 }
 0x1cd   :  { %v1735_v45 = vadd.f32 %v1734_v46, %v1647_v60  ;;  %v1822_v15 = vpop.f32.mrf.mxu3  ;;  %v2909_v60 = vld [vmem:[%s5547_s0 + $0x27c] sm:$0xf0] }
 0x1ce   :  { %v1649_v58 = vpop.f32.mrf.mxu1  ;;  %v2912_v55 = vor.u32 %v3496_v56, %v2909_v60 }
 0x1cf   :  { %v1823_v3 = vadd.f32 %v1822_v15, %v1735_v45  ;;  %v1650_v59 = vadd.f32 %v1649_v58, %v1562_v13 }
 0x1d0   :  { %v1913_v49 = vpop.f32.mrf.mxu0 }
 0x1d1   :  { %1960 = vmatmul.bf16.gmra.mxu1 %v2868_v52  ;;  %2048 = vmatmul.bf16.gmra.mxu2 %v2872_v18  ;;  %v4752_v28 = vadd.f32 %v1910_v51, %v1823_v3  ;;  %v2915_v51 = vld [vmem:[%s5547_s0 + $0x260] sm:$0xf] }
 0x1d2   :  { %2136 = vmatmul.bf16.gmra.mxu3 %v2876_v61  ;;  %v2916_v8 = vor.u32 %v3501_v63, %v2915_v51 }
 0x1d3   :  { %2224 = vmatmul.bf16.gmra.mxu0 %v2880_v24 }
 0x1d4   :  { %v1737_v29 = vpop.f32.mrf.mxu2 }
 0x1d5   :  { %v1738_v33 = vadd.f32 %v1737_v29, %v1650_v59  ;;  %v1825_v37 = vpop.f32.mrf.mxu3  ;;  %v3504_v59 = vld [vmem:[%s5547_s0 + $0x29c] sm:$0xf]  ;;  %v3509_v29 = vld [vmem:[%s5547_s0 + $0x2c0] sm:$0xf0] }
 0x1d6   :  { %v1651_v47 = vpop.f32.mrf.mxu1 }
 0x1d7   :  { %v1826_v36 = vadd.f32 %v1825_v37, %v1738_v33  ;;  %v2945_v33 = vld [vmem:[%s5547_s0 + $0x2c4] sm:$0xf0]  ;;  %v3510_v47 = vld [vmem:[%s5547_s0 + $0x2c8] sm:$0xf0] }
 0x1d8   :  { %v1915_v41 = vpop.f32.mrf.mxu0  ;;  %v2951_v37 = vld [vmem:[%s5547_s0 + $0x2a8] sm:$0xf] }
 0x1d9   :  { %v4760_v7 = vadd.f32 %v1913_v49, %v1826_v36  ;;  %v2943_v49 = vld [vmem:[%s5547_s0 + $0x2a0] sm:$0xf]  ;;  %v2952_v60 = vor.u32 %v3510_v47, %v2951_v37 }
 0x1da   :  { %v2944_v42 = vor.u32 %v3509_v29, %v2943_v49 }
 0x1dc   :  { %v1739_v1 = vpop.f32.mrf.mxu2 }
 0x1dd   :  { %v1827_v35 = vpop.f32.mrf.mxu3 }
 0x1de   :  { %v1926_v6 = vpop.f32.mrf.mxu1 }
 0x1df   :  { %v1927_v46 = vadd.f32 %v1926_v6, %v4274_v43  ;;  %v2937_v43 = vld [vmem:[%s5547_s0 + $0x2bc] sm:$0xf0] }
 0x1e0   :  { %v2190_v13 = vpop.f32.mrf.mxu0  ;;  %v2940_v50 = vor.u32 %v3504_v59, %v2937_v43 }
 0x1e1   :  { %1965 = vmatmul.bf16.gmra.mxu1 %v2904_v38  ;;  %2053 = vmatmul.bf16.gmra.mxu2 %v2908_v48 }
 0x1e2   :  { %2141 = vmatmul.bf16.gmra.mxu3 %v2912_v55 }
 0x1e3   :  { %2229 = vmatmul.bf16.gmra.mxu0 %v2916_v8 }
 0x1e4   :  { %v2014_v45 = vpop.f32.mrf.mxu2 }
 0x1e5   :  { %v2015_v15 = vadd.f32 %v2014_v45, %v1927_v46  ;;  %v2102_v52 = vpop.f32.mrf.mxu3 }
 0x1e6   :  { %v1928_v18 = vpop.f32.mrf.mxu1 }
 0x1e7   :  { %v2103_v58 = vadd.f32 %v2102_v52, %v2015_v15  ;;  %v1929_v61 = vadd.f32 %v1928_v18, %v4296_v22  ;;  %v3505_v22 = vld [vmem:[%s5547_s0 + $0x2a4] sm:$0xf]  ;;  %v2973_v15 = vld [vmem:[%s5547_s0 + $0x304] sm:$0xf0]  ;;  %v3518_v18 = vld [vmem:[%s5547_s0 + $0x308] sm:$0xf0] }
 0x1e8   :  { %v2192_v24 = vpop.f32.mrf.mxu0  ;;  %v2948_v56 = vor.u32 %v3505_v22, %v2945_v33  ;;  %v2979_v52 = vld [vmem:[%s5547_s0 + $0x2e8] sm:$0xf] }
 0x1e9   :  { %v4782_v3 = vadd.f32 %v2190_v13, %v2103_v58  ;;  %v2981_v58 = vld [vmem:[%s5547_s0 + $0x30c] sm:$0xf0]  ;;  %v2980_v22 = vor.u32 %v3518_v18, %v2979_v52 }
 0x1ec   :  { %v2016_v36 = vpop.f32.mrf.mxu2 }
 0x1ed   :  { %v2017_v41 = vadd.f32 %v2016_v36, %v1929_v61  ;;  %v2104_v19 = vpop.f32.mrf.mxu3  ;;  %v2987_v61 = vld [vmem:[%s5547_s0 + $0x2f0] sm:$0xf] }
 0x1ee   :  { %v1931_v53 = vpop.f32.mrf.mxu1 }
 0x1ef   :  { %v2105_v51 = vadd.f32 %v2104_v19, %v2017_v41  ;;  %v1932_v63 = vadd.f32 %v1931_v53, %v4306_v32  ;;  %v3513_v32 = vld [vmem:[%s5547_s0 + $0x2e4] sm:$0xf] }
 0x1f0   :  { %v2195_v1 = vpop.f32.mrf.mxu0  ;;  %v2976_v29 = vor.u32 %v3513_v32, %v2973_v15 }
 0x1f1   :  { %v4809_v35 = vadd.f32 %v2192_v24, %v2105_v51  ;;  %1970 = vmatmul.bf16.gmra.mxu1 %v2940_v50  ;;  %2058 = vmatmul.bf16.gmra.mxu2 %v2944_v42  ;;  %v3519_v24 = vld [vmem:[%s5547_s0 + $0x310] sm:$0xf0] }
 0x1f2   :  { %2146 = vmatmul.bf16.gmra.mxu3 %v2948_v56  ;;  %v2988_v47 = vor.u32 %v3519_v24, %v2987_v61 }
 0x1f3   :  { %2234 = vmatmul.bf16.gmra.mxu0 %v2952_v60 }
 0x1f4   :  { %v2019_v38 = vpop.f32.mrf.mxu2 }
 0x1f5   :  { %v2020_v48 = vadd.f32 %v2019_v38, %v1932_v63  ;;  %v2107_v6 = vpop.f32.mrf.mxu3 }
 0x1f6   :  { %v1933_v55 = vpop.f32.mrf.mxu1 }
 0x1f7   :  { %v2108_v8 = vadd.f32 %v2107_v6, %v2020_v48  ;;  %v1934_v46 = vadd.f32 %v1933_v55, %v4328_v12  ;;  %v3514_v12 = vld [vmem:[%s5547_s0 + $0x2ec] sm:$0xf]  ;;  %v3009_v48 = vld [vmem:[%s5547_s0 + $0x34c] sm:$0xf0]  ;;  %v3527_v55 = vld [vmem:[%s5547_s0 + $0x350] sm:$0xf0] }
 0x1f8   :  { %v2197_v13 = vpop.f32.mrf.mxu0  ;;  %v2984_v37 = vor.u32 %v3514_v12, %v2981_v58  ;;  %v3015_v6 = vld [vmem:[%s5547_s0 + $0x330] sm:$0xf] }
 0x1f9   :  { %v4812_v45 = vadd.f32 %v2195_v1, %v2108_v8  ;;  %v3017_v8 = vld [vmem:[%s5547_s0 + $0x354] sm:$0xf0]  ;;  %v3016_v12 = vor.u32 %v3527_v55, %v3015_v6 }
 0x1fc   :  { %v2021_v59 = vpop.f32.mrf.mxu2 }
 0x1fd   :  { %v2022_v43 = vadd.f32 %v2021_v59, %v1934_v46  ;;  %v2109_v49 = vpop.f32.mrf.mxu3  ;;  %v3023_v46 = vld [vmem:[%s5547_s0 + $0x338] sm:$0xf] }
 0x1fe   :  { %v1936_v33 = vpop.f32.mrf.mxu1 }
 0x1ff   :  { %v2110_v36 = vadd.f32 %v2109_v49, %v2022_v43  ;;  %v1937_v41 = vadd.f32 %v1936_v33, %v4350_v30  ;;  %v3522_v30 = vld [vmem:[%s5547_s0 + $0x32c] sm:$0xf] }
 0x200   :  { %v2200_v19 = vpop.f32.mrf.mxu0  ;;  %v3012_v18 = vor.u32 %v3522_v30, %v3009_v48 }
 0x201   :  { %v4839_v50 = vadd.f32 %v2197_v13, %v2110_v36  ;;  %1975 = vmatmul.bf16.gmra.mxu1 %v2976_v29  ;;  %2063 = vmatmul.bf16.gmra.mxu2 %v2980_v22  ;;  %v3528_v13 = vld [vmem:[%s5547_s0 + $0x358] sm:$0xf0] }
 0x202   :  { %2151 = vmatmul.bf16.gmra.mxu3 %v2984_v37  ;;  %v3024_v24 = vor.u32 %v3528_v13, %v3023_v46 }
 0x203   :  { %2239 = vmatmul.bf16.gmra.mxu0 %v2988_v47 }
 0x204   :  { %v2024_v42 = vpop.f32.mrf.mxu2 }
 0x205   :  { %v2025_v53 = vadd.f32 %v2024_v42, %v1937_v41  ;;  %v2112_v56 = vpop.f32.mrf.mxu3 }
 0x206   :  { %v1938_v60 = vpop.f32.mrf.mxu1 }
 0x207   :  { %v2113_v51 = vadd.f32 %v2112_v56, %v2025_v53  ;;  %v1939_v63 = vadd.f32 %v1938_v60, %v4372_v14  ;;  %v3523_v14 = vld [vmem:[%s5547_s0 + $0x334] sm:$0xf]  ;;  %v3045_v53 = vld [vmem:[%s5547_s0 + $0x394] sm:$0xf0]  ;;  %v3536_v60 = vld [vmem:[%s5547_s0 + $0x398] sm:$0xf0] }
 0x208   :  { %v2202_v1 = vpop.f32.mrf.mxu0  ;;  %v3020_v61 = vor.u32 %v3523_v14, %v3017_v8  ;;  %v3051_v56 = vld [vmem:[%s5547_s0 + $0x378] sm:$0xf] }
 0x209   :  { %v4842_v38 = vadd.f32 %v2200_v19, %v2113_v51  ;;  %v3053_v51 = vld [vmem:[%s5547_s0 + $0x39c] sm:$0xf0]  ;;  %v3052_v14 = vor.u32 %v3536_v60, %v3051_v56 }
 0x20c   :  { %v2026_v32 = vpop.f32.mrf.mxu2 }
 0x20d   :  { %v2027_v15 = vadd.f32 %v2026_v32, %v1939_v63  ;;  %v2114_v52 = vpop.f32.mrf.mxu3  ;;  %v3059_v63 = vld [vmem:[%s5547_s0 + $0x380] sm:$0xf] }
 0x20e   :  { %v1941_v58 = vpop.f32.mrf.mxu1 }
 0x20f   :  { %v2115_v59 = vadd.f32 %v2114_v52, %v2027_v15  ;;  %v1942_v43 = vadd.f32 %v1941_v58, %v4382_v27  ;;  %v3531_v27 = vld [vmem:[%s5547_s0 + $0x374] sm:$0xf] }
 0x210   :  { %v2205_v49 = vpop.f32.mrf.mxu0  ;;  %v3048_v55 = vor.u32 %v3531_v27, %v3045_v53 }
 0x211   :  { %v4869_v29 = vadd.f32 %v2202_v1, %v2115_v59  ;;  %1980 = vmatmul.bf16.gmra.mxu1 %v3012_v18  ;;  %2068 = vmatmul.bf16.gmra.mxu2 %v3016_v12  ;;  %v3537_v1 = vld [vmem:[%s5547_s0 + $0x3a0] sm:$0xf0] }
 0x212   :  { %2156 = vmatmul.bf16.gmra.mxu3 %v3020_v61  ;;  %v3060_v13 = vor.u32 %v3537_v1, %v3059_v63 }
 0x213   :  { %2244 = vmatmul.bf16.gmra.mxu0 %v3024_v24 }
 0x214   :  { %v2029_v22 = vpop.f32.mrf.mxu2 }
 0x215   :  { %v2030_v33 = vadd.f32 %v2029_v22, %v1942_v43  ;;  %v2117_v37 = vpop.f32.mrf.mxu3 }
 0x216   :  { %v1943_v47 = vpop.f32.mrf.mxu1 }
 0x217   :  { %v2118_v36 = vadd.f32 %v2117_v37, %v2030_v33  ;;  %v1944_v41 = vadd.f32 %v1943_v47, %v4404_v5  ;;  %v3532_v5 = vld [vmem:[%s5547_s0 + $0x37c] sm:$0xf]  ;;  %v3081_v33 = vld [vmem:[%s5547_s0 + $0x3dc] sm:$0xf0]  ;;  %v3545_v47 = vld [vmem:[%s5547_s0 + $0x3e0] sm:$0xf0] }
 0x218   :  { %v2207_v19 = vpop.f32.mrf.mxu0  ;;  %v3056_v46 = vor.u32 %v3532_v5, %v3053_v51  ;;  %v3087_v37 = vld [vmem:[%s5547_s0 + $0x3c0] sm:$0xf] }
 0x219   :  { %v4872_v42 = vadd.f32 %v2205_v49, %v2118_v36  ;;  %v3089_v36 = vld [vmem:[%s5547_s0 + $0x3e4] sm:$0xf0]  ;;  %v3088_v5 = vor.u32 %v3545_v47, %v3087_v37 }
 0x21c   :  { %v2031_v30 = vpop.f32.mrf.mxu2 }
 0x21d   :  { %v2032_v48 = vadd.f32 %v2031_v30, %v1944_v41  ;;  %v2119_v6 = vpop.f32.mrf.mxu3  ;;  %v3095_v41 = vld [vmem:[%s5547_s0 + $0x3c8] sm:$0xf] }
 0x21e   :  { %v1946_v8 = vpop.f32.mrf.mxu1 }
 0x21f   :  { %v2120_v32 = vadd.f32 %v2119_v6, %v2032_v48  ;;  %v1947_v15 = vadd.f32 %v1946_v8, %v4426_v26  ;;  %v3540_v26 = vld [vmem:[%s5547_s0 + $0x3bc] sm:$0xf] }
 0x220   :  { %v2210_v52 = vpop.f32.mrf.mxu0  ;;  %v3084_v60 = vor.u32 %v3540_v26, %v3081_v33 }
 0x221   :  { %v4899_v18 = vadd.f32 %v2207_v19, %v2120_v32  ;;  %1985 = vmatmul.bf16.gmra.mxu1 %v3048_v55  ;;  %2073 = vmatmul.bf16.gmra.mxu2 %v3052_v14  ;;  %v3546_v19 = vld [vmem:[%s5547_s0 + $0x3e8] sm:$0xf0] }
 0x222   :  { %2161 = vmatmul.bf16.gmra.mxu3 %v3056_v46  ;;  %v3096_v1 = vor.u32 %v3546_v19, %v3095_v41 }
 0x223   :  { %2249 = vmatmul.bf16.gmra.mxu0 %v3060_v13 }
 0x224   :  { %v2034_v12 = vpop.f32.mrf.mxu2 }
 0x225   :  { %v2035_v58 = vadd.f32 %v2034_v12, %v1947_v15  ;;  %v2122_v61 = vpop.f32.mrf.mxu3 }
 0x226   :  { %v1948_v24 = vpop.f32.mrf.mxu1 }
 0x227   :  { %v2123_v59 = vadd.f32 %v2122_v61, %v2035_v58  ;;  %v1949_v43 = vadd.f32 %v1948_v24, %v4448_v31  ;;  %v3541_v31 = vld [vmem:[%s5547_s0 + $0x3c4] sm:$0xf]  ;;  %v3117_v58 = vld [vmem:[%s5547_s0 + $0x424] sm:$0xf0]  ;;  %v3554_v24 = vld [vmem:[%s5547_s0 + $0x428] sm:$0xf0] }
 0x228   :  { %v2212_v49 = vpop.f32.mrf.mxu0  ;;  %v3092_v63 = vor.u32 %v3541_v31, %v3089_v36  ;;  %v3123_v61 = vld [vmem:[%s5547_s0 + $0x408] sm:$0xf] }
 0x229   :  { %v4902_v22 = vadd.f32 %v2210_v52, %v2123_v59  ;;  %v3125_v59 = vld [vmem:[%s5547_s0 + $0x42c] sm:$0xf0]  ;;  %v3124_v31 = vor.u32 %v3554_v24, %v3123_v61 }
 0x22c   :  { %v2036_v27 = vpop.f32.mrf.mxu2 }
 0x22d   :  { %v2037_v53 = vadd.f32 %v2036_v27, %v1949_v43  ;;  %v2124_v56 = vpop.f32.mrf.mxu3  ;;  %v3131_v43 = vld [vmem:[%s5547_s0 + $0x410] sm:$0xf] }
 0x22e   :  { %v1951_v51 = vpop.f32.mrf.mxu1 }
 0x22f   :  { %v2125_v30 = vadd.f32 %v2124_v56, %v2037_v53  ;;  %v1952_v48 = vadd.f32 %v1951_v51, %v4458_v23  ;;  %v3549_v23 = vld [vmem:[%s5547_s0 + $0x404] sm:$0xf] }
 0x230   :  { %v2215_v6 = vpop.f32.mrf.mxu0  ;;  %v3120_v47 = vor.u32 %v3549_v23, %v3117_v58 }
 0x231   :  { %v4929_v55 = vadd.f32 %v2212_v49, %v2125_v30  ;;  %1990 = vmatmul.bf16.gmra.mxu1 %v3084_v60  ;;  %2078 = vmatmul.bf16.gmra.mxu2 %v3088_v5  ;;  %v3555_v49 = vld [vmem:[%s5547_s0 + $0x430] sm:$0xf0] }
 0x232   :  { %2166 = vmatmul.bf16.gmra.mxu3 %v3092_v63  ;;  %v3132_v19 = vor.u32 %v3555_v49, %v3131_v43  ;;  %v173_v30 = vld [vmem:[%s5547_s0 + $0x450] sm:$0x11] }
 0x233   :  { %2254 = vmatmul.bf16.gmra.mxu0 %v3096_v1 }
 0x234   :  { %v2039_v14 = vpop.f32.mrf.mxu2 }
 0x235   :  { %v2040_v8 = vadd.f32 %v2039_v14, %v1952_v48  ;;  %v2127_v46 = vpop.f32.mrf.mxu3 }
 0x236   :  { %v1953_v13 = vpop.f32.mrf.mxu1 }
 0x237   :  { %v2128_v32 = vadd.f32 %v2127_v46, %v2040_v8  ;;  %v1954_v15 = vadd.f32 %v1953_v13, %v4480_v0  ;;  %v3550_v0 = vld [vmem:[%s5547_s0 + $0x40c] sm:$0xf] }
 0x238   :  { %v2217_v52 = vpop.f32.mrf.mxu0  ;;  %v3128_v41 = vor.u32 %v3550_v0, %v3125_v59  ;;  %v3661_v46 = vld [vmem:[%s5547_s0 + $0x448] sm:$0x11] }
 0x239   :  { %v4932_v12 = vadd.f32 %v2215_v6, %v2128_v32  ;;  %v753_v13 = vunpack.c.h.b16 %v3661_v46  ;;  %v754_v32 = vunpack.c.l.b16 %v173_v30 }
 0x23b   :  { %v897_v24 = vpack.c.b16 %v753_v13, %v753_v13 }
 0x23c   :  { %v2041_v26 = vpop.f32.mrf.mxu2 }
 0x23d   :  { %v2042_v33 = vadd.f32 %v2041_v26, %v1954_v15  ;;  %v2129_v37 = vpop.f32.mrf.mxu3  ;;  %v755_v15 = vunpack.c.h.b16 %v173_v30 }
 0x23e   :  { %v1956_v36 = vpop.f32.mrf.mxu1 }
 0x23f   :  { %v2130_v27 = vadd.f32 %v2129_v37, %v2042_v33  ;;  %v1957_v53 = vadd.f32 %v1956_v36, %v4491_v34  ;;  %v174_v34 = vld [vmem:[%s5547_s0 + $0x458] sm:$0x1]  ;;  %v899_v59 = vpack.c.b16 %v755_v15, %v755_v15 }
 0x240   :  { %v2220_v56 = vpop.f32.mrf.mxu0 }
 0x241   :  { %v4959_v60 = vadd.f32 %v2217_v52, %v2130_v27  ;;  %1995 = vmatmul.bf16.gmra.mxu1 %v3120_v47  ;;  %2083 = vmatmul.bf16.gmra.mxu2 %v3124_v31  ;;  %v756_v52 = vunpack.c.l.b16 %v174_v34 }
 0x242   :  { %2171 = vmatmul.bf16.gmra.mxu3 %v3128_v41 }
 0x243   :  { %2259 = vmatmul.bf16.gmra.mxu0 %v3132_v19  ;;  %v900_v43 = vpack.c.b16 %v756_v52, %v756_v52 }
 0x244   :  { %v2044_v5 = vpop.f32.mrf.mxu2 }
 0x245   :  { %v2045_v51 = vadd.f32 %v2044_v5, %v1957_v53  ;;  %v2132_v63 = vpop.f32.mrf.mxu3 }
 0x246   :  { %v1958_v1 = vpop.f32.mrf.mxu1 }
 0x247   :  { %v2133_v48 = vadd.f32 %v2132_v63, %v2045_v51  ;;  %v1959_v6 = vadd.f32 %v1958_v1, %v4495_v16  ;;  %v898_v16 = vpack.c.b16 %v754_v32, %v754_v32 }
 0x248   :  { %v2222_v14 = vpop.f32.mrf.mxu0 }
 0x249   :  { %v4968_v8 = vadd.f32 %v2220_v56, %v2133_v48 }
 0x24c   :  { %v2046_v23 = vpop.f32.mrf.mxu2 }
 0x24d   :  { %v2047_v58 = vadd.f32 %v2046_v23, %v1959_v6  ;;  %v2134_v61 = vpop.f32.mrf.mxu3 }
 0x24e   :  { %v1961_v0 = vpop.f32.mrf.mxu1 }
 0x24f   :  { %v2135_v49 = vadd.f32 %v2134_v61, %v2047_v58  ;;  %v1962_v26 = vadd.f32 %v1961_v0, %v4505_v4 }
 0x250   :  { %v2225_v33 = vpop.f32.mrf.mxu0 }
 0x251   :  { %v4974_v37 = vadd.f32 %v2222_v14, %v2135_v49  ;;  %2000 = vmatmul.bf16.gmra.mxu1 %v897_v24  ;;  %2088 = vmatmul.bf16.gmra.mxu2 %v898_v16 }
 0x252   :  { %2176 = vmatmul.bf16.gmra.mxu3 %v899_v59 }
 0x253   :  { %2264 = vmatmul.bf16.gmra.mxu0 %v900_v43 }
 0x254   :  { %v2049_v47 = vpop.f32.mrf.mxu2 }
 0x255   :  { %v2050_v31 = vadd.f32 %v2049_v47, %v1962_v26  ;;  %v2137_v36 = vpop.f32.mrf.mxu3 }
 0x256   :  { %v1963_v41 = vpop.f32.mrf.mxu1 }
 0x257   :  { %v2138_v19 = vadd.f32 %v2137_v36, %v2050_v31  ;;  %v1964_v27 = vadd.f32 %v1963_v41, %v4527_v21 }
 0x258   :  { %v2227_v53 = vpop.f32.mrf.mxu0 }
 0x259   :  { %v4977_v56 = vadd.f32 %v2225_v33, %v2138_v19 }
 0x25c   :  { %v2051_v5 = vpop.f32.mrf.mxu2 }
 0x25d   :  { %v2052_v51 = vadd.f32 %v2051_v5, %v1964_v27  ;;  %v2139_v4 = vpop.f32.mrf.mxu3 }
 0x25e   :  { %v1966_v63 = vpop.f32.mrf.mxu1 }
 0x25f   :  { %v2140_v1 = vadd.f32 %v2139_v4, %v2052_v51  ;;  %v1967_v30 = vadd.f32 %v1966_v63, %v4537_v57 }
 0x260   :  { %v2230_v48 = vpop.f32.mrf.mxu0 }
 0x261   :  { %v4980_v6 = vadd.f32 %v2227_v53, %v2140_v1 }
 0x264   :  { %v2054_v14 = vpop.f32.mrf.mxu2 }
 0x265   :  { %v2055_v34 = vadd.f32 %v2054_v14, %v1967_v30  ;;  %v2142_v46 = vpop.f32.mrf.mxu3  ;;  %v2270_v14 = vmax.f32 %v4809_v35, 0.0 }
 0x266   :  { %v1968_v13 = vpop.f32.mrf.mxu1 }
 0x267   :  { %v2143_v32 = vadd.f32 %v2142_v46, %v2055_v34  ;;  %v1969_v21 = vadd.f32 %v1968_v13, %v4559_v25  ;;  %v2269_v13 = vmax.f32 %v4782_v3, 0.0 }
 0x268   :  { %v2232_v15 = vpop.f32.mrf.mxu0 }
 0x269   :  { %v4983_v52 = vadd.f32 %v2230_v48, %v2143_v32  ;;  %v2271_v32 = vmax.f32 %v4812_v45, 0.0 }
 0x26c   :  { %v2056_v23 = vpop.f32.mrf.mxu2 }
 0x26d   :  { %v2057_v58 = vadd.f32 %v2056_v23, %v1969_v21  ;;  %v2144_v61 = vpop.f32.mrf.mxu3 }
 0x26e   :  { %v1971_v24 = vpop.f32.mrf.mxu1 }
 0x26f   :  { %v2145_v16 = vadd.f32 %v2144_v61, %v2057_v58  ;;  %v1972_v57 = vadd.f32 %v1971_v24, %v4569_v44 }
 0x270   :  { %v2235_v0 = vpop.f32.mrf.mxu0 }
 0x271   :  { %v4986_v59 = vadd.f32 %v2232_v15, %v2145_v16  ;;  %v2272_v15 = vmax.f32 %v4839_v50, 0.0 }
 0x274   :  { %v2059_v43 = vpop.f32.mrf.mxu2 }
 0x275   :  { %v2060_v49 = vadd.f32 %v2059_v43, %v1972_v57  ;;  %v2147_v26 = vpop.f32.mrf.mxu3 }
 0x276   :  { %v1973_v33 = vpop.f32.mrf.mxu1 }
 0x277   :  { %v2148_v47 = vadd.f32 %v2147_v26, %v2060_v49  ;;  %v1974_v25 = vadd.f32 %v1973_v33, %v4591_v17 }
 0x278   :  { %v2237_v31 = vpop.f32.mrf.mxu0 }
 0x279   :  { %v4989_v36 = vadd.f32 %v2235_v0, %v2148_v47  ;;  %v2274_v0 = vmax.f32 %v4869_v29, 0.0  ;;  %v2275_v47 = vmax.f32 %v4872_v42, 0.0 }
 0x27c   :  { %v2061_v41 = vpop.f32.mrf.mxu2 }
 0x27d   :  { %v2062_v19 = vadd.f32 %v2061_v41, %v1974_v25  ;;  %v2149_v27 = vpop.f32.mrf.mxu3  ;;  %v2276_v41 = vmax.f32 %v4899_v18, 0.0 }
 0x27e   :  { %v1976_v53 = vpop.f32.mrf.mxu1 }
 0x27f   :  { %v2150_v5 = vadd.f32 %v2149_v27, %v2062_v19  ;;  %v1977_v44 = vadd.f32 %v1976_v53, %v4601_v62  ;;  %v2300_v62 = vadd.f32 %v2270_v14, %v2269_v13  ;;  %v2277_v53 = vmax.f32 %v4902_v22, 0.0 }
 0x280   :  { %v2240_v51 = vpop.f32.mrf.mxu0 }
 0x281   :  { %v4992_v4 = vadd.f32 %v2237_v31, %v2150_v5  ;;  %v2301_v58 = vadd.f32 %v2300_v62, %v2271_v32 }
 0x283   :  { %v2302_v57 = vadd.f32 %v2301_v58, %v2272_v15 }
 0x284   :  { %v2064_v63 = vpop.f32.mrf.mxu2 }
 0x285   :  { %v2065_v1 = vadd.f32 %v2064_v63, %v1977_v44  ;;  %v2152_v30 = vpop.f32.mrf.mxu3  ;;  %v5566_v63 = vmax.f32 %v4929_v55, 0.0 }
 0x286   :  { %v1978_v48 = vpop.f32.mrf.mxu1 }
 0x287   :  { %v2153_v17 = vadd.f32 %v2152_v30, %v2065_v1  ;;  %v1979_v34 = vadd.f32 %v1978_v48, %v4623_v9  ;;  %v2273_v9 = vmax.f32 %v4842_v38, 0.0 }
 0x288   :  { %v2242_v46 = vpop.f32.mrf.mxu0 }
 0x289   :  { %v4998_v21 = vadd.f32 %v2240_v51, %v2153_v17  ;;  %v2303_v33 = vadd.f32 %v2302_v57, %v2273_v9 }
 0x28b   :  { %v2304_v31 = vadd.f32 %v2303_v33, %v2274_v0 }
 0x28c   :  { %v2066_v23 = vpop.f32.mrf.mxu2 }
 0x28d   :  { %v2067_v61 = vadd.f32 %v2066_v23, %v1979_v34  ;;  %v2154_v24 = vpop.f32.mrf.mxu3  ;;  %v2305_v27 = vadd.f32 %v2304_v31, %v2275_v47  ;;  %v5565_v34 = vmax.f32 %v4932_v12, 0.0  ;;  %v5564_v23 = vmax.f32 %v4959_v60, 0.0 }
 0x28e   :  { %v1981_v16 = vpop.f32.mrf.mxu1 }
 0x28f   :  { %v2155_v43 = vadd.f32 %v2154_v24, %v2067_v61  ;;  %v1982_v49 = vadd.f32 %v1981_v16, %v4633_v39  ;;  %v2306_v51 = vadd.f32 %v2305_v27, %v2276_v41  ;;  %v5563_v24 = vmax.f32 %v4968_v8, 0.0 }
 0x290   :  { %v2245_v26 = vpop.f32.mrf.mxu0 }
 0x291   :  { %v5015_v25 = vadd.f32 %v2242_v46, %v2155_v43  ;;  %v2307_v17 = vadd.f32 %v2306_v51, %v2277_v53 }
 0x293   :  { %v2308_v62 = vadd.f32 %v2307_v17, %v5566_v63 }
 0x294   :  { %v2069_v19 = vpop.f32.mrf.mxu2 }
 0x295   :  { %v2070_v39 = vadd.f32 %v2069_v19, %v1982_v49  ;;  %v2157_v5 = vpop.f32.mrf.mxu3  ;;  %v2309_v61 = vadd.f32 %v2308_v62, %v5565_v34  ;;  %v5562_v49 = vmax.f32 %v4974_v37, 0.0  ;;  %v5560_v19 = vmax.f32 %v4977_v56, 0.0 }
 0x296   :  { %v1983_v44 = vpop.f32.mrf.mxu1 }
 0x297   :  { %v2158_v1 = vadd.f32 %v2157_v5, %v2070_v39  ;;  %v1984_v30 = vadd.f32 %v1983_v44, %v4655_v11  ;;  %v2310_v43 = vadd.f32 %v2309_v61, %v5564_v23  ;;  %v5557_v5 = vmax.f32 %v4980_v6, 0.0 }
 0x298   :  { %v2247_v48 = vpop.f32.mrf.mxu0  ;;  %v5552_v61 = vmax.f32 %v4986_v59, 0.0 }
 0x299   :  { %v5030_v46 = vadd.f32 %v2245_v26, %v2158_v1  ;;  %v2311_v31 = vadd.f32 %v2310_v43, %v5563_v24 }
 0x29b   :  { %v2312_v39 = vadd.f32 %v2311_v31, %v5562_v49  ;;  %v5554_v31 = vmax.f32 %v4992_v4, 0.0 }
 0x29c   :  { %v2071_v58 = vpop.f32.mrf.mxu2 }
 0x29d   :  { %v2072_v11 = vadd.f32 %v2071_v58, %v1984_v30  ;;  %v2159_v16 = vpop.f32.mrf.mxu3  ;;  %v2313_v1 = vadd.f32 %v2312_v39, %v5560_v19  ;;  %v5551_v30 = vmax.f32 %v4983_v52, 0.0 }
 0x29e   :  { %v1986_v57 = vpop.f32.mrf.mxu1 }
 0x29f   :  { %v2160_v26 = vadd.f32 %v2159_v16, %v2072_v11  ;;  %v1987_v44 = vadd.f32 %v1986_v57, %v4665_v20  ;;  %v5553_v20 = vmax.f32 %v4989_v36, 0.0 }
 0x2a0   :  { %v2250_v33 = vpop.f32.mrf.mxu0 }
 0x2a1   :  { %v5044_v27 = vadd.f32 %v2247_v48, %v2160_v26  ;;  %v2314_v48 = vadd.f32 %v2313_v1, %v5557_v5  ;;  %v5555_v1 = vmax.f32 %v4998_v21, 0.0 }
 0x2a3   :  { %v2315_v43 = vadd.f32 %v2314_v48, %v5551_v30 }
 0x2a4   :  { %v2074_v51 = vpop.f32.mrf.mxu2 }
 0x2a5   :  { %v2075_v17 = vadd.f32 %v2074_v51, %v1987_v44  ;;  %v2162_v62 = vpop.f32.mrf.mxu3  ;;  %v2316_v26 = vadd.f32 %v2315_v43, %v5552_v61 }
 0x2a6   :  { %v1988_v58 = vpop.f32.mrf.mxu1 }
 0x2a7   :  { %v2163_v11 = vadd.f32 %v2162_v62, %v2075_v17  ;;  %v1989_v39 = vadd.f32 %v1988_v58, %v4687_v54  ;;  %v2317_v51 = vadd.f32 %v2316_v26, %v5553_v20  ;;  %v5559_v54 = vmax.f32 %v5030_v46, 0.0 }
 0x2a8   :  { %v2252_v16 = vpop.f32.mrf.mxu0  ;;  %v5558_v26 = vmax.f32 %v5044_v27, 0.0 }
 0x2a9   :  { %v5059_v57 = vadd.f32 %v2250_v33, %v2163_v11  ;;  %v2318_v33 = vadd.f32 %v2317_v51, %v5554_v31  ;;  %v5556_v11 = vmax.f32 %v5015_v25, 0.0 }
 0x2ab   :  { %v2319_v61 = vadd.f32 %v2318_v33, %v5555_v1 }
 0x2ac   :  { %v2076_v44 = vpop.f32.mrf.mxu2 }
 0x2ad   :  { %v2077_v17 = vadd.f32 %v2076_v44, %v1989_v39  ;;  %v2164_v62 = vpop.f32.mrf.mxu3  ;;  %v2320_v58 = vadd.f32 %v2319_v61, %v5556_v11 }
 0x2ae   :  { %v1991_v48 = vpop.f32.mrf.mxu1 }
 0x2af   :  { %v2165_v30 = vadd.f32 %v2164_v62, %v2077_v17  ;;  %v1992_v44 = vadd.f32 %v1991_v48, %v4697_v10  ;;  %v2321_v51 = vadd.f32 %v2320_v58, %v5559_v54  ;;  %v5561_v17 = vmax.f32 %v5059_v57, 0.0 }
 0x2b0   :  { %v2255_v43 = vpop.f32.mrf.mxu0 }
 0x2b1   :  { %v5077_v39 = vadd.f32 %v2252_v16, %v2165_v30  ;;  %v2322_v1 = vadd.f32 %v2321_v51, %v5558_v26 }
 0x2b3   :  { %v2294_v61 = vmax.f32 %v5077_v39, 0.0  ;;  %v2323_v30 = vadd.f32 %v2322_v1, %v5561_v17 }
 0x2b4   :  { %v2079_v20 = vpop.f32.mrf.mxu2 }
 0x2b5   :  { %v2080_v62 = vadd.f32 %v2079_v20, %v1992_v44  ;;  %v2167_v31 = vpop.f32.mrf.mxu3  ;;  %v2324_v16 = vadd.f32 %v2323_v30, %v2294_v61 }
 0x2b6   :  { %v1993_v33 = vpop.f32.mrf.mxu1 }
 0x2b7   :  { %v2168_v11 = vadd.f32 %v2167_v31, %v2080_v62  ;;  %v1994_v20 = vadd.f32 %v1993_v33, %v4719_v40 }
 0x2b8   :  { %v2257_v5 = vpop.f32.mrf.mxu0 }
 0x2b9   :  { %v5088_v10 = vadd.f32 %v2255_v43, %v2168_v11 }
 0x2bb   :  { %v2295_v48 = vmax.f32 %v5088_v10, 0.0 }
 0x2bc   :  { %v2081_v58 = vpop.f32.mrf.mxu2 }
 0x2bd   :  { %v2325_v44 = vadd.f32 %v2324_v16, %v2295_v48  ;;  %v2082_v51 = vadd.f32 %v2081_v58, %v1994_v20  ;;  %v2169_v26 = vpop.f32.mrf.mxu3 }
 0x2be   :  { %v1996_v31 = vpop.f32.mrf.mxu1 }
 0x2bf   :  { %v2170_v62 = vadd.f32 %v2169_v26, %v2082_v51  ;;  %v1997_v11 = vadd.f32 %v1996_v31, %v4731_v2 }
 0x2c0   :  { %v2260_v54 = vpop.f32.mrf.mxu0 }
 0x2c1   :  { %v2258_v19 = vadd.f32 %v2257_v5, %v2170_v62 }
 0x2c3   :  { %v2296_v1 = vmax.f32 %v2258_v19, 0.0 }
 0x2c4   :  { %v2084_v43 = vpop.f32.mrf.mxu2 }
 0x2c5   :  { %v2326_v17 = vadd.f32 %v2325_v44, %v2296_v1  ;;  %v2085_v30 = vadd.f32 %v2084_v43, %v1997_v11  ;;  %v2172_v49 = vpop.f32.mrf.mxu3  ;;  %v3662_v11 = vmov 242.0  }
 0x2c6   :  { %v1998_v24 = vpop.f32.mrf.mxu1  ;;  %3656 = vrcp.f32 %v3662_v11 }
 0x2c7   :  { %v2173_v23 = vadd.f32 %v2172_v49, %v2085_v30  ;;  %v1999_v16 = vadd.f32 %v1998_v24, %v4752_v28 }
 0x2c8   :  { %v2262_v40 = vpop.f32.mrf.mxu0 }
 0x2c9   :  { %v2261_v33 = vadd.f32 %v2260_v54, %v2173_v23 }
 0x2cb   :  { %v2297_v34 = vmax.f32 %v2261_v33, 0.0 }
 0x2cc   :  { %v2086_v20 = vpop.f32.mrf.mxu2 }
 0x2cd   :  { %v2327_v58 = vadd.f32 %v2326_v17, %v2297_v34  ;;  %v2087_v63 = vadd.f32 %v2086_v20, %v1999_v16  ;;  %v2174_v26 = vpop.f32.mrf.mxu3  ;;  %v3657_v17 = vpop.eup %3656 }
 0x2ce   :  { %v2001_v51 = vpop.f32.mrf.mxu1  ;;  %vm2343_vm1 = vweird.f32 %v3657_v17 }
 0x2cf   :  { %v2175_v5 = vadd.f32 %v2174_v26, %v2087_v63  ;;  %v2002_v44 = vadd.f32 %v2001_v51, %v4760_v7 }
 0x2d0   :  { %v2265_v19 = vpop.f32.mrf.mxu0 }
 0x2d1   :  { %v2263_v62 = vadd.f32 %v2262_v40, %v2175_v5  ;;  %v2339_v40 = vmul.f32 242.0, %v3657_v17 }
 0x2d3   :  { %v2298_v2 = vmax.f32 %v2263_v62, 0.0  ;;  %v2340_v51 = vsub.f32 1.0, %v2339_v40 }
 0x2d4   :  { %v2089_v31 = vpop.f32.mrf.mxu2 }
 0x2d5   :  { %v2328_v49 = vadd.f32 %v2327_v58, %v2298_v2  ;;  %v2090_v43 = vadd.f32 %v2089_v31, %v2002_v44  ;;  %v2177_v23 = vpop.f32.mrf.mxu3  ;;  %v2341_v58 = vmul.f32 %v3657_v17, %v2340_v51  ;;  %v5570_v51 = vmax.f32 %v4968_v8, 0.0 }
 0x2d6   :  { %v2003_v54 = vpop.f32.mrf.mxu1 }
 0x2d7   :  { %v2178_v30 = vadd.f32 %v2177_v23, %v2090_v43  ;;  %v2342_v11 = vadd.f32 %v3657_v17, %v2341_v58  ;;  %v5571_v58 = vmax.f32 %v4974_v37, 0.0 }
 0x2d8   :  { %v2267_v28 = vpop.f32.mrf.mxu0 }
 0x2d9   :  { %v2266_v24 = vadd.f32 %v2265_v19, %v2178_v30  ;;  %v5100_v19 = vsel %vm2343_vm1, %v3657_v17, %v2342_v11  ;;  %v5572_v11 = vmax.f32 %v4977_v56, 0.0 }
 0x2db   :  { %v2299_v33 = vmax.f32 %v2266_v24, 0.0 }
 0x2dc   :  { %v2091_v16 = vpop.f32.mrf.mxu2 }
 0x2dd   :  { %v2330_v63 = vsel %vm2329_vm0, %v2299_v33, 0.0  ;;  %v2179_v20 = vpop.f32.mrf.mxu3 }
 0x2de   :  { %v2331_v26 = vadd.f32 %v2330_v63, %v2328_v49  ;;  %v5568_v63 = vmax.f32 %v4932_v12, 0.0  ;;  %v5569_v20 = vmax.f32 %v4959_v60, 0.0 }
 0x2e0   :  { %v2332_v7 = vrot.slane %v2331_v26, 4 }
 0x2e2   :  { %v2333_v5 = vadd.f32 %v2332_v7, %v2331_v26 }
 0x2e4   :  { %v2334_v62 = vrot.slane %v2333_v5, 2 }
 0x2e6   :  { %v2335_v44 = vadd.f32 %v2334_v62, %v2333_v5 }
 0x2e8   :  { %v2336_v31 = vrot.slane %v2335_v44, 1 }
 0x2ea   :  { %v2337_v43 = vadd.f32 %v2336_v31, %v2335_v44 }
 0x2ec   :  { %v5103_v23 = vmul.f32 %v5100_v19, %v2337_v43 }
 0x2ee   :  { %v5108_v54 = vsub.f32 %v2269_v13, %v5103_v23  ;;  %v5113_v49 = vsub.f32 %v2294_v61, %v5103_v23  ;;  %v5118_v30 = vsub.f32 %v2295_v48, %v5103_v23  ;;  %v5121_v28 = vsub.f32 %v2296_v1, %v5103_v23 }
 0x2ef   :  { %v5126_v24 = vsub.f32 %v2270_v14, %v5103_v23  ;;  %v5129_v3 = vsub.f32 %v2297_v34, %v5103_v23  ;;  %v5132_v13 = vsub.f32 %v2298_v2, %v5103_v23  ;;  %v5135_v39 = vsub.f32 %v2299_v33, %v5103_v23 }
 0x2f0   :  { %v5140_v61 = vsub.f32 %v2271_v32, %v5103_v23  ;;  %v2377_v10 = vmul.f32 %v5108_v54, %v5108_v54  ;;  %v5149_v14 = vsub.f32 %v2272_v15, %v5103_v23  ;;  %v5154_v34 = vsub.f32 %v2273_v9, %v5103_v23 }
 0x2f1   :  { %v2378_v35 = vmul.f32 %v5126_v24, %v5126_v24  ;;  %v5161_v48 = vsub.f32 %v2274_v0, %v5103_v23  ;;  %v5168_v15 = vsub.f32 %v2275_v47, %v5103_v23  ;;  %v5175_v2 = vsub.f32 %v2276_v41, %v5103_v23 }
 0x2f2   :  { %v2379_v45 = vmul.f32 %v5140_v61, %v5140_v61  ;;  %v2380_v1 = vmul.f32 %v5149_v14, %v5149_v14  ;;  %v2381_v38 = vmul.f32 %v5154_v34, %v5154_v34  ;;  %v5182_v17 = vsub.f32 %v2277_v53, %v5103_v23 }
 0x2f3   :  { %v2408_v32 = vadd.f32 %v2378_v35, %v2377_v10  ;;  %v2382_v29 = vmul.f32 %v5161_v48, %v5161_v48  ;;  %v2383_v42 = vmul.f32 %v5168_v15, %v5168_v15  ;;  %v5567_v33 = vmax.f32 %v4929_v55, 0.0 }
 0x2f4   :  { %v2384_v18 = vmul.f32 %v5175_v2, %v5175_v2  ;;  %v5196_v40 = vsub.f32 %v5568_v63, %v5103_v23  ;;  %v2385_v22 = vmul.f32 %v5182_v17, %v5182_v17  ;;  %v5203_v26 = vsub.f32 %v5569_v20, %v5103_v23 }
 0x2f5   :  { %v2409_v50 = vadd.f32 %v2408_v32, %v2379_v45  ;;  %v5189_v16 = vsub.f32 %v5567_v33, %v5103_v23  ;;  %v5210_v5 = vsub.f32 %v5570_v51, %v5103_v23  ;;  %v5217_v44 = vsub.f32 %v5571_v58, %v5103_v23 }
 0x2f6   :  { %v2387_v12 = vmul.f32 %v5196_v40, %v5196_v40  ;;  %v2388_v60 = vmul.f32 %v5203_v26, %v5203_v26  ;;  %v5224_v43 = vsub.f32 %v5572_v11, %v5103_v23  ;;  %v5573_v35 = vmax.f32 %v4980_v6, 0.0 }
 0x2f7   :  { %v2410_v9 = vadd.f32 %v2409_v50, %v2380_v1  ;;  %v2386_v55 = vmul.f32 %v5189_v16, %v5189_v16  ;;  %v2389_v8 = vmul.f32 %v5210_v5, %v5210_v5  ;;  %v2390_v37 = vmul.f32 %v5217_v44, %v5217_v44 }
 0x2f8   :  { %v5231_v45 = vsub.f32 %v5573_v35, %v5103_v23  ;;  %v5574_v1 = vmax.f32 %v4983_v52, 0.0  ;;  %v2391_v56 = vmul.f32 %v5224_v43, %v5224_v43 }
 0x2f9   :  { %v2411_v0 = vadd.f32 %v2410_v9, %v2381_v38  ;;  %v5575_v9 = vmax.f32 %v4986_v59, 0.0 }
 0x2fa   :  { %v5238_v50 = vsub.f32 %v5574_v1, %v5103_v23  ;;  %v2392_v6 = vmul.f32 %v5231_v45, %v5231_v45 }
 0x2fb   :  { %v2412_v47 = vadd.f32 %v2411_v0, %v2382_v29  ;;  %v5245_v29 = vsub.f32 %v5575_v9, %v5103_v23  ;;  %v2404_v9 = vmul.f32 %v5121_v28, %v5121_v28 }
 0x2fc   :  { %v2393_v52 = vmul.f32 %v5238_v50, %v5238_v50 }
 0x2fd   :  { %v2413_v41 = vadd.f32 %v2412_v47, %v2383_v42  ;;  %v5576_v42 = vmax.f32 %v4989_v36, 0.0  ;;  %v2394_v59 = vmul.f32 %v5245_v29, %v5245_v29 }
 0x2ff   :  { %v2414_v53 = vadd.f32 %v2413_v41, %v2384_v18  ;;  %v5252_v47 = vsub.f32 %v5576_v42, %v5103_v23  ;;  %v5577_v18 = vmax.f32 %v4992_v4, 0.0 }
 0x301   :  { %v2415_v7 = vadd.f32 %v2414_v53, %v2385_v22  ;;  %v5259_v41 = vsub.f32 %v5577_v18, %v5103_v23  ;;  %v5578_v22 = vmax.f32 %v4998_v21, 0.0  ;;  %v2395_v36 = vmul.f32 %v5252_v47, %v5252_v47 }
 0x303   :  { %v2416_v62 = vadd.f32 %v2415_v7, %v2386_v55  ;;  %v5266_v53 = vsub.f32 %v5578_v22, %v5103_v23  ;;  %v5579_v55 = vmax.f32 %v5015_v25, 0.0  ;;  %v2396_v4 = vmul.f32 %v5259_v41, %v5259_v41 }
 0x305   :  { %v2417_v31 = vadd.f32 %v2416_v62, %v2387_v12  ;;  %v5273_v7 = vsub.f32 %v5579_v55, %v5103_v23  ;;  %v5580_v12 = vmax.f32 %v5030_v46, 0.0  ;;  %v2397_v21 = vmul.f32 %v5266_v53, %v5266_v53 }
 0x307   :  { %v2418_v10 = vadd.f32 %v2417_v31, %v2388_v60  ;;  %v5280_v62 = vsub.f32 %v5580_v12, %v5103_v23  ;;  %v5581_v60 = vmax.f32 %v5044_v27, 0.0  ;;  %v2398_v25 = vmul.f32 %v5273_v7, %v5273_v7 }
 0x309   :  { %v2419_v32 = vadd.f32 %v2418_v10, %v2389_v8  ;;  %v5287_v31 = vsub.f32 %v5581_v60, %v5103_v23  ;;  %v5582_v8 = vmax.f32 %v5059_v57, 0.0  ;;  %v2399_v46 = vmul.f32 %v5280_v62, %v5280_v62 }
 0x30a   :  { %v2403_v57 = vmul.f32 %v5118_v30, %v5118_v30 }
 0x30b   :  { %v2420_v38 = vadd.f32 %v2419_v32, %v2390_v37  ;;  %v5294_v10 = vsub.f32 %v5582_v8, %v5103_v23  ;;  %v2400_v37 = vmul.f32 %v5287_v31, %v5287_v31 }
 0x30d   :  { %v2421_v0 = vadd.f32 %v2420_v38, %v2391_v56  ;;  %v2401_v27 = vmul.f32 %v5294_v10, %v5294_v10  ;;  %v2402_v56 = vmul.f32 %v5113_v49, %v5113_v49 }
 0x30f   :  { %v2422_v33 = vadd.f32 %v2421_v0, %v2392_v6  ;;  %v2405_v0 = vmul.f32 %v5129_v3, %v5129_v3 }
 0x311   :  { %v2423_v63 = vadd.f32 %v2422_v33, %v2393_v52  ;;  %v2407_v52 = vmul.f32 %v5135_v39, %v5135_v39  ;;  %v2406_v33 = vmul.f32 %v5132_v13, %v5132_v13 }
 0x313   :  { %v2424_v20 = vadd.f32 %v2423_v63, %v2394_v59  ;;  %v2437_v63 = vsel %vm2329_vm0, %v2407_v52, 0.0 }
 0x315   :  { %v2425_v51 = vadd.f32 %v2424_v20, %v2395_v36 }
 0x317   :  { %v2426_v58 = vadd.f32 %v2425_v51, %v2396_v4 }
 0x319   :  { %v2427_v11 = vadd.f32 %v2426_v58, %v2397_v21 }
 0x31b   :  { %v2428_v35 = vadd.f32 %v2427_v11, %v2398_v25 }
 0x31d   :  { %v2429_v32 = vadd.f32 %v2428_v35, %v2399_v46 }
 0x31f   :  { %v2430_v1 = vadd.f32 %v2429_v32, %v2400_v37 }
 0x321   :  { %v2431_v38 = vadd.f32 %v2430_v1, %v2401_v27 }
 0x323   :  { %v2432_v23 = vadd.f32 %v2431_v38, %v2402_v56 }
 0x325   :  { %v2433_v6 = vadd.f32 %v2432_v23, %v2403_v57 }
 0x327   :  { %v2434_v42 = vadd.f32 %v2433_v6, %v2404_v9 }
 0x329   :  { %v2435_v18 = vadd.f32 %v2434_v42, %v2405_v0 }
 0x32b   :  { %v2436_v59 = vadd.f32 %v2435_v18, %v2406_v33 }
 0x32d   :  { %v2438_v22 = vadd.f32 %v2437_v63, %v2436_v59 }
 0x32f   :  { %v2439_v36 = vrot.slane %v2438_v22, 4 }
 0x331   :  { %v2440_v20 = vadd.f32 %v2439_v36, %v2438_v22 }
 0x333   :  { %v2441_v55 = vrot.slane %v2440_v20, 2 }
 0x335   :  { %v2442_v4 = vadd.f32 %v2441_v55, %v2440_v20 }
 0x337   :  { %v2443_v51 = vrot.slane %v2442_v4, 1 }
 0x339   :  { %v2444_v12 = vadd.f32 %v2443_v51, %v2442_v4 }
 0x33b   :  { %v2445_v21 = vmul.f32 %v2444_v12, %v5100_v19  ;;  %v5325_v19 = vld [vmem:[%s5548_s3] ss:$0 sm:$0xff] }
 0x33d   :  { %v2446_v58 = vadd.f32 1e-05, %v2445_v21 }
 0x33f   :  { %3658 = vrsqrt.f32 %v2446_v58  ;;  %vm2453_vm3 = vweird.f32 %v2446_v58 }
 0x345   :  { %v3659_v60 = vpop.eup %3658 }
 0x346   :  { %v2448_v25 = vmul.f32 %v3659_v60, %v2446_v58  ;;  %vm2454_vm2 = vweird.f32 %v3659_v60 }
 0x347   :  { %vm2455_vm4 = vmor %vm2453_vm3, %vm2454_vm2 }
 0x348   :  { %v2449_v11 = vmul.f32 %v3659_v60, %v2448_v25 }
 0x34a   :  { %v2450_v8 = vmul.f32 0.5, %v2449_v11 }
 0x34c   :  { %v2451_v46 = vsub.f32 1.5, %v2450_v8 }
 0x34e   :  { %v2452_v35 = vmul.f32 %v3659_v60, %v2451_v46 }
 0x350   :  { %v5316_v37 = vsel %vm2455_vm4, %v3659_v60, %v2452_v35 }
 0x351   :  { %v2457_v32 = vmul.f32 %v5316_v37, %v5108_v54  ;;  %v2458_v27 = vmul.f32 %v5316_v37, %v5126_v24  ;;  %v2459_v1 = vmul.f32 %v5316_v37, %v5140_v61  ;;  %v2460_v56 = vmul.f32 %v5316_v37, %v5149_v14  ;;  %v5342_v61 = vld [vmem:[%s5549_s4] ss:$0 sm:$0xff] }
 0x352   :  { %v2461_v38 = vmul.f32 %v5316_v37, %v5154_v34  ;;  %v2462_v54 = vmul.f32 %v5316_v37, %v5161_v48  ;;  %v2463_v24 = vmul.f32 %v5316_v37, %v5168_v15  ;;  %v2464_v14 = vmul.f32 %v5316_v37, %v5175_v2 }
 0x353   :  { %v2492_v57 = vmul.f32 %v5325_v19, %v2457_v32  ;;  %v2493_v23 = vmul.f32 %v5325_v19, %v2458_v27  ;;  %v2494_v34 = vmul.f32 %v5325_v19, %v2459_v1  ;;  %v2495_v9 = vmul.f32 %v5325_v19, %v2460_v56 }
 0x354   :  { %v2465_v48 = vmul.f32 %v5316_v37, %v5182_v17  ;;  %v2496_v15 = vmul.f32 %v5325_v19, %v2461_v38  ;;  %v2466_v6 = vmul.f32 %v5316_v37, %v5189_v16  ;;  %v2497_v0 = vmul.f32 %v5325_v19, %v2462_v54 }
 0x355   :  { %v2467_v42 = vmul.f32 %v5316_v37, %v5196_v40  ;;  %v2498_v52 = vmul.f32 %v5325_v19, %v2463_v24  ;;  %v2527_v2 = vadd.f32 %v5342_v61, %v2492_v57  ;;  %v2528_v33 = vadd.f32 %v5342_v61, %v2493_v23 }
 0x356   :  { %v2468_v18 = vmul.f32 %v5316_v37, %v5203_v26  ;;  %v2499_v17 = vmul.f32 %v5325_v19, %v2464_v14  ;;  %v2529_v59 = vadd.f32 %v5342_v61, %v2494_v34  ;;  %v2530_v16 = vadd.f32 %v5342_v61, %v2495_v9 }
 0x357   :  { %v2469_v63 = vmul.f32 %v5316_v37, %v5210_v5  ;;  %v2500_v40 = vmul.f32 %v5325_v19, %v2465_v48  ;;  %v2531_v22 = vadd.f32 %v5342_v61, %v2496_v15  ;;  %2558 = vst [vmem:[%s5550_s5] sm:$0xff] %v2527_v2  ;;  %v2470_v26 = vmul.f32 %v5316_v37, %v5217_v44 }
 0x358   :  { %v2501_v36 = vmul.f32 %v5325_v19, %v2466_v6  ;;  %v2532_v20 = vadd.f32 %v5342_v61, %v2497_v0  ;;  %2559 = vst [vmem:[%s5550_s5 + $0x8] sm:$0xff] %v2528_v33  ;;  %v2471_v5 = vmul.f32 %v5316_v37, %v5224_v43  ;;  %v2502_v55 = vmul.f32 %v5325_v19, %v2467_v42 }
 0x359   :  { %v2533_v4 = vadd.f32 %v5342_v61, %v2498_v52  ;;  %2560 = vst [vmem:[%s5550_s5 + $0x10] sm:$0xff] %v2529_v59  ;;  %v2472_v44 = vmul.f32 %v5316_v37, %v5231_v45  ;;  %v2503_v51 = vmul.f32 %v5325_v19, %v2468_v18  ;;  %v2534_v12 = vadd.f32 %v5342_v61, %v2499_v17 }
 0x35a   :  { %2561 = vst [vmem:[%s5550_s5 + $0x18] sm:$0xff] %v2530_v16  ;;  %v2473_v43 = vmul.f32 %v5316_v37, %v5238_v50  ;;  %v2504_v21 = vmul.f32 %v5325_v19, %v2469_v63  ;;  %v2535_v58 = vadd.f32 %v5342_v61, %v2500_v40  ;;  %v2474_v45 = vmul.f32 %v5316_v37, %v5245_v29 }
 0x35b   :  { %2562 = vst [vmem:[%s5550_s5 + $0x20] sm:$0xff] %v2531_v22  ;;  %v2505_v60 = vmul.f32 %v5325_v19, %v2470_v26  ;;  %v2536_v25 = vadd.f32 %v5342_v61, %v2501_v36  ;;  %v2475_v50 = vmul.f32 %v5316_v37, %v5252_v47  ;;  %v2506_v11 = vmul.f32 %v5325_v19, %v2471_v5 }
 0x35c   :  { %2563 = vst [vmem:[%s5550_s5 + $0x28] sm:$0xff] %v2532_v20  ;;  %v2537_v8 = vadd.f32 %v5342_v61, %v2502_v55  ;;  %v2476_v29 = vmul.f32 %v5316_v37, %v5259_v41  ;;  %v2507_v46 = vmul.f32 %v5325_v19, %v2472_v44  ;;  %v2538_v35 = vadd.f32 %v5342_v61, %v2503_v51 }
 0x35d   :  { %2564 = vst [vmem:[%s5550_s5 + $0x30] sm:$0xff] %v2533_v4  ;;  %v2477_v47 = vmul.f32 %v5316_v37, %v5266_v53  ;;  %v2508_v32 = vmul.f32 %v5325_v19, %v2473_v43  ;;  %v2539_v27 = vadd.f32 %v5342_v61, %v2504_v21  ;;  %v2478_v41 = vmul.f32 %v5316_v37, %v5273_v7 }
 0x35e   :  { %2565 = vst [vmem:[%s5550_s5 + $0x38] sm:$0xff] %v2534_v12  ;;  %v2509_v1 = vmul.f32 %v5325_v19, %v2474_v45  ;;  %v2540_v56 = vadd.f32 %v5342_v61, %v2505_v60  ;;  %v2479_v53 = vmul.f32 %v5316_v37, %v5280_v62  ;;  %v2510_v38 = vmul.f32 %v5325_v19, %v2475_v50 }
 0x35f   :  { %2566 = vst [vmem:[%s5550_s5 + $0x40] sm:$0xff] %v2535_v58  ;;  %v2541_v54 = vadd.f32 %v5342_v61, %v2506_v11  ;;  %v2480_v7 = vmul.f32 %v5316_v37, %v5287_v31  ;;  %v2511_v24 = vmul.f32 %v5325_v19, %v2476_v29  ;;  %v2542_v57 = vadd.f32 %v5342_v61, %v2507_v46 }
 0x360   :  { %2567 = vst [vmem:[%s5550_s5 + $0x48] sm:$0xff] %v2536_v25  ;;  %v2481_v62 = vmul.f32 %v5316_v37, %v5294_v10  ;;  %v2512_v23 = vmul.f32 %v5325_v19, %v2477_v47  ;;  %v2543_v14 = vadd.f32 %v5342_v61, %v2508_v32  ;;  %v2482_v31 = vmul.f32 %v5316_v37, %v5113_v49 }
 0x361   :  { %2568 = vst [vmem:[%s5550_s5 + $0x50] sm:$0xff] %v2537_v8  ;;  %v2513_v34 = vmul.f32 %v5325_v19, %v2478_v41  ;;  %v2544_v9 = vadd.f32 %v5342_v61, %v2509_v1  ;;  %v2483_v10 = vmul.f32 %v5316_v37, %v5118_v30  ;;  %v2514_v48 = vmul.f32 %v5325_v19, %v2479_v53 }
 0x362   :  { %2569 = vst [vmem:[%s5550_s5 + $0x58] sm:$0xff] %v2538_v35  ;;  %v2545_v15 = vadd.f32 %v5342_v61, %v2510_v38  ;;  %v2484_v49 = vmul.f32 %v5316_v37, %v5121_v28  ;;  %v2515_v6 = vmul.f32 %v5325_v19, %v2480_v7  ;;  %v2546_v0 = vadd.f32 %v5342_v61, %v2511_v24 }
 0x363   :  { %2570 = vst [vmem:[%s5550_s5 + $0x60] sm:$0xff] %v2539_v27  ;;  %v2485_v30 = vmul.f32 %v5316_v37, %v5129_v3  ;;  %v2516_v42 = vmul.f32 %v5325_v19, %v2481_v62  ;;  %v2547_v52 = vadd.f32 %v5342_v61, %v2512_v23  ;;  %v2486_v28 = vmul.f32 %v5316_v37, %v5132_v13 }
 0x364   :  { %2571 = vst [vmem:[%s5550_s5 + $0x68] sm:$0xff] %v2540_v56  ;;  %v2517_v2 = vmul.f32 %v5325_v19, %v2482_v31  ;;  %v2548_v33 = vadd.f32 %v5342_v61, %v2513_v34  ;;  %v2487_v3 = vmul.f32 %v5316_v37, %v5135_v39  ;;  %v2518_v18 = vmul.f32 %v5325_v19, %v2483_v10 }
 0x365   :  { %2572 = vst [vmem:[%s5550_s5 + $0x70] sm:$0xff] %v2541_v54  ;;  %v2549_v17 = vadd.f32 %v5342_v61, %v2514_v48  ;;  %v2519_v13 = vmul.f32 %v5325_v19, %v2484_v49  ;;  %v2550_v59 = vadd.f32 %v5342_v61, %v2515_v6  ;;  %v2520_v16 = vmul.f32 %v5325_v19, %v2485_v30 }
 0x366   :  { %2573 = vst [vmem:[%s5550_s5 + $0x78] sm:$0xff] %v2542_v57  ;;  %v2551_v39 = vadd.f32 %v5342_v61, %v2516_v42  ;;  %v2521_v37 = vmul.f32 %v5325_v19, %v2486_v28  ;;  %v2552_v63 = vadd.f32 %v5342_v61, %v2517_v2  ;;  %v2522_v40 = vmul.f32 %v5325_v19, %v2487_v3 }
 0x367   :  { %2574 = vst [vmem:[%s5550_s5 + $0x80] sm:$0xff] %v2543_v14  ;;  %v2553_v22 = vadd.f32 %v5342_v61, %v2518_v18  ;;  %v2554_v26 = vadd.f32 %v5342_v61, %v2519_v13  ;;  %v2555_v36 = vadd.f32 %v5342_v61, %v2520_v16 }
 0x368   :  { %2575 = vst [vmem:[%s5550_s5 + $0x88] sm:$0xff] %v2544_v9  ;;  %v2556_v19 = vadd.f32 %v5342_v61, %v2521_v37  ;;  %v2557_v20 = vadd.f32 %v5342_v61, %v2522_v40 }
 0x369   :  { %2576 = vst [vmem:[%s5550_s5 + $0x90] sm:$0xff] %v2545_v15 }
 0x36a   :  { %2577 = vst [vmem:[%s5550_s5 + $0x98] sm:$0xff] %v2546_v0 }
 0x36b   :  { %2578 = vst [vmem:[%s5550_s5 + $0xa0] sm:$0xff] %v2547_v52 }
 0x36c   :  { %2579 = vst [vmem:[%s5550_s5 + $0xa8] sm:$0xff] %v2548_v33 }
 0x36d   :  { %2580 = vst [vmem:[%s5550_s5 + $0xb0] sm:$0xff] %v2549_v17 }
 0x36e   :  { %2581 = vst [vmem:[%s5550_s5 + $0xb8] sm:$0xff] %v2550_v59 }
 0x36f   :  { %2582 = vst [vmem:[%s5550_s5 + $0xc0] sm:$0xff] %v2551_v39 }
 0x370   :  { %2583 = vst [vmem:[%s5550_s5 + $0xc8] sm:$0xff] %v2552_v63 }
 0x371   :  { %2584 = vst [vmem:[%s5550_s5 + $0xd0] sm:$0xff] %v2553_v22 }
 0x372   :  { %2585 = vst [vmem:[%s5550_s5 + $0xd8] sm:$0xff] %v2554_v26 }
 0x373   :  { %2586 = vst [vmem:[%s5550_s5 + $0xe0] sm:$0xff] %v2555_v36 }
 0x374   :  { %2587 = vst [vmem:[%s5550_s5 + $0xe8] sm:$0xff] %v2556_v19 }
 0x375   :  { %2588 = vst [vmem:[%s5550_s5 + $0xf0] sm:$0x3] %v2557_v20 }

// kernel: pallas_forward.5
= control target key start
LH: loop header
LB: loop body
LE: loop exit
PB: predicated region body
PF: predicated region fallthrough
CT: control target
= control target key end

     0   :  { %vm1260_vm0 = vcmask 130048   ;;  %s9521_s1 = inlined_call_operand.vmem [shape: bf16[400,1024], index: 1, kind: input, shape index: {}]   ;;  %s9522_s0 = inlined_call_operand.vmem [shape: bf16[8,400], index: 0, kind: input, shape index: {}]   ;;  %s9523_s3 = inlined_call_operand.vmem [shape: bf16[1024,512], index: 3, kind: input, shape index: {}]   ;;  %s9524_s2 = inlined_call_operand.vmem [shape: f32[1,1024], index: 2, kind: input, shape index: {}]   ;;  %s9525_s4 = inlined_call_operand.vmem [shape: f32[1,512], index: 4, kind: input, shape index: {}]   ;;  %s9526_s5 = inlined_call_operand.vmem [shape: bf16[512,128], index: 5, kind: input, shape index: {}]   ;;  %s9527_s6 = inlined_call_operand.vmem [shape: f32[1,128], index: 6, kind: input, shape index: {}]   ;;  %s9528_s7 = inlined_call_operand.vmem [shape: f32[8,128], index: 7, kind: output, shape index: {}]  }
   0x1   :  { %v4223_v0 = vld [vmem:[%s9521_s1 + $0x1c0] sm:$0xf]  ;;  %v6013_v9 = vld [vmem:[%s9521_s1 + $0x1c4] sm:$0xf]  ;;  %v6627_v63 = vld [vmem:[%s9522_s0 + $0x8] sm:$0xff] }
   0x2   :  { %v6017_v1 = vld [vmem:[%s9521_s1 + $0x1dc] sm:$0xf0]  ;;  %v4225_v10 = vld [vmem:[%s9521_s1 + $0x1e0] sm:$0xf0] }
   0x3   :  { %v4735_v2 = vld [vmem:[%s9521_s1 + $0x5c0] sm:$0xf]  ;;  %v4224_v3 = vor.u32 %v6017_v1, %v4223_v0  ;;  %v4228_v12 = vor.u32 %v6013_v9, %v4225_v10  ;;  %v6005_v20 = vld [vmem:[%s9521_s1 + $0x184] sm:$0xf] }
   0x4   :  { %v6145_v4 = vld [vmem:[%s9521_s1 + $0x5dc] sm:$0xf0]  ;;  %v4193_v22 = vld [vmem:[%s9521_s1 + $0x1a0] sm:$0xf0] }
   0x5   :  { %v4767_v5 = vld [vmem:[%s9521_s1 + $0x600] sm:$0xf]  ;;  %v4736_v7 = vor.u32 %v6145_v4, %v4735_v2  ;;  %1264 = vmatpush.bf16.msra.mxu0 %v4224_v3  ;;  %v4196_v25 = vor.u32 %v6005_v20, %v4193_v22  ;;  %v5997_v32 = vld [vmem:[%s9521_s1 + $0x144] sm:$0xf]  ;;  %v252_v3 = vunpack.c.h.b16 %v6627_v63 }
   0x6   :  { %v6153_v6 = vld [vmem:[%s9521_s1 + $0x61c] sm:$0xf0]  ;;  %v4161_v33 = vld [vmem:[%s9521_s1 + $0x160] sm:$0xf0] }
   0x7   :  { %v4768_v8 = vor.u32 %v6153_v6, %v4767_v5  ;;  %v4191_v11 = vld [vmem:[%s9521_s1 + $0x180] sm:$0xf]  ;;  %1290 = vmatpush.bf16.msra.mxu2 %v4736_v7  ;;  %v4164_v38 = vor.u32 %v5997_v32, %v4161_v33  ;;  %v5989_v43 = vld [vmem:[%s9521_s1 + $0x104] sm:$0xf] }
   0x8   :  { %v6009_v13 = vld [vmem:[%s9521_s1 + $0x19c] sm:$0xf0]  ;;  %v4129_v44 = vld [vmem:[%s9521_s1 + $0x120] sm:$0xf0] }
   0x9   :  { %v4479_v14 = vld [vmem:[%s9521_s1 + $0x3c0] sm:$0xf]  ;;  %1310 = vmatpush.bf16.msra.mxu3 %v4768_v8  ;;  %v4192_v16 = vor.u32 %v6009_v13, %v4191_v11  ;;  %v4132_v51 = vor.u32 %v5989_v43, %v4129_v44  ;;  %v5981_v55 = vld [vmem:[%s9521_s1 + $0xc4] sm:$0xf]  ;;  %v6642_v8 = vpack.c.b16 %v252_v3, %v252_v3  ;;  %v6074_v3 = vld [vmem:[%s9521_s1 + $0x3a4] sm:$0xf0] }
   0xa   :  { %v6081_v15 = vld [vmem:[%s9521_s1 + $0x3dc] sm:$0xf0]  ;;  %v4097_v56 = vld [vmem:[%s9521_s1 + $0xe0] sm:$0xf0] }
   0xb   :  { %v4480_v17 = vor.u32 %v6081_v15, %v4479_v14  ;;  %v4703_v18 = vld [vmem:[%s9521_s1 + $0x580] sm:$0xf]  ;;  %1265 = vmatpush.bf16.msra.mxu0 %v4192_v16  ;;  %v4100_v0 = vor.u32 %v5981_v55, %v4097_v56  ;;  %v5973_v5 = vld [vmem:[%s9521_s1 + $0x84] sm:$0xf] }
   0xc   :  { %v6137_v19 = vld [vmem:[%s9521_s1 + $0x59c] sm:$0xf0]  ;;  %v4065_v6 = vld [vmem:[%s9521_s1 + $0xa0] sm:$0xf0]  ;;  %4797 = vmatmul.msk.bf16.vlgmr.msra.gmra.mxu3 %vm1260_vm0, %v6642_v8 }
   0xd   :  { %1316 = vmatpush.bf16.msrb.mxu3 %v4228_v12  ;;  %v4704_v21 = vor.u32 %v6137_v19, %v4703_v18  ;;  %v4159_v23 = vld [vmem:[%s9521_s1 + $0x140] sm:$0xf]  ;;  %1277 = vmatpush.bf16.msra.mxu1 %v4480_v17  ;;  %v4068_v14 = vor.u32 %v5973_v5, %v4065_v6  ;;  %v5965_v17 = vld [vmem:[%s9521_s1 + $0x44] sm:$0xf] }
   0xe   :  { %v6001_v24 = vld [vmem:[%s9521_s1 + $0x15c] sm:$0xf0]  ;;  %v4033_v19 = vld [vmem:[%s9521_s1 + $0x60] sm:$0xf0] }
   0xf   :  { %v4447_v26 = vld [vmem:[%s9521_s1 + $0x380] sm:$0xf]  ;;  %v4160_v29 = vor.u32 %v6001_v24, %v4159_v23  ;;  %1291 = vmatpush.bf16.msra.mxu2 %v4704_v21  ;;  %v6077_v32 = vld [vmem:[%s9521_s1 + $0x3c4] sm:$0xf] }
  0x10   :  { %v6073_v27 = vld [vmem:[%s9521_s1 + $0x39c] sm:$0xf0]  ;;  %v4481_v33 = vld [vmem:[%s9521_s1 + $0x3e0] sm:$0xf0] }
  0x11   :  { %v4671_v28 = vld [vmem:[%s9521_s1 + $0x540] sm:$0xf]  ;;  %v4448_v30 = vor.u32 %v6073_v27, %v4447_v26  ;;  %1317 = vmatpush.bf16.msrb.mxu3 %v4196_v25  ;;  %1266 = vmatpush.bf16.msra.mxu0 %v4160_v29  ;;  %v4737_v55 = vld [vmem:[%s9521_s1 + $0x5e0] sm:$0xf0] }
  0x12   :  { %v6129_v31 = vld [vmem:[%s9521_s1 + $0x55c] sm:$0xf0]  ;;  %v6133_v6 = vld [vmem:[%s9521_s1 + $0x584] sm:$0xf] }
  0x13   :  { %v4672_v34 = vor.u32 %v6129_v31, %v4671_v28  ;;  %v4127_v35 = vld [vmem:[%s9521_s1 + $0x100] sm:$0xf]  ;;  %1278 = vmatpush.bf16.msra.mxu1 %v4448_v30  ;;  %v5957_v28 = vld [vmem:[%s9521_s1 + $0x4] sm:$0xf]  ;;  %v4036_v30 = vor.u32 %v5965_v17, %v4033_v19  ;;  %v6066_v17 = vld [vmem:[%s9521_s1 + $0x364] sm:$0xf0] }
  0x14   :  { %v5993_v36 = vld [vmem:[%s9521_s1 + $0x11c] sm:$0xf0]  ;;  %v4001_v31 = vld [vmem:[%s9521_s1 + $0x20] sm:$0xf0] }
  0x15   :  { %v4415_v37 = vld [vmem:[%s9521_s1 + $0x340] sm:$0xf]  ;;  %v4128_v45 = vor.u32 %v5993_v36, %v4127_v35  ;;  %1292 = vmatpush.bf16.msra.mxu2 %v4672_v34  ;;  %1318 = vmatpush.bf16.msrb.mxu3 %v4164_v38  ;;  %v4231_v35 = vld [vmem:[%s9521_s1 + $0x1c8] sm:$0xf]  ;;  %v6149_v36 = vld [vmem:[%s9521_s1 + $0x604] sm:$0xf] }
  0x16   :  { %v6065_v39 = vld [vmem:[%s9521_s1 + $0x35c] sm:$0xf0]  ;;  %v6125_v19 = vld [vmem:[%s9521_s1 + $0x544] sm:$0xf] }
  0x17   :  { %v4639_v40 = vld [vmem:[%s9521_s1 + $0x500] sm:$0xf]  ;;  %v4416_v42 = vor.u32 %v6065_v39, %v4415_v37  ;;  %1267 = vmatpush.bf16.msra.mxu0 %v4128_v45  ;;  %v4769_v37 = vld [vmem:[%s9521_s1 + $0x620] sm:$0xf0]  ;;  %v6018_v39 = vld [vmem:[%s9521_s1 + $0x1e4] sm:$0xf0]  ;;  %v4484_v45 = vor.u32 %v6077_v32, %v4481_v33 }
  0x18   :  { %v6121_v41 = vld [vmem:[%s9521_s1 + $0x51c] sm:$0xf0]  ;;  %v4641_v32 = vld [vmem:[%s9521_s1 + $0x520] sm:$0xf0]  ;;  %v4103_v33 = vld [vmem:[%s9521_s1 + $0xc8] sm:$0xf] }
  0x19   :  { %v4383_v46 = vld [vmem:[%s9521_s1 + $0x300] sm:$0xf]  ;;  %v4640_v48 = vor.u32 %v6121_v41, %v4639_v40  ;;  %1279 = vmatpush.bf16.msra.mxu1 %v4416_v42  ;;  %1319 = vmatpush.bf16.msrb.mxu3 %v4132_v51  ;;  %v251_v40 = vunpack.c.l.b16 %v6627_v63  ;;  %v6082_v51 = vld [vmem:[%s9521_s1 + $0x3e4] sm:$0xf0]  ;;  %v6061_v63 = vld [vmem:[%s9521_s1 + $0x344] sm:$0xf] }
  0x1a   :  { %v6057_v47 = vld [vmem:[%s9521_s1 + $0x31c] sm:$0xf0] }
  0x1b   :  { %v4095_v49 = vld [vmem:[%s9521_s1 + $0xc0] sm:$0xf]  ;;  %v4384_v54 = vor.u32 %v6057_v47, %v4383_v46  ;;  %1293 = vmatpush.bf16.msra.mxu2 %v4640_v48  ;;  %v6069_v46 = vld [vmem:[%s9521_s1 + $0x384] sm:$0xf]  ;;  %v4004_v47 = vor.u32 %v5957_v28, %v4001_v31  ;;  %v4772_v48 = vor.u32 %v6149_v36, %v4769_v37  ;;  %v4391_v28 = vld [vmem:[%s9521_s1 + $0x308] sm:$0xf] }
  0x1c   :  { %v5985_v50 = vld [vmem:[%s9521_s1 + $0xdc] sm:$0xf0]  ;;  %v6117_v31 = vld [vmem:[%s9521_s1 + $0x504] sm:$0xf] }
  0x1d   :  { %v4607_v52 = vld [vmem:[%s9521_s1 + $0x4c0] sm:$0xf]  ;;  %v4096_v57 = vor.u32 %v5985_v50, %v4095_v49  ;;  %1280 = vmatpush.bf16.msra.mxu1 %v4384_v54  ;;  %1320 = vmatpush.bf16.msrb.mxu3 %v4100_v0  ;;  %v4449_v49 = vld [vmem:[%s9521_s1 + $0x3a0] sm:$0xf0]  ;;  %v4487_v50 = vld [vmem:[%s9521_s1 + $0x3c8] sm:$0xf] }
  0x1e   :  { %v6113_v53 = vld [vmem:[%s9521_s1 + $0x4dc] sm:$0xf0]  ;;  %v6141_v54 = vld [vmem:[%s9521_s1 + $0x5c4] sm:$0xf] }
  0x1f   :  { %v4351_v58 = vld [vmem:[%s9521_s1 + $0x2c0] sm:$0xf]  ;;  %v4608_v60 = vor.u32 %v6113_v53, %v4607_v52  ;;  %1268 = vmatpush.bf16.msra.mxu0 %v4096_v57  ;;  %v4232_v52 = vor.u32 %v6018_v39, %v4231_v35  ;;  %v6740_v57 = vpack.c.b16 %v251_v40, %v251_v40  ;;  %v4740_v0 = vor.u32 %v6141_v54, %v4737_v55  ;;  %v6037_v37 = vld [vmem:[%s9521_s1 + $0x284] sm:$0xf]  ;;  %v4359_v40 = vld [vmem:[%s9521_s1 + $0x2c8] sm:$0xf] }
  0x20   :  { %v6049_v59 = vld [vmem:[%s9521_s1 + $0x2dc] sm:$0xf0]  ;;  %v4321_v39 = vld [vmem:[%s9521_s1 + $0x2a0] sm:$0xf0] }
  0x21   :  { %v4063_v61 = vld [vmem:[%s9521_s1 + $0x80] sm:$0xf]  ;;  %v4352_v4 = vor.u32 %v6049_v59, %v4351_v58  ;;  %1294 = vmatpush.bf16.msra.mxu2 %v4608_v60  ;;  %1321 = vmatpush.bf16.msrb.mxu3 %v4068_v14  ;;  %v4199_v59 = vld [vmem:[%s9521_s1 + $0x188] sm:$0xf]  ;;  %v6101_v55 = vld [vmem:[%s9521_s1 + $0x484] sm:$0xf] }
  0x22   :  { %v5977_v62 = vld [vmem:[%s9521_s1 + $0x9c] sm:$0xf0]  ;;  %v6010_v60 = vld [vmem:[%s9521_s1 + $0x1a4] sm:$0xf0] }
  0x23   :  { %v4575_v1 = vld [vmem:[%s9521_s1 + $0x480] sm:$0xf]  ;;  %v4064_v7 = vor.u32 %v5977_v62, %v4063_v61  ;;  %1281 = vmatpush.bf16.msra.mxu1 %v4352_v4  ;;  %v4452_v61 = vor.u32 %v6069_v46, %v4449_v49  ;;  %v4488_v62 = vor.u32 %v6082_v51, %v4487_v50  ;;  %v4200_v4 = vor.u32 %v6010_v60, %v4199_v59  ;;  %v5978_v46 = vld [vmem:[%s9521_s1 + $0xa4] sm:$0xf0]  ;;  %v6029_v49 = vld [vmem:[%s9521_s1 + $0x244] sm:$0xf] }
  0x24   :  { %v6105_v2 = vld [vmem:[%s9521_s1 + $0x49c] sm:$0xf0]  ;;  %v4289_v51 = vld [vmem:[%s9521_s1 + $0x260] sm:$0xf0]  ;;  %v4039_v59 = vld [vmem:[%s9521_s1 + $0x48] sm:$0xf] }
  0x25   :  { %v4319_v9 = vld [vmem:[%s9521_s1 + $0x280] sm:$0xf]  ;;  %v4576_v11 = vor.u32 %v6105_v2, %v4575_v1  ;;  %1269 = vmatpush.bf16.msra.mxu0 %v4064_v7  ;;  %1322 = vmatpush.bf16.msrb.mxu3 %v4036_v30  ;;  %v4417_v1 = vld [vmem:[%s9521_s1 + $0x360] sm:$0xf0]  ;;  %v4455_v2 = vld [vmem:[%s9521_s1 + $0x388] sm:$0xf] }
  0x26   :  { %v6041_v10 = vld [vmem:[%s9521_s1 + $0x29c] sm:$0xf0]  ;;  %v4705_v7 = vld [vmem:[%s9521_s1 + $0x5a0] sm:$0xf0]  ;;  %v5970_v60 = vld [vmem:[%s9521_s1 + $0x64] sm:$0xf0] }
  0x27   :  { %v4031_v12 = vld [vmem:[%s9521_s1 + $0x40] sm:$0xf]  ;;  %v4320_v18 = vor.u32 %v6041_v10, %v4319_v9  ;;  %1295 = vmatpush.bf16.msra.mxu2 %v4576_v11  ;;  %v4167_v9 = vld [vmem:[%s9521_s1 + $0x148] sm:$0xf]  ;;  %v4420_v11 = vor.u32 %v6061_v63, %v4417_v1  ;;  %v4708_v14 = vor.u32 %v6133_v6, %v4705_v7  ;;  %v6021_v63 = vld [vmem:[%s9521_s1 + $0x204] sm:$0xf]  ;;  %v4040_v6 = vor.u32 %v5970_v60, %v4039_v59 }
  0x28   :  { %v5969_v13 = vld [vmem:[%s9521_s1 + $0x5c] sm:$0xf0]  ;;  %v6002_v10 = vld [vmem:[%s9521_s1 + $0x164] sm:$0xf0]  ;;  %v4545_v7 = vld [vmem:[%s9521_s1 + $0x460] sm:$0xf0] }
  0x29   :  { %v4543_v15 = vld [vmem:[%s9521_s1 + $0x440] sm:$0xf]  ;;  %v4032_v22 = vor.u32 %v5969_v13, %v4031_v12  ;;  %1282 = vmatpush.bf16.msra.mxu1 %v4320_v18  ;;  %1323 = vmatpush.bf16.msrb.mxu3 %v4004_v47  ;;  %v4456_v12 = vor.u32 %v6074_v3, %v4455_v2  ;;  %v6053_v13 = vld [vmem:[%s9521_s1 + $0x304] sm:$0xf]  ;;  %v4168_v18 = vor.u32 %v6002_v10, %v4167_v9  ;;  %v4295_v2 = vld [vmem:[%s9521_s1 + $0x248] sm:$0xf] }
  0x2a   :  { %v6097_v16 = vld [vmem:[%s9521_s1 + $0x45c] sm:$0xf0]  ;;  %v4324_v47 = vor.u32 %v6037_v37, %v4321_v39  ;;  %v6034_v3 = vld [vmem:[%s9521_s1 + $0x264] sm:$0xf0]  ;;  %v5990_v59 = vld [vmem:[%s9521_s1 + $0x10c] sm:$0xf] }
  0x2b   :  { %v3999_v20 = vld [vmem:[%s9521_s1] sm:$0xf]  ;;  %v4544_v26 = vor.u32 %v6097_v16, %v4543_v15  ;;  %1270 = vmatpush.bf16.msra.mxu0 %v4032_v22  ;;  %v4385_v15 = vld [vmem:[%s9521_s1 + $0x320] sm:$0xf0]  ;;  %v4423_v16 = vld [vmem:[%s9521_s1 + $0x348] sm:$0xf] }
  0x2c   :  { %v5961_v21 = vld [vmem:[%s9521_s1 + $0x1c] sm:$0xf0]  ;;  %v5994_v22 = vld [vmem:[%s9521_s1 + $0x124] sm:$0xf0]  ;;  %v4137_v60 = vld [vmem:[%s9521_s1 + $0x128] sm:$0xf0] }
  0x2d   :  { %v4287_v23 = vld [vmem:[%s9521_s1 + $0x240] sm:$0xf]  ;;  %v4000_v38 = vor.u32 %v5961_v21, %v3999_v20  ;;  %1296 = vmatpush.bf16.msra.mxu2 %v4544_v26  ;;  %1368 = vmatpush.bf16.msra.mxu3 %v4232_v52  ;;  %v4673_v20 = vld [vmem:[%s9521_s1 + $0x560] sm:$0xf0]  ;;  %v4135_v21 = vld [vmem:[%s9521_s1 + $0x108] sm:$0xf] }
  0x2e   :  { %v6033_v24 = vld [vmem:[%s9521_s1 + $0x25c] sm:$0xf0]  ;;  %v4676_v26 = vor.u32 %v6125_v19, %v4673_v20  ;;  %v4136_v30 = vor.u32 %v5994_v22, %v4135_v21  ;;  %v4327_v52 = vld [vmem:[%s9521_s1 + $0x288] sm:$0xf]  ;;  %v6085_v21 = vld [vmem:[%s9521_s1 + $0x404] sm:$0xf] }
  0x2f   :  { %v4511_v25 = vld [vmem:[%s9521_s1 + $0x400] sm:$0xf]  ;;  %v4288_v34 = vor.u32 %v6033_v24, %v4287_v23  ;;  %1271 = vmatpush.bf16.msra.mxu0 %v4000_v38  ;;  %v4388_v23 = vor.u32 %v6053_v13, %v4385_v15  ;;  %v4424_v24 = vor.u32 %v6066_v17, %v4423_v16  ;;  %v4644_v38 = vor.u32 %v6117_v31, %v4641_v32  ;;  %v4743_v9 = vld [vmem:[%s9521_s1 + $0x5c8] sm:$0xf]  ;;  %v6014_v15 = vld [vmem:[%s9521_s1 + $0x1cc] sm:$0xf] }
  0x30   :  { %v6089_v27 = vld [vmem:[%s9521_s1 + $0x41c] sm:$0xf0]  ;;  %v6146_v10 = vld [vmem:[%s9521_s1 + $0x5e4] sm:$0xf0]  ;;  %v4233_v16 = vld [vmem:[%s9521_s1 + $0x1e8] sm:$0xf0] }
  0x31   :  { %v27_v29 = vld [vmem:[%s9522_s0] sm:$0xff]  ;;  %v4512_v44 = vor.u32 %v6089_v27, %v4511_v25  ;;  %1283 = vmatpush.bf16.msra.mxu1 %v4288_v34  ;;  %1369 = vmatpush.bf16.msra.mxu3 %v4200_v4  ;;  %v5986_v34 = vld [vmem:[%s9521_s1 + $0xe4] sm:$0xf0]  ;;  %v4744_v19 = vor.u32 %v6146_v10, %v4743_v9  ;;  %v6006_v32 = vld [vmem:[%s9521_s1 + $0x18c] sm:$0xf] }
  0x32   :  { %v4255_v41 = vld [vmem:[%s9521_s1 + $0x200] sm:$0xf]  ;;  %v249_v43 = vunpack.c.l.b16 %v27_v29  ;;  %v250_v56 = vunpack.c.h.b16 %v27_v29  ;;  %v6045_v25 = vld [vmem:[%s9521_s1 + $0x2c4] sm:$0xf]  ;;  %v6058_v29 = vld [vmem:[%s9521_s1 + $0x324] sm:$0xf0] }
  0x33   :  { %v6025_v42 = vld [vmem:[%s9521_s1 + $0x21c] sm:$0xf0]  ;;  %1297 = vmatpush.bf16.msra.mxu2 %v4512_v44  ;;  %1329 = vmatpush.bf16.msrb.mxu0 %v4484_v45  ;;  %v4353_v27 = vld [vmem:[%s9521_s1 + $0x2e0] sm:$0xf0]  ;;  %v4392_v36 = vor.u32 %v6058_v29, %v4391_v28  ;;  %v4071_v45 = vld [vmem:[%s9521_s1 + $0x88] sm:$0xf] }
  0x34   :  { %v4256_v53 = vor.u32 %v6025_v42, %v4255_v41  ;;  %v6742_v58 = vpack.c.b16 %v249_v43, %v249_v43  ;;  %v6762_v5 = vpack.c.b16 %v250_v56, %v250_v56  ;;  %v4356_v35 = vor.u32 %v6045_v25, %v4353_v27  ;;  %v6050_v41 = vld [vmem:[%s9521_s1 + $0x2e4] sm:$0xf0]  ;;  %v6109_v43 = vld [vmem:[%s9521_s1 + $0x4c4] sm:$0xf]  ;;  %v4745_v28 = vld [vmem:[%s9521_s1 + $0x5e8] sm:$0xf0] }
  0x35   :  { %1370 = vmatpush.bf16.msra.mxu3 %v4168_v18  ;;  %v4104_v42 = vor.u32 %v5986_v34, %v4103_v33  ;;  %v4609_v44 = vld [vmem:[%s9521_s1 + $0x4e0] sm:$0xf0]  ;;  %v4072_v54 = vor.u32 %v5978_v46, %v4071_v45  ;;  %v4263_v17 = vld [vmem:[%s9521_s1 + $0x208] sm:$0xf]  ;;  %v4236_v27 = vor.u32 %v6014_v15, %v4233_v16  ;;  %v4201_v33 = vld [vmem:[%s9521_s1 + $0x1a8] sm:$0xf0] }
  0x36   :  { %1284 = vmatpush.bf16.msra.mxu1 %v4256_v53  ;;  %1298 = vmatmul.bf16.vlgmr.msra.gmra.mxu2 %v6740_v57  ;;  %v4612_v50 = vor.u32 %v6109_v43, %v4609_v44  ;;  %v6042_v53 = vld [vmem:[%s9521_s1 + $0x2a4] sm:$0xf0]  ;;  %v4577_v56 = vld [vmem:[%s9521_s1 + $0x4a0] sm:$0xf0]  ;;  %v6134_v43 = vld [vmem:[%s9521_s1 + $0x58c] sm:$0xf] }
  0x37   :  { %1362 = vmatpush.bf16.msrb.mxu2 %v4772_v48  ;;  %1272 = vmatmul.bf16.vlgmr.msra.gmra.mxu0 %v6742_v58  ;;  %v4360_v48 = vor.u32 %v6050_v41, %v4359_v40  ;;  %v4580_v1 = vor.u32 %v6101_v55, %v4577_v56  ;;  %v6093_v4 = vld [vmem:[%s9521_s1 + $0x444] sm:$0xf]  ;;  %v6026_v20 = vld [vmem:[%s9521_s1 + $0x224] sm:$0xf0]  ;;  %v6078_v40 = vld [vmem:[%s9521_s1 + $0x3cc] sm:$0xf] }
  0x38   :  { %1330 = vmatpush.bf16.msrb.mxu0 %v4452_v61  ;;  %1324 = vmatmul.bf16.vlgmr.msrb.gmra.mxu3 %v6742_v58  ;;  %v4292_v61 = vor.u32 %v6029_v49, %v4289_v51  ;;  %v4548_v18 = vor.u32 %v6093_v4, %v4545_v7  ;;  %v4513_v22 = vld [vmem:[%s9521_s1 + $0x420] sm:$0xf0]  ;;  %v6138_v25 = vld [vmem:[%s9521_s1 + $0x5a4] sm:$0xf0]  ;;  %v4264_v31 = vor.u32 %v6026_v20, %v4263_v17  ;;  %v4489_v41 = vld [vmem:[%s9521_s1 + $0x3e8] sm:$0xf0] }
  0x39   :  { %1285 = vmatmul.bf16.vlgmr.msra.gmra.mxu1 %v6762_v5  ;;  %1371 = vmatpush.bf16.msra.mxu3 %v4136_v30  ;;  %v4775_v29 = vld [vmem:[%s9521_s1 + $0x608] sm:$0xf]  ;;  %v4516_v34 = vor.u32 %v6085_v21, %v4513_v22  ;;  %v4713_v44 = vld [vmem:[%s9521_s1 + $0x5a8] sm:$0xf0]  ;;  %v4140_v4 = vor.u32 %v5990_v59, %v4137_v60  ;;  %v4495_v59 = vld [vmem:[%s9521_s1 + $0x3d0] sm:$0xf] }
  0x3a   :  { %1342 = vmatpush.bf16.msrb.mxu1 %v4740_v0  ;;  %v4257_v0 = vld [vmem:[%s9521_s1 + $0x220] sm:$0xf0]  ;;  %v6154_v30 = vld [vmem:[%s9521_s1 + $0x624] sm:$0xf0]  ;;  %v5998_v45 = vld [vmem:[%s9521_s1 + $0x14c] sm:$0xf] }
  0x3b   :  { %1381 = vmatpush.bf16.msra.mxu2 %v4488_v62  ;;  %v4328_v62 = vor.u32 %v6042_v53, %v4327_v52  ;;  %v4260_v13 = vor.u32 %v6021_v63, %v4257_v0  ;;  %v6130_v39 = vld [vmem:[%s9521_s1 + $0x564] sm:$0xf0]  ;;  %v4169_v46 = vld [vmem:[%s9521_s1 + $0x168] sm:$0xf0]  ;;  %v6083_v60 = vld [vmem:[%s9521_s1 + $0x3ec] sm:$0xf0] }
  0x3c   :  { %1331 = vmatpush.bf16.msrb.mxu0 %v4420_v11  ;;  %v4007_v11 = vld [vmem:[%s9521_s1 + $0x8] sm:$0xf]  ;;  %v6070_v52 = vld [vmem:[%s9521_s1 + $0x38c] sm:$0xf] }
  0x3d   :  { %1372 = vmatpush.bf16.msra.mxu3 %v4104_v42  ;;  %v4204_v42 = vor.u32 %v6006_v32, %v4201_v33  ;;  %v4647_v49 = vld [vmem:[%s9521_s1 + $0x508] sm:$0xf]  ;;  %v4457_v53 = vld [vmem:[%s9521_s1 + $0x3a8] sm:$0xf0] }
  0x3e   :  { %1343 = vmatpush.bf16.msrb.mxu1 %v4708_v14  ;;  %v4296_v14 = vor.u32 %v6034_v3, %v4295_v2  ;;  %v6122_v51 = vld [vmem:[%s9521_s1 + $0x524] sm:$0xf0]  ;;  %v6126_v55 = vld [vmem:[%s9521_s1 + $0x54c] sm:$0xf] }
  0x3f   :  { %1382 = vmatpush.bf16.msra.mxu2 %v4456_v12  ;;  %v5962_v12 = vld [vmem:[%s9521_s1 + $0x24] sm:$0xf0]  ;;  %v4681_v56 = vld [vmem:[%s9521_s1 + $0x568] sm:$0xf0] }
  0x40   :  { %1332 = vmatpush.bf16.msrb.mxu0 %v4388_v23  ;;  %v4008_v23 = vor.u32 %v5962_v12, %v4007_v11  ;;  %v4615_v63 = vld [vmem:[%s9521_s1 + $0x4c8] sm:$0xf]  ;;  %v4684_v0 = vor.u32 %v6126_v55, %v4681_v56  ;;  %v6062_v2 = vld [vmem:[%s9521_s1 + $0x34c] sm:$0xf] }
  0x41   :  { %1373 = vmatpush.bf16.msra.mxu3 %v4072_v54  ;;  %v4172_v54 = vor.u32 %v5998_v45, %v4169_v46  ;;  %v4425_v3 = vld [vmem:[%s9521_s1 + $0x368] sm:$0xf0]  ;;  %v6106_v15 = vld [vmem:[%s9521_s1 + $0x4a4] sm:$0xf0] }
  0x42   :  { %1344 = vmatpush.bf16.msrb.mxu1 %v4676_v26  ;;  %v6142_v26 = vld [vmem:[%s9521_s1 + $0x5cc] sm:$0xf]  ;;  %v4428_v12 = vor.u32 %v6062_v2, %v4425_v3  ;;  %v6155_v2 = vld [vmem:[%s9521_s1 + $0x62c] sm:$0xf0] }
  0x43   :  { %1383 = vmatpush.bf16.msra.mxu2 %v4424_v24  ;;  %v4711_v24 = vld [vmem:[%s9521_s1 + $0x588] sm:$0xf]  ;;  %v4748_v37 = vor.u32 %v6142_v26, %v4745_v28  ;;  %v4649_v7 = vld [vmem:[%s9521_s1 + $0x528] sm:$0xf0] }
  0x44   :  { %1333 = vmatpush.bf16.msrb.mxu0 %v4356_v35  ;;  %v4712_v35 = vor.u32 %v6138_v25, %v4711_v24  ;;  %v5982_v9 = vld [vmem:[%s9521_s1 + $0xcc] sm:$0xf]  ;;  %v4551_v25 = vld [vmem:[%s9521_s1 + $0x448] sm:$0xf] }
  0x45   :  { %1374 = vmatpush.bf16.msra.mxu3 %v4040_v6  ;;  %v6118_v6 = vld [vmem:[%s9521_s1 + $0x50c] sm:$0xf] }
  0x46   :  { %1345 = vmatpush.bf16.msrb.mxu1 %v4644_v38  ;;  %4798 = vmatmul.msk.bf16.vlgmr.msrb.gmra.mxu2 %vm1260_vm0, %v6642_v8  ;;  %v4776_v38 = vor.u32 %v6154_v30, %v4775_v29  ;;  %v4105_v10 = vld [vmem:[%s9521_s1 + $0xe8] sm:$0xf0] }
  0x47   :  { %1384 = vmatpush.bf16.msra.mxu2 %v4392_v36  ;;  %v4679_v36 = vld [vmem:[%s9521_s1 + $0x548] sm:$0xf]  ;;  %v6054_v16 = vld [vmem:[%s9521_s1 + $0x30c] sm:$0xf] }
  0x48   :  { %1334 = vmatpush.bf16.msrb.mxu0 %v4324_v47  ;;  %v4680_v47 = vor.u32 %v6130_v39, %v4679_v36  ;;  %v4393_v17 = vld [vmem:[%s9521_s1 + $0x328] sm:$0xf0] }
  0x49   :  { %1375 = vmatpush.bf16.msra.mxu3 %v4008_v23  ;;  %v4617_v20 = vld [vmem:[%s9521_s1 + $0x4e8] sm:$0xf0]  ;;  %v4396_v24 = vor.u32 %v6054_v16, %v4393_v17  ;;  %v4241_v16 = vld [vmem:[%s9521_s1 + $0x1f0] sm:$0xf0] }
  0x4a   :  { %1346 = vmatpush.bf16.msrb.mxu1 %v4612_v50  ;;  %v4716_v50 = vor.u32 %v6134_v43, %v4713_v44  ;;  %v5974_v21 = vld [vmem:[%s9521_s1 + $0x8c] sm:$0xf] }
  0x4b   :  { %1385 = vmatpush.bf16.msra.mxu2 %v4360_v48  ;;  %v4492_v48 = vor.u32 %v6078_v40, %v4489_v41  ;;  %v4073_v22 = vld [vmem:[%s9521_s1 + $0xa8] sm:$0xf0] }
  0x4c   :  { %1335 = vmatpush.bf16.msrb.mxu0 %v4292_v61  ;;  %1376 = vmatmul.bf16.vlgmr.msra.gmra.mxu3 %v6742_v58  ;;  %v4648_v61 = vor.u32 %v6122_v51, %v4647_v49  ;;  %v6046_v28 = vld [vmem:[%s9521_s1 + $0x2cc] sm:$0xf]  ;;  %v4076_v30 = vor.u32 %v5974_v21, %v4073_v22  ;;  %v4239_v51 = vld [vmem:[%s9521_s1 + $0x1d0] sm:$0xf] }
  0x4d   :  { %1420 = vmatpush.bf16.msrb.mxu3 %v4236_v27  ;;  %v6098_v27 = vld [vmem:[%s9521_s1 + $0x464] sm:$0xf0]  ;;  %v4361_v29 = vld [vmem:[%s9521_s1 + $0x2e8] sm:$0xf0]  ;;  %v4175_v21 = vld [vmem:[%s9521_s1 + $0x150] sm:$0xf] }
  0x4e   :  { %1347 = vmatpush.bf16.msrb.mxu1 %v4580_v1  ;;  %v6114_v1 = vld [vmem:[%s9521_s1 + $0x4e4] sm:$0xf0]  ;;  %v4585_v32 = vld [vmem:[%s9521_s1 + $0x4a8] sm:$0xf0]  ;;  %v4364_v36 = vor.u32 %v6046_v28, %v4361_v29  ;;  %v6003_v22 = vld [vmem:[%s9521_s1 + $0x16c] sm:$0xf0] }
  0x4f   :  { %1386 = vmatpush.bf16.msra.mxu2 %v4328_v62  ;;  %v4460_v62 = vor.u32 %v6070_v52, %v4457_v53  ;;  %v4616_v11 = vor.u32 %v6114_v1, %v4615_v63  ;;  %v5966_v33 = vld [vmem:[%s9521_s1 + $0x4c] sm:$0xf]  ;;  %v6019_v52 = vld [vmem:[%s9521_s1 + $0x1ec] sm:$0xf0]  ;;  %v6007_v28 = vld [vmem:[%s9521_s1 + $0x194] sm:$0xf] }
  0x50   :  { %1336 = vmatpush.bf16.msrb.mxu0 %v4260_v13  ;;  %v4583_v13 = vld [vmem:[%s9521_s1 + $0x488] sm:$0xf]  ;;  %v6038_v40 = vld [vmem:[%s9521_s1 + $0x28c] sm:$0xf]  ;;  %v4783_v1 = vld [vmem:[%s9521_s1 + $0x610] sm:$0xf] }
  0x51   :  { %1421 = vmatpush.bf16.msrb.mxu3 %v4204_v42  ;;  %v4584_v23 = vor.u32 %v6106_v15, %v4583_v13  ;;  %v4329_v41 = vld [vmem:[%s9521_s1 + $0x2a8] sm:$0xf0]  ;;  %v4784_v13 = vor.u32 %v6155_v2, %v4783_v1  ;;  %v6015_v15 = vld [vmem:[%s9521_s1 + $0x1d4] sm:$0xf]  ;;  %v6043_v1 = vld [vmem:[%s9521_s1 + $0x2ac] sm:$0xf0] }
  0x52   :  { %1348 = vmatpush.bf16.msrb.mxu1 %v4548_v18  ;;  %v4108_v18 = vor.u32 %v5982_v9, %v4105_v10  ;;  %v6094_v42 = vld [vmem:[%s9521_s1 + $0x44c] sm:$0xf]  ;;  %v4209_v29 = vld [vmem:[%s9521_s1 + $0x1b0] sm:$0xf0] }
  0x53   :  { %1387 = vmatpush.bf16.msra.mxu2 %v4296_v14  ;;  %1337 = vmatmul.bf16.vlgmr.msrb.gmra.mxu0 %v6762_v5  ;;  %v4652_v14 = vor.u32 %v6118_v6, %v4649_v7  ;;  %v4553_v44 = vld [vmem:[%s9521_s1 + $0x468] sm:$0xf0]  ;;  %v4207_v6 = vld [vmem:[%s9521_s1 + $0x190] sm:$0xf]  ;;  %v5983_v2 = vld [vmem:[%s9521_s1 + $0xd4] sm:$0xf] }
  0x54   :  { %1394 = vmatpush.bf16.msra.mxu0 %v4744_v19  ;;  %v6110_v19 = vld [vmem:[%s9521_s1 + $0x4cc] sm:$0xf]  ;;  %v6011_v7 = vld [vmem:[%s9521_s1 + $0x1ac] sm:$0xf0] }
  0x55   :  { %1422 = vmatpush.bf16.msrb.mxu3 %v4172_v54  ;;  %v4620_v26 = vor.u32 %v6110_v19, %v4617_v20  ;;  %v6150_v45 = vld [vmem:[%s9521_s1 + $0x60c] sm:$0xf]  ;;  %v4556_v54 = vor.u32 %v6094_v42, %v4553_v44  ;;  %v4208_v17 = vor.u32 %v6011_v7, %v4207_v6  ;;  %v6147_v19 = vld [vmem:[%s9521_s1 + $0x5ec] sm:$0xf0] }
  0x56   :  { %1349 = vmatpush.bf16.msrb.mxu1 %v4516_v34  ;;  %v4041_v34 = vld [vmem:[%s9521_s1 + $0x68] sm:$0xf0]  ;;  %v6131_v44 = vld [vmem:[%s9521_s1 + $0x56c] sm:$0xf0] }
  0x57   :  { %1388 = vmatpush.bf16.msra.mxu2 %v4264_v31  ;;  %v6102_v31 = vld [vmem:[%s9521_s1 + $0x48c] sm:$0xf]  ;;  %v4044_v43 = vor.u32 %v5966_v33, %v4041_v34  ;;  %v4143_v33 = vld [vmem:[%s9521_s1 + $0x110] sm:$0xf] }
  0x58   :  { %1395 = vmatpush.bf16.msra.mxu0 %v4712_v35  ;;  %v4552_v35 = vor.u32 %v6098_v27, %v4551_v25  ;;  %v4588_v39 = vor.u32 %v6102_v31, %v4585_v32  ;;  %v4777_v46 = vld [vmem:[%s9521_s1 + $0x628] sm:$0xf0]  ;;  %v4431_v25 = vld [vmem:[%s9521_s1 + $0x350] sm:$0xf] }
  0x59   :  { %1350 = vmatmul.bf16.vlgmr.msrb.gmra.mxu1 %v6740_v57  ;;  %1423 = vmatpush.bf16.msrb.mxu3 %v4140_v4  ;;  %v6030_v53 = vld [vmem:[%s9521_s1 + $0x24c] sm:$0xf]  ;;  %v4780_v55 = vor.u32 %v6150_v45, %v4777_v46  ;;  %v4496_v4 = vor.u32 %v6083_v60, %v4495_v59  ;;  %v6067_v27 = vld [vmem:[%s9521_s1 + $0x36c] sm:$0xf0] }
  0x5a   :  { %1414 = vmatpush.bf16.msra.mxu1 %v4776_v38  ;;  %1389 = vmatmul.bf16.vlgmr.msra.gmra.mxu2 %v6762_v5  ;;  %v6090_v38 = vld [vmem:[%s9521_s1 + $0x424] sm:$0xf0]  ;;  %v4297_v56 = vld [vmem:[%s9521_s1 + $0x268] sm:$0xf0]  ;;  %v4719_v31 = vld [vmem:[%s9521_s1 + $0x590] sm:$0xf] }
  0x5b   :  { %1446 = vmatpush.bf16.msrb.mxu2 %v4748_v37  ;;  %v4519_v37 = vld [vmem:[%s9521_s1 + $0x408] sm:$0xf]  ;;  %v4521_v63 = vld [vmem:[%s9521_s1 + $0x428] sm:$0xf0]  ;;  %v4300_v3 = vor.u32 %v6030_v53, %v4297_v56  ;;  %v6139_v32 = vld [vmem:[%s9521_s1 + $0x5ac] sm:$0xf0] }
  0x5c   :  { %1396 = vmatpush.bf16.msra.mxu0 %v4680_v47  ;;  %v5958_v47 = vld [vmem:[%s9521_s1 + $0xc] sm:$0xf]  ;;  %v4520_v49 = vor.u32 %v6090_v38, %v4519_v37  ;;  %v5995_v34 = vld [vmem:[%s9521_s1 + $0x12c] sm:$0xf0]  ;;  %v4720_v38 = vor.u32 %v6139_v32, %v4719_v31  ;;  %v4145_v53 = vld [vmem:[%s9521_s1 + $0x130] sm:$0xf0] }
  0x5d   :  { %1424 = vmatpush.bf16.msrb.mxu3 %v4108_v18  ;;  %v6022_v10 = vld [vmem:[%s9521_s1 + $0x20c] sm:$0xf]  ;;  %v4751_v18 = vld [vmem:[%s9521_s1 + $0x5d0] sm:$0xf]  ;;  %v4144_v42 = vor.u32 %v5995_v34, %v4143_v33  ;;  %v4049_v31 = vld [vmem:[%s9521_s1 + $0x70] sm:$0xf0] }
  0x5e   :  { %1433 = vmatpush.bf16.msrb.mxu1 %v4492_v48  ;;  %v4009_v48 = vld [vmem:[%s9521_s1 + $0x28] sm:$0xf0]  ;;  %v4399_v37 = vld [vmem:[%s9521_s1 + $0x310] sm:$0xf] }
  0x5f   :  { %1447 = vmatpush.bf16.msrb.mxu2 %v4716_v50  ;;  %v4332_v50 = vor.u32 %v6038_v40, %v4329_v41  ;;  %v5999_v40 = vld [vmem:[%s9521_s1 + $0x154] sm:$0xf]  ;;  %v4111_v45 = vld [vmem:[%s9521_s1 + $0xd0] sm:$0xf] }
  0x60   :  { %1397 = vmatpush.bf16.msra.mxu0 %v4648_v61  ;;  %v4012_v61 = vor.u32 %v5958_v47, %v4009_v48  ;;  %v4177_v41 = vld [vmem:[%s9521_s1 + $0x170] sm:$0xf0]  ;;  %v5987_v46 = vld [vmem:[%s9521_s1 + $0xec] sm:$0xf0] }
  0x61   :  { %1425 = vmatpush.bf16.msrb.mxu3 %v4076_v30  ;;  %v4176_v30 = vor.u32 %v6003_v22, %v4175_v21  ;;  %v4180_v48 = vor.u32 %v5999_v40, %v4177_v41  ;;  %v6123_v56 = vld [vmem:[%s9521_s1 + $0x52c] sm:$0xf0]  ;;  %v6071_v40 = vld [vmem:[%s9521_s1 + $0x394] sm:$0xf] }
  0x62   :  { %1434 = vmatpush.bf16.msrb.mxu1 %v4460_v62  ;;  %v6086_v62 = vld [vmem:[%s9521_s1 + $0x40c] sm:$0xf]  ;;  %v4079_v59 = vld [vmem:[%s9521_s1 + $0x90] sm:$0xf]  ;;  %v4465_v41 = vld [vmem:[%s9521_s1 + $0x3b0] sm:$0xf0] }
  0x63   :  { %1448 = vmatpush.bf16.msrb.mxu2 %v4684_v0  ;;  %v4240_v0 = vor.u32 %v6019_v52, %v4239_v51  ;;  %v4524_v9 = vor.u32 %v6086_v62, %v4521_v63  ;;  %v6051_v51 = vld [vmem:[%s9521_s1 + $0x2ec] sm:$0xf0]  ;;  %v5991_v52 = vld [vmem:[%s9521_s1 + $0x114] sm:$0xf] }
  0x64   :  { %1398 = vmatpush.bf16.msra.mxu0 %v4616_v11  ;;  %v4265_v11 = vld [vmem:[%s9521_s1 + $0x228] sm:$0xf0]  ;;  %v5979_v60 = vld [vmem:[%s9521_s1 + $0xac] sm:$0xf0]  ;;  %v4148_v62 = vor.u32 %v5991_v52, %v4145_v53  ;;  %v4721_v52 = vld [vmem:[%s9521_s1 + $0x5b0] sm:$0xf0] }
  0x65   :  { %1426 = vmatpush.bf16.msrb.mxu3 %v4044_v43  ;;  %v4268_v20 = vor.u32 %v6022_v10, %v4265_v11  ;;  %v4687_v43 = vld [vmem:[%s9521_s1 + $0x550] sm:$0xf]  ;;  %v6151_v53 = vld [vmem:[%s9521_s1 + $0x614] sm:$0xf] }
  0x66   :  { %1435 = vmatpush.bf16.msrb.mxu1 %v4428_v12  ;;  %v4463_v12 = vld [vmem:[%s9521_s1 + $0x390] sm:$0xf] }
  0x67   :  { %1449 = vmatpush.bf16.msrb.mxu2 %v4652_v14  ;;  %v6075_v14 = vld [vmem:[%s9521_s1 + $0x3ac] sm:$0xf0] }
  0x68   :  { %1399 = vmatpush.bf16.msra.mxu0 %v4584_v23  ;;  %v4464_v23 = vor.u32 %v6075_v14, %v4463_v12  ;;  %v4335_v63 = vld [vmem:[%s9521_s1 + $0x290] sm:$0xf] }
  0x69   :  { %4799 = vmatmul.msk.bf16.vlgmr.msra.gmra.mxu1 %vm1260_vm0, %v6642_v8  ;;  %1427 = vmatpush.bf16.msrb.mxu3 %v4012_v61  ;;  %v4623_v6 = vld [vmem:[%s9521_s1 + $0x4d0] sm:$0xf]  ;;  %v4336_v11 = vor.u32 %v6043_v1, %v4335_v63  ;;  %v6020_v1 = vld [vmem:[%s9521_s1 + $0x1f4] sm:$0xf0] }
  0x6a   :  { %1436 = vmatpush.bf16.msrb.mxu1 %v4396_v24  ;;  %v4244_v24 = vor.u32 %v6015_v15, %v4241_v16  ;;  %v6115_v7 = vld [vmem:[%s9521_s1 + $0x4ec] sm:$0xf0]  ;;  %v5975_v16 = vld [vmem:[%s9521_s1 + $0x94] sm:$0xf] }
  0x6b   :  { %1450 = vmatpush.bf16.msrb.mxu2 %v4620_v26  ;;  %v4752_v26 = vor.u32 %v6147_v19, %v4751_v18  ;;  %v5971_v10 = vld [vmem:[%s9521_s1 + $0x6c] sm:$0xf0]  ;;  %v4624_v14 = vor.u32 %v6115_v7, %v4623_v6  ;;  %v6127_v6 = vld [vmem:[%s9521_s1 + $0x554] sm:$0xf] }
  0x6c   :  { %1400 = vmatpush.bf16.msra.mxu0 %v4552_v35  ;;  %1428 = vmatmul.bf16.vlgmr.msrb.gmra.mxu3 %v6742_v58  ;;  %v4432_v35 = vor.u32 %v6067_v27, %v4431_v25  ;;  %v6035_v15 = vld [vmem:[%s9521_s1 + $0x26c] sm:$0xf0]  ;;  %v6079_v25 = vld [vmem:[%s9521_s1 + $0x3d4] sm:$0xf] }
  0x6d   :  { %1472 = vmatpush.bf16.msra.mxu3 %v4240_v0  ;;  %v4591_v19 = vld [vmem:[%s9521_s1 + $0x490] sm:$0xf]  ;;  %v4689_v7 = vld [vmem:[%s9521_s1 + $0x570] sm:$0xf0] }
  0x6e   :  { %1437 = vmatpush.bf16.msrb.mxu1 %v4364_v36  ;;  %v4212_v36 = vor.u32 %v6007_v28, %v4209_v29  ;;  %v4015_v21 = vld [vmem:[%s9521_s1 + $0x10] sm:$0xf] }
  0x6f   :  { %1451 = vmatpush.bf16.msrb.mxu2 %v4588_v39  ;;  %v6059_v39 = vld [vmem:[%s9521_s1 + $0x32c] sm:$0xf0] }
  0x70   :  { %1401 = vmatpush.bf16.msra.mxu0 %v4520_v49  ;;  %v4400_v47 = vor.u32 %v6059_v39, %v4399_v37  ;;  %v4367_v49 = vld [vmem:[%s9521_s1 + $0x2d0] sm:$0xf]  ;;  %v4753_v37 = vld [vmem:[%s9521_s1 + $0x5f0] sm:$0xf0] }
  0x71   :  { %1473 = vmatpush.bf16.msra.mxu3 %v4208_v17  ;;  %v4368_v61 = vor.u32 %v6051_v51, %v4367_v49  ;;  %v4081_v17 = vld [vmem:[%s9521_s1 + $0xb0] sm:$0xf0]  ;;  %v5963_v22 = vld [vmem:[%s9521_s1 + $0x2c] sm:$0xf0]  ;;  %v4503_v49 = vld [vmem:[%s9521_s1 + $0x3d8] sm:$0xf]  ;;  %v4468_v51 = vor.u32 %v6071_v40, %v4465_v41 }
  0x72   :  { %1438 = vmatpush.bf16.msrb.mxu1 %v4332_v50  ;;  %v4688_v50 = vor.u32 %v6131_v44, %v4687_v43  ;;  %v4271_v27 = vld [vmem:[%s9521_s1 + $0x210] sm:$0xf]  ;;  %v4016_v32 = vor.u32 %v5963_v22, %v4015_v21  ;;  %v4017_v44 = vld [vmem:[%s9521_s1 + $0x30] sm:$0xf0]  ;;  %v4375_v40 = vld [vmem:[%s9521_s1 + $0x2d8] sm:$0xf] }
  0x73   :  { %1452 = vmatpush.bf16.msrb.mxu2 %v4556_v54  ;;  %1402 = vmatmul.bf16.vlgmr.msra.gmra.mxu0 %v6740_v57  ;;  %v4112_v54 = vor.u32 %v5987_v46, %v4111_v45  ;;  %v6027_v29 = vld [vmem:[%s9521_s1 + $0x22c] sm:$0xf0]  ;;  %v6047_v21 = vld [vmem:[%s9521_s1 + $0x2d4] sm:$0xf]  ;;  %v6052_v41 = vld [vmem:[%s9521_s1 + $0x2f4] sm:$0xf0] }
  0x74   :  { %1466 = vmatpush.bf16.msrb.mxu0 %v4780_v55  ;;  %v4655_v55 = vld [vmem:[%s9521_s1 + $0x510] sm:$0xf]  ;;  %v4369_v22 = vld [vmem:[%s9521_s1 + $0x2f0] sm:$0xf0] }
  0x75   :  { %1474 = vmatpush.bf16.msra.mxu3 %v4176_v30  ;;  %v4656_v0 = vor.u32 %v6123_v56, %v4655_v55  ;;  %v5967_v30 = vld [vmem:[%s9521_s1 + $0x54] sm:$0xf]  ;;  %v4559_v33 = vld [vmem:[%s9521_s1 + $0x450] sm:$0xf] }
  0x76   :  { %1439 = vmatpush.bf16.msrb.mxu1 %v4300_v3  ;;  %v4113_v3 = vld [vmem:[%s9521_s1 + $0xf0] sm:$0xf0]  ;;  %v6099_v34 = vld [vmem:[%s9521_s1 + $0x46c] sm:$0xf0]  ;;  %v4052_v39 = vor.u32 %v5967_v30, %v4049_v31  ;;  %v4372_v30 = vor.u32 %v6047_v21, %v4369_v22  ;;  %v4279_v21 = vld [vmem:[%s9521_s1 + $0x218] sm:$0xf] }
  0x77   :  { %1453 = vmatpush.bf16.msrb.mxu2 %v4524_v9  ;;  %v4047_v9 = vld [vmem:[%s9521_s1 + $0x50] sm:$0xf]  ;;  %v4116_v12 = vor.u32 %v5983_v2, %v4113_v3  ;;  %v4560_v43 = vor.u32 %v6099_v34, %v4559_v33  ;;  %v6063_v56 = vld [vmem:[%s9521_s1 + $0x354] sm:$0xf]  ;;  %v4471_v2 = vld [vmem:[%s9521_s1 + $0x398] sm:$0xf] }
  0x78   :  { %1485 = vmatpush.bf16.msra.mxu0 %v4496_v4  ;;  %v4080_v4 = vor.u32 %v5979_v60, %v4079_v59  ;;  %v4048_v18 = vor.u32 %v5971_v10, %v4047_v9  ;;  %v4527_v45 = vld [vmem:[%s9521_s1 + $0x410] sm:$0xf]  ;;  %v4433_v59 = vld [vmem:[%s9521_s1 + $0x370] sm:$0xf0]  ;;  %v6076_v3 = vld [vmem:[%s9521_s1 + $0x3b4] sm:$0xf0] }
  0x79   :  { %1475 = vmatpush.bf16.msra.mxu3 %v4144_v42  ;;  %v5959_v42 = vld [vmem:[%s9521_s1 + $0x14] sm:$0xf]  ;;  %v6091_v46 = vld [vmem:[%s9521_s1 + $0x42c] sm:$0xf0] }
  0x7a   :  { %1440 = vmatpush.bf16.msrb.mxu1 %v4268_v20  ;;  %1454 = vmatmul.bf16.vlgmr.msrb.gmra.mxu2 %v6740_v57  ;;  %v6107_v20 = vld [vmem:[%s9521_s1 + $0x4ac] sm:$0xf0]  ;;  %v4020_v55 = vor.u32 %v5959_v42, %v4017_v44  ;;  %v4528_v60 = vor.u32 %v6091_v46, %v4527_v45  ;;  %v6055_v9 = vld [vmem:[%s9521_s1 + $0x314] sm:$0xf] }
  0x7b   :  { %1518 = vmatpush.bf16.msra.mxu2 %v4784_v13  ;;  %v4303_v13 = vld [vmem:[%s9521_s1 + $0x250] sm:$0xf]  ;;  %v4592_v28 = vor.u32 %v6107_v20, %v4591_v19  ;;  %v4401_v10 = vld [vmem:[%s9521_s1 + $0x330] sm:$0xf0] }
  0x7c   :  { %1486 = vmatpush.bf16.msra.mxu0 %v4464_v23  ;;  %v4304_v23 = vor.u32 %v6035_v15, %v4303_v13  ;;  %v4215_v13 = vld [vmem:[%s9521_s1 + $0x198] sm:$0xf]  ;;  %v6119_v19 = vld [vmem:[%s9521_s1 + $0x514] sm:$0xf] }
  0x7d   :  { %1441 = vmatmul.bf16.vlgmr.msrb.gmra.mxu1 %v6762_v5  ;;  %1476 = vmatpush.bf16.msra.mxu3 %v4112_v54  ;;  %v4785_v54 = vld [vmem:[%s9521_s1 + $0x630] sm:$0xf0]  ;;  %v6012_v15 = vld [vmem:[%s9521_s1 + $0x1b4] sm:$0xf0] }
  0x7e   :  { %1498 = vmatpush.bf16.msra.mxu1 %v4752_v26  ;;  %v4497_v26 = vld [vmem:[%s9521_s1 + $0x3f0] sm:$0xf0] }
  0x7f   :  { %1524 = vmatpush.bf16.msrb.mxu2 %v4244_v24  ;;  %v4084_v24 = vor.u32 %v5975_v16, %v4081_v17  ;;  %v4439_v16 = vld [vmem:[%s9521_s1 + $0x358] sm:$0xf]  ;;  %v4657_v20 = vld [vmem:[%s9521_s1 + $0x530] sm:$0xf0] }
  0x80   :  { %1487 = vmatpush.bf16.msra.mxu0 %v4432_v35  ;;  %v4500_v35 = vor.u32 %v6079_v25, %v4497_v26  ;;  %v6068_v17 = vld [vmem:[%s9521_s1 + $0x374] sm:$0xf0]  ;;  %v4660_v26 = vor.u32 %v6119_v19, %v4657_v20  ;;  %v6111_v31 = vld [vmem:[%s9521_s1 + $0x4d4] sm:$0xf] }
  0x81   :  { %1477 = vmatpush.bf16.msra.mxu3 %v4080_v4  ;;  %v4436_v4 = vor.u32 %v6063_v56, %v4433_v59  ;;  %v4183_v25 = vld [vmem:[%s9521_s1 + $0x158] sm:$0xf]  ;;  %v6039_v33 = vld [vmem:[%s9521_s1 + $0x294] sm:$0xf] }
  0x82   :  { %1499 = vmatpush.bf16.msra.mxu1 %v4720_v38  ;;  %v4272_v38 = vor.u32 %v6027_v29, %v4271_v27  ;;  %v6004_v27 = vld [vmem:[%s9521_s1 + $0x174] sm:$0xf0]  ;;  %v4337_v34 = vld [vmem:[%s9521_s1 + $0x2b0] sm:$0xf0] }
  0x83   :  { %1525 = vmatpush.bf16.msrb.mxu2 %v4212_v36  ;;  %4800 = vmatmul.msk.bf16.vlgmr.msrb.gmra.mxu0 %vm1260_vm0, %v6642_v8  ;;  %v6143_v36 = vld [vmem:[%s9521_s1 + $0x5d4] sm:$0xf]  ;;  %v6060_v29 = vld [vmem:[%s9521_s1 + $0x334] sm:$0xf0]  ;;  %v4340_v42 = vor.u32 %v6039_v33, %v4337_v34 }
  0x84   :  { %1488 = vmatpush.bf16.msra.mxu0 %v4400_v47  ;;  %v4756_v47 = vor.u32 %v6143_v36, %v4753_v37  ;;  %v4151_v37 = vld [vmem:[%s9521_s1 + $0x118] sm:$0xf]  ;;  %v4593_v44 = vld [vmem:[%s9521_s1 + $0x4b0] sm:$0xf0] }
  0x85   :  { %1478 = vmatpush.bf16.msra.mxu3 %v4048_v18  ;;  %v4404_v18 = vor.u32 %v6055_v9, %v4401_v10  ;;  %v6031_v45 = vld [vmem:[%s9521_s1 + $0x254] sm:$0xf]  ;;  %v4055_v19 = vld [vmem:[%s9521_s1 + $0x58] sm:$0xf] }
  0x86   :  { %1500 = vmatpush.bf16.msra.mxu1 %v4688_v50  ;;  %v6084_v50 = vld [vmem:[%s9521_s1 + $0x3f4] sm:$0xf0]  ;;  %v4305_v46 = vld [vmem:[%s9521_s1 + $0x270] sm:$0xf0] }
  0x87   :  { %1526 = vmatpush.bf16.msrb.mxu2 %v4180_v48  ;;  %v6135_v48 = vld [vmem:[%s9521_s1 + $0x594] sm:$0xf]  ;;  %v5972_v20 = vld [vmem:[%s9521_s1 + $0x74] sm:$0xf0] }
  0x88   :  { %1489 = vmatpush.bf16.msra.mxu0 %v4368_v61  ;;  %v4504_v61 = vor.u32 %v6084_v50, %v4503_v49  ;;  %v4724_v63 = vor.u32 %v6135_v48, %v4721_v52  ;;  %v4376_v48 = vor.u32 %v6052_v41, %v4375_v40  ;;  %v4119_v49 = vld [vmem:[%s9521_s1 + $0xd8] sm:$0xf]  ;;  %v4561_v56 = vld [vmem:[%s9521_s1 + $0x470] sm:$0xf0]  ;;  %v6080_v40 = vld [vmem:[%s9521_s1 + $0x3dc] sm:$0xf] }
  0x89   :  { %1479 = vmatpush.bf16.msra.mxu3 %v4016_v32  ;;  %v4625_v32 = vld [vmem:[%s9521_s1 + $0x4f0] sm:$0xf0]  ;;  %v4343_v52 = vld [vmem:[%s9521_s1 + $0x298] sm:$0xf]  ;;  %v4505_v41 = vld [vmem:[%s9521_s1 + $0x3f8] sm:$0xf0] }
  0x8a   :  { %1501 = vmatpush.bf16.msra.mxu1 %v4656_v0  ;;  %4801 = vmatmul.msk.bf16.vlgmr.msra.gmra.mxu2 %vm1260_vm0, %v6642_v8  ;;  %v4788_v0 = vor.u32 %v6151_v53, %v4785_v54  ;;  %v6044_v53 = vld [vmem:[%s9521_s1 + $0x2b4] sm:$0xf0]  ;;  %v4308_v54 = vor.u32 %v6031_v45, %v4305_v46  ;;  %v6023_v59 = vld [vmem:[%s9521_s1 + $0x214] sm:$0xf] }
  0x8b   :  { %1527 = vmatpush.bf16.msrb.mxu2 %v4148_v62  ;;  %v4247_v62 = vld [vmem:[%s9521_s1 + $0x1d8] sm:$0xf]  ;;  %v6087_v9 = vld [vmem:[%s9521_s1 + $0x414] sm:$0xf] }
  0x8c   :  { %1490 = vmatpush.bf16.msra.mxu0 %v4336_v11  ;;  %1480 = vmatmul.bf16.vlgmr.msra.gmra.mxu3 %v6742_v58  ;;  %v4248_v11 = vor.u32 %v6020_v1, %v4247_v62  ;;  %v4344_v62 = vor.u32 %v6044_v53, %v4343_v52  ;;  %v4087_v1 = vld [vmem:[%s9521_s1 + $0x98] sm:$0xf]  ;;  %v4529_v10 = vld [vmem:[%s9521_s1 + $0x430] sm:$0xf0]  ;;  %v4185_v52 = vld [vmem:[%s9521_s1 + $0x178] sm:$0xf0] }
  0x8d   :  { %1537 = vmatpush.bf16.msrb.mxu3 %v4500_v35  ;;  %v4184_v35 = vor.u32 %v6004_v27, %v4183_v25  ;;  %v4249_v25 = vld [vmem:[%s9521_s1 + $0x1f8] sm:$0xf0]  ;;  %v4023_v34 = vld [vmem:[%s9521_s1 + $0x18] sm:$0xf] }
  0x8e   :  { %1502 = vmatpush.bf16.msra.mxu1 %v4624_v14  ;;  %v4692_v14 = vor.u32 %v6127_v6, %v4689_v7  ;;  %v6036_v6 = vld [vmem:[%s9521_s1 + $0x274] sm:$0xf0]  ;;  %v6144_v27 = vld [vmem:[%s9521_s1 + $0x5dc] sm:$0xf] }
  0x8f   :  { %1528 = vmatpush.bf16.msrb.mxu2 %v4116_v12  ;;  %v4472_v12 = vor.u32 %v6076_v3, %v4471_v2  ;;  %v5980_v3 = vld [vmem:[%s9521_s1 + $0xb4] sm:$0xf0]  ;;  %v6072_v53 = vld [vmem:[%s9521_s1 + $0x39c] sm:$0xf] }
  0x90   :  { %1491 = vmatpush.bf16.msra.mxu0 %v4304_v23  ;;  %v4216_v23 = vor.u32 %v6012_v15, %v4215_v13  ;;  %v6156_v13 = vld [vmem:[%s9521_s1 + $0x634] sm:$0xf0] }
  0x91   :  { %1538 = vmatpush.bf16.msrb.mxu3 %v4468_v51  ;;  %v5988_v51 = vld [vmem:[%s9521_s1 + $0xf4] sm:$0xf0] }
  0x92   :  { %1503 = vmatpush.bf16.msra.mxu1 %v4592_v28  ;;  %v4407_v28 = vld [vmem:[%s9521_s1 + $0x318] sm:$0xf] }
  0x93   :  { %1529 = vmatpush.bf16.msrb.mxu2 %v4084_v24  ;;  %v4440_v24 = vor.u32 %v6068_v17, %v4439_v16  ;;  %v4408_v36 = vor.u32 %v6060_v29, %v4407_v28  ;;  %v4727_v16 = vld [vmem:[%s9521_s1 + $0x598] sm:$0xf]  ;;  %v4761_v28 = vld [vmem:[%s9521_s1 + $0x5f8] sm:$0xf0]  ;;  %v4056_v29 = vor.u32 %v5972_v20, %v4055_v19 }
  0x94   :  { %1492 = vmatpush.bf16.msra.mxu0 %v4272_v38  ;;  %v4628_v38 = vor.u32 %v6111_v31, %v4625_v32  ;;  %v6140_v17 = vld [vmem:[%s9521_s1 + $0x5b4] sm:$0xf0]  ;;  %v4121_v19 = vld [vmem:[%s9521_s1 + $0xf8] sm:$0xf0] }
  0x95   :  { %1539 = vmatpush.bf16.msrb.mxu3 %v4436_v4  ;;  %v4311_v4 = vld [vmem:[%s9521_s1 + $0x258] sm:$0xf]  ;;  %v6056_v20 = vld [vmem:[%s9521_s1 + $0x31c] sm:$0xf] }
  0x96   :  { %1504 = vmatpush.bf16.msra.mxu1 %v4560_v43  ;;  %v6103_v43 = vld [vmem:[%s9521_s1 + $0x494] sm:$0xf]  ;;  %v4312_v15 = vor.u32 %v6036_v6, %v4311_v4  ;;  %v6132_v31 = vld [vmem:[%s9521_s1 + $0x574] sm:$0xf0]  ;;  %v4153_v4 = vld [vmem:[%s9521_s1 + $0x138] sm:$0xf0] }
  0x97   :  { %1530 = vmatpush.bf16.msrb.mxu2 %v4052_v39  ;;  %1493 = vmatmul.bf16.vlgmr.msra.gmra.mxu0 %v6762_v5  ;;  %v5996_v39 = vld [vmem:[%s9521_s1 + $0x134] sm:$0xf0]  ;;  %v4596_v50 = vor.u32 %v6103_v43, %v4593_v44  ;;  %v6136_v43 = vld [vmem:[%s9521_s1 + $0x59c] sm:$0xf] }
  0x98   :  { %1550 = vmatpush.bf16.msrb.mxu0 %v4756_v47  ;;  %v4152_v47 = vor.u32 %v5996_v39, %v4151_v37  ;;  %v4764_v37 = vor.u32 %v6144_v27, %v4761_v28  ;;  %v4217_v39 = vld [vmem:[%s9521_s1 + $0x1b8] sm:$0xf0]  ;;  %v4663_v46 = vld [vmem:[%s9521_s1 + $0x518] sm:$0xf] }
  0x99   :  { %1540 = vmatpush.bf16.msrb.mxu3 %v4404_v18  ;;  %v4532_v18 = vor.u32 %v6087_v9, %v4529_v10  ;;  %v4729_v44 = vld [vmem:[%s9521_s1 + $0x5b8] sm:$0xf0]  ;;  %v6100_v27 = vld [vmem:[%s9521_s1 + $0x474] sm:$0xf0] }
  0x9a   :  { %1505 = vmatpush.bf16.msra.mxu1 %v4528_v60  ;;  %v4273_v60 = vld [vmem:[%s9521_s1 + $0x230] sm:$0xf0]  ;;  %v6064_v6 = vld [vmem:[%s9521_s1 + $0x35c] sm:$0xf] }
  0x9b   :  { %1531 = vmatpush.bf16.msrb.mxu2 %v4020_v55  ;;  %v6095_v55 = vld [vmem:[%s9521_s1 + $0x454] sm:$0xf]  ;;  %v4276_v7 = vor.u32 %v6023_v59, %v4273_v60  ;;  %v4697_v59 = vld [vmem:[%s9521_s1 + $0x578] sm:$0xf0]  ;;  %v4631_v60 = vld [vmem:[%s9521_s1 + $0x4d8] sm:$0xf] }
  0x9c   :  { %1551 = vmatpush.bf16.msrb.mxu0 %v4724_v63  ;;  %v4759_v63 = vld [vmem:[%s9521_s1 + $0x5d8] sm:$0xf]  ;;  %v4564_v2 = vor.u32 %v6095_v55, %v4561_v56  ;;  %v6128_v56 = vld [vmem:[%s9521_s1 + $0x55c] sm:$0xf] }
  0x9d   :  { %1506 = vmatmul.bf16.vlgmr.msra.gmra.mxu1 %v6740_v57  ;;  %1541 = vmatpush.bf16.msrb.mxu3 %v4372_v30  ;;  %v4695_v30 = vld [vmem:[%s9521_s1 + $0x558] sm:$0xf]  ;;  %v6120_v10 = vld [vmem:[%s9521_s1 + $0x51c] sm:$0xf] }
  0x9e   :  { %1570 = vmatpush.bf16.msrb.mxu1 %v4788_v0  ;;  %1532 = vmatmul.bf16.vlgmr.msrb.gmra.mxu2 %v6742_v58  ;;  %v6148_v0 = vld [vmem:[%s9521_s1 + $0x5f4] sm:$0xf0] }
  0x9f   :  { %1589 = vmatpush.bf16.msra.mxu2 %v4504_v61  ;;  %v4120_v61 = vor.u32 %v5988_v51, %v4119_v49  ;;  %v4508_v49 = vor.u32 %v6080_v40, %v4505_v41  ;;  %v4732_v51 = vor.u32 %v6136_v43, %v4729_v44  ;;  %v4535_v41 = vld [vmem:[%s9521_s1 + $0x418] sm:$0xf] }
  0xa0   :  { %1552 = vmatpush.bf16.msrb.mxu0 %v4692_v14  ;;  %v4088_v14 = vor.u32 %v5980_v3, %v4087_v1  ;;  %v5992_v1 = vld [vmem:[%s9521_s1 + $0x11c] sm:$0xf] }
  0xa1   :  { %1542 = vmatpush.bf16.msrb.mxu3 %v4340_v42  ;;  %v4696_v42 = vor.u32 %v6132_v31, %v4695_v30  ;;  %v5976_v30 = vld [vmem:[%s9521_s1 + $0x9c] sm:$0xf] }
  0xa2   :  { %1576 = vmatpush.bf16.msra.mxu1 %v4248_v11  ;;  %v4760_v11 = vor.u32 %v6148_v0, %v4759_v63 }
  0xa3   :  { %1590 = vmatpush.bf16.msra.mxu2 %v4472_v12  ;;  %v4791_v12 = vld [vmem:[%s9521_s1 + $0x618] sm:$0xf] }
  0xa4   :  { %1553 = vmatpush.bf16.msrb.mxu0 %v4660_v26  ;;  %v4792_v22 = vor.u32 %v6156_v13, %v4791_v12  ;;  %v4728_v26 = vor.u32 %v6140_v17, %v4727_v16  ;;  %v4599_v13 = vld [vmem:[%s9521_s1 + $0x498] sm:$0xf]  ;;  %v5984_v17 = vld [vmem:[%s9521_s1 + $0xdc] sm:$0xf] }
  0xa5   :  { %1543 = vmatpush.bf16.msrb.mxu3 %v4308_v54  ;;  %v4473_v54 = vld [vmem:[%s9521_s1 + $0x3b8] sm:$0xf0]  ;;  %v4124_v28 = vor.u32 %v5984_v17, %v4121_v19  ;;  %v5303_v17 = vld [vmem:[%s9523_s3 + $0x3e0] sm:$0xf] }
  0xa6   :  { %1577 = vmatpush.bf16.msra.mxu1 %v4216_v23  ;;  %v6028_v23 = vld [vmem:[%s9521_s1 + $0x234] sm:$0xf0]  ;;  %v4476_v0 = vor.u32 %v6072_v53, %v4473_v54  ;;  %v7775_v19 = vld [vmem:[%s9524_s2] sm:$0xff] }
  0xa7   :  { %1591 = vmatpush.bf16.msra.mxu2 %v4440_v24  ;;  %v6016_v24 = vld [vmem:[%s9521_s1 + $0x1dc] sm:$0xf]  ;;  %v4280_v32 = vor.u32 %v6028_v23, %v4279_v21 }
  0xa8   :  { %1554 = vmatpush.bf16.msrb.mxu0 %v4628_v38  ;;  %v4252_v33 = vor.u32 %v6016_v24, %v4249_v25  ;;  %v7574_v38 = vpop.f32.mrf.mxu3  ;;  %v4409_v21 = vld [vmem:[%s9521_s1 + $0x338] sm:$0xf0] }
  0xa9   :  { %1544 = vmatpush.bf16.msrb.mxu3 %v4276_v7  ;;  %v4441_v7 = vld [vmem:[%s9521_s1 + $0x378] sm:$0xf0] }
  0xaa   :  { %1578 = vmatpush.bf16.msra.mxu1 %v4184_v35  ;;  %v5964_v35 = vld [vmem:[%s9521_s1 + $0x34] sm:$0xf0]  ;;  %v4444_v16 = vor.u32 %v6064_v6, %v4441_v7  ;;  %v6112_v24 = vld [vmem:[%s9521_s1 + $0x4dc] sm:$0xf] }
  0xab   :  { %1592 = vmatpush.bf16.msra.mxu2 %v4408_v36  ;;  %v6008_v36 = vld [vmem:[%s9521_s1 + $0x19c] sm:$0xf]  ;;  %v4024_v45 = vor.u32 %v5964_v35, %v4023_v34 }
  0xac   :  { %1555 = vmatpush.bf16.msrb.mxu0 %v4596_v50  ;;  %1545 = vmatmul.bf16.vlgmr.msrb.gmra.mxu3 %v6762_v5  ;;  %v6000_v50 = vld [vmem:[%s9521_s1 + $0x15c] sm:$0xf] }
  0xad   :  { %4802 = vmatmul.msk.bf16.vlgmr.msrb.gmra.mxu1 %vm1260_vm0, %v6642_v8  ;;  %1602 = vmatpush.bf16.msra.mxu3 %v4760_v11  ;;  %v4188_v63 = vor.u32 %v6000_v50, %v4185_v52  ;;  %v4665_v11 = vld [vmem:[%s9521_s1 + $0x538] sm:$0xf0] }
  0xae   :  { %1579 = vmatpush.bf16.msra.mxu1 %v4152_v47  ;;  %v6124_v47 = vld [vmem:[%s9521_s1 + $0x534] sm:$0xf0]  ;;  %v4633_v25 = vld [vmem:[%s9521_s1 + $0x4f8] sm:$0xf0] }
  0xaf   :  { %1593 = vmatpush.bf16.msra.mxu2 %v4376_v48  ;;  %v4220_v48 = vor.u32 %v6008_v36, %v4217_v39  ;;  %v4664_v55 = vor.u32 %v6124_v47, %v4663_v46  ;;  %v6048_v34 = vld [vmem:[%s9521_s1 + $0x2dc] sm:$0xf] }
  0xb0   :  { %1556 = vmatpush.bf16.msrb.mxu0 %v4564_v2  ;;  %v4700_v2 = vor.u32 %v6128_v56, %v4697_v59  ;;  %v1314_v3 = vpop.f32.mrf.mxu3  ;;  %v4377_v35 = vld [vmem:[%s9521_s1 + $0x2f8] sm:$0xf0] }
  0xb1   :  { %1603 = vmatpush.bf16.msra.mxu3 %v4728_v26  ;;  %v4567_v26 = vld [vmem:[%s9521_s1 + $0x458] sm:$0xf]  ;;  %v4601_v39 = vld [vmem:[%s9521_s1 + $0x4b8] sm:$0xf0] }
  0xb2   :  { %1580 = vmatpush.bf16.msra.mxu1 %v4120_v61  ;;  %v6116_v61 = vld [vmem:[%s9521_s1 + $0x4f4] sm:$0xf0]  ;;  %v4568_v36 = vor.u32 %v6100_v27, %v4567_v26  ;;  %v5968_v46 = vld [vmem:[%s9521_s1 + $0x5c] sm:$0xf]  ;;  %v5031_v27 = vld [vmem:[%s9523_s3 + $0x1c0] sm:$0xf] }
  0xb3   :  { %1594 = vmatpush.bf16.msra.mxu2 %v4344_v62  ;;  %v4632_v9 = vor.u32 %v6116_v61, %v4631_v60  ;;  %v6152_v47 = vld [vmem:[%s9521_s1 + $0x61c] sm:$0xf]  ;;  %v4919_v60 = vld [vmem:[%s9523_s3 + $0xe0] sm:$0xf]  ;;  %v6187_v61 = vld [vmem:[%s9523_s3 + $0xec] sm:$0xf0] }
  0xb4   :  { %1557 = vmatpush.bf16.msrb.mxu0 %v4532_v18  ;;  %v7623_v62 = vpop.f32.mrf.mxu0  ;;  %v4668_v18 = vor.u32 %v6120_v10, %v4665_v11  ;;  %v4057_v50 = vld [vmem:[%s9521_s1 + $0x78] sm:$0xf0]  ;;  %v4920_v10 = vor.u32 %v6187_v61, %v4919_v60  ;;  %v5047_v11 = vld [vmem:[%s9523_s3 + $0x1e0] sm:$0xf] }
  0xb5   :  { %1604 = vmatpush.bf16.msra.mxu3 %v4696_v42  ;;  %v6092_v42 = vld [vmem:[%s9521_s1 + $0x434] sm:$0xf0]  ;;  %v4345_v52 = vld [vmem:[%s9521_s1 + $0x2b8] sm:$0xf0]  ;;  %v4999_v61 = vld [vmem:[%s9523_s3 + $0x180] sm:$0xf] }
  0xb6   :  { %1581 = vmatpush.bf16.msra.mxu1 %v4088_v14  ;;  %v7644_v12 = vpop.f32.mrf.mxu1  ;;  %v6108_v14 = vld [vmem:[%s9521_s1 + $0x4b4] sm:$0xf0]  ;;  %v4536_v54 = vor.u32 %v6092_v42, %v4535_v41  ;;  %v4569_v56 = vld [vmem:[%s9521_s1 + $0x478] sm:$0xf0]  ;;  %v231_v41 = vperm.slane %v7775_v19, 0 }
  0xb7   :  { %1595 = vmatpush.bf16.msra.mxu2 %v4312_v15  ;;  %1558 = vmatmul.bf16.vlgmr.msrb.gmra.mxu0 %v6740_v57  ;;  %v4156_v15 = vor.u32 %v5992_v1, %v4153_v4  ;;  %v4600_v23 = vor.u32 %v6108_v14, %v4599_v13  ;;  %v5960_v1 = vld [vmem:[%s9521_s1 + $0x1c] sm:$0xf]  ;;  %v6219_v13 = vld [vmem:[%s9523_s3 + $0x1ec] sm:$0xf0]  ;;  %v4903_v14 = vld [vmem:[%s9523_s3 + $0xc0] sm:$0xf] }
  0xb8   :  { %1622 = vmatpush.bf16.msra.mxu0 %v4792_v22  ;;  %v6032_v3 = vld [vmem:[%s9521_s1 + $0x25c] sm:$0xf] }
  0xb9   :  { %1605 = vmatpush.bf16.msra.mxu3 %v4664_v55  ;;  %v7664_v22 = vpop.f32.mrf.mxu2  ;;  %v6096_v55 = vld [vmem:[%s9521_s1 + $0x45c] sm:$0xf] }
  0xba   :  { %1582 = vmatpush.bf16.msra.mxu1 %v4056_v29  ;;  %v4412_v29 = vor.u32 %v6056_v20, %v4409_v21  ;;  %v4572_v4 = vor.u32 %v6096_v55, %v4569_v56  ;;  %v4313_v6 = vld [vmem:[%s9521_s1 + $0x278] sm:$0xf0]  ;;  %v1274_v55 = vadd.f32 %v7623_v62, %v231_v41  ;;  %v4855_v62 = vld [vmem:[%s9523_s3 + $0x60] sm:$0xf] }
  0xbb   :  { %1596 = vmatpush.bf16.msra.mxu2 %v4280_v32  ;;  %v4636_v32 = vor.u32 %v6112_v24, %v4633_v25  ;;  %v7696_v40 = vpop.f32.mrf.mxu3  ;;  %v6088_v7 = vld [vmem:[%s9521_s1 + $0x41c] sm:$0xf]  ;;  %v4316_v21 = vor.u32 %v6032_v3, %v4313_v6  ;;  %v5048_v25 = vor.u32 %v6219_v13, %v5047_v11  ;;  %v6243_v3 = vld [vmem:[%s9523_s3 + $0x2ac] sm:$0xf0]  ;;  %v4983_v13 = vld [vmem:[%s9523_s3 + $0x160] sm:$0xf] }
  0xbc   :  { %1628 = vmatpush.bf16.msrb.mxu0 %v4252_v33  ;;  %v1275_v31 = vpop.f32.mrf.mxu0  ;;  %v4089_v33 = vld [vmem:[%s9521_s1 + $0xb8] sm:$0xf0]  ;;  %v1287_v6 = vadd.f32 %v7644_v12, %v1274_v55  ;;  %v4839_v12 = vld [vmem:[%s9523_s3 + $0x40] sm:$0xf] }
  0xbd   :  { %1606 = vmatpush.bf16.msra.mxu3 %v4632_v9  ;;  %v4092_v44 = vor.u32 %v5976_v30, %v4089_v33  ;;  %v4537_v9 = vld [vmem:[%s9521_s1 + $0x438] sm:$0xf0]  ;;  %v4887_v30 = vld [vmem:[%s9523_s3 + $0xa0] sm:$0xf] }
  0xbe   :  { %1583 = vmatpush.bf16.msra.mxu1 %v4024_v45  ;;  %1597 = vmatmul.bf16.vlgmr.msra.gmra.mxu2 %v6762_v5  ;;  %v1288_v43 = vpop.f32.mrf.mxu1  ;;  %v4380_v45 = vor.u32 %v6048_v34, %v4377_v35  ;;  %v4540_v24 = vor.u32 %v6088_v7, %v4537_v9  ;;  %v4281_v26 = vld [vmem:[%s9521_s1 + $0x238] sm:$0xf0]  ;;  %v5175_v31 = vld [vmem:[%s9523_s3 + $0x2e0] sm:$0xf]  ;;  %v6179_v35 = vld [vmem:[%s9523_s3 + $0xac] sm:$0xf0] }
  0xbf   :  { %1654 = vmatpush.bf16.msrb.mxu2 %v4764_v37  ;;  %v6104_v37 = vld [vmem:[%s9521_s1 + $0x49c] sm:$0xf]  ;;  %v5015_v43 = vld [vmem:[%s9523_s3 + $0x1a0] sm:$0xf] }
  0xc0   :  { %1629 = vmatpush.bf16.msrb.mxu0 %v4220_v48  ;;  %v4793_v48 = vld [vmem:[%s9521_s1 + $0x638] sm:$0xf0]  ;;  %v5207_v55 = vld [vmem:[%s9523_s3 + $0x320] sm:$0xf] }
  0xc1   :  { %1584 = vmatmul.bf16.vlgmr.msra.gmra.mxu1 %v6742_v58  ;;  %1607 = vmatpush.bf16.msra.mxu3 %v4600_v23  ;;  %v1301_v53 = vpop.f32.mrf.mxu2  ;;  %v4796_v59 = vor.u32 %v6152_v47, %v4793_v48  ;;  %v6024_v23 = vld [vmem:[%s9521_s1 + $0x21c] sm:$0xf]  ;;  %v4871_v47 = vld [vmem:[%s9523_s3 + $0x80] sm:$0xf] }
  0xc2   :  { %1641 = vmatpush.bf16.msrb.mxu1 %v4508_v49  ;;  %v4604_v49 = vor.u32 %v6104_v37, %v4601_v39  ;;  %v6279_v37 = vld [vmem:[%s9523_s3 + $0x3cc] sm:$0xf0]  ;;  %v4284_v39 = vor.u32 %v6024_v23, %v4281_v26  ;;  %v5159_v48 = vld [vmem:[%s9523_s3 + $0x2c0] sm:$0xf] }
  0xc3   :  { %1655 = vmatpush.bf16.msrb.mxu2 %v4732_v51  ;;  %v6040_v51 = vld [vmem:[%s9521_s1 + $0x29c] sm:$0xf]  ;;  %v6275_v53 = vld [vmem:[%s9523_s3 + $0x3ac] sm:$0xf0] }
  0xc4   :  { %1630 = vmatpush.bf16.msrb.mxu0 %v4188_v63  ;;  %v4060_v63 = vor.u32 %v5968_v46, %v4057_v50  ;;  %v4888_v46 = vor.u32 %v6179_v35, %v4887_v30  ;;  %v6267_v23 = vld [vmem:[%s9523_s3 + $0x36c] sm:$0xf0] }
  0xc5   :  { %1608 = vmatpush.bf16.msra.mxu3 %v4568_v36  ;;  %v5287_v36 = vld [vmem:[%s9523_s3 + $0x3c0] sm:$0xf]  ;;  %v6235_v35 = vld [vmem:[%s9523_s3 + $0x26c] sm:$0xf0] }
  0xc6   :  { %1642 = vmatpush.bf16.msrb.mxu1 %v4476_v0  ;;  %v4348_v0 = vor.u32 %v6040_v51, %v4345_v52  ;;  %v5288_v50 = vor.u32 %v6279_v37, %v5287_v36  ;;  %v6175_v51 = vld [vmem:[%s9523_s3 + $0x8c] sm:$0xf0]  ;;  %v5271_v52 = vld [vmem:[%s9523_s3 + $0x3a0] sm:$0xf] }
  0xc7   :  { %1656 = vmatpush.bf16.msrb.mxu2 %v4700_v2  ;;  %4803 = vmatmul.msk.bf16.vlgmr.msra.gmra.mxu0 %vm1260_vm0, %v6642_v8  ;;  %v4025_v2 = vld [vmem:[%s9521_s1 + $0x38] sm:$0xf0]  ;;  %v4872_v60 = vor.u32 %v6175_v51, %v4871_v47  ;;  %v5223_v37 = vld [vmem:[%s9523_s3 + $0x340] sm:$0xf]  ;;  %v6195_v47 = vld [vmem:[%s9523_s3 + $0x12c] sm:$0xf0] }
  0xc8   :  { %1631 = vmatpush.bf16.msrb.mxu0 %v4156_v15  ;;  %v1327_v15 = vpop.f32.mrf.mxu3  ;;  %v4028_v20 = vor.u32 %v5960_v1, %v4025_v2  ;;  %v6171_v1 = vld [vmem:[%s9523_s3 + $0x6c] sm:$0xf0]  ;;  %v5143_v2 = vld [vmem:[%s9523_s3 + $0x2a0] sm:$0xf] }
  0xc9   :  { %1609 = vmatpush.bf16.msra.mxu3 %v4536_v54  ;;  %v7799_v33 = vpop.f32.mrf.mxu2  ;;  %v4856_v11 = vor.u32 %v6171_v1, %v4855_v62  ;;  %v5144_v15 = vor.u32 %v6243_v3, %v5143_v2  ;;  %v5095_v51 = vld [vmem:[%s9523_s3 + $0x240] sm:$0xf] }
  0xca   :  { %1643 = vmatpush.bf16.msrb.mxu1 %v4444_v16  ;;  %v6183_v16 = vld [vmem:[%s9523_s3 + $0xcc] sm:$0xf0]  ;;  %v5079_v2 = vld [vmem:[%s9523_s3 + $0x220] sm:$0xf] }
  0xcb   :  { %1657 = vmatpush.bf16.msrb.mxu2 %v4668_v18  ;;  %v6283_v18 = vld [vmem:[%s9523_s3 + $0x3ec] sm:$0xf0] }
  0xcc   :  { %1632 = vmatpush.bf16.msrb.mxu0 %v4124_v28  ;;  %1610 = vmatmul.bf16.vlgmr.msra.gmra.mxu3 %v6740_v57  ;;  %v6215_v28 = vld [vmem:[%s9523_s3 + $0x1cc] sm:$0xf0]  ;;  %v5304_v34 = vor.u32 %v6283_v18, %v5303_v17 }
  0xcd   :  { %1674 = vmatpush.bf16.msrb.mxu3 %v4796_v59  ;;  %v5032_v42 = vor.u32 %v6215_v28, %v5031_v27  ;;  %v6239_v17 = vld [vmem:[%s9523_s3 + $0x28c] sm:$0xf0]  ;;  %v4967_v28 = vld [vmem:[%s9523_s3 + $0x140] sm:$0xf] }
  0xce   :  { %1644 = vmatpush.bf16.msrb.mxu1 %v4412_v29  ;;  %v4904_v29 = vor.u32 %v6183_v16, %v4903_v14  ;;  %v6203_v14 = vld [vmem:[%s9523_s3 + $0x16c] sm:$0xf0]  ;;  %v5127_v16 = vld [vmem:[%s9523_s3 + $0x280] sm:$0xf] }
  0xcf   :  { %1658 = vmatpush.bf16.msrb.mxu2 %v4636_v32  ;;  %v6251_v32 = vld [vmem:[%s9523_s3 + $0x2ec] sm:$0xf0]  ;;  %v5128_v30 = vor.u32 %v6239_v17, %v5127_v16  ;;  %v5063_v17 = vld [vmem:[%s9523_s3 + $0x200] sm:$0xf] }
  0xd0   :  { %1633 = vmatpush.bf16.msrb.mxu0 %v4092_v44  ;;  %v6211_v44 = vld [vmem:[%s9523_s3 + $0x1ac] sm:$0xf0]  ;;  %v1338_v54 = vpop.f32.mrf.mxu0 }
  0xd1   :  { %3242 = vmatpush.bf16.msra.mxu3 %v4920_v10  ;;  %v5016_v56 = vor.u32 %v6211_v44, %v5015_v43  ;;  %v4951_v44 = vld [vmem:[%s9523_s3 + $0x120] sm:$0xf] }
  0xd2   :  { %1645 = vmatpush.bf16.msrb.mxu1 %v4380_v45  ;;  %v5176_v45 = vor.u32 %v6251_v32, %v5175_v31  ;;  %v1377_v32 = vpop.f32.mrf.mxu3 }
  0xd3   :  { %1659 = vmatpush.bf16.msrb.mxu2 %v4604_v49  ;;  %v6247_v49 = vld [vmem:[%s9523_s3 + $0x2cc] sm:$0xf0] }
  0xd4   :  { %1634 = vmatpush.bf16.msrb.mxu0 %v4060_v63  ;;  %v5160_v59 = vor.u32 %v6247_v49, %v5159_v48  ;;  %v1366_v63 = vpop.f32.mrf.mxu2  ;;  %v4807_v48 = vld [vmem:[%s9523_s3] sm:$0xf] }
  0xd5   :  { %3243 = vmatpush.bf16.msra.mxu3 %v4904_v29  ;;  %v6199_v29 = vld [vmem:[%s9523_s3 + $0x14c] sm:$0xf0]  ;;  %v233_v63 = vperm.slane %v7775_v19, 2 }
  0xd6   :  { %1646 = vmatpush.bf16.msrb.mxu1 %v4348_v0  ;;  %v5272_v0 = vor.u32 %v6275_v53, %v5271_v52  ;;  %v1351_v7 = vpop.f32.mrf.mxu1  ;;  %v4968_v43 = vor.u32 %v6199_v29, %v4967_v28  ;;  %v6231_v52 = vld [vmem:[%s9523_s3 + $0x24c] sm:$0xf0] }
  0xd7   :  { %1660 = vmatpush.bf16.msrb.mxu2 %v4572_v4  ;;  %v5255_v4 = vld [vmem:[%s9523_s3 + $0x380] sm:$0xf]  ;;  %v5096_v1 = vor.u32 %v6231_v52, %v5095_v51  ;;  %v6307_v28 = vld [vmem:[%s9523_s3 + $0x4ac] sm:$0xf0] }
  0xd8   :  { %1635 = vmatpush.bf16.msrb.mxu0 %v4028_v20  ;;  %v1340_v20 = vpop.f32.mrf.mxu0  ;;  %v5495_v52 = vld [vmem:[%s9523_s3 + $0x560] sm:$0xf] }
  0xd9   :  { %3244 = vmatpush.bf16.msra.mxu3 %v4888_v46 }
  0xda   :  { %1647 = vmatpush.bf16.msrb.mxu1 %v4316_v21  ;;  %v5239_v21 = vld [vmem:[%s9523_s3 + $0x360] sm:$0xf] }
  0xdb   :  { %1661 = vmatpush.bf16.msrb.mxu2 %v4540_v24  ;;  %1636 = vmatmul.bf16.vlgmr.msrb.gmra.mxu0 %v6742_v58  ;;  %v232_v58 = vperm.slane %v7775_v19, 1  ;;  %v1300_v24 = vadd.f32 %v7664_v22, %v1287_v6  ;;  %v4823_v22 = vld [vmem:[%s9523_s3 + $0x20] sm:$0xf]  ;;  %v5240_v36 = vor.u32 %v6267_v23, %v5239_v21 }
  0xdc   :  { %3255 = vmatpush.bf16.msra.mxu0 %v5048_v25  ;;  %4804 = vmatmul.msk.bf16.vlgmr.msrb.gmra.mxu3 %vm1260_vm0, %v6642_v8  ;;  %v4984_v25 = vor.u32 %v6203_v14, %v4983_v13  ;;  %v6163_v8 = vld [vmem:[%s9523_s3 + $0x2c] sm:$0xf0] }
  0xdd   :  { %v1326_v10 = vadd.f32 %v7696_v40, %v232_v58  ;;  %3245 = vmatpush.bf16.msra.mxu3 %v4872_v60  ;;  %v6167_v40 = vld [vmem:[%s9523_s3 + $0x4c] sm:$0xf0]  ;;  %v7902_v31 = vpop.f32.mrf.mxu2  ;;  %v1313_v41 = vadd.f32 %v7574_v38, %v1300_v24  ;;  %v4824_v46 = vor.u32 %v6163_v8, %v4823_v22  ;;  %v4935_v60 = vld [vmem:[%s9523_s3 + $0x100] sm:$0xf] }
  0xde   :  { %1662 = vmatmul.bf16.vlgmr.msrb.gmra.mxu2 %v6740_v57  ;;  %1648 = vmatpush.bf16.msrb.mxu1 %v4284_v39  ;;  %v6207_v57 = vld [vmem:[%s9523_s3 + $0x18c] sm:$0xf0]  ;;  %v4840_v27 = vor.u32 %v6167_v40, %v4839_v12  ;;  %v1378_v40 = vadd.f32 %v1377_v32, %v233_v63  ;;  %v5479_v63 = vld [vmem:[%s9523_s3 + $0x540] sm:$0xf] }
  0xdf   :  { %3281 = vmatpush.bf16.msra.mxu2 %v5304_v34  ;;  %v5000_v9 = vor.u32 %v6207_v57, %v4999_v61  ;;  %v1339_v26 = vadd.f32 %v1338_v54, %v1326_v10  ;;  %v5111_v34 = vld [vmem:[%s9523_s3 + $0x260] sm:$0xf]  ;;  %v6263_v39 = vld [vmem:[%s9523_s3 + $0x34c] sm:$0xf0] }
  0xe0   :  { %3256 = vmatpush.bf16.msra.mxu0 %v5032_v42  ;;  %v1353_v42 = vpop.f32.mrf.mxu1  ;;  %v6159_v38 = vld [vmem:[%s9523_s3 + $0xc] sm:$0xf0]  ;;  %v5112_v49 = vor.u32 %v6235_v35, %v5111_v34  ;;  %v5224_v53 = vor.u32 %v6263_v39, %v5223_v37  ;;  %v5527_v34 = vld [vmem:[%s9523_s3 + $0x5a0] sm:$0xf] }
  0xe1   :  { %1649 = vmatmul.bf16.vlgmr.msrb.gmra.mxu1 %v6762_v5  ;;  %v6271_v5 = vld [vmem:[%s9523_s3 + $0x38c] sm:$0xf0]  ;;  %3246 = vmatpush.bf16.msra.mxu3 %v4856_v11  ;;  %v4808_v62 = vor.u32 %v6159_v38, %v4807_v48  ;;  %v5191_v11 = vld [vmem:[%s9523_s3 + $0x300] sm:$0xf] }
  0xe2   :  { %3268 = vmatpush.bf16.msra.mxu1 %v5176_v45  ;;  %v5256_v18 = vor.u32 %v6271_v5, %v5255_v4  ;;  %v1352_v45 = vadd.f32 %v1351_v7, %v1339_v26  ;;  %v6315_v54 = vld [vmem:[%s9523_s3 + $0x4ec] sm:$0xf0]  ;;  %v1379_v5 = vpop.f32.mrf.mxu3  ;;  %v5559_v7 = vld [vmem:[%s9523_s3 + $0x5e0] sm:$0xf] }
  0xe3   :  { %3282 = vmatpush.bf16.msra.mxu2 %v5288_v50  ;;  %v5431_v50 = vld [vmem:[%s9523_s3 + $0x4e0] sm:$0xf]  ;;  %v6259_v58 = vld [vmem:[%s9523_s3 + $0x32c] sm:$0xf0] }
  0xe4   :  { %3257 = vmatpush.bf16.msra.mxu0 %v5016_v56  ;;  %v1680_v56 = vmax.f32 %v1313_v41, 0.0  ;;  %v6191_v61 = vld [vmem:[%s9523_s3 + $0x10c] sm:$0xf0]  ;;  %v1365_v57 = vadd.f32 %v7799_v33, %v1352_v45  ;;  %v5432_v4 = vor.u32 %v6315_v54, %v5431_v50  ;;  %v5208_v6 = vor.u32 %v6259_v58, %v5207_v55  ;;  %v5351_v55 = vld [vmem:[%s9523_s3 + $0x440] sm:$0xf] }
  0xe5   :  { %3247 = vmatpush.bf16.msra.mxu3 %v4840_v27  ;;  %v1392_v3 = vpop.f32.mrf.mxu2  ;;  %v6227_v33 = vld [vmem:[%s9523_s3 + $0x22c] sm:$0xf0]  ;;  %v4936_v14 = vor.u32 %v6191_v61, %v4935_v60  ;;  %v5399_v27 = vld [vmem:[%s9523_s3 + $0x4a0] sm:$0xf] }
  0xe6   :  { %3269 = vmatpush.bf16.msra.mxu1 %v5160_v59  ;;  %v4952_v59 = vor.u32 %v6195_v47, %v4951_v44  ;;  %v6311_v10 = vld [vmem:[%s9523_s3 + $0x4cc] sm:$0xf0]  ;;  %v5080_v16 = vor.u32 %v6227_v33, %v5079_v2  ;;  %v7988_v21 = vpack.c.bf16 %v1680_v56, %v1680_v56  ;;  %v5400_v32 = vor.u32 %v6307_v28, %v5399_v27  ;;  %v5511_v44 = vld [vmem:[%s9523_s3 + $0x580] sm:$0xf]  ;;  %v6181_v28 = vld [vmem:[%s9523_s3 + $0xc4] sm:$0xf] }
  0xe7   :  { %3283 = vmatpush.bf16.msra.mxu2 %v5272_v0  ;;  %v5415_v0 = vld [vmem:[%s9523_s3 + $0x4c0] sm:$0xf]  ;;  %v6255_v13 = vld [vmem:[%s9523_s3 + $0x30c] sm:$0xf0] }
  0xe8   :  { %3258 = vmatpush.bf16.msra.mxu0 %v5000_v9  ;;  %v6347_v9 = vld [vmem:[%s9523_s3 + $0x5ec] sm:$0xf0]  ;;  %v1416_v12 = vpop.f32.mrf.mxu1  ;;  %v5416_v23 = vor.u32 %v6311_v10, %v5415_v0  ;;  %v5192_v24 = vor.u32 %v6255_v13, %v5191_v11  ;;  %v5367_v47 = vld [vmem:[%s9523_s3 + $0x460] sm:$0xf] }
  0xe9   :  { %3248 = vmatpush.bf16.msra.mxu3 %v4824_v46  ;;  %v5560_v20 = vor.u32 %v6347_v9, %v5559_v7  ;;  %v6343_v26 = vld [vmem:[%s9523_s3 + $0x5cc] sm:$0xf0]  ;;  %v5335_v3 = vld [vmem:[%s9523_s3 + $0x420] sm:$0xf] }
  0xea   :  { %3270 = vmatpush.bf16.msra.mxu1 %v5144_v15  ;;  %v1681_v15 = vmax.f32 %v1365_v57, 0.0  ;;  %v6339_v35 = vld [vmem:[%s9523_s3 + $0x5ac] sm:$0xf0]  ;;  %v5687_v5 = vld [vmem:[%s9523_s3 + $0x6e0] sm:$0xf] }
  0xeb   :  { %3284 = vmatpush.bf16.msra.mxu2 %v5256_v18  ;;  %v6223_v18 = vld [vmem:[%s9523_s3 + $0x20c] sm:$0xf0]  ;;  %v5528_v42 = vor.u32 %v6339_v35, %v5527_v34  ;;  %v5463_v11 = vld [vmem:[%s9523_s3 + $0x520] sm:$0xf]  ;;  %v6217_v35 = vld [vmem:[%s9523_s3 + $0x1e4] sm:$0xf] }
  0xec   :  { %3259 = vmatpush.bf16.msra.mxu0 %v4984_v25  ;;  %v5543_v25 = vld [vmem:[%s9523_s3 + $0x5c0] sm:$0xf]  ;;  %v5064_v29 = vor.u32 %v6223_v18, %v5063_v17  ;;  %v8003_v22 = vpack.c.bf16 %v1681_v15, %v1681_v15  ;;  %v6335_v45 = vld [vmem:[%s9523_s3 + $0x58c] sm:$0xf0]  ;;  %v6185_v15 = vld [vmem:[%s9523_s3 + $0xe4] sm:$0xf] }
  0xed   :  { %3249 = vmatpush.bf16.msra.mxu3 %v4808_v62  ;;  %v5544_v8 = vor.u32 %v6343_v26, %v5543_v25  ;;  %v6299_v48 = vld [vmem:[%s9523_s3 + $0x46c] sm:$0xf0]  ;;  %v5512_v50 = vor.u32 %v6335_v45, %v5511_v44  ;;  %v5671_v18 = vld [vmem:[%s9523_s3 + $0x6c0] sm:$0xf]  ;;  %v6177_v44 = vld [vmem:[%s9523_s3 + $0xa4] sm:$0xf] }
  0xee   :  { %3271 = vmatpush.bf16.msra.mxu1 %v5128_v30  ;;  %v1391_v30 = vadd.f32 %v7902_v31, %v1378_v40  ;;  %v5383_v31 = vld [vmem:[%s9523_s3 + $0x480] sm:$0xf]  ;;  %v5368_v51 = vor.u32 %v6299_v48, %v5367_v47  ;;  %v6295_v58 = vld [vmem:[%s9523_s3 + $0x44c] sm:$0xf0]  ;;  %v4889_v47 = vld [vmem:[%s9523_s3 + $0xb0] sm:$0xf0] }
  0xef   :  { %3285 = vmatpush.bf16.msra.mxu2 %v5240_v36  ;;  %v6303_v36 = vld [vmem:[%s9523_s3 + $0x48c] sm:$0xf0]  ;;  %v5352_v62 = vor.u32 %v6295_v58, %v5351_v55  ;;  %v6213_v48 = vld [vmem:[%s9523_s3 + $0x1c4] sm:$0xf] }
  0xf0   :  { %3260 = vmatpush.bf16.msra.mxu0 %v4968_v43  ;;  %3250 = vmatmul.bf16.vlgmr.msra.gmra.mxu3 %v7988_v21  ;;  %v1403_v37 = vpop.f32.mrf.mxu0  ;;  %v1418_v39 = vpop.f32.mrf.mxu1  ;;  %v5384_v43 = vor.u32 %v6303_v36, %v5383_v31  ;;  %v6327_v0 = vld [vmem:[%s9523_s3 + $0x54c] sm:$0xf0]  ;;  %v5049_v31 = vld [vmem:[%s9523_s3 + $0x1f0] sm:$0xf0] }
  0xf1   :  { %3294 = vmatpush.bf16.msrb.mxu3 %v5432_v4  ;;  %v1404_v41 = vadd.f32 %v1403_v37, %v1391_v30  ;;  %v6291_v4 = vld [vmem:[%s9523_s3 + $0x42c] sm:$0xf0]  ;;  %v5480_v7 = vor.u32 %v6327_v0, %v5479_v63  ;;  %v4905_v36 = vld [vmem:[%s9523_s3 + $0xd0] sm:$0xf0]  ;;  %v5655_v37 = vld [vmem:[%s9523_s3 + $0x6a0] sm:$0xf]  ;;  %v5052_v45 = vor.u32 %v6217_v35, %v5049_v31 }
  0xf2   :  { %3272 = vmatpush.bf16.msra.mxu1 %v5112_v49  ;;  %v234_v49 = vperm.slane %v7775_v19, 3  ;;  %v6379_v33 = vld [vmem:[%s9523_s3 + $0x6ec] sm:$0xf0]  ;;  %v5336_v10 = vor.u32 %v6291_v4, %v5335_v3  ;;  %v4873_v63 = vld [vmem:[%s9523_s3 + $0x90] sm:$0xf0] }
  0xf3   :  { %3286 = vmatpush.bf16.msra.mxu2 %v5224_v53  ;;  %v1417_v46 = vadd.f32 %v1416_v12, %v1404_v41  ;;  %v6331_v53 = vld [vmem:[%s9523_s3 + $0x56c] sm:$0xf0]  ;;  %v5688_v9 = vor.u32 %v6379_v33, %v5687_v5  ;;  %v5623_v0 = vld [vmem:[%s9523_s3 + $0x660] sm:$0xf] }
  0xf4   :  { %3261 = vmatpush.bf16.msra.mxu0 %v4952_v59  ;;  %v1429_v59 = vpop.f32.mrf.mxu3  ;;  %v5496_v57 = vor.u32 %v6331_v53, %v5495_v52  ;;  %v6323_v13 = vld [vmem:[%s9523_s3 + $0x52c] sm:$0xf0]  ;;  %v5815_v52 = vld [vmem:[%s9523_s3 + $0x7e0] sm:$0xf] }
  0xf5   :  { %3295 = vmatpush.bf16.msrb.mxu3 %v5416_v23  ;;  %v1682_v38 = vmax.f32 %v1417_v46, 0.0  ;;  %v1430_v60 = vadd.f32 %v1429_v59, %v234_v49  ;;  %v6287_v12 = vld [vmem:[%s9523_s3 + $0x40c] sm:$0xf0]  ;;  %v5464_v25 = vor.u32 %v6323_v13, %v5463_v11  ;;  %v4908_v46 = vor.u32 %v6181_v28, %v4905_v36  ;;  %v5799_v3 = vld [vmem:[%s9523_s3 + $0x7c0] sm:$0xf] }
  0xf6   :  { %3273 = vmatpush.bf16.msra.mxu1 %v5096_v1  ;;  %v6319_v30 = vld [vmem:[%s9523_s3 + $0x50c] sm:$0xf0]  ;;  %v4892_v59 = vor.u32 %v6177_v44, %v4889_v47  ;;  %v4857_v11 = vld [vmem:[%s9523_s3 + $0x70] sm:$0xf0]  ;;  %v5607_v13 = vld [vmem:[%s9523_s3 + $0x640] sm:$0xf] }
  0xf7   :  { %3287 = vmatpush.bf16.msra.mxu2 %v5208_v6  ;;  %v8038_v54 = vpack.c.bf16 %v1682_v38, %v1682_v38  ;;  %v6371_v39 = vld [vmem:[%s9523_s3 + $0x6ac] sm:$0xf0]  ;;  %v5033_v38 = vld [vmem:[%s9523_s3 + $0x1d0] sm:$0xf0]  ;;  %v5767_v36 = vld [vmem:[%s9523_s3 + $0x780] sm:$0xf] }
  0xf8   :  { %3262 = vmatpush.bf16.msra.mxu0 %v4936_v14  ;;  %v1405_v56 = vpop.f32.mrf.mxu0  ;;  %v5319_v14 = vld [vmem:[%s9523_s3 + $0x400] sm:$0xf]  ;;  %v6411_v55 = vld [vmem:[%s9523_s3 + $0x7ec] sm:$0xf0]  ;;  %v5036_v58 = vor.u32 %v6213_v48, %v5033_v38  ;;  %v4841_v28 = vld [vmem:[%s9523_s3 + $0x50] sm:$0xf0] }
  0xf9   :  { %3296 = vmatpush.bf16.msrb.mxu3 %v5400_v32  ;;  %v5320_v27 = vor.u32 %v6287_v12, %v5319_v14  ;;  %v5816_v56 = vor.u32 %v6411_v55, %v5815_v52  ;;  %v6407_v4 = vld [vmem:[%s9523_s3 + $0x7cc] sm:$0xf0]  ;;  %v4969_v44 = vld [vmem:[%s9523_s3 + $0x150] sm:$0xf0]  ;;  %v5575_v48 = vld [vmem:[%s9523_s3 + $0x600] sm:$0xf] }
  0xfa   :  { %3274 = vmatpush.bf16.msra.mxu1 %v5080_v16  ;;  %v1442_v61 = vpop.f32.mrf.mxu1  ;;  %v4921_v16 = vld [vmem:[%s9523_s3 + $0xf0] sm:$0xf0]  ;;  %v5800_v33 = vor.u32 %v6407_v4, %v5799_v3  ;;  %v6359_v14 = vld [vmem:[%s9523_s3 + $0x64c] sm:$0xf0]  ;;  %v6313_v4 = vld [vmem:[%s9523_s3 + $0x4e4] sm:$0xf] }
  0xfb   :  { %3288 = vmatpush.bf16.msra.mxu2 %v5192_v24  ;;  %3263 = vmatmul.bf16.vlgmr.msra.gmra.mxu0 %v8003_v22  ;;  %v1443_v2 = vadd.f32 %v1442_v61, %v1430_v60  ;;  %v4924_v34 = vor.u32 %v6185_v15, %v4921_v16  ;;  %v6173_v60 = vld [vmem:[%s9523_s3 + $0x84] sm:$0xf]  ;;  %v5608_v15 = vor.u32 %v6359_v14, %v5607_v13  ;;  %v4825_v47 = vld [vmem:[%s9523_s3 + $0x30] sm:$0xf0]  ;;  %v6351_v38 = vld [vmem:[%s9523_s3 + $0x60c] sm:$0xf0] }
  0xfc   :  { %3307 = vmatpush.bf16.msrb.mxu0 %v5560_v20  ;;  %v1431_v17 = vpop.f32.mrf.mxu3  ;;  %v6375_v20 = vld [vmem:[%s9523_s3 + $0x6cc] sm:$0xf0]  ;;  %v5177_v52 = vld [vmem:[%s9523_s3 + $0x2f0] sm:$0xf0]  ;;  %v5735_v13 = vld [vmem:[%s9523_s3 + $0x740] sm:$0xf] }
  0xfd   :  { %3297 = vmatpush.bf16.msrb.mxu3 %v5384_v43  ;;  %v1455_v1 = vpop.f32.mrf.mxu2  ;;  %v5672_v26 = vor.u32 %v6375_v20, %v5671_v18  ;;  %v5656_v43 = vor.u32 %v6371_v39, %v5655_v37  ;;  %v5783_v17 = vld [vmem:[%s9523_s3 + $0x7a0] sm:$0xf]  ;;  %v6403_v18 = vld [vmem:[%s9523_s3 + $0x7ac] sm:$0xf0]  ;;  %v4809_v3 = vld [vmem:[%s9523_s3 + $0x10] sm:$0xf0] }
  0xfe   :  { %3275 = vmatpush.bf16.msra.mxu1 %v5064_v29  ;;  %v1456_v6 = vadd.f32 %v1455_v1, %v1443_v2  ;;  %v5447_v29 = vld [vmem:[%s9523_s3 + $0x500] sm:$0xf]  ;;  %v6363_v1 = vld [vmem:[%s9523_s3 + $0x66c] sm:$0xf0] }
  0xff   :  { %3333 = vmatpush.bf16.msrb.mxu2 %v5816_v56  ;;  %v5624_v2 = vor.u32 %v6363_v1, %v5623_v0  ;;  %v6399_v37 = vld [vmem:[%s9523_s3 + $0x78c] sm:$0xf0]  ;;  %v5751_v56 = vld [vmem:[%s9523_s3 + $0x760] sm:$0xf] }
 0x100   :  { %3308 = vmatpush.bf16.msrb.mxu0 %v5544_v8  ;;  %v1468_v40 = vpop.f32.mrf.mxu0  ;;  %v6391_v14 = vld [vmem:[%s9523_s3 + $0x74c] sm:$0xf0] }
 0x101   :  { %3276 = vmatmul.bf16.vlgmr.msra.gmra.mxu1 %v8038_v54  ;;  %3298 = vmatpush.bf16.msrb.mxu3 %v5368_v51  ;;  %v1469_v23 = vadd.f32 %v1468_v40, %v1456_v6  ;;  %v6367_v51 = vld [vmem:[%s9523_s3 + $0x68c] sm:$0xf0]  ;;  %v4876_v6 = vor.u32 %v6173_v60, %v4873_v63  ;;  %v235_v40 = vperm.slane %v7775_v19, 4  ;;  %v4953_v63 = vld [vmem:[%s9523_s3 + $0x130] sm:$0xf0] }
 0x102   :  { %3320 = vmatpush.bf16.msrb.mxu1 %v5688_v9  ;;  %v1444_v24 = vpop.f32.mrf.mxu1  ;;  %v6205_v9 = vld [vmem:[%s9523_s3 + $0x184] sm:$0xf] }
 0x103   :  { %v1683_v8 = vmax.f32 %v1469_v23, 0.0  ;;  %3334 = vmatpush.bf16.msrb.mxu2 %v5800_v33  ;;  %v6165_v23 = vld [vmem:[%s9523_s3 + $0x44] sm:$0xf] }
 0x104   :  { %3309 = vmatpush.bf16.msrb.mxu0 %v5528_v42  ;;  %v5448_v42 = vor.u32 %v6319_v30, %v5447_v29  ;;  %v5591_v29 = vld [vmem:[%s9523_s3 + $0x620] sm:$0xf]  ;;  %v6355_v30 = vld [vmem:[%s9523_s3 + $0x62c] sm:$0xf0]  ;;  %v4844_v39 = vor.u32 %v6165_v23, %v4841_v28  ;;  %v5417_v23 = vld [vmem:[%s9523_s3 + $0x4d0] sm:$0xf0] }
 0x105   :  { %3299 = vmatpush.bf16.msrb.mxu3 %v5352_v62  ;;  %v1457_v32 = vpop.f32.mrf.mxu2  ;;  %v8113_v41 = vpack.c.bf16 %v1683_v8, %v1683_v8  ;;  %v5017_v62 = vld [vmem:[%s9523_s3 + $0x1b0] sm:$0xf0]  ;;  %v5719_v28 = vld [vmem:[%s9523_s3 + $0x720] sm:$0xf] }
 0x106   :  { %3321 = vmatpush.bf16.msrb.mxu1 %v5672_v26  ;;  %v4985_v26 = vld [vmem:[%s9523_s3 + $0x170] sm:$0xf0]  ;;  %v5592_v32 = vor.u32 %v6355_v30, %v5591_v29  ;;  %v6387_v29 = vld [vmem:[%s9523_s3 + $0x72c] sm:$0xf0] }
 0x107   :  { %3289 = vmatmul.bf16.vlgmr.msra.gmra.mxu2 %v8113_v41 }
 0x108   :  { %3310 = vmatpush.bf16.msrb.mxu0 %v5512_v50  ;;  %v1470_v49 = vpop.f32.mrf.mxu0  ;;  %v5639_v50 = vld [vmem:[%s9523_s3 + $0x680] sm:$0xf] }
 0x109   :  { %3300 = vmatpush.bf16.msrb.mxu3 %v5336_v10  ;;  %v5640_v53 = vor.u32 %v6367_v51, %v5639_v50  ;;  %v5001_v10 = vld [vmem:[%s9523_s3 + $0x190] sm:$0xf0]  ;;  %v5576_v50 = vor.u32 %v6351_v38, %v5575_v48  ;;  %v6249_v51 = vld [vmem:[%s9523_s3 + $0x2e4] sm:$0xf] }
 0x10a   :  { %3322 = vmatpush.bf16.msrb.mxu1 %v5656_v43  ;;  %v5004_v16 = vor.u32 %v6205_v9, %v5001_v10  ;;  %v6197_v43 = vld [vmem:[%s9523_s3 + $0x144] sm:$0xf] }
 0x10b   :  { %v4972_v55 = vor.u32 %v6197_v43, %v4969_v44  ;;  %v6383_v43 = vld [vmem:[%s9523_s3 + $0x70c] sm:$0xf0]  ;;  %v6301_v48 = vld [vmem:[%s9523_s3 + $0x484] sm:$0xf] }
 0x10c   :  { %3311 = vmatpush.bf16.msrb.mxu0 %v5496_v57  ;;  %v6209_v57 = vld [vmem:[%s9523_s3 + $0x1a4] sm:$0xf] }
 0x10d   :  { %3301 = vmatpush.bf16.msrb.mxu3 %v5320_v27  ;;  %v8143_v61 = vpop.f32.mrf.mxu2  ;;  %v5020_v5 = vor.u32 %v6209_v57, %v5017_v62  ;;  %v5784_v27 = vor.u32 %v6403_v18, %v5783_v17  ;;  %v6193_v62 = vld [vmem:[%s9523_s3 + $0x124] sm:$0xf] }
 0x10e   :  { %3323 = vmatpush.bf16.msrb.mxu1 %v5640_v53  ;;  %v4956_v10 = vor.u32 %v6193_v62, %v4953_v63  ;;  %v5369_v62 = vld [vmem:[%s9523_s3 + $0x470] sm:$0xf0] }
 0x10f   :  { %v1481_v8 = vpop.f32.mrf.mxu3  ;;  %3335 = vmatpush.bf16.msrb.mxu2 %v5784_v27  ;;  %v5097_v63 = vld [vmem:[%s9523_s3 + $0x250] sm:$0xf0] }
 0x110   :  { %3312 = vmatpush.bf16.msrb.mxu0 %v5480_v7  ;;  %v6169_v7 = vld [vmem:[%s9523_s3 + $0x64] sm:$0xf] }
 0x111   :  { %3346 = vmatpush.bf16.msra.mxu3 %v4924_v34  ;;  %v4860_v20 = vor.u32 %v6169_v7, %v4857_v11  ;;  %v1482_v34 = vadd.f32 %v1481_v8, %v235_v40  ;;  %v4937_v40 = vld [vmem:[%s9523_s3 + $0x110] sm:$0xf0]  ;;  %v5720_v8 = vor.u32 %v6387_v29, %v5719_v28 }
 0x112   :  { %3324 = vmatpush.bf16.msrb.mxu1 %v5624_v2  ;;  %v6157_v2 = vld [vmem:[%s9523_s3 + $0x4] sm:$0xf] }
 0x114   :  { %3313 = vmatpush.bf16.msrb.mxu0 %v5464_v25  ;;  %v1494_v12 = vpop.f32.mrf.mxu0  ;;  %v6201_v25 = vld [vmem:[%s9523_s3 + $0x164] sm:$0xf] }
 0x115   :  { %3347 = vmatpush.bf16.msra.mxu3 %v4908_v46  ;;  %v1522_v24 = vpop.f32.mrf.mxu2  ;;  %v4988_v31 = vor.u32 %v6201_v25, %v4985_v26  ;;  %v1495_v46 = vadd.f32 %v1494_v12, %v1482_v34  ;;  %v4812_v12 = vor.u32 %v6157_v2, %v4809_v3  ;;  %v5145_v25 = vld [vmem:[%s9523_s3 + $0x2b0] sm:$0xf0]  ;;  %v6305_v34 = vld [vmem:[%s9523_s3 + $0x4a4] sm:$0xf] }
 0x116   :  { %3325 = vmatpush.bf16.msrb.mxu1 %v5608_v15  ;;  %v6189_v15 = vld [vmem:[%s9523_s3 + $0x104] sm:$0xf] }
 0x117   :  { %v1483_v33 = vpop.f32.mrf.mxu3  ;;  %v6241_v24 = vld [vmem:[%s9523_s3 + $0x2a4] sm:$0xf]  ;;  %v4940_v26 = vor.u32 %v6189_v15, %v4937_v40 }
 0x118   :  { %3314 = vmatpush.bf16.msrb.mxu0 %v5448_v42  ;;  %v6161_v42 = vld [vmem:[%s9523_s3 + $0x24] sm:$0xf]  ;;  %v5148_v27 = vor.u32 %v6241_v24, %v5145_v25  ;;  %v5065_v24 = vld [vmem:[%s9523_s3 + $0x210] sm:$0xf0] }
 0x119   :  { %3348 = vmatpush.bf16.msra.mxu3 %v4892_v59  ;;  %v6395_v59 = vld [vmem:[%s9523_s3 + $0x76c] sm:$0xf0]  ;;  %v4828_v60 = vor.u32 %v6161_v42, %v4825_v47  ;;  %v5703_v42 = vld [vmem:[%s9523_s3 + $0x700] sm:$0xf]  ;;  %v6289_v40 = vld [vmem:[%s9523_s3 + $0x424] sm:$0xf] }
 0x11a   :  { %v1507_v35 = vpop.f32.mrf.mxu1  ;;  %3326 = vmatpush.bf16.msrb.mxu1 %v5592_v32  ;;  %v5752_v0 = vor.u32 %v6395_v59, %v5751_v56  ;;  %v5704_v44 = vor.u32 %v6383_v43, %v5703_v42  ;;  %v6297_v59 = vld [vmem:[%s9523_s3 + $0x464] sm:$0xf] }
 0x11b   :  { %v1508_v53 = vadd.f32 %v1507_v35, %v1495_v46  ;;  %v5401_v35 = vld [vmem:[%s9523_s3 + $0x4b0] sm:$0xf0]  ;;  %v5372_v33 = vor.u32 %v6297_v59, %v5369_v62  ;;  %v6345_v25 = vld [vmem:[%s9523_s3 + $0x5e4] sm:$0xf] }
 0x11c   :  { %3359 = vmatpush.bf16.msra.mxu0 %v5052_v45  ;;  %v5768_v45 = vor.u32 %v6399_v37, %v5767_v36  ;;  %v1496_v49 = vpop.f32.mrf.mxu0  ;;  %v5129_v36 = vld [vmem:[%s9523_s3 + $0x290] sm:$0xf0]  ;;  %v5404_v47 = vor.u32 %v6305_v34, %v5401_v35 }
 0x11d   :  { %3349 = vmatpush.bf16.msra.mxu3 %v4876_v6  ;;  %v1521_v1 = vadd.f32 %v8143_v61, %v1508_v53  ;;  %v6245_v61 = vld [vmem:[%s9523_s3 + $0x2c4] sm:$0xf]  ;;  %v5161_v6 = vld [vmem:[%s9523_s3 + $0x2d0] sm:$0xf0]  ;;  %v236_v53 = vperm.slane %v7775_v19, 5 }
 0x11e   :  { %3336 = vmatpush.bf16.msrb.mxu2 %v5768_v45  ;;  %3327 = vmatpush.bf16.msrb.mxu1 %v5576_v50  ;;  %v5164_v11 = vor.u32 %v6245_v61, %v5161_v6  ;;  %v6281_v45 = vld [vmem:[%s9523_s3 + $0x3e4] sm:$0xf]  ;;  %v5305_v46 = vld [vmem:[%s9523_s3 + $0x3f0] sm:$0xf0] }
 0x11f   :  { %v1684_v7 = vmax.f32 %v1521_v1, 0.0  ;;  %v5308_v38 = vor.u32 %v6281_v45, %v5305_v46  ;;  %v5385_v49 = vld [vmem:[%s9523_s3 + $0x490] sm:$0xf0]  ;;  %v6233_v50 = vld [vmem:[%s9523_s3 + $0x264] sm:$0xf] }
 0x120   :  { %3360 = vmatpush.bf16.msra.mxu0 %v5036_v58  ;;  %v5180_v58 = vor.u32 %v6249_v51, %v5177_v52  ;;  %v5113_v51 = vld [vmem:[%s9523_s3 + $0x270] sm:$0xf0]  ;;  %v5388_v56 = vor.u32 %v6301_v48, %v5385_v49  ;;  %v6229_v19 = vld [vmem:[%s9523_s3 + $0x244] sm:$0xf]  ;;  %v4927_v45 = vld [vmem:[%s9523_s3 + $0xe8] sm:$0xf] }
 0x121   :  { %3350 = vmatpush.bf16.msra.mxu3 %v4860_v20  ;;  %v8245_v57 = vpop.f32.mrf.mxu2  ;;  %v8284_v17 = vpack.c.bf16 %v1684_v7, %v1684_v7  ;;  %v6309_v20 = vld [vmem:[%s9523_s3 + $0x4c4] sm:$0xf]  ;;  %v5116_v52 = vor.u32 %v6233_v50, %v5113_v51  ;;  %v5100_v1 = vor.u32 %v6229_v19, %v5097_v63  ;;  %v6188_v46 = vld [vmem:[%s9523_s3 + $0xf4] sm:$0xf0]  ;;  %v5545_v48 = vld [vmem:[%s9523_s3 + $0x5d0] sm:$0xf0] }
 0x122   :  { %3372 = vmatpush.bf16.msra.mxu1 %v5180_v58  ;;  %3337 = vmatpush.bf16.msrb.mxu2 %v5752_v0  ;;  %v1509_v9 = vpop.f32.mrf.mxu1  ;;  %v5420_v32 = vor.u32 %v6309_v20, %v5417_v23  ;;  %v5289_v58 = vld [vmem:[%s9523_s3 + $0x3d0] sm:$0xf0]  ;;  %v1534_v2 = vadd.f32 %v8245_v57, %v236_v53  ;;  %v6293_v61 = vld [vmem:[%s9523_s3 + $0x444] sm:$0xf] }
 0x123   :  { %3302 = vmatmul.bf16.vlgmr.msrb.gmra.mxu3 %v8284_v17  ;;  %v5353_v57 = vld [vmem:[%s9523_s3 + $0x450] sm:$0xf0]  ;;  %v6225_v7 = vld [vmem:[%s9523_s3 + $0x224] sm:$0xf] }
 0x124   :  { %3361 = vmatpush.bf16.msra.mxu0 %v5020_v5  ;;  %v5433_v5 = vld [vmem:[%s9523_s3 + $0x4f0] sm:$0xf0]  ;;  %v5356_v15 = vor.u32 %v6293_v61, %v5353_v57  ;;  %v6221_v23 = vld [vmem:[%s9523_s3 + $0x204] sm:$0xf] }
 0x125   :  { %3351 = vmatpush.bf16.msra.mxu3 %v4844_v39  ;;  %v5436_v18 = vor.u32 %v6313_v4, %v5433_v5  ;;  %v6273_v4 = vld [vmem:[%s9523_s3 + $0x3a4] sm:$0xf]  ;;  %v5273_v5 = vld [vmem:[%s9523_s3 + $0x3b0] sm:$0xf0] }
 0x126   :  { %3373 = vmatpush.bf16.msra.mxu1 %v5164_v11  ;;  %v5276_v6 = vor.u32 %v6273_v4, %v5273_v5  ;;  %v5081_v9 = vld [vmem:[%s9523_s3 + $0x230] sm:$0xf0]  ;;  %v6257_v19 = vld [vmem:[%s9523_s3 + $0x324] sm:$0xf]  ;;  %v4895_v5 = vld [vmem:[%s9523_s3 + $0xa8] sm:$0xf] }
 0x127   :  { %v5084_v11 = vor.u32 %v6225_v7, %v5081_v9  ;;  %v5337_v20 = vld [vmem:[%s9523_s3 + $0x430] sm:$0xf0]  ;;  %v6333_v4 = vld [vmem:[%s9523_s3 + $0x584] sm:$0xf] }
 0x128   :  { %3362 = vmatpush.bf16.msra.mxu0 %v5004_v16  ;;  %v5736_v16 = vor.u32 %v6391_v14, %v5735_v13  ;;  %v6269_v14 = vld [vmem:[%s9523_s3 + $0x384] sm:$0xf]  ;;  %v5340_v34 = vor.u32 %v6289_v40, %v5337_v20  ;;  %v5225_v49 = vld [vmem:[%s9523_s3 + $0x350] sm:$0xf0] }
 0x129   :  { %3352 = vmatpush.bf16.msra.mxu3 %v4828_v60  ;;  %v1535_v30 = vpop.f32.mrf.mxu2  ;;  %v5529_v62 = vld [vmem:[%s9523_s3 + $0x5b0] sm:$0xf0]  ;;  %v6450_v7 = vld [vmem:[%s9524_s2] sm:$0xff] }
 0x12a   :  { %3338 = vmatpush.bf16.msrb.mxu2 %v5736_v16  ;;  %3374 = vmatpush.bf16.msra.mxu1 %v5148_v27  ;;  %v8317_v37 = vpop.f32.mrf.mxu1  ;;  %v5068_v27 = vor.u32 %v6221_v23, %v5065_v24  ;;  %v5561_v30 = vld [vmem:[%s9523_s3 + $0x5f0] sm:$0xf0]  ;;  %v237_v9 = vperm.slane %v6450_v7, 6  ;;  %v6329_v40 = vld [vmem:[%s9523_s3 + $0x564] sm:$0xf] }
 0x12b   :  { %v5564_v42 = vor.u32 %v6345_v25, %v5561_v30  ;;  %v5209_v63 = vld [vmem:[%s9523_s3 + $0x330] sm:$0xf0]  ;;  %v4863_v24 = vld [vmem:[%s9523_s3 + $0x68] sm:$0xf]  ;;  %v6172_v25 = vld [vmem:[%s9523_s3 + $0x74] sm:$0xf0] }
 0x12c   :  { %3363 = vmatpush.bf16.msra.mxu0 %v4988_v31  ;;  %v6237_v31 = vld [vmem:[%s9523_s3 + $0x284] sm:$0xf]  ;;  %v5513_v61 = vld [vmem:[%s9523_s3 + $0x590] sm:$0xf0] }
 0x12d   :  { %3353 = vmatpush.bf16.msra.mxu3 %v4812_v12  ;;  %v5132_v39 = vor.u32 %v6237_v31, %v5129_v36  ;;  %v5257_v12 = vld [vmem:[%s9523_s3 + $0x390] sm:$0xf0]  ;;  %v6285_v36 = vld [vmem:[%s9523_s3 + $0x404] sm:$0xf] }
 0x12e   :  { %3339 = vmatpush.bf16.msrb.mxu2 %v5720_v8  ;;  %v5260_v16 = vor.u32 %v6269_v14, %v5257_v12  ;;  %v6265_v8 = vld [vmem:[%s9523_s3 + $0x364] sm:$0xf]  ;;  %v5193_v57 = vld [vmem:[%s9523_s3 + $0x310] sm:$0xf0]  ;;  %v4879_v14 = vld [vmem:[%s9523_s3 + $0x88] sm:$0xf] }
 0x12f   :  { %3375 = vmatpush.bf16.msra.mxu1 %v5132_v39  ;;  %v6176_v12 = vld [vmem:[%s9523_s3 + $0x94] sm:$0xf0] }
 0x130   :  { %3364 = vmatpush.bf16.msra.mxu0 %v4972_v55  ;;  %v6277_v55 = vld [vmem:[%s9523_s3 + $0x3c4] sm:$0xf]  ;;  %v4880_v20 = vor.u32 %v6176_v12, %v4879_v14 }
 0x131   :  { %3398 = vmatpush.bf16.msrb.mxu3 %v5436_v18  ;;  %v5292_v60 = vor.u32 %v6277_v55, %v5289_v58  ;;  %v6337_v55 = vld [vmem:[%s9523_s3 + $0x5a4] sm:$0xf]  ;;  %v4911_v58 = vld [vmem:[%s9523_s3 + $0xc8] sm:$0xf] }
 0x132   :  { %3340 = vmatpush.bf16.msrb.mxu2 %v5704_v44  ;;  %v1574_v0 = vpop.f32.mrf.mxu1  ;;  %v6341_v44 = vld [vmem:[%s9523_s3 + $0x5c4] sm:$0xf] }
 0x133   :  { %3376 = vmatpush.bf16.msra.mxu1 %v5116_v52  ;;  %3354 = vmatmul.bf16.vlgmr.msra.gmra.mxu3 %v7988_v21  ;;  %v4928_v52 = vor.u32 %v6188_v46, %v4927_v45  ;;  %v5548_v53 = vor.u32 %v6341_v44, %v5545_v48  ;;  %v5212_v0 = vor.u32 %v6257_v19, %v5209_v63  ;;  %v5689_v46 = vld [vmem:[%s9523_s3 + $0x6f0] sm:$0xf0]  ;;  %v4831_v48 = vld [vmem:[%s9523_s3 + $0x28] sm:$0xf]  ;;  %v6373_v63 = vld [vmem:[%s9523_s3 + $0x6c4] sm:$0xf] }
 0x134   :  { %3365 = vmatpush.bf16.msra.mxu0 %v4956_v10  ;;  %v1559_v3 = vpop.f32.mrf.mxu0  ;;  %v1546_v10 = vpop.f32.mrf.mxu3 }
 0x135   :  { %3399 = vmatpush.bf16.msrb.mxu3 %v5420_v32  ;;  %v1547_v13 = vadd.f32 %v1546_v10, %v1534_v2  ;;  %v5241_v32 = vld [vmem:[%s9523_s3 + $0x370] sm:$0xf0] }
 0x136   :  { %3385 = vmatpush.bf16.msra.mxu2 %v5308_v38  ;;  %v5244_v35 = vor.u32 %v6265_v8, %v5241_v32  ;;  %v6261_v38 = vld [vmem:[%s9523_s3 + $0x344] sm:$0xf]  ;;  %v4847_v8 = vld [vmem:[%s9523_s3 + $0x48] sm:$0xf]  ;;  %v6168_v32 = vld [vmem:[%s9523_s3 + $0x54] sm:$0xf0] }
 0x137   :  { %3377 = vmatpush.bf16.msra.mxu1 %v5100_v1  ;;  %v1560_v18 = vadd.f32 %v1559_v3, %v1547_v13  ;;  %v5228_v51 = vor.u32 %v6261_v38, %v5225_v49  ;;  %v5532_v3 = vor.u32 %v6337_v55, %v5529_v62  ;;  %v5516_v13 = vor.u32 %v6333_v4, %v5513_v61  ;;  %v6164_v38 = vld [vmem:[%s9523_s3 + $0x34] sm:$0xf0]  ;;  %v5055_v55 = vld [vmem:[%s9523_s3 + $0x1e8] sm:$0xf] }
 0x138   :  { %3366 = vmatpush.bf16.msra.mxu0 %v4940_v26  ;;  %v4815_v4 = vld [vmem:[%s9523_s3 + $0x8] sm:$0xf] }
 0x139   :  { %3400 = vmatpush.bf16.msrb.mxu3 %v5404_v47  ;;  %v1573_v28 = vadd.f32 %v8317_v37, %v1560_v18  ;;  %v5321_v37 = vld [vmem:[%s9523_s3 + $0x410] sm:$0xf0] }
 0x13a   :  { %3386 = vmatpush.bf16.msra.mxu2 %v5292_v60  ;;  %v5324_v50 = vor.u32 %v6285_v36, %v5321_v37  ;;  %v5465_v36 = vld [vmem:[%s9523_s3 + $0x530] sm:$0xf0] }
 0x13b   :  { %3378 = vmatpush.bf16.msra.mxu1 %v5084_v11  ;;  %v1685_v31 = vmax.f32 %v1573_v28, 0.0 }
 0x13c   :  { %v1561_v29 = vpop.f32.mrf.mxu0  ;;  %v1548_v43 = vpop.f32.mrf.mxu3 }
 0x13d   :  { %3401 = vmatpush.bf16.msrb.mxu3 %v5388_v56  ;;  %v8432_v47 = vpack.c.bf16 %v1685_v31, %v1685_v31  ;;  %v6184_v56 = vld [vmem:[%s9523_s3 + $0xd4] sm:$0xf0]  ;;  %v4864_v29 = vor.u32 %v6172_v25, %v4863_v24  ;;  %v6321_v31 = vld [vmem:[%s9523_s3 + $0x524] sm:$0xf] }
 0x13e   :  { %3387 = vmatpush.bf16.msra.mxu2 %v5276_v6  ;;  %v8403_v26 = vpop.f32.mrf.mxu1  ;;  %v4912_v1 = vor.u32 %v6184_v56, %v4911_v58  ;;  %v6253_v6 = vld [vmem:[%s9523_s3 + $0x304] sm:$0xf]  ;;  %v5468_v45 = vor.u32 %v6321_v31, %v5465_v36  ;;  %v6220_v58 = vld [vmem:[%s9523_s3 + $0x1f4] sm:$0xf0] }
 0x13f   :  { %3379 = vmatpush.bf16.msra.mxu1 %v5068_v27  ;;  %3315 = vmatmul.bf16.vlgmr.msrb.gmra.mxu0 %v8432_v47  ;;  %v5196_v10 = vor.u32 %v6253_v6, %v5193_v57  ;;  %v1586_v18 = vadd.f32 %v8403_v26, %v237_v9  ;;  %v6325_v27 = vld [vmem:[%s9523_s3 + $0x544] sm:$0xf]  ;;  %v5481_v26 = vld [vmem:[%s9523_s3 + $0x550] sm:$0xf0]  ;;  %v6216_v6 = vld [vmem:[%s9523_s3 + $0x1d4] sm:$0xf0] }
 0x140   :  { %3411 = vmatpush.bf16.msrb.mxu0 %v5564_v42  ;;  %v5484_v30 = vor.u32 %v6325_v27, %v5481_v26  ;;  %v4848_v42 = vor.u32 %v6168_v32, %v4847_v8  ;;  %v6377_v43 = vld [vmem:[%s9523_s3 + $0x6e4] sm:$0xf]  ;;  %v5439_v57 = vld [vmem:[%s9523_s3 + $0x4e8] sm:$0xf]  ;;  %v5641_v26 = vld [vmem:[%s9523_s3 + $0x690] sm:$0xf0] }
 0x141   :  { %3402 = vmatpush.bf16.msrb.mxu3 %v5372_v33  ;;  %v8421_v39 = vpop.f32.mrf.mxu2  ;;  %v6180_v33 = vld [vmem:[%s9523_s3 + $0xb4] sm:$0xf0]  ;;  %v5692_v56 = vor.u32 %v6377_v43, %v5689_v46  ;;  %v6365_v27 = vld [vmem:[%s9523_s3 + $0x684] sm:$0xf] }
 0x142   :  { %3388 = vmatpush.bf16.msra.mxu2 %v5260_v16  ;;  %v4896_v11 = vor.u32 %v6180_v33, %v4895_v5  ;;  %v5497_v16 = vld [vmem:[%s9523_s3 + $0x570] sm:$0xf0]  ;;  %v1599_v28 = vadd.f32 %v8421_v39, %v1586_v18  ;;  %v238_v39 = vperm.slane %v6450_v7, 7  ;;  %v6160_v5 = vld [vmem:[%s9523_s3 + $0x14] sm:$0xf0]  ;;  %v5644_v36 = vor.u32 %v6365_v27, %v5641_v26 }
 0x143   :  { %v5500_v23 = vor.u32 %v6329_v40, %v5497_v16  ;;  %v5039_v33 = vld [vmem:[%s9523_s3 + $0x1c8] sm:$0xf]  ;;  %v6316_v7 = vld [vmem:[%s9523_s3 + $0x4f4] sm:$0xf0]  ;;  %v6409_v8 = vld [vmem:[%s9523_s3 + $0x7e4] sm:$0xf] }
 0x144   :  { %v1624_v60 = vpop.f32.mrf.mxu0  ;;  %3412 = vmatpush.bf16.msrb.mxu0 %v5548_v53  ;;  %v5040_v12 = vor.u32 %v6216_v6, %v5039_v33  ;;  %v5023_v40 = vld [vmem:[%s9523_s3 + $0x1a8] sm:$0xf]  ;;  %v6212_v18 = vld [vmem:[%s9523_s3 + $0x1b4] sm:$0xf0]  ;;  %v6361_v43 = vld [vmem:[%s9523_s3 + $0x664] sm:$0xf] }
 0x145   :  { %3403 = vmatpush.bf16.msrb.mxu3 %v5356_v15  ;;  %v6208_v31 = vld [vmem:[%s9523_s3 + $0x194] sm:$0xf0]  ;;  %v5183_v27 = vld [vmem:[%s9523_s3 + $0x2e8] sm:$0xf] }
 0x146   :  { %3389 = vmatpush.bf16.msra.mxu2 %v5244_v35  ;;  %v1587_v59 = vpop.f32.mrf.mxu1  ;;  %v6300_v6 = vld [vmem:[%s9523_s3 + $0x474] sm:$0xf0] }
 0x147   :  { %v4832_v59 = vor.u32 %v6164_v38, %v4831_v48  ;;  %v6405_v48 = vld [vmem:[%s9523_s3 + $0x7c4] sm:$0xf] }
 0x148   :  { %3413 = vmatpush.bf16.msrb.mxu0 %v5532_v3  ;;  %v5056_v3 = vor.u32 %v6220_v58, %v5055_v55  ;;  %v5391_v55 = vld [vmem:[%s9523_s3 + $0x488] sm:$0xf]  ;;  %v6304_v58 = vld [vmem:[%s9523_s3 + $0x494] sm:$0xf0] }
 0x149   :  { %3404 = vmatpush.bf16.msrb.mxu3 %v5340_v34  ;;  %v1600_v2 = vpop.f32.mrf.mxu2 }
 0x14a   :  { %3390 = vmatpush.bf16.msra.mxu2 %v5228_v51  ;;  %v5449_v51 = vld [vmem:[%s9523_s3 + $0x510] sm:$0xf0] }
 0x14c   :  { %v1626_v15 = vpop.f32.mrf.mxu0  ;;  %3414 = vmatpush.bf16.msrb.mxu0 %v5516_v13  ;;  %v5657_v13 = vld [vmem:[%s9523_s3 + $0x6b0] sm:$0xf0] }
 0x14d   :  { %3405 = vmatpush.bf16.msrb.mxu3 %v5324_v50  ;;  %v6317_v50 = vld [vmem:[%s9523_s3 + $0x504] sm:$0xf]  ;;  %v5440_v15 = vor.u32 %v6316_v7, %v5439_v57  ;;  %v5593_v7 = vld [vmem:[%s9523_s3 + $0x630] sm:$0xf0] }
 0x14e   :  { %3391 = vmatpush.bf16.msra.mxu2 %v5212_v0  ;;  %v5452_v19 = vor.u32 %v6317_v50, %v5449_v51  ;;  %v5673_v0 = vld [vmem:[%s9523_s3 + $0x6d0] sm:$0xf0]  ;;  %v4991_v51 = vld [vmem:[%s9523_s3 + $0x168] sm:$0xf]  ;;  %v6353_v57 = vld [vmem:[%s9523_s3 + $0x624] sm:$0xf] }
 0x14f   :  { %3367 = vmatmul.bf16.vlgmr.msra.gmra.mxu0 %v8003_v22  ;;  %v1611_v34 = vpop.f32.mrf.mxu3  ;;  %v5676_v9 = vor.u32 %v6373_v63, %v5673_v0  ;;  %v5801_v50 = vld [vmem:[%s9523_s3 + $0x7d0] sm:$0xf0]  ;;  %v6401_v0 = vld [vmem:[%s9523_s3 + $0x7a4] sm:$0xf] }
 0x150   :  { %3406 = vmatmul.bf16.vlgmr.msrb.gmra.mxu3 %v8284_v17  ;;  %3415 = vmatpush.bf16.msrb.mxu0 %v5500_v23  ;;  %v1612_v37 = vadd.f32 %v1611_v34, %v1599_v28  ;;  %v6312_v23 = vld [vmem:[%s9523_s3 + $0x4d4] sm:$0xf0]  ;;  %v5817_v34 = vld [vmem:[%s9523_s3 + $0x7f0] sm:$0xf0] }
 0x151   :  { %3450 = vmatpush.bf16.msra.mxu3 %v4928_v52 }
 0x152   :  { %3392 = vmatpush.bf16.msra.mxu2 %v5196_v10  ;;  %v1625_v44 = vadd.f32 %v1624_v60, %v1612_v37  ;;  %v4816_v10 = vor.u32 %v6160_v5, %v4815_v4  ;;  %v5407_v37 = vld [vmem:[%s9523_s3 + $0x4a8] sm:$0xf]  ;;  %v6200_v4 = vld [vmem:[%s9523_s3 + $0x154] sm:$0xf0]  ;;  %v1952_v5 = vld [vmem:[%s9525_s4] sm:$0xf] }
 0x154   :  { %3416 = vmatpush.bf16.msrb.mxu0 %v5484_v30  ;;  %v1686_v52 = vmax.f32 %v1625_v44, 0.0  ;;  %v5625_v44 = vld [vmem:[%s9523_s3 + $0x670] sm:$0xf0] }
 0x155   :  { %3451 = vmatpush.bf16.msra.mxu3 %v4912_v1 }
 0x156   :  { %v8547_v60 = vpack.c.bf16 %v1686_v52, %v1686_v52  ;;  %v6204_v52 = vld [vmem:[%s9523_s3 + $0x174] sm:$0xf0] }
 0x157   :  { %v1613_v1 = vpop.f32.mrf.mxu3  ;;  %v4992_v63 = vor.u32 %v6204_v52, %v4991_v51  ;;  %v6248_v51 = vld [vmem:[%s9523_s3 + $0x2d4] sm:$0xf0] }
 0x158   :  { %v1637_v35 = vpop.f32.mrf.mxu0  ;;  %3417 = vmatpush.bf16.msrb.mxu0 %v5468_v45  ;;  %3328 = vmatmul.bf16.vlgmr.msrb.gmra.mxu1 %v8547_v60  ;;  %v5820_v45 = vor.u32 %v6409_v8, %v5817_v34  ;;  %v5785_v1 = vld [vmem:[%s9523_s3 + $0x7b0] sm:$0xf0]  ;;  %v6393_v8 = vld [vmem:[%s9523_s3 + $0x764] sm:$0xf] }
 0x159   :  { %3452 = vmatpush.bf16.msra.mxu3 %v4896_v11  ;;  %v1638_v53 = vadd.f32 %v1637_v35, %v238_v39  ;;  %3424 = vmatpush.bf16.msrb.mxu1 %v5692_v56  ;;  %v6369_v11 = vld [vmem:[%s9523_s3 + $0x6a4] sm:$0xf]  ;;  %v5007_v35 = vld [vmem:[%s9523_s3 + $0x188] sm:$0xf]  ;;  %v6308_v39 = vld [vmem:[%s9523_s3 + $0x4b4] sm:$0xf0] }
 0x15a   :  { %v5660_v24 = vor.u32 %v6369_v11, %v5657_v13  ;;  %v5008_v46 = vor.u32 %v6208_v31, %v5007_v35  ;;  %v6357_v56 = vld [vmem:[%s9523_s3 + $0x644] sm:$0xf]  ;;  %v1954_v11 = vperm.slane %v1952_v5, 0  ;;  %v4943_v31 = vld [vmem:[%s9523_s3 + $0x108] sm:$0xf] }
 0x15b   :  { %v6397_v13 = vld [vmem:[%s9523_s3 + $0x784] sm:$0xf] }
 0x15c   :  { %3418 = vmatpush.bf16.msrb.mxu0 %v5452_v19  ;;  %v5804_v19 = vor.u32 %v6405_v48, %v5801_v50  ;;  %v5167_v50 = vld [vmem:[%s9523_s3 + $0x2c8] sm:$0xf] }
 0x15d   :  { %3453 = vmatpush.bf16.msra.mxu3 %v4880_v20  ;;  %v5423_v20 = vld [vmem:[%s9523_s3 + $0x4c8] sm:$0xf]  ;;  %3425 = vmatpush.bf16.msrb.mxu1 %v5676_v9  ;;  %v5788_v9 = vor.u32 %v6401_v0, %v5785_v1  ;;  %v5168_v1 = vor.u32 %v6248_v51, %v5167_v50  ;;  %v6174_v50 = vld [vmem:[%s9523_s3 + $0x8c] sm:$0xf]  ;;  %v4881_v51 = vld [vmem:[%s9523_s3 + $0x98] sm:$0xf0] }
 0x15e   :  { %v1650_v49 = vpop.f32.mrf.mxu1  ;;  %v5424_v30 = vor.u32 %v6312_v23, %v5423_v20  ;;  %v5359_v20 = vld [vmem:[%s9523_s3 + $0x448] sm:$0xf]  ;;  %v6296_v23 = vld [vmem:[%s9523_s3 + $0x454] sm:$0xf0] }
 0x15f   :  { %v1651_v61 = vadd.f32 %v1650_v49, %v1638_v53  ;;  %3419 = vmatmul.bf16.vlgmr.msrb.gmra.mxu0 %v8432_v47  ;;  %v1676_v28 = vpop.f32.mrf.mxu3  ;;  %v5408_v49 = vor.u32 %v6308_v39, %v5407_v37  ;;  %v5628_v53 = vor.u32 %v6361_v43, %v5625_v44  ;;  %v5360_v35 = vor.u32 %v6296_v23, %v5359_v20  ;;  %v5343_v37 = vld [vmem:[%s9523_s3 + $0x428] sm:$0xf]  ;;  %v6348_v44 = vld [vmem:[%s9523_s3 + $0x5f4] sm:$0xf0] }
 0x160   :  { %v1639_v2 = vpop.f32.mrf.mxu0  ;;  %3463 = vmatpush.bf16.msra.mxu0 %v5056_v3  ;;  %v4975_v3 = vld [vmem:[%s9523_s3 + $0x148] sm:$0xf]  ;;  %v6240_v20 = vld [vmem:[%s9523_s3 + $0x294] sm:$0xf0] }
 0x161   :  { %3454 = vmatpush.bf16.msra.mxu3 %v4864_v29  ;;  %v1663_v62 = vpop.f32.mrf.mxu2  ;;  %v5024_v29 = vor.u32 %v6212_v18, %v5023_v40  ;;  %3426 = vmatpush.bf16.msrb.mxu1 %v5660_v24  ;;  %v5392_v2 = vor.u32 %v6304_v58, %v5391_v55  ;;  %v4959_v40 = vld [vmem:[%s9523_s3 + $0x128] sm:$0xf]  ;;  %v5596_v18 = vor.u32 %v6353_v57, %v5593_v7  ;;  %v6349_v24 = vld [vmem:[%s9523_s3 + $0x604] sm:$0xf] }
 0x162   :  { %v1664_v16 = vadd.f32 %v1663_v62, %v1651_v61  ;;  %v5375_v61 = vld [vmem:[%s9523_s3 + $0x468] sm:$0xf]  ;;  %v6389_v58 = vld [vmem:[%s9523_s3 + $0x744] sm:$0xf] }
 0x163   :  { %v5567_v43 = vld [vmem:[%s9523_s3 + $0x5e8] sm:$0xf] }
 0x164   :  { %3464 = vmatpush.bf16.msra.mxu0 %v5040_v12  ;;  %v1677_v32 = vadd.f32 %v1676_v28, %v1664_v16  ;;  %v5376_v12 = vor.u32 %v6300_v6, %v5375_v61  ;;  %v6196_v16 = vld [vmem:[%s9523_s3 + $0x134] sm:$0xf0]  ;;  %v5568_v55 = vor.u32 %v6348_v44, %v5567_v43  ;;  %v5151_v61 = vld [vmem:[%s9523_s3 + $0x2a8] sm:$0xf] }
 0x165   :  { %3455 = vmatpush.bf16.msra.mxu3 %v4848_v42  ;;  %3427 = vmatpush.bf16.msrb.mxu1 %v5644_v36  ;;  %v6192_v36 = vld [vmem:[%s9523_s3 + $0x114] sm:$0xf0]  ;;  %v5295_v43 = vld [vmem:[%s9523_s3 + $0x3c8] sm:$0xf] }
 0x166   :  { %v1652_v14 = vpop.f32.mrf.mxu1  ;;  %v1687_v42 = vmax.f32 %v1677_v32, 0.0  ;;  %v5753_v32 = vld [vmem:[%s9523_s3 + $0x770] sm:$0xf0]  ;;  %v6244_v6 = vld [vmem:[%s9523_s3 + $0x2b4] sm:$0xf0] }
 0x167   :  { %v1678_v62 = vpop.f32.mrf.mxu3  ;;  %v5756_v48 = vor.u32 %v6393_v8, %v5753_v32 }
 0x168   :  { %3465 = vmatpush.bf16.msra.mxu0 %v5024_v29  ;;  %v8627_v38 = vpack.c.bf16 %v1687_v42, %v1687_v42  ;;  %3380 = vmatmul.bf16.vlgmr.msra.gmra.mxu1 %v8038_v54  ;;  %v4960_v29 = vor.u32 %v6196_v16, %v4959_v40  ;;  %v6292_v42 = vld [vmem:[%s9523_s3 + $0x434] sm:$0xf0]  ;;  %v4913_v40 = vld [vmem:[%s9523_s3 + $0xd8] sm:$0xf0] }
 0x169   :  { %3456 = vmatpush.bf16.msra.mxu3 %v4832_v59  ;;  %v1665_v25 = vpop.f32.mrf.mxu2  ;;  %v5609_v59 = vld [vmem:[%s9523_s3 + $0x650] sm:$0xf0]  ;;  %3428 = vmatpush.bf16.msrb.mxu1 %v5628_v53  ;;  %v5344_v53 = vor.u32 %v6292_v42, %v5343_v37  ;;  %v6288_v62 = vld [vmem:[%s9523_s3 + $0x414] sm:$0xf0] }
 0x16a   :  { %3341 = vmatmul.bf16.vlgmr.msrb.gmra.mxu2 %v8627_v38  ;;  %v5612_v33 = vor.u32 %v6357_v56, %v5609_v59  ;;  %v5577_v25 = vld [vmem:[%s9523_s3 + $0x610] sm:$0xf0]  ;;  %v5327_v59 = vld [vmem:[%s9523_s3 + $0x408] sm:$0xf]  ;;  %v6236_v37 = vld [vmem:[%s9523_s3 + $0x274] sm:$0xf0] }
 0x16b   :  { %3437 = vmatpush.bf16.msrb.mxu2 %v5820_v45  ;;  %v5580_v39 = vor.u32 %v6349_v24, %v5577_v25  ;;  %v5737_v56 = vld [vmem:[%s9523_s3 + $0x750] sm:$0xf0]  ;;  %v5328_v57 = vor.u32 %v6288_v62, %v5327_v59  ;;  %v6381_v24 = vld [vmem:[%s9523_s3 + $0x704] sm:$0xf]  ;;  %v4884_v59 = vor.u32 %v6174_v50, %v4881_v51  ;;  %v6276_v62 = vld [vmem:[%s9523_s3 + $0x3b4] sm:$0xf0] }
 0x16c   :  { %3466 = vmatpush.bf16.msra.mxu0 %v5008_v46  ;;  %v5705_v25 = vld [vmem:[%s9523_s3 + $0x710] sm:$0xf0]  ;;  %v6214_v50 = vld [vmem:[%s9523_s3 + $0x1cc] sm:$0xf] }
 0x16d   :  { %3457 = vmatpush.bf16.msra.mxu3 %v4816_v10  ;;  %v4976_v10 = vor.u32 %v6200_v4, %v4975_v3  ;;  %3429 = vmatpush.bf16.msrb.mxu1 %v5612_v33  ;;  %v4929_v3 = vld [vmem:[%s9523_s3 + $0xf8] sm:$0xf0]  ;;  %v5740_v33 = vor.u32 %v6389_v58, %v5737_v56  ;;  %v5279_v56 = vld [vmem:[%s9523_s3 + $0x3a8] sm:$0xf] }
 0x16f   :  { %3438 = vmatpush.bf16.msrb.mxu2 %v5804_v19  ;;  %v5551_v19 = vld [vmem:[%s9523_s3 + $0x5c8] sm:$0xf] }
 0x170   :  { %3458 = vmatmul.bf16.vlgmr.msra.gmra.mxu3 %v7988_v21  ;;  %3467 = vmatpush.bf16.msra.mxu0 %v4992_v63  ;;  %v6344_v63 = vld [vmem:[%s9523_s3 + $0x5d4] sm:$0xf0] }
 0x171   :  { %3502 = vmatpush.bf16.msrb.mxu3 %v5440_v15  ;;  %v5769_v15 = vld [vmem:[%s9523_s3 + $0x790] sm:$0xf0]  ;;  %3430 = vmatpush.bf16.msrb.mxu1 %v5596_v18  ;;  %v5552_v7 = vor.u32 %v6344_v63, %v5551_v19  ;;  %v5135_v18 = vld [vmem:[%s9523_s3 + $0x288] sm:$0xf]  ;;  %v6328_v63 = vld [vmem:[%s9523_s3 + $0x554] sm:$0xf0] }
 0x172   :  { %v5772_v28 = vor.u32 %v6397_v13, %v5769_v15  ;;  %v5535_v13 = vld [vmem:[%s9523_s3 + $0x5a8] sm:$0xf]  ;;  %v6182_v15 = vld [vmem:[%s9523_s3 + $0xcc] sm:$0xf]  ;;  %v5136_v32 = vor.u32 %v6240_v20, %v5135_v18 }
 0x173   :  { %3439 = vmatpush.bf16.msrb.mxu2 %v5788_v9  ;;  %v3251_v26 = vpop.f32.mrf.mxu3  ;;  %v6385_v9 = vld [vmem:[%s9523_s3 + $0x724] sm:$0xf]  ;;  %v5487_v19 = vld [vmem:[%s9523_s3 + $0x548] sm:$0xf] }
 0x174   :  { %3468 = vmatpush.bf16.msra.mxu0 %v4976_v10  ;;  %v3252_v34 = vadd.f32 %v3251_v26, %v1954_v11  ;;  %v5721_v10 = vld [vmem:[%s9523_s3 + $0x730] sm:$0xf0]  ;;  %v4916_v26 = vor.u32 %v6182_v15, %v4913_v40  ;;  %v5071_v40 = vld [vmem:[%s9523_s3 + $0x208] sm:$0xf] }
 0x175   :  { %3503 = vmatpush.bf16.msrb.mxu3 %v5424_v30  ;;  %v6252_v30 = vld [vmem:[%s9523_s3 + $0x2f4] sm:$0xf0]  ;;  %3431 = vmatpush.bf16.msrb.mxu1 %v5580_v39  ;;  %v5724_v16 = vor.u32 %v6385_v9, %v5721_v10  ;;  %v5471_v9 = vld [vmem:[%s9523_s3 + $0x528] sm:$0xf] }
 0x176   :  { %v5184_v45 = vor.u32 %v6252_v30, %v5183_v27  ;;  %v5311_v27 = vld [vmem:[%s9523_s3 + $0x3e8] sm:$0xf]  ;;  %v6336_v30 = vld [vmem:[%s9523_s3 + $0x594] sm:$0xf0] }
 0x177   :  { %3440 = vmatpush.bf16.msrb.mxu2 %v5772_v28  ;;  %v6284_v28 = vld [vmem:[%s9523_s3 + $0x3f4] sm:$0xf0] }
 0x178   :  { %v3264_v14 = vpop.f32.mrf.mxu0  ;;  %3469 = vmatpush.bf16.msra.mxu0 %v4960_v29  ;;  %3432 = vmatmul.bf16.vlgmr.msrb.gmra.mxu1 %v8547_v60  ;;  %v5519_v29 = vld [vmem:[%s9523_s3 + $0x588] sm:$0xf]  ;;  %v5312_v39 = vor.u32 %v6284_v28, %v5311_v27  ;;  %v6324_v10 = vld [vmem:[%s9523_s3 + $0x534] sm:$0xf0] }
 0x179   :  { %3504 = vmatpush.bf16.msrb.mxu3 %v5408_v49  ;;  %v3265_v46 = vadd.f32 %v3264_v14, %v3252_v34  ;;  %v4944_v49 = vor.u32 %v6192_v36, %v4943_v31  ;;  %3476 = vmatpush.bf16.msra.mxu1 %v5184_v45  ;;  %v6340_v14 = vld [vmem:[%s9523_s3 + $0x5b4] sm:$0xf0]  ;;  %v6178_v34 = vld [vmem:[%s9523_s3 + $0xac] sm:$0xf]  ;;  %v5708_v31 = vor.u32 %v6381_v24, %v5705_v25  ;;  %v5119_v36 = vld [vmem:[%s9523_s3 + $0x268] sm:$0xf] }
 0x17a   :  { %3393 = vmatmul.bf16.vlgmr.msra.gmra.mxu2 %v8113_v41  ;;  %v5536_v23 = vor.u32 %v6340_v14, %v5535_v13  ;;  %v5520_v42 = vor.u32 %v6336_v30, %v5519_v29  ;;  %v6280_v45 = vld [vmem:[%s9523_s3 + $0x3d4] sm:$0xf0]  ;;  %v6166_v14 = vld [vmem:[%s9523_s3 + $0x4c] sm:$0xf]  ;;  %v5472_v20 = vor.u32 %v6324_v10, %v5471_v9  ;;  %v5247_v24 = vld [vmem:[%s9523_s3 + $0x368] sm:$0xf] }
 0x17b   :  { %3441 = vmatpush.bf16.msrb.mxu2 %v5756_v48  ;;  %v3253_v4 = vpop.f32.mrf.mxu3  ;;  %v6332_v48 = vld [vmem:[%s9523_s3 + $0x574] sm:$0xf0]  ;;  %v6162_v30 = vld [vmem:[%s9523_s3 + $0x2c] sm:$0xf]  ;;  %v5199_v9 = vld [vmem:[%s9523_s3 + $0x308] sm:$0xf] }
 0x17c   :  { %3470 = vmatpush.bf16.msra.mxu0 %v4944_v49  ;;  %v5120_v49 = vor.u32 %v6236_v37, %v5119_v36  ;;  %v6228_v4 = vld [vmem:[%s9523_s3 + $0x234] sm:$0xf0]  ;;  %v5679_v37 = vld [vmem:[%s9523_s3 + $0x6c8] sm:$0xf] }
 0x17d   :  { %3505 = vmatpush.bf16.msrb.mxu3 %v5392_v2  ;;  %v6186_v2 = vld [vmem:[%s9523_s3 + $0xec] sm:$0xf]  ;;  %3477 = vmatpush.bf16.msra.mxu1 %v5168_v1  ;;  %v6268_v27 = vld [vmem:[%s9523_s3 + $0x374] sm:$0xf0] }
 0x17e   :  { %v3277_v0 = vpop.f32.mrf.mxu1  ;;  %v4932_v11 = vor.u32 %v6186_v2, %v4929_v3  ;;  %v6170_v1 = vld [vmem:[%s9523_s3 + $0x6c] sm:$0xf]  ;;  %v4865_v2 = vld [vmem:[%s9523_s3 + $0x78] sm:$0xf0]  ;;  %v5087_v3 = vld [vmem:[%s9523_s3 + $0x228] sm:$0xf] }
 0x17f   :  { %v8764_v5 = vadd.f32 %v3277_v0, %v3265_v46  ;;  %3471 = vmatmul.bf16.vlgmr.msra.gmra.mxu0 %v8003_v22  ;;  %3442 = vmatpush.bf16.msrb.mxu2 %v5740_v33  ;;  %v5503_v46 = vld [vmem:[%s9523_s3 + $0x568] sm:$0xf]  ;;  %v5280_v33 = vor.u32 %v6276_v62, %v5279_v56  ;;  %v5088_v13 = vor.u32 %v6228_v4, %v5087_v3  ;;  %v6320_v28 = vld [vmem:[%s9523_s3 + $0x514] sm:$0xf0]  ;;  %v5025_v4 = vld [vmem:[%s9523_s3 + $0x1b8] sm:$0xf0] }
 0x180   :  { %v3266_v52 = vpop.f32.mrf.mxu0  ;;  %3515 = vmatpush.bf16.msrb.mxu0 %v5568_v55  ;;  %v5296_v55 = vor.u32 %v6280_v45, %v5295_v43  ;;  %v5504_v58 = vor.u32 %v6332_v48, %v5503_v46  ;;  %v5231_v43 = vld [vmem:[%s9523_s3 + $0x348] sm:$0xf]  ;;  %v6158_v48 = vld [vmem:[%s9523_s3 + $0xc] sm:$0xf]  ;;  %v6256_v10 = vld [vmem:[%s9523_s3 + $0x314] sm:$0xf0] }
 0x181   :  { %3506 = vmatpush.bf16.msrb.mxu3 %v5376_v12  ;;  %v5152_v12 = vor.u32 %v6244_v6, %v5151_v61  ;;  %v5103_v52 = vld [vmem:[%s9523_s3 + $0x248] sm:$0xf]  ;;  %v5488_v61 = vor.u32 %v6328_v63, %v5487_v19  ;;  %v6260_v63 = vld [vmem:[%s9523_s3 + $0x334] sm:$0xf0] }
 0x182   :  { %v5263_v6 = vld [vmem:[%s9523_s3 + $0x388] sm:$0xf] }
 0x183   :  { %3478 = vmatpush.bf16.msra.mxu1 %v5152_v12  ;;  %3443 = vmatpush.bf16.msrb.mxu2 %v5724_v16  ;;  %v4849_v12 = vld [vmem:[%s9523_s3 + $0x58] sm:$0xf0]  ;;  %v6224_v16 = vld [vmem:[%s9523_s3 + $0x214] sm:$0xf0]  ;;  %v5663_v56 = vld [vmem:[%s9523_s3 + $0x6a8] sm:$0xf] }
 0x184   :  { %3516 = vmatpush.bf16.msrb.mxu0 %v5552_v7  ;;  %v6272_v7 = vld [vmem:[%s9523_s3 + $0x394] sm:$0xf0]  ;;  %v4852_v25 = vor.u32 %v6166_v14, %v4849_v12  ;;  %v5072_v29 = vor.u32 %v6224_v16, %v5071_v40  ;;  %v5215_v19 = vld [vmem:[%s9523_s3 + $0x328] sm:$0xf]  ;;  %v6206_v40 = vld [vmem:[%s9523_s3 + $0x18c] sm:$0xf] }
 0x185   :  { %3507 = vmatpush.bf16.msrb.mxu3 %v5360_v35  ;;  %v4897_v35 = vld [vmem:[%s9523_s3 + $0xb8] sm:$0xf0]  ;;  %v5264_v18 = vor.u32 %v6272_v7, %v5263_v6  ;;  %v5216_v6 = vor.u32 %v6260_v63, %v5215_v19  ;;  %v6368_v7 = vld [vmem:[%s9523_s3 + $0x694] sm:$0xf0]  ;;  %v5823_v14 = vld [vmem:[%s9523_s3 + $0x7e8] sm:$0xf] }
 0x186   :  { %v3279_v8 = vpop.f32.mrf.mxu1  ;;  %v4900_v44 = vor.u32 %v6178_v34, %v4897_v35  ;;  %v6218_v34 = vld [vmem:[%s9523_s3 + $0x1ec] sm:$0xf]  ;;  %v5057_v35 = vld [vmem:[%s9523_s3 + $0x1f8] sm:$0xf0]  ;;  %v6412_v12 = vld [vmem:[%s9523_s3 + $0x7f4] sm:$0xf0] }
 0x187   :  { %3479 = vmatpush.bf16.msra.mxu1 %v5136_v32  ;;  %3444 = vmatpush.bf16.msrb.mxu2 %v5708_v31  ;;  %v4833_v8 = vld [vmem:[%s9523_s3 + $0x38] sm:$0xf0]  ;;  %v5248_v31 = vor.u32 %v6268_v27, %v5247_v24  ;;  %v5060_v46 = vor.u32 %v6218_v34, %v5057_v35  ;;  %v5631_v24 = vld [vmem:[%s9523_s3 + $0x668] sm:$0xf]  ;;  %v5824_v27 = vor.u32 %v6412_v12, %v5823_v14  ;;  %v6302_v34 = vld [vmem:[%s9523_s3 + $0x48c] sm:$0xf] }
 0x188   :  { %3517 = vmatpush.bf16.msrb.mxu0 %v5536_v23  ;;  %v5695_v23 = vld [vmem:[%s9523_s3 + $0x6e8] sm:$0xf]  ;;  %v5393_v35 = vld [vmem:[%s9523_s3 + $0x498] sm:$0xf0]  ;;  %v6194_v19 = vld [vmem:[%s9523_s3 + $0x12c] sm:$0xf] }
 0x189   :  { %3508 = vmatpush.bf16.msrb.mxu3 %v5344_v53  ;;  %v6232_v53 = vld [vmem:[%s9523_s3 + $0x254] sm:$0xf0]  ;;  %v4945_v14 = vld [vmem:[%s9523_s3 + $0x118] sm:$0xf0]  ;;  %v6290_v12 = vld [vmem:[%s9523_s3 + $0x42c] sm:$0xf] }
 0x18a   :  { %3445 = vmatmul.bf16.vlgmr.msrb.gmra.mxu2 %v8627_v38  ;;  %v5104_v0 = vor.u32 %v6232_v53, %v5103_v52  ;;  %v5041_v52 = vld [vmem:[%s9523_s3 + $0x1d8] sm:$0xf0]  ;;  %v6314_v53 = vld [vmem:[%s9523_s3 + $0x4ec] sm:$0xf] }
 0x18b   :  { %3489 = vmatpush.bf16.msra.mxu2 %v5312_v39  ;;  %3480 = vmatpush.bf16.msra.mxu1 %v5120_v49  ;;  %v6376_v39 = vld [vmem:[%s9523_s3 + $0x6d4] sm:$0xf0]  ;;  %v4817_v49 = vld [vmem:[%s9523_s3 + $0x18] sm:$0xf0] }
 0x18c   :  { %3518 = vmatpush.bf16.msrb.mxu0 %v5520_v42  ;;  %v4836_v42 = vor.u32 %v6162_v30, %v4833_v8  ;;  %v5680_v51 = vor.u32 %v6376_v39, %v5679_v37  ;;  %v4820_v62 = vor.u32 %v6158_v48, %v4817_v49  ;;  %v6202_v30 = vld [vmem:[%s9523_s3 + $0x16c] sm:$0xf]  ;;  %v4977_v48 = vld [vmem:[%s9523_s3 + $0x158] sm:$0xf0] }
 0x18d   :  { %3509 = vmatpush.bf16.msrb.mxu3 %v5328_v57  ;;  %v4868_v57 = vor.u32 %v6170_v1, %v4865_v2  ;;  %v6210_v2 = vld [vmem:[%s9523_s3 + $0x1ac] sm:$0xf] }
 0x18e   :  { %v6298_v49 = vld [vmem:[%s9523_s3 + $0x46c] sm:$0xf] }
 0x18f   :  { %3490 = vmatpush.bf16.msra.mxu2 %v5296_v55  ;;  %3481 = vmatpush.bf16.msra.mxu1 %v5104_v0  ;;  %v5441_v55 = vld [vmem:[%s9523_s3 + $0x4f8] sm:$0xf0]  ;;  %v5044_v0 = vor.u32 %v6214_v50, %v5041_v52  ;;  %v6356_v52 = vld [vmem:[%s9523_s3 + $0x634] sm:$0xf0] }
 0x190   :  { %3510 = vmatmul.bf16.vlgmr.msrb.gmra.mxu3 %v8284_v17  ;;  %3519 = vmatpush.bf16.msrb.mxu0 %v5504_v58  ;;  %v5444_v1 = vor.u32 %v6314_v53, %v5441_v55  ;;  %v5377_v50 = vld [vmem:[%s9523_s3 + $0x478] sm:$0xf0] }
 0x191   :  { %3554 = vmatpush.bf16.msra.mxu3 %v4932_v11  ;;  %v3290_v11 = vpop.f32.mrf.mxu2 }
 0x192   :  { %v8897_v15 = vadd.f32 %v3290_v11, %v8764_v5  ;;  %v6380_v5 = vld [vmem:[%s9523_s3 + $0x6f4] sm:$0xf0]  ;;  %v5028_v11 = vor.u32 %v6210_v2, %v5025_v4  ;;  %v5361_v2 = vld [vmem:[%s9523_s3 + $0x458] sm:$0xf0] }
 0x193   :  { %3491 = vmatpush.bf16.msra.mxu2 %v5280_v33  ;;  %3482 = vmatpush.bf16.msra.mxu1 %v5088_v13  ;;  %v5696_v32 = vor.u32 %v6380_v5, %v5695_v23  ;;  %v6310_v33 = vld [vmem:[%s9523_s3 + $0x4cc] sm:$0xf]  ;;  %v5409_v23 = vld [vmem:[%s9523_s3 + $0x4b8] sm:$0xf0]  ;;  %v5200_v5 = vor.u32 %v6256_v10, %v5199_v9  ;;  %v6352_v4 = vld [vmem:[%s9523_s3 + $0x614] sm:$0xf0] }
 0x194   :  { %3520 = vmatpush.bf16.msrb.mxu0 %v5488_v61  ;;  %v5425_v61 = vld [vmem:[%s9523_s3 + $0x4d8] sm:$0xf0]  ;;  %v5759_v9 = vld [vmem:[%s9523_s3 + $0x768] sm:$0xf]  ;;  %v6396_v10 = vld [vmem:[%s9523_s3 + $0x774] sm:$0xf0] }
 0x195   :  { %3555 = vmatpush.bf16.msra.mxu3 %v4916_v26  ;;  %v5455_v26 = vld [vmem:[%s9523_s3 + $0x508] sm:$0xf]  ;;  %v5428_v13 = vor.u32 %v6310_v33, %v5425_v61  ;;  %v6250_v61 = vld [vmem:[%s9523_s3 + $0x2ec] sm:$0xf] }
 0x196   :  { %v5456_v36 = vor.u32 %v6320_v28, %v5455_v26 }
 0x197   :  { %3492 = vmatpush.bf16.msra.mxu2 %v5264_v18  ;;  %3483 = vmatpush.bf16.msra.mxu1 %v5072_v29  ;;  %v5009_v18 = vld [vmem:[%s9523_s3 + $0x198] sm:$0xf0]  ;;  %v5807_v29 = vld [vmem:[%s9523_s3 + $0x7c8] sm:$0xf] }
 0x198   :  { %3521 = vmatpush.bf16.msrb.mxu0 %v5472_v20  ;;  %v6306_v20 = vld [vmem:[%s9523_s3 + $0x4ac] sm:$0xf]  ;;  %v5012_v26 = vor.u32 %v6206_v40, %v5009_v18  ;;  %v5345_v40 = vld [vmem:[%s9523_s3 + $0x438] sm:$0xf0] }
 0x199   :  { %3556 = vmatpush.bf16.msra.mxu3 %v4900_v44  ;;  %v6264_v44 = vld [vmem:[%s9523_s3 + $0x354] sm:$0xf0]  ;;  %v3292_v45 = vpop.f32.mrf.mxu2  ;;  %v5412_v28 = vor.u32 %v6306_v20, %v5409_v23  ;;  %v6346_v18 = vld [vmem:[%s9523_s3 + $0x5ec] sm:$0xf]  ;;  %v5569_v20 = vld [vmem:[%s9523_s3 + $0x5f8] sm:$0xf0] }
 0x19a   :  { %v5232_v58 = vor.u32 %v6264_v44, %v5231_v43  ;;  %3484 = vmatmul.bf16.vlgmr.msra.gmra.mxu1 %v8038_v54  ;;  %v5791_v43 = vld [vmem:[%s9523_s3 + $0x7a8] sm:$0xf]  ;;  %v6404_v44 = vld [vmem:[%s9523_s3 + $0x7b4] sm:$0xf0]  ;;  %v6198_v45 = vld [vmem:[%s9523_s3 + $0x14c] sm:$0xf] }
 0x19b   :  { %3528 = vmatpush.bf16.msrb.mxu1 %v5696_v32  ;;  %3493 = vmatpush.bf16.msra.mxu2 %v5248_v31  ;;  %v4993_v32 = vld [vmem:[%s9523_s3 + $0x178] sm:$0xf0]  ;;  %v5615_v31 = vld [vmem:[%s9523_s3 + $0x648] sm:$0xf]  ;;  %v5792_v55 = vor.u32 %v6404_v44, %v5791_v43  ;;  %v6388_v43 = vld [vmem:[%s9523_s3 + $0x734] sm:$0xf0] }
 0x19c   :  { %3522 = vmatpush.bf16.msrb.mxu0 %v5456_v36  ;;  %v6360_v36 = vld [vmem:[%s9523_s3 + $0x654] sm:$0xf0]  ;;  %v4996_v39 = vor.u32 %v6202_v30, %v4993_v32  ;;  %v6286_v30 = vld [vmem:[%s9523_s3 + $0x40c] sm:$0xf] }
 0x19d   :  { %3557 = vmatpush.bf16.msra.mxu3 %v4884_v59  ;;  %v6372_v59 = vld [vmem:[%s9523_s3 + $0x6b4] sm:$0xf0] }
 0x19e   :  { %v5664_v3 = vor.u32 %v6372_v59, %v5663_v56  ;;  %v5380_v56 = vor.u32 %v6298_v49, %v5377_v50  ;;  %v5775_v59 = vld [vmem:[%s9523_s3 + $0x788] sm:$0xf]  ;;  %v5537_v49 = vld [vmem:[%s9523_s3 + $0x5b8] sm:$0xf0] }
 0x19f   :  { %3523 = vmatmul.bf16.vlgmr.msrb.gmra.mxu0 %v8432_v47  ;;  %3529 = vmatpush.bf16.msrb.mxu1 %v5680_v51  ;;  %v5599_v51 = vld [vmem:[%s9523_s3 + $0x628] sm:$0xf] }
 0x1a0   :  { %3567 = vmatpush.bf16.msra.mxu0 %v5060_v46  ;;  %3494 = vmatpush.bf16.msra.mxu2 %v5232_v58  ;;  %v5616_v46 = vor.u32 %v6360_v36, %v5615_v31  ;;  %v4980_v58 = vor.u32 %v6198_v45, %v4977_v48  ;;  %v5600_v63 = vor.u32 %v6356_v52, %v5599_v51  ;;  %v6242_v36 = vld [vmem:[%s9523_s3 + $0x2ac] sm:$0xf]  ;;  %v6420_v45 = vld [vmem:[%s9526_s5 + $0x38] sm:$0xff] }
 0x1a1   :  { %3558 = vmatpush.bf16.msra.mxu3 %v4868_v57  ;;  %v5647_v57 = vld [vmem:[%s9523_s3 + $0x688] sm:$0xf]  ;;  %v6338_v48 = vld [vmem:[%s9523_s3 + $0x5ac] sm:$0xf] }
 0x1a2   :  { %v5648_v16 = vor.u32 %v6368_v7, %v5647_v57  ;;  %v6238_v52 = vld [vmem:[%s9523_s3 + $0x28c] sm:$0xf] }
 0x1a3   :  { %3530 = vmatpush.bf16.msrb.mxu1 %v5664_v3  ;;  %v5583_v3 = vld [vmem:[%s9523_s3 + $0x608] sm:$0xf] }
 0x1a4   :  { %3568 = vmatpush.bf16.msra.mxu0 %v5044_v0  ;;  %3495 = vmatpush.bf16.msra.mxu2 %v5216_v6  ;;  %v4961_v0 = vld [vmem:[%s9523_s3 + $0x138] sm:$0xf0] }
 0x1a5   :  { %3559 = vmatpush.bf16.msra.mxu3 %v4852_v25  ;;  %v6364_v25 = vld [vmem:[%s9523_s3 + $0x674] sm:$0xf0]  ;;  %v5185_v6 = vld [vmem:[%s9523_s3 + $0x2f8] sm:$0xf0]  ;;  %v4964_v57 = vor.u32 %v6194_v19, %v4961_v0  ;;  %v6419_v19 = vld [vmem:[%s9526_s5 + $0x30] sm:$0xff] }
 0x1a6   :  { %v5632_v8 = vor.u32 %v6364_v25, %v5631_v24  ;;  %v9077_v53 = vpop.f32.mrf.mxu3  ;;  %v6246_v24 = vld [vmem:[%s9523_s3 + $0x2cc] sm:$0xf]  ;;  %v5169_v25 = vld [vmem:[%s9523_s3 + $0x2d8] sm:$0xf0] }
 0x1a7   :  { %3531 = vmatpush.bf16.msrb.mxu1 %v5648_v16  ;;  %v5188_v16 = vor.u32 %v6250_v61, %v5185_v6  ;;  %v5172_v32 = vor.u32 %v6246_v24, %v5169_v25  ;;  %v6334_v0 = vld [vmem:[%s9523_s3 + $0x58c] sm:$0xf]  ;;  %v5489_v25 = vld [vmem:[%s9523_s3 + $0x558] sm:$0xf0] }
 0x1a8   :  { %3569 = vmatpush.bf16.msra.mxu0 %v5028_v11  ;;  %3496 = vmatpush.bf16.msra.mxu2 %v5200_v5  ;;  %v6190_v11 = vld [vmem:[%s9523_s3 + $0x10c] sm:$0xf]  ;;  %v5760_v5 = vor.u32 %v6396_v10, %v5759_v9 }
 0x1a9   :  { %3560 = vmatpush.bf16.msra.mxu3 %v4836_v42  ;;  %v5396_v42 = vor.u32 %v6302_v34, %v5393_v35  ;;  %v6342_v34 = vld [vmem:[%s9523_s3 + $0x5cc] sm:$0xf]  ;;  %v5553_v35 = vld [vmem:[%s9523_s3 + $0x5d8] sm:$0xf0] }
 0x1aa   :  { %v5556_v44 = vor.u32 %v6342_v34, %v5553_v35  ;;  %v6330_v10 = vld [vmem:[%s9523_s3 + $0x56c] sm:$0xf] }
 0x1ab   :  { %3497 = vmatmul.bf16.vlgmr.msra.gmra.mxu2 %v8113_v41  ;;  %3532 = vmatpush.bf16.msrb.mxu1 %v5632_v8  ;;  %v5329_v8 = vld [vmem:[%s9523_s3 + $0x418] sm:$0xf0]  ;;  %v6326_v24 = vld [vmem:[%s9523_s3 + $0x54c] sm:$0xf] }
 0x1ac   :  { %3541 = vmatpush.bf16.msrb.mxu2 %v5824_v27  ;;  %3570 = vmatpush.bf16.msra.mxu0 %v5012_v26  ;;  %v4948_v27 = vor.u32 %v6190_v11, %v4945_v14  ;;  %v5348_v26 = vor.u32 %v6290_v12, %v5345_v40  ;;  %v5505_v11 = vld [vmem:[%s9523_s3 + $0x578] sm:$0xf0]  ;;  %v6230_v14 = vld [vmem:[%s9523_s3 + $0x24c] sm:$0xf] }
 0x1ad   :  { %3561 = vmatpush.bf16.msra.mxu3 %v4820_v62  ;;  %v6400_v62 = vld [vmem:[%s9523_s3 + $0x794] sm:$0xf0]  ;;  %v5105_v12 = vld [vmem:[%s9523_s3 + $0x258] sm:$0xf0]  ;;  %v6322_v35 = vld [vmem:[%s9523_s3 + $0x52c] sm:$0xf] }
 0x1ae   :  { %v5776_v33 = vor.u32 %v6400_v62, %v5775_v59  ;;  %v3305_v23 = vpop.f32.mrf.mxu3  ;;  %v6282_v59 = vld [vmem:[%s9523_s3 + $0x3ec] sm:$0xf]  ;;  %v5313_v62 = vld [vmem:[%s9523_s3 + $0x3f8] sm:$0xf0] }
 0x1af   :  { %3533 = vmatpush.bf16.msrb.mxu1 %v5616_v46  ;;  %v5316_v61 = vor.u32 %v6282_v59, %v5313_v62  ;;  %v6417_v23 = vld [vmem:[%s9526_s5 + $0x20] sm:$0xff]  ;;  %v6374_v59 = vld [vmem:[%s9523_s3 + $0x6cc] sm:$0xf]  ;;  %v5681_v62 = vld [vmem:[%s9523_s3 + $0x6d8] sm:$0xf0] }
 0x1b0   :  { %3562 = vmatmul.bf16.vlgmr.msra.gmra.mxu3 %v7988_v21  ;;  %v6408_v21 = vld [vmem:[%s9523_s3 + $0x7d4] sm:$0xf0]  ;;  %3571 = vmatpush.bf16.msra.mxu0 %v4996_v39  ;;  %v5332_v39 = vor.u32 %v6286_v30, %v5329_v8  ;;  %v6270_v30 = vld [vmem:[%s9523_s3 + $0x38c] sm:$0xf]  ;;  %v5265_v8 = vld [vmem:[%s9523_s3 + $0x398] sm:$0xf0] }
 0x1b1   :  { %3606 = vmatpush.bf16.msrb.mxu3 %v5444_v1  ;;  %v5808_v37 = vor.u32 %v6408_v21, %v5807_v29  ;;  %v6294_v1 = vld [vmem:[%s9523_s3 + $0x44c] sm:$0xf]  ;;  %v6392_v29 = vld [vmem:[%s9523_s3 + $0x754] sm:$0xf0]  ;;  %v5572_v21 = vor.u32 %v6346_v18, %v5569_v20  ;;  %v5281_v20 = vld [vmem:[%s9523_s3 + $0x3b8] sm:$0xf0] }
 0x1b2   :  { %v5364_v7 = vor.u32 %v6294_v1, %v5361_v2  ;;  %v5521_v1 = vld [vmem:[%s9523_s3 + $0x598] sm:$0xf0]  ;;  %v6274_v18 = vld [vmem:[%s9523_s3 + $0x3ac] sm:$0xf] }
 0x1b3   :  { %3542 = vmatpush.bf16.msrb.mxu2 %v5808_v37  ;;  %3534 = vmatpush.bf16.msrb.mxu1 %v5600_v63  ;;  %v5153_v37 = vld [vmem:[%s9523_s3 + $0x2b8] sm:$0xf0]  ;;  %v5524_v6 = vor.u32 %v6334_v0, %v5521_v1  ;;  %v6414_v1 = vld [vmem:[%s9526_s5 + $0x8] sm:$0xff] }
 0x1b4   :  { %3572 = vmatpush.bf16.msra.mxu0 %v4980_v58  ;;  %v5156_v46 = vor.u32 %v6242_v36, %v5153_v37  ;;  %v5711_v58 = vld [vmem:[%s9523_s3 + $0x708] sm:$0xf]  ;;  %v6222_v36 = vld [vmem:[%s9523_s3 + $0x20c] sm:$0xf]  ;;  %v5073_v37 = vld [vmem:[%s9523_s3 + $0x218] sm:$0xf0] }
 0x1b5   :  { %3607 = vmatpush.bf16.msrb.mxu3 %v5428_v13  ;;  %v5584_v13 = vor.u32 %v6352_v4, %v5583_v3  ;;  %v6234_v3 = vld [vmem:[%s9523_s3 + $0x26c] sm:$0xf]  ;;  %v5121_v4 = vld [vmem:[%s9523_s3 + $0x278] sm:$0xf0] }
 0x1b6   :  { %v9180_v50 = vpop.f32.mrf.mxu3  ;;  %v5124_v9 = vor.u32 %v6234_v3, %v5121_v4  ;;  %v5233_v0 = vld [vmem:[%s9523_s3 + $0x358] sm:$0xf0] }
 0x1b7   :  { %3543 = vmatpush.bf16.msrb.mxu2 %v5792_v55  ;;  %3535 = vmatpush.bf16.msrb.mxu1 %v5584_v13  ;;  %v5137_v55 = vld [vmem:[%s9523_s3 + $0x298] sm:$0xf0] }
 0x1b8   :  { %3573 = vmatpush.bf16.msra.mxu0 %v4964_v57  ;;  %v5140_v63 = vor.u32 %v6238_v52, %v5137_v55  ;;  %v6278_v57 = vld [vmem:[%s9523_s3 + $0x3cc] sm:$0xf]  ;;  %v5457_v55 = vld [vmem:[%s9523_s3 + $0x518] sm:$0xf0] }
 0x1b9   :  { %3608 = vmatpush.bf16.msrb.mxu3 %v5412_v28  ;;  %v5743_v28 = vld [vmem:[%s9523_s3 + $0x748] sm:$0xf]  ;;  %v6318_v52 = vld [vmem:[%s9523_s3 + $0x50c] sm:$0xf] }
 0x1ba   :  { %v5744_v31 = vor.u32 %v6392_v29, %v5743_v28  ;;  %3536 = vmatmul.bf16.vlgmr.msrb.gmra.mxu1 %v8547_v60  ;;  %v5284_v29 = vor.u32 %v6274_v18, %v5281_v20 }
 0x1bb   :  { %3544 = vmatpush.bf16.msrb.mxu2 %v5776_v33  ;;  %3580 = vmatpush.bf16.msra.mxu1 %v5188_v16  ;;  %v5508_v16 = vor.u32 %v6330_v10, %v5505_v11  ;;  %v6428_v10 = vld [vmem:[%s9526_s5 + $0x78] sm:$0xff] }
 0x1bc   :  { %3574 = vmatpush.bf16.msra.mxu0 %v4948_v27  ;;  %v9216_v33 = vpop.f32.mrf.mxu0  ;;  %v6226_v27 = vld [vmem:[%s9523_s3 + $0x22c] sm:$0xf] }
 0x1bd   :  { %3609 = vmatpush.bf16.msrb.mxu3 %v5396_v42  ;;  %v5727_v42 = vld [vmem:[%s9523_s3 + $0x728] sm:$0xf] }
 0x1be   :  { %v5728_v51 = vor.u32 %v6388_v43, %v5727_v42  ;;  %v3357_v13 = vpop.f32.mrf.mxu3  ;;  %v5268_v42 = vor.u32 %v6270_v30, %v5265_v8  ;;  %v6378_v43 = vld [vmem:[%s9523_s3 + $0x6ec] sm:$0xf] }
 0x1bf   :  { %3545 = vmatpush.bf16.msrb.mxu2 %v5760_v5  ;;  %3581 = vmatpush.bf16.msra.mxu1 %v5172_v32  ;;  %v5108_v5 = vor.u32 %v6230_v14, %v5105_v12  ;;  %v6416_v32 = vld [vmem:[%s9526_s5 + $0x18] sm:$0xff]  ;;  %v6366_v13 = vld [vmem:[%s9523_s3 + $0x68c] sm:$0xf] }
 0x1c0   :  { %3619 = vmatpush.bf16.msrb.mxu0 %v5572_v21  ;;  %v5492_v21 = vor.u32 %v6326_v24, %v5489_v25  ;;  %v5649_v14 = vld [vmem:[%s9523_s3 + $0x698] sm:$0xf0]  ;;  %v6254_v12 = vld [vmem:[%s9523_s3 + $0x30c] sm:$0xf] }
 0x1c1   :  { %3610 = vmatpush.bf16.msrb.mxu3 %v5380_v56  ;;  %3575 = vmatmul.bf16.vlgmr.msra.gmra.mxu0 %v8003_v22  ;;  %v6384_v22 = vld [vmem:[%s9523_s3 + $0x714] sm:$0xf0]  ;;  %v5540_v56 = vor.u32 %v6338_v48, %v5537_v49  ;;  %v5249_v48 = vld [vmem:[%s9523_s3 + $0x378] sm:$0xf0]  ;;  %v6415_v49 = vld [vmem:[%s9526_s5 + $0x10] sm:$0xff]  ;;  %v5652_v20 = vor.u32 %v6366_v13, %v5649_v14 }
 0x1c2   :  { %v5712_v2 = vor.u32 %v6384_v22, %v5711_v58  ;;  %v6362_v24 = vld [vmem:[%s9523_s3 + $0x66c] sm:$0xf]  ;;  %v5633_v25 = vld [vmem:[%s9523_s3 + $0x678] sm:$0xf0] }
 0x1c3   :  { %3546 = vmatpush.bf16.msrb.mxu2 %v5744_v31  ;;  %3582 = vmatpush.bf16.msra.mxu1 %v5156_v46  ;;  %v5473_v31 = vld [vmem:[%s9523_s3 + $0x538] sm:$0xf0]  ;;  %v6266_v46 = vld [vmem:[%s9523_s3 + $0x36c] sm:$0xf] }
 0x1c4   :  { %3620 = vmatpush.bf16.msrb.mxu0 %v5556_v44  ;;  %v3318_v28 = vpop.f32.mrf.mxu0  ;;  %v5697_v44 = vld [vmem:[%s9523_s3 + $0x6f8] sm:$0xf0]  ;;  %v6358_v8 = vld [vmem:[%s9523_s3 + $0x64c] sm:$0xf] }
 0x1c5   :  { %3611 = vmatpush.bf16.msrb.mxu3 %v5364_v7  ;;  %v6418_v7 = vld [vmem:[%s9526_s5 + $0x28] sm:$0xff]  ;;  %v5700_v58 = vor.u32 %v6378_v43, %v5697_v44  ;;  %v5809_v28 = vld [vmem:[%s9523_s3 + $0x7d8] sm:$0xf0] }
 0x1c6   :  { %v6354_v43 = vld [vmem:[%s9523_s3 + $0x62c] sm:$0xf]  ;;  %v5601_v44 = vld [vmem:[%s9523_s3 + $0x638] sm:$0xf0] }
 0x1c7   :  { %3547 = vmatpush.bf16.msrb.mxu2 %v5728_v51  ;;  %3583 = vmatpush.bf16.msra.mxu1 %v5140_v63  ;;  %v5076_v51 = vor.u32 %v6222_v36, %v5073_v37  ;;  %v6262_v63 = vld [vmem:[%s9523_s3 + $0x34c] sm:$0xf] }
 0x1c8   :  { %3621 = vmatpush.bf16.msrb.mxu0 %v5540_v56  ;;  %v5252_v56 = vor.u32 %v6266_v46, %v5249_v48  ;;  %v5236_v4 = vor.u32 %v6262_v63, %v5233_v0  ;;  %v5777_v46 = vld [vmem:[%s9523_s3 + $0x798] sm:$0xf0]  ;;  %v5604_v48 = vor.u32 %v6354_v43, %v5601_v44 }
 0x1c9   :  { %3612 = vmatpush.bf16.msrb.mxu3 %v5348_v26  ;;  %v5089_v26 = vld [vmem:[%s9523_s3 + $0x238] sm:$0xf0] }
 0x1ca   :  { %v5092_v34 = vor.u32 %v6226_v27, %v5089_v26  ;;  %v6406_v26 = vld [vmem:[%s9523_s3 + $0x7cc] sm:$0xf]  ;;  %v5761_v63 = vld [vmem:[%s9523_s3 + $0x778] sm:$0xf0] }
 0x1cb   :  { %3548 = vmatpush.bf16.msrb.mxu2 %v5712_v2  ;;  %3584 = vmatpush.bf16.msra.mxu1 %v5124_v9  ;;  %v5684_v2 = vor.u32 %v6374_v59, %v5681_v62  ;;  %v3304_v59 = vadd.f32 %v9077_v53, %v8897_v15  ;;  %v6390_v15 = vld [vmem:[%s9523_s3 + $0x74c] sm:$0xf]  ;;  %v5745_v53 = vld [vmem:[%s9523_s3 + $0x758] sm:$0xf0] }
 0x1cc   :  { %3622 = vmatpush.bf16.msrb.mxu0 %v5524_v6  ;;  %v9305_v22 = vpop.f32.mrf.mxu0  ;;  %v5665_v6 = vld [vmem:[%s9523_s3 + $0x6b8] sm:$0xf0] }
 0x1cd   :  { %3613 = vmatpush.bf16.msrb.mxu3 %v5332_v39 }
 0x1ce   :  { %3549 = vmatmul.bf16.vlgmr.msrb.gmra.mxu2 %v8627_v38 }
 0x1cf   :  { %3593 = vmatpush.bf16.msra.mxu2 %v5316_v61  ;;  %3585 = vmatpush.bf16.msra.mxu1 %v5108_v5  ;;  %v6370_v61 = vld [vmem:[%s9523_s3 + $0x6ac] sm:$0xf] }
 0x1d0   :  { %3614 = vmatmul.bf16.vlgmr.msrb.gmra.mxu3 %v8284_v17  ;;  %v5297_v17 = vld [vmem:[%s9523_s3 + $0x3d8] sm:$0xf0]  ;;  %3623 = vmatpush.bf16.msrb.mxu0 %v5508_v16  ;;  %v5668_v9 = vor.u32 %v6370_v61, %v5665_v6  ;;  %v6422_v6 = vld [vmem:[%s9526_s5 + $0x48] sm:$0xff] }
 0x1d1   :  { %3926 = vmatpush.bf16.msra.mxu3 %v6420_v45  ;;  %v5300_v40 = vor.u32 %v6278_v57, %v5297_v17  ;;  %v5476_v45 = vor.u32 %v6322_v35, %v5473_v31  ;;  %v6258_v57 = vld [vmem:[%s9523_s3 + $0x32c] sm:$0xf]  ;;  %v5217_v17 = vld [vmem:[%s9523_s3 + $0x338] sm:$0xf0] }
 0x1d2   :  { %v5220_v11 = vor.u32 %v6258_v57, %v5217_v17  ;;  %v5825_v16 = vld [vmem:[%s9523_s3 + $0x7f8] sm:$0xf0]  ;;  %v6402_v35 = vld [vmem:[%s9523_s3 + $0x7ac] sm:$0xf] }
 0x1d3   :  { %3594 = vmatpush.bf16.msra.mxu2 %v5300_v40  ;;  %v9282_v39 = vpop.f32.mrf.mxu3  ;;  %3586 = vmatpush.bf16.msra.mxu1 %v5092_v34  ;;  %v5201_v40 = vld [vmem:[%s9523_s3 + $0x318] sm:$0xf0]  ;;  %v5812_v34 = vor.u32 %v6406_v26, %v5809_v28 }
 0x1d4   :  { %3624 = vmatpush.bf16.msrb.mxu0 %v5492_v21  ;;  %v5204_v5 = vor.u32 %v6254_v12, %v5201_v40  ;;  %v6426_v21 = vld [vmem:[%s9526_s5 + $0x68] sm:$0xff]  ;;  %v5793_v31 = vld [vmem:[%s9523_s3 + $0x7b8] sm:$0xf0] }
 0x1d5   :  { %3927 = vmatpush.bf16.msra.mxu3 %v6419_v19  ;;  %v5460_v19 = vor.u32 %v6318_v52, %v5457_v55  ;;  %v3329_v18 = vpop.f32.mrf.mxu1  ;;  %v6350_v52 = vld [vmem:[%s9523_s3 + $0x60c] sm:$0xf]  ;;  %v5585_v55 = vld [vmem:[%s9523_s3 + $0x618] sm:$0xf0] }
 0x1d6   :  { %v5713_v12 = vld [vmem:[%s9523_s3 + $0x718] sm:$0xf0] }
 0x1d7   :  { %3595 = vmatpush.bf16.msra.mxu2 %v5284_v29  ;;  %3587 = vmatpush.bf16.msra.mxu1 %v5076_v51  ;;  %v5636_v29 = vor.u32 %v6362_v24, %v5633_v25 }
 0x1d8   :  { %3625 = vmatpush.bf16.msrb.mxu0 %v5476_v45  ;;  %v5796_v45 = vor.u32 %v6402_v35, %v5793_v31 }
 0x1d9   :  { %3928 = vmatpush.bf16.msra.mxu3 %v6418_v7  ;;  %v6413_v7 = vld [vmem:[%s9526_s5] sm:$0xff] }
 0x1da   :  { %3588 = vmatmul.bf16.vlgmr.msra.gmra.mxu1 %v8038_v54  ;;  %v3370_v54 = vpop.f32.mrf.mxu0 }
 0x1db   :  { %3596 = vmatpush.bf16.msra.mxu2 %v5268_v42  ;;  %3632 = vmatpush.bf16.msrb.mxu1 %v5700_v58  ;;  %v3409_v3 = vpop.f32.mrf.mxu3  ;;  %v6425_v42 = vld [vmem:[%s9526_s5 + $0x60] sm:$0xff] }
 0x1dc   :  { %3626 = vmatpush.bf16.msrb.mxu0 %v5460_v19  ;;  %v6394_v19 = vld [vmem:[%s9523_s3 + $0x76c] sm:$0xf] }
 0x1dd   :  { %3929 = vmatpush.bf16.msra.mxu3 %v6417_v23  ;;  %v6427_v23 = vld [vmem:[%s9526_s5 + $0x70] sm:$0xff]  ;;  %v3331_v36 = vpop.f32.mrf.mxu1  ;;  %v5764_v3 = vor.u32 %v6394_v19, %v5761_v63 }
 0x1df   :  { %3597 = vmatpush.bf16.msra.mxu2 %v5252_v56  ;;  %3633 = vmatpush.bf16.msrb.mxu1 %v5684_v2  ;;  %v6423_v56 = vld [vmem:[%s9526_s5 + $0x50] sm:$0xff]  ;;  %v3317_v2 = vadd.f32 %v9216_v33, %v3304_v59  ;;  %v5748_v33 = vor.u32 %v6390_v15, %v5745_v53 }
 0x1e0   :  { %3627 = vmatmul.bf16.vlgmr.msrb.gmra.mxu0 %v8432_v47  ;;  %v6410_v47 = vld [vmem:[%s9523_s3 + $0x7ec] sm:$0xf] }
 0x1e1   :  { %3930 = vmatpush.bf16.msra.mxu3 %v6416_v32  ;;  %3939 = vmatpush.bf16.msra.mxu0 %v6428_v10  ;;  %v5828_v27 = vor.u32 %v6410_v47, %v5825_v16  ;;  %v5617_v32 = vld [vmem:[%s9523_s3 + $0x658] sm:$0xf0]  ;;  %v9457_v47 = vld [vmem:[%s9525_s4] sm:$0xf] }
 0x1e2   :  { %v9378_v30 = vpop.f32.mrf.mxu0  ;;  %v5620_v37 = vor.u32 %v6358_v8, %v5617_v32  ;;  %v5729_v10 = vld [vmem:[%s9523_s3 + $0x738] sm:$0xf0]  ;;  %v1955_v16 = vperm.slane %v9457_v47, 1 }
 0x1e3   :  { %3598 = vmatpush.bf16.msra.mxu2 %v5236_v4  ;;  %3634 = vmatpush.bf16.msrb.mxu1 %v5668_v9  ;;  %v3330_v4 = vadd.f32 %v3329_v18, %v3317_v2  ;;  %v6386_v9 = vld [vmem:[%s9523_s3 + $0x72c] sm:$0xf]  ;;  %v1956_v18 = vperm.slane %v9457_v47, 2 }
 0x1e4   :  { %v5732_v14 = vor.u32 %v6386_v9, %v5729_v10 }
 0x1e5   :  { %3931 = vmatpush.bf16.msra.mxu3 %v6415_v49  ;;  %3940 = vmatpush.bf16.msra.mxu0 %v6427_v23  ;;  %v6424_v49 = vld [vmem:[%s9526_s5 + $0x58] sm:$0xff]  ;;  %v3381_v0 = vpop.f32.mrf.mxu1  ;;  %v3356_v23 = vadd.f32 %v9180_v50, %v1955_v16 }
 0x1e7   :  { %3599 = vmatpush.bf16.msra.mxu2 %v5220_v11  ;;  %3635 = vmatpush.bf16.msrb.mxu1 %v5652_v20  ;;  %v6421_v11 = vld [vmem:[%s9526_s5 + $0x40] sm:$0xff] }
 0x1e9   :  { %3932 = vmatpush.bf16.msra.mxu3 %v6414_v1  ;;  %3941 = vmatpush.bf16.msra.mxu0 %v6426_v21  ;;  %v5588_v1 = vor.u32 %v6350_v52, %v5585_v55  ;;  %v6431_v55 = vld [vmem:[%s9526_s5 + $0x90] sm:$0xff] }
 0x1ea   :  { %v3422_v51 = vpop.f32.mrf.mxu0 }
 0x1eb   :  { %3600 = vmatpush.bf16.msra.mxu2 %v5204_v5  ;;  %3636 = vmatpush.bf16.msrb.mxu1 %v5636_v29  ;;  %v6432_v51 = vld [vmem:[%s9526_s5 + $0x98] sm:$0xff] }
 0x1ed   :  { %3933 = vmatpush.bf16.msra.mxu3 %v6413_v7  ;;  %3942 = vmatpush.bf16.msra.mxu0 %v6425_v42  ;;  %v3342_v61 = vpop.f32.mrf.mxu2  ;;  %v3383_v54 = vpop.f32.mrf.mxu1 }
 0x1ee   :  { %3601 = vmatmul.bf16.vlgmr.msra.gmra.mxu2 %v8113_v41  ;;  %v6398_v41 = vld [vmem:[%s9523_s3 + $0x78c] sm:$0xf]  ;;  %v3343_v57 = vadd.f32 %v3342_v61, %v3330_v4 }
 0x1ef   :  { %3645 = vmatpush.bf16.msrb.mxu2 %v5828_v27  ;;  %3637 = vmatpush.bf16.msrb.mxu1 %v5620_v37  ;;  %v5780_v58 = vor.u32 %v6398_v41, %v5777_v46  ;;  %v3369_v27 = vadd.f32 %v9305_v22, %v3356_v23  ;;  %v6436_v22 = vld [vmem:[%s9526_s5 + $0xb8] sm:$0xff] }
 0x1f0   :  { %v3658_v17 = vmax.f32 %v3343_v57, 0.0 }
 0x1f1   :  { %3943 = vmatpush.bf16.msra.mxu0 %v6424_v49  ;;  %v3382_v29 = vadd.f32 %v3381_v0, %v3369_v27  ;;  %v1957_v27 = vperm.slane %v9457_v47, 3  ;;  %v6445_v47 = vld [vmem:[%s9527_s6] ss:$0 sm:$0xff] }
 0x1f2   :  { %v3662_v13 = vpack.c.bf16 %v3658_v17, %v3658_v17  ;;  %v6444_v17 = vld [vmem:[%s9526_s5 + $0xf8] sm:$0xff] }
 0x1f3   :  { %3646 = vmatpush.bf16.msrb.mxu2 %v5812_v34  ;;  %v3459_v62 = vpop.f32.mrf.mxu3  ;;  %3638 = vmatpush.bf16.msrb.mxu1 %v5604_v48  ;;  %v6433_v48 = vld [vmem:[%s9526_s5 + $0xa0] sm:$0xff] }
 0x1f4   :  { %3934 = vmatmul.bf16.vlgmr.msra.gmra.mxu3 %v3662_v13  ;;  %v3460_v5 = vadd.f32 %v3459_v62, %v1956_v18  ;;  %v6429_v62 = vld [vmem:[%s9526_s5 + $0x80] sm:$0xff]  ;;  %v6442_v13 = vld [vmem:[%s9526_s5 + $0xe8] sm:$0xff]  ;;  %v6440_v18 = vld [vmem:[%s9526_s5 + $0xd8] sm:$0xff] }
 0x1f5   :  { %3944 = vmatpush.bf16.msra.mxu0 %v6423_v56  ;;  %v3344_v40 = vpop.f32.mrf.mxu2  ;;  %v3433_v24 = vpop.f32.mrf.mxu1  ;;  %v6430_v56 = vld [vmem:[%s9526_s5 + $0x88] sm:$0xff] }
 0x1f6   :  { %v6441_v40 = vld [vmem:[%s9526_s5 + $0xe0] sm:$0xff] }
 0x1f7   :  { %3647 = vmatpush.bf16.msrb.mxu2 %v5796_v45  ;;  %3639 = vmatpush.bf16.msrb.mxu1 %v5588_v1  ;;  %v6435_v45 = vld [vmem:[%s9526_s5 + $0xb0] sm:$0xff] }
 0x1f9   :  { %3945 = vmatpush.bf16.msra.mxu0 %v6422_v6 }
 0x1fa   :  { %3640 = vmatmul.bf16.vlgmr.msrb.gmra.mxu1 %v8547_v60  ;;  %v6382_v60 = vld [vmem:[%s9523_s3 + $0x70c] sm:$0xf] }
 0x1fb   :  { %3648 = vmatpush.bf16.msrb.mxu2 %v5780_v58  ;;  %v3461_v7 = vpop.f32.mrf.mxu3  ;;  %v5716_v20 = vor.u32 %v6382_v60, %v5713_v12  ;;  %3952 = vmatpush.bf16.msra.mxu1 %v6436_v22 }
 0x1fc   :  { %v3472_v25 = vpop.f32.mrf.mxu0 }
 0x1fd   :  { %3946 = vmatpush.bf16.msra.mxu0 %v6421_v11  ;;  %v3473_v26 = vadd.f32 %v3472_v25, %v3460_v5  ;;  %v3394_v28 = vpop.f32.mrf.mxu2  ;;  %v3435_v8 = vpop.f32.mrf.mxu1  ;;  %v6443_v11 = vld [vmem:[%s9526_s5 + $0xf0] sm:$0xff]  ;;  %v6438_v5 = vld [vmem:[%s9526_s5 + $0xc8] sm:$0xff]  ;;  %v6437_v25 = vld [vmem:[%s9526_s5 + $0xc0] sm:$0xff] }
 0x1fe   :  { %v3395_v21 = vadd.f32 %v3394_v28, %v3382_v29 }
 0x1ff   :  { %3649 = vmatpush.bf16.msrb.mxu2 %v5764_v3  ;;  %3953 = vmatpush.bf16.msra.mxu1 %v6435_v45 }
 0x200   :  { %v3408_v34 = vadd.f32 %v9282_v39, %v3395_v21 }
 0x202   :  { %v3421_v50 = vadd.f32 %v9378_v30, %v3408_v34  ;;  %v6434_v30 = vld [vmem:[%s9526_s5 + $0xa8] sm:$0xff] }
 0x203   :  { %3650 = vmatpush.bf16.msrb.mxu2 %v5748_v33  ;;  %3954 = vmatpush.bf16.msra.mxu1 %v6434_v30 }
 0x204   :  { %v3474_v32 = vpop.f32.mrf.mxu0  ;;  %v3434_v36 = vadd.f32 %v3433_v24, %v3421_v50 }
 0x205   :  { %v3396_v35 = vpop.f32.mrf.mxu2 }
 0x207   :  { %3651 = vmatpush.bf16.msrb.mxu2 %v5732_v14  ;;  %3955 = vmatpush.bf16.msra.mxu1 %v6433_v48 }
 0x20b   :  { %3652 = vmatpush.bf16.msrb.mxu2 %v5716_v20  ;;  %3956 = vmatpush.bf16.msra.mxu1 %v6432_v51  ;;  %v6439_v20 = vld [vmem:[%s9526_s5 + $0xd0] sm:$0xff] }
 0x20d   :  { %v3446_v37 = vpop.f32.mrf.mxu2 }
 0x20e   :  { %3653 = vmatmul.bf16.vlgmr.msrb.gmra.mxu2 %v8627_v38  ;;  %v3447_v43 = vadd.f32 %v3446_v37, %v3434_v36 }
 0x20f   :  { %3957 = vmatpush.bf16.msra.mxu1 %v6431_v55  ;;  %3965 = vmatpush.bf16.msra.mxu2 %v6444_v17 }
 0x210   :  { %v3659_v44 = vmax.f32 %v3447_v43, 0.0 }
 0x212   :  { %v3663_v38 = vpack.c.bf16 %v3659_v44, %v3659_v44 }
 0x213   :  { %v3511_v31 = vpop.f32.mrf.mxu3  ;;  %3958 = vmatpush.bf16.msra.mxu1 %v6430_v56  ;;  %3966 = vmatpush.bf16.msra.mxu2 %v6443_v11 }
 0x214   :  { %3947 = vmatmul.bf16.vlgmr.msra.gmra.mxu0 %v3663_v38 }
 0x215   :  { %v3448_v39 = vpop.f32.mrf.mxu2 }
 0x217   :  { %v3485_v41 = vpop.f32.mrf.mxu1  ;;  %3959 = vmatpush.bf16.msra.mxu1 %v6429_v62  ;;  %3967 = vmatpush.bf16.msra.mxu2 %v6442_v13 }
 0x218   :  { %v3486_v2 = vadd.f32 %v3485_v41, %v3473_v26 }
 0x21b   :  { %v3513_v42 = vpop.f32.mrf.mxu3  ;;  %3968 = vmatpush.bf16.msra.mxu2 %v6441_v40 }
 0x21c   :  { %v3524_v46 = vpop.f32.mrf.mxu0 }
 0x21f   :  { %v3487_v49 = vpop.f32.mrf.mxu1  ;;  %3969 = vmatpush.bf16.msra.mxu2 %v6440_v18 }
 0x220   :  { %v3978_v49 = vlaneseq }
 0x222   :  { %v3979_v51 = vand.u32 127, %v3978_v49 }
 0x223   :  { %3970 = vmatpush.bf16.msra.mxu2 %v6439_v20 }
 0x224   :  { %v3526_v52 = vpop.f32.mrf.mxu0  ;;  %vm3980_vm1 = vcmp.lt.s32.totalorder %v3979_v51, 10 }
 0x227   :  { %3971 = vmatpush.bf16.msra.mxu2 %v6438_v5 }
 0x22b   :  { %3972 = vmatpush.bf16.msra.mxu2 %v6437_v25 }
 0x22e   :  { %v3498_v59 = vpop.f32.mrf.mxu2 }
 0x22f   :  { %v3499_v3 = vadd.f32 %v3498_v59, %v3486_v2 }
 0x231   :  { %v3512_v53 = vadd.f32 %v3511_v31, %v3499_v3 }
 0x233   :  { %v3563_v58 = vpop.f32.mrf.mxu3  ;;  %v3525_v6 = vadd.f32 %v3524_v46, %v3512_v53 }
 0x234   :  { %v3564_v29 = vadd.f32 %v3563_v58, %v1957_v27 }
 0x236   :  { %v3500_v63 = vpop.f32.mrf.mxu2 }
 0x237   :  { %v3537_v0 = vpop.f32.mrf.mxu1 }
 0x238   :  { %v3538_v57 = vadd.f32 %v3537_v0, %v3525_v6 }
 0x23b   :  { %v3565_v19 = vpop.f32.mrf.mxu3 }
 0x23e   :  { %v3576_v1 = vpop.f32.mrf.mxu0 }
 0x23f   :  { %v3539_v4 = vpop.f32.mrf.mxu1  ;;  %v3577_v21 = vadd.f32 %v3576_v1, %v3564_v29 }
 0x246   :  { %v3578_v15 = vpop.f32.mrf.mxu0 }
 0x251   :  { %v3550_v33 = vpop.f32.mrf.mxu2 }
 0x252   :  { %v3551_v7 = vadd.f32 %v3550_v33, %v3538_v57 }
 0x253   :  { %v3615_v61 = vpop.f32.mrf.mxu3 }
 0x254   :  { %v3660_v10 = vmax.f32 %v3551_v7, 0.0 }
 0x256   :  { %v3664_v54 = vpack.c.bf16 %v3660_v10, %v3660_v10 }
 0x257   :  { %v3589_v60 = vpop.f32.mrf.mxu1 }
 0x258   :  { %3960 = vmatmul.bf16.vlgmr.msra.gmra.mxu1 %v3664_v54  ;;  %v3590_v8 = vadd.f32 %v3589_v60, %v3577_v21 }
 0x259   :  { %v3552_v14 = vpop.f32.mrf.mxu2 }
 0x25b   :  { %v3617_v9 = vpop.f32.mrf.mxu3 }
 0x25d   :  { %v3628_v12 = vpop.f32.mrf.mxu0 }
 0x25f   :  { %v3591_v16 = vpop.f32.mrf.mxu1 }
 0x265   :  { %v3630_v23 = vpop.f32.mrf.mxu0 }
 0x271   :  { %v3602_v24 = vpop.f32.mrf.mxu2 }
 0x272   :  { %v3603_v34 = vadd.f32 %v3602_v24, %v3590_v8 }
 0x274   :  { %v3616_v31 = vadd.f32 %v3615_v61, %v3603_v34 }
 0x276   :  { %v3629_v50 = vadd.f32 %v3628_v12, %v3616_v31 }
 0x277   :  { %v3641_v28 = vpop.f32.mrf.mxu1  ;;  %v3935_v35 = vpop.f32.mrf.mxu3 }
 0x278   :  { %v3642_v37 = vadd.f32 %v3641_v28, %v3629_v50  ;;  %v3936_v45 = vadd.f32 %v6445_v47, %v3935_v35 }
 0x279   :  { %v3604_v26 = vpop.f32.mrf.mxu2 }
 0x27f   :  { %v3643_v32 = vpop.f32.mrf.mxu1  ;;  %v3937_v36 = vpop.f32.mrf.mxu3 }
 0x291   :  { %v3654_v22 = vpop.f32.mrf.mxu2  ;;  %v3948_v39 = vpop.f32.mrf.mxu0 }
 0x292   :  { %v3655_v42 = vadd.f32 %v3654_v22, %v3642_v37  ;;  %v3949_v41 = vadd.f32 %v3948_v39, %v3936_v45 }
 0x294   :  { %v3661_v43 = vmax.f32 %v3655_v42, 0.0 }
 0x296   :  { %v3665_v44 = vpack.c.bf16 %v3661_v43, %v3661_v43 }
 0x298   :  { %3973 = vmatmul.bf16.vlgmr.msra.gmra.mxu2 %v3665_v44 }
 0x299   :  { %v3656_v38 = vpop.f32.mrf.mxu2  ;;  %v3950_v30 = vpop.f32.mrf.mxu0 }
 0x2d5   :  { %v3961_v46 = vpop.f32.mrf.mxu1 }
 0x2d6   :  { %v3962_v52 = vadd.f32 %v3961_v46, %v3949_v41 }
 0x2dd   :  { %v3963_v48 = vpop.f32.mrf.mxu1 }
 0x31b   :  { %v3974_v55 = vpop.f32.mrf.mxu2 }
 0x31c   :  { %v3975_v58 = vadd.f32 %v3974_v55, %v3962_v52 }
 0x31e   :  { %v3981_v56 = vsel %vm3980_vm1, %v3975_v58, -inf }
 0x31f   :  { %3982 = vmax.xlane.f32.xlu0 %v3981_v56 }
 0x323   :  { %v3976_v59 = vpop.f32.mrf.mxu2 }
 0x392   :  { %v3983_v62 = vpop.xlane.xlu0 %3982 }
 0x393   :  { %v3984_v19 = vsub.f32 %v3981_v56, %v3983_v62 }
 0x395   :  { %v3985_v63 = vmul.f32 1.442695, %v3984_v19 }
 0x397   :  { %6446 = vpow2.f32 %v3985_v63 }
 0x39d   :  { %v6447_v0 = vpop.eup %6446 }
 0x39e   :  { %3987 = vadd.xlane.f32.xlu0 %v6447_v0 }
 0x411   :  { %v3988_v1 = vpop.xlane.xlu0 %3987 }
 0x412   :  { %6448 = vlog2.f32 %v3988_v1 }
 0x418   :  { %v6449_v2 = vpop.eup %6448 }
 0x419   :  { %v3990_v3 = vmul.f32 0.6931472, %v6449_v2 }
 0x41b   :  { %v3991_v4 = vsub.f32 %v3984_v19, %v3990_v3 }
 0x41d   :  { %3992 = vst [vmem:[%s9528_s7] sm:$0xff] %v3991_v4 }

</bundles_post_ra>
